<compile_context>
chip_gen: v6e
topology: v6e:2x2x1
jax: 0.10.0
libtpu: 0.0.40
codegen_flags: <defaults>
</compile_context>

<pallas_src>
import functools

import jax
import jax.numpy as jnp
from jax.experimental import pallas as pl
from jax.experimental.pallas import tpu as pltpu

HIDDEN = 256  # mid channels of the aux head (fixed by the module)


def _aux_kernel(x_ref, w1_ref, shift_ref, w2_ref, b2_ref, o_ref, *, TH, WP):
    # x_ref:     (1, (TH+3)*WP, C_in) bf16  flattened, haloed input row window
    # w1_ref:    (9, C_in, 256)       bf16  3x3 conv taps (BN scale folded in)
    # shift_ref: (1, 256)             f32   folded conv1 bias + BN shift
    # w2_ref:    (256, NC_PAD)        bf16  1x1 conv weights, class-dim padded
    # b2_ref:    (1, NC_PAD)          f32   1x1 conv bias, class-dim padded
    # o_ref:     (TH*WP, NC_PAD)            lane-dense "wide" output slab
    M = TH * WP
    acc = jnp.zeros((M, HIDDEN), jnp.float32)
    # 3x3 conv as 9 shifted-view taps accumulated on the MXU: tap (ky, kx)
    # reads flat rows [ky*WP+kx, ky*WP+kx+M) of the padded window -- a pure
    # offset view, no im2col slab, no concatenation.
    for ky in range(3):
        for kx in range(3):
            lhs = x_ref[0, pl.ds(ky * WP + kx, M), :]
            acc = acc + jnp.dot(lhs, w1_ref[ky * 3 + kx],
                                preferred_element_type=jnp.float32)
    # conv1 bias + eval-mode BatchNorm (scale already folded into w1), ReLU.
    h = jnp.maximum(acc + shift_ref[...], 0.0)
    # Dropout2d(0.1) is the identity in eval mode.
    # TODO(synk): training-mode per-channel dropout mask is not implemented.
    out = jnp.dot(h.astype(w2_ref.dtype), w2_ref[...],
                  preferred_element_type=jnp.float32)
    o_ref[...] = (out + b2_ref[...]).astype(o_ref.dtype)


def _vmem_plan():
    """(tile budget, scoped-VMEM limit) derived from this chip's physical VMEM."""
    phys = 64 * 1024 * 1024                       # conservative fallback (v7x-sized)
    try:
        cap = getattr(pltpu.get_tpu_info(), "vmem_capacity_bytes", None)
        if cap:
            phys = int(cap)
    except Exception:
        pass
    # v5e/v6e (128 MiB) -> 64 MiB tile budget / 96 MiB limit; v7x (64 MiB)
    # -> 32 MiB budget / 48 MiB limit.
    return phys // 2, (phys * 3) // 4


def _pick_row_tile(H, WP, C_in, nc_pad, out_bytes, budget_bytes):
    """Largest useful row tile whose per-step VMEM working set fits the budget."""
    # Grid-invariant operands; counted double-buffered so the estimate stays
    # valid even when the pl.Buffered(1) request is not honoured.
    weights = 2 * (9 * C_in * HIDDEN * 2 + HIDDEN * nc_pad * 2
                   + HIDDEN * 4 + nc_pad * 4)

    def step_bytes(th):
        m = th * WP
        x_win = 2 * (th + 3) * WP * C_in * 2      # double-buffered bf16 input window
        lhs = m * C_in * 2                        # one tap's LHS view/copy
        acc = m * HIDDEN * 4                      # f32 conv1 accumulator
        hid = m * HIDDEN * 2                      # bf16 hidden activations
        logits = m * nc_pad * 4                   # f32 conv2 result (pre-cast)
        out = 2 * m * nc_pad * out_bytes          # double-buffered output block
        return weights + x_win + lhs + acc + hid + logits + out

    fitting = [th for th in range(1, H + 1) if step_bytes(th) <= budget_bytes]
    if not fitting:
        return 1
    # Minimize padded-row waste (ceil(H/th)*th - H), then take the largest
    # fitting tile (fewest grid steps / best per-step amortization).
    return min(fitting, key=lambda th: (-(-H // th) * th, -th))


def aux_module_forward(x_nchw, params, *, num_classes, row_tile=None,
                       out_dtype=jnp.float32):
    """x_nchw: (N, C_in, H, W) float32.  Returns (N, num_classes, H, W)."""
    w1, b1 = params["w1"], params["b1"]
    gamma, beta = params["bn_gamma"], params["bn_beta"]
    mean, var = params["bn_mean"], params["bn_var"]
    w2, b2 = params["w2"], params["b2"]

    N, C_in, H, W = x_nchw.shape
    NC = num_classes
    NC_PAD = -(-NC // 128) * 128        # lane-dense output classes
    WP = -(-(W + 2) // 8) * 8           # padded row width (>= W+2, 8-aligned)
    eps = 1e-5

    # Fold conv1 bias + eval-mode BN:  bn(conv(x) + b1) = conv_{w1*s}(x) + shift
    # with s = gamma/sqrt(var+eps), shift = beta + (b1 - mean)*s.  Fold in f32.
    s = gamma / jnp.sqrt(var + eps)
    shift = (beta + (b1 - mean) * s).reshape(1, HIDDEN).astype(jnp.float32)
    # OIHW -> (ky, kx, C_in, 256) -> (9, C_in, 256), BN scale folded per out-ch.
    w1_taps = jnp.transpose(w1, (2, 3, 1, 0)).reshape(9, C_in, HIDDEN)
    w1_taps = (w1_taps * s[None, None, :]).astype(jnp.bfloat16)
    # 1x1 conv: (NC, 256, 1, 1) -> (256, NC), class dim zero-padded to NC_PAD.
    w2_mat = jnp.transpose(w2[:, :, 0, 0], (1, 0))
    w2_pad = jnp.zeros((HIDDEN, NC_PAD), jnp.bfloat16).at[:, :NC].set(
        w2_mat.astype(jnp.bfloat16))
    b2_pad = jnp.zeros((1, NC_PAD), jnp.float32).at[0, :NC].set(
        b2.astype(jnp.float32))

    out_bytes = jnp.dtype(out_dtype).itemsize
    vmem_budget, vmem_limit = _vmem_plan()
    TH = row_tile if row_tile is not None else _pick_row_tile(
        H, WP, C_in, NC_PAD, out_bytes, vmem_budget)
    TH = max(1, min(TH, H))
    R = -(-H // TH)
    Hp = R * TH                          # row-padded height (junk rows sliced off)
    M = TH * WP                          # flattened output rows per block
    WIN = (TH + 3) * WP                  # flattened input rows per window
                                         # (TH + 2 halo rows + 1 over-read row)

    # NCHW -> NHWC bf16, zero-pad: 1 halo row on top, (Hp-H)+2 rows at the
    # bottom (halo + over-read), 1 halo column left, WP-W-1 columns right,
    # then flatten rows so each window is a contiguous HBM slab.
    x_nhwc = jnp.transpose(x_nchw, (0, 2, 3, 1)).astype(jnp.bfloat16)
    x_pad = jnp.pad(x_nhwc, ((0, 0), (1, Hp - H + 2), (1, WP - W - 1), (0, 0)))
    x_flat = x_pad.reshape(N, (Hp + 3) * WP, C_in)

    kernel = functools.partial(_aux_kernel, TH=TH, WP=WP)
    out_shape = jax.ShapeDtypeStruct((N, R, M, NC_PAD), out_dtype)
    out_spec = pl.BlockSpec((None, None, M, NC_PAD), lambda n, r: (n, r, 0, 0))
    cparams = pltpu.CompilerParams(
        dimension_semantics=("parallel", "parallel"),
        vmem_limit_bytes=int(vmem_limit))

    def _const_spec(shape, single_buffered):
        # Grid-invariant operand: a single VMEM buffer is enough.
        if single_buffered:
            return pl.BlockSpec(shape, lambda n, r: (0,) * len(shape),
                                pipeline_mode=pl.Buffered(1))
        return pl.BlockSpec(shape, lambda n, r: (0,) * len(shape))

    def _attempt(element_windows, single_buffered):
        if element_windows:
            # Overlapping haloed windows read in place from x_flat: the row
            # dim is Element-indexed with element offset r*TH*WP -- no HBM
            # gather / tile duplication in the wrapper.
            x_arg = x_flat
            x_spec = pl.BlockSpec((1, pl.Element(WIN), C_in),
                                  lambda n, r: (n, r * TH * WP, 0))
        else:
            # Compatibility fallback: materialize overlapping windows in HBM.
            ridx = (jnp.arange(R) * (TH * WP))[:, None] + jnp.arange(WIN)[None, :]
            x_arg = x_flat[:, ridx]                      # (N, R, WIN, C_in)
            x_spec = pl.BlockSpec((1, None, WIN, C_in),
                                  lambda n, r: (n, r, 0, 0))
        in_specs = [
            x_spec,
            _const_spec((9, C_in, HIDDEN), single_buffered),
            _const_spec((1, HIDDEN), single_buffered),
            _const_spec((HIDDEN, NC_PAD), single_buffered),
            _const_spec((1, NC_PAD), single_buffered),
        ]
        return pl.pallas_call(
            kernel,
            out_shape=out_shape,
            grid_spec=pltpu.PrefetchScalarGridSpec(
                num_scalar_prefetch=0, grid=(N, R),
                in_specs=in_specs, out_specs=out_spec),
            compiler_params=cparams,
        )(x_arg, w1_taps, shift, w2_pad, b2_pad)

    out = None
    err = None
    # Preferred config first; fall back only if this jax build rejects
    # Element windows or Buffered(1) single-buffering.
    for cfg in ((True, True), (True, False), (False, True), (False, False)):
        try:
            out = _attempt(*cfg)
            break
        except Exception as e:      # pragma: no cover -- compatibility fallback
            err = e
    if out is None:
        raise err

    # Wide slab -> (N, H, W, NC): drop junk columns (>= W), padded rows (>= H)
    # and class padding, then back to the PyTorch NCHW convention.
    out = out.reshape(N, R * TH, WP, NC_PAD)[:, :H, :W, :NC]
    return jnp.transpose(out, (0, 3, 1, 2))


def _reference_forward(x_nchw, params, num_classes):
    """Pure-JAX f32 reference of the PyTorch module (eval mode)."""
    eps = 1e-5
    w1, b1 = params["w1"], params["b1"]
    g, beta = params["bn_gamma"], params["bn_beta"]
    mean, var = params["bn_mean"], params["bn_var"]
    w2, b2 = params["w2"], params["b2"]

    y = jax.lax.conv_general_dilated(
        x_nchw, w1, window_strides=(1, 1), padding=((1, 1), (1, 1)),
        dimension_numbers=("NCHW", "OIHW", "NCHW"))
    y = y + b1[None, :, None, None]
    y = (y - mean[None, :, None, None]) / jnp.sqrt(var + eps)[None, :, None, None]
    y = y * g[None, :, None, None] + beta[None, :, None, None]
    y = jnp.maximum(y, 0.0)
    y = jax.lax.conv_general_dilated(
        y, w2, window_strides=(1, 1), padding=((0, 0), (0, 0)),
        dimension_numbers=("NCHW", "OIHW", "NCHW"))
    return y + b2[None, :, None, None]


def init_params(key, in_planes, num_classes):
    k1, k2, k3, k4 = jax.random.split(key, 4)
    return {
        # Conv2d(in_planes, 256, k=3): weight OIHW, bias.
        "w1": 0.05 * jax.random.normal(k1, (HIDDEN, in_planes, 3, 3), jnp.float32),
        "b1": 0.01 * jax.random.normal(k2, (HIDDEN,), jnp.float32),
        # BatchNorm2d(256) eval-mode params / running stats.
        "bn_gamma": jnp.ones((HIDDEN,), jnp.float32),
        "bn_beta": jnp.zeros((HIDDEN,), jnp.float32),
        "bn_mean": jnp.zeros((HIDDEN,), jnp.float32),
        "bn_var": jnp.ones((HIDDEN,), jnp.float32),
        # Conv2d(256, num_classes, k=1): weight OIHW, bias.
        "w2": 0.05 * jax.random.normal(k3, (num_classes, HIDDEN, 1, 1), jnp.float32),
        "b2": 0.01 * jax.random.normal(k4, (num_classes,), jnp.float32),
    }


if __name__ == "__main__":
    N, C_in, H, W = 2, 4, 16, 16
    num_classes = 19

    key = jax.random.PRNGKey(0)
    kx, kp = jax.random.split(key)
    x = jax.random.normal(kx, (N, C_in, H, W), jnp.float32)
    params = init_params(kp, C_in, num_classes)

    # row_tile=8 exercises the overlapping haloed-window multi-tile path
    # (grid = 2 batches x 2 row tiles) at the toy size.
    out = aux_module_forward(x, params, num_classes=num_classes, row_tile=8)
    out = jax.block_until_ready(out)
    assert out.shape == (N, num_classes, H, W), out.shape

    # Loose tolerance: kernel runs activations/weights in bf16 (f32 accum).
    ref = _reference_forward(x, params, num_classes)
    max_err = float(jnp.max(jnp.abs(out - ref)))
    assert max_err < 5e-2, f"max abs err vs f32 reference: {max_err}"

    print("KERNEL_OK")
</pallas_src>

<mosaic_0001>
module attributes {stable_mosaic.version = 11 : i64} {
  func.func @_aux_kernel(%arg0: i32, %arg1: i32, %arg2: memref<1x1x264x4xbf16, #tpu.memory_space<vmem>>, %arg3: memref<9x4x256xbf16, #tpu.memory_space<vmem>>, %arg4: memref<1x256xf32, #tpu.memory_space<vmem>>, %arg5: memref<256x128xbf16, #tpu.memory_space<vmem>>, %arg6: memref<1x128xf32, #tpu.memory_space<vmem>>, %arg7: memref<1x1x192x128xf32, #tpu.memory_space<vmem>>) attributes {dimension_semantics = [#tpu.dimension_semantics<parallel>, #tpu.dimension_semantics<parallel>], iteration_bounds = array<i64: 2, 2>, scalar_prefetch = 0 : i64, scratch_operands = 0 : i64, tpu.core_type = #tpu.core_type<tc>, window_params = [{transform_indices = @transform_0, window_bounds = array<i64: 1, 1, 264, 4>}, {pipeline_mode = #tpu.pipeline_mode<synchronous>, transform_indices = @transform_1, window_bounds = array<i64: 9, 4, 256>}, {pipeline_mode = #tpu.pipeline_mode<synchronous>, transform_indices = @transform_2, window_bounds = array<i64: 1, 256>}, {pipeline_mode = #tpu.pipeline_mode<synchronous>, transform_indices = @transform_3, window_bounds = array<i64: 256, 128>}, {pipeline_mode = #tpu.pipeline_mode<synchronous>, transform_indices = @transform_4, window_bounds = array<i64: 1, 128>}, {transform_indices = @transform_5, window_bounds = array<i64: 1, 1, 192, 128>}]} {
    %cst = arith.constant 0.000000e+00 : f32
    %0 = vector.broadcast %cst : f32 to vector<192x256xf32>
    %c0 = arith.constant 0 : index
    %c0_0 = arith.constant 0 : index
    %c0_1 = arith.constant 0 : index
    %c0_2 = arith.constant 0 : index
    %1 = vector.load %arg2[%c0, %c0_0, %c0_1, %c0_2] : memref<1x1x264x4xbf16, #tpu.memory_space<vmem>>, vector<1x1x192x4xbf16>
    %2 = vector.shape_cast %1 : vector<1x1x192x4xbf16> to vector<192x4xbf16>
    %c0_3 = arith.constant 0 : index
    %c0_4 = arith.constant 0 : index
    %c0_5 = arith.constant 0 : index
    %3 = vector.load %arg3[%c0_3, %c0_4, %c0_5] : memref<9x4x256xbf16, #tpu.memory_space<vmem>>, vector<1x4x256xbf16>
    %4 = vector.shape_cast %3 : vector<1x4x256xbf16> to vector<4x256xbf16>
    %cst_6 = arith.constant dense<0.000000e+00> : vector<192x256xf32>
    %5 = tpu.matmul %2, %4, %cst_6 {dimension_numbers = #tpu.dot_dimension_numbers<[1], [0], [0], [1], [0, 0, 1, 1], [], []>} : vector<192x4xbf16>, vector<4x256xbf16>, vector<192x256xf32> -> vector<192x256xf32>
    %6 = arith.addf %0, %5 : vector<192x256xf32>
    %c0_7 = arith.constant 0 : index
    %c0_8 = arith.constant 0 : index
    %c1 = arith.constant 1 : index
    %c0_9 = arith.constant 0 : index
    %7 = vector.load %arg2[%c0_7, %c0_8, %c1, %c0_9] : memref<1x1x264x4xbf16, #tpu.memory_space<vmem>>, vector<1x1x192x4xbf16>
    %8 = vector.shape_cast %7 : vector<1x1x192x4xbf16> to vector<192x4xbf16>
    %c1_10 = arith.constant 1 : index
    %c0_11 = arith.constant 0 : index
    %c0_12 = arith.constant 0 : index
    %9 = vector.load %arg3[%c1_10, %c0_11, %c0_12] : memref<9x4x256xbf16, #tpu.memory_space<vmem>>, vector<1x4x256xbf16>
    %10 = vector.shape_cast %9 : vector<1x4x256xbf16> to vector<4x256xbf16>
    %cst_13 = arith.constant dense<0.000000e+00> : vector<192x256xf32>
    %11 = tpu.matmul %8, %10, %cst_13 {dimension_numbers = #tpu.dot_dimension_numbers<[1], [0], [0], [1], [0, 0, 1, 1], [], []>} : vector<192x4xbf16>, vector<4x256xbf16>, vector<192x256xf32> -> vector<192x256xf32>
    %12 = arith.addf %6, %11 : vector<192x256xf32>
    %c0_14 = arith.constant 0 : index
    %c0_15 = arith.constant 0 : index
    %c2 = arith.constant 2 : index
    %c0_16 = arith.constant 0 : index
    %13 = vector.load %arg2[%c0_14, %c0_15, %c2, %c0_16] : memref<1x1x264x4xbf16, #tpu.memory_space<vmem>>, vector<1x1x192x4xbf16>
    %14 = vector.shape_cast %13 : vector<1x1x192x4xbf16> to vector<192x4xbf16>
    %c2_17 = arith.constant 2 : index
    %c0_18 = arith.constant 0 : index
    %c0_19 = arith.constant 0 : index
    %15 = vector.load %arg3[%c2_17, %c0_18, %c0_19] : memref<9x4x256xbf16, #tpu.memory_space<vmem>>, vector<1x4x256xbf16>
    %16 = vector.shape_cast %15 : vector<1x4x256xbf16> to vector<4x256xbf16>
    %cst_20 = arith.constant dense<0.000000e+00> : vector<192x256xf32>
    %17 = tpu.matmul %14, %16, %cst_20 {dimension_numbers = #tpu.dot_dimension_numbers<[1], [0], [0], [1], [0, 0, 1, 1], [], []>} : vector<192x4xbf16>, vector<4x256xbf16>, vector<192x256xf32> -> vector<192x256xf32>
    %18 = arith.addf %12, %17 : vector<192x256xf32>
    %c0_21 = arith.constant 0 : index
    %c0_22 = arith.constant 0 : index
    %c24 = arith.constant 24 : index
    %c0_23 = arith.constant 0 : index
    %19 = vector.load %arg2[%c0_21, %c0_22, %c24, %c0_23] : memref<1x1x264x4xbf16, #tpu.memory_space<vmem>>, vector<1x1x192x4xbf16>
    %20 = vector.shape_cast %19 : vector<1x1x192x4xbf16> to vector<192x4xbf16>
    %c3 = arith.constant 3 : index
    %c0_24 = arith.constant 0 : index
    %c0_25 = arith.constant 0 : index
    %21 = vector.load %arg3[%c3, %c0_24, %c0_25] : memref<9x4x256xbf16, #tpu.memory_space<vmem>>, vector<1x4x256xbf16>
    %22 = vector.shape_cast %21 : vector<1x4x256xbf16> to vector<4x256xbf16>
    %cst_26 = arith.constant dense<0.000000e+00> : vector<192x256xf32>
    %23 = tpu.matmul %20, %22, %cst_26 {dimension_numbers = #tpu.dot_dimension_numbers<[1], [0], [0], [1], [0, 0, 1, 1], [], []>} : vector<192x4xbf16>, vector<4x256xbf16>, vector<192x256xf32> -> vector<192x256xf32>
    %24 = arith.addf %18, %23 : vector<192x256xf32>
    %c0_27 = arith.constant 0 : index
    %c0_28 = arith.constant 0 : index
    %c25 = arith.constant 25 : index
    %c0_29 = arith.constant 0 : index
    %25 = vector.load %arg2[%c0_27, %c0_28, %c25, %c0_29] : memref<1x1x264x4xbf16, #tpu.memory_space<vmem>>, vector<1x1x192x4xbf16>
    %26 = vector.shape_cast %25 : vector<1x1x192x4xbf16> to vector<192x4xbf16>
    %c4 = arith.constant 4 : index
    %c0_30 = arith.constant 0 : index
    %c0_31 = arith.constant 0 : index
    %27 = vector.load %arg3[%c4, %c0_30, %c0_31] : memref<9x4x256xbf16, #tpu.memory_space<vmem>>, vector<1x4x256xbf16>
    %28 = vector.shape_cast %27 : vector<1x4x256xbf16> to vector<4x256xbf16>
    %cst_32 = arith.constant dense<0.000000e+00> : vector<192x256xf32>
    %29 = tpu.matmul %26, %28, %cst_32 {dimension_numbers = #tpu.dot_dimension_numbers<[1], [0], [0], [1], [0, 0, 1, 1], [], []>} : vector<192x4xbf16>, vector<4x256xbf16>, vector<192x256xf32> -> vector<192x256xf32>
    %30 = arith.addf %24, %29 : vector<192x256xf32>
    %c0_33 = arith.constant 0 : index
    %c0_34 = arith.constant 0 : index
    %c26 = arith.constant 26 : index
    %c0_35 = arith.constant 0 : index
    %31 = vector.load %arg2[%c0_33, %c0_34, %c26, %c0_35] : memref<1x1x264x4xbf16, #tpu.memory_space<vmem>>, vector<1x1x192x4xbf16>
    %32 = vector.shape_cast %31 : vector<1x1x192x4xbf16> to vector<192x4xbf16>
    %c5 = arith.constant 5 : index
    %c0_36 = arith.constant 0 : index
    %c0_37 = arith.constant 0 : index
    %33 = vector.load %arg3[%c5, %c0_36, %c0_37] : memref<9x4x256xbf16, #tpu.memory_space<vmem>>, vector<1x4x256xbf16>
    %34 = vector.shape_cast %33 : vector<1x4x256xbf16> to vector<4x256xbf16>
    %cst_38 = arith.constant dense<0.000000e+00> : vector<192x256xf32>
    %35 = tpu.matmul %32, %34, %cst_38 {dimension_numbers = #tpu.dot_dimension_numbers<[1], [0], [0], [1], [0, 0, 1, 1], [], []>} : vector<192x4xbf16>, vector<4x256xbf16>, vector<192x256xf32> -> vector<192x256xf32>
    %36 = arith.addf %30, %35 : vector<192x256xf32>
    %c0_39 = arith.constant 0 : index
    %c0_40 = arith.constant 0 : index
    %c48 = arith.constant 48 : index
    %c0_41 = arith.constant 0 : index
    %37 = vector.load %arg2[%c0_39, %c0_40, %c48, %c0_41] : memref<1x1x264x4xbf16, #tpu.memory_space<vmem>>, vector<1x1x192x4xbf16>
    %38 = vector.shape_cast %37 : vector<1x1x192x4xbf16> to vector<192x4xbf16>
    %c6 = arith.constant 6 : index
    %c0_42 = arith.constant 0 : index
    %c0_43 = arith.constant 0 : index
    %39 = vector.load %arg3[%c6, %c0_42, %c0_43] : memref<9x4x256xbf16, #tpu.memory_space<vmem>>, vector<1x4x256xbf16>
    %40 = vector.shape_cast %39 : vector<1x4x256xbf16> to vector<4x256xbf16>
    %cst_44 = arith.constant dense<0.000000e+00> : vector<192x256xf32>
    %41 = tpu.matmul %38, %40, %cst_44 {dimension_numbers = #tpu.dot_dimension_numbers<[1], [0], [0], [1], [0, 0, 1, 1], [], []>} : vector<192x4xbf16>, vector<4x256xbf16>, vector<192x256xf32> -> vector<192x256xf32>
    %42 = arith.addf %36, %41 : vector<192x256xf32>
    %c0_45 = arith.constant 0 : index
    %c0_46 = arith.constant 0 : index
    %c49 = arith.constant 49 : index
    %c0_47 = arith.constant 0 : index
    %43 = vector.load %arg2[%c0_45, %c0_46, %c49, %c0_47] : memref<1x1x264x4xbf16, #tpu.memory_space<vmem>>, vector<1x1x192x4xbf16>
    %44 = vector.shape_cast %43 : vector<1x1x192x4xbf16> to vector<192x4xbf16>
    %c7 = arith.constant 7 : index
    %c0_48 = arith.constant 0 : index
    %c0_49 = arith.constant 0 : index
    %45 = vector.load %arg3[%c7, %c0_48, %c0_49] : memref<9x4x256xbf16, #tpu.memory_space<vmem>>, vector<1x4x256xbf16>
    %46 = vector.shape_cast %45 : vector<1x4x256xbf16> to vector<4x256xbf16>
    %cst_50 = arith.constant dense<0.000000e+00> : vector<192x256xf32>
    %47 = tpu.matmul %44, %46, %cst_50 {dimension_numbers = #tpu.dot_dimension_numbers<[1], [0], [0], [1], [0, 0, 1, 1], [], []>} : vector<192x4xbf16>, vector<4x256xbf16>, vector<192x256xf32> -> vector<192x256xf32>
    %48 = arith.addf %42, %47 : vector<192x256xf32>
    %c0_51 = arith.constant 0 : index
    %c0_52 = arith.constant 0 : index
    %c50 = arith.constant 50 : index
    %c0_53 = arith.constant 0 : index
    %49 = vector.load %arg2[%c0_51, %c0_52, %c50, %c0_53] : memref<1x1x264x4xbf16, #tpu.memory_space<vmem>>, vector<1x1x192x4xbf16>
    %50 = vector.shape_cast %49 : vector<1x1x192x4xbf16> to vector<192x4xbf16>
    %c8 = arith.constant 8 : index
    %c0_54 = arith.constant 0 : index
    %c0_55 = arith.constant 0 : index
    %51 = vector.load %arg3[%c8, %c0_54, %c0_55] : memref<9x4x256xbf16, #tpu.memory_space<vmem>>, vector<1x4x256xbf16>
    %52 = vector.shape_cast %51 : vector<1x4x256xbf16> to vector<4x256xbf16>
    %cst_56 = arith.constant dense<0.000000e+00> : vector<192x256xf32>
    %53 = tpu.matmul %50, %52, %cst_56 {dimension_numbers = #tpu.dot_dimension_numbers<[1], [0], [0], [1], [0, 0, 1, 1], [], []>} : vector<192x4xbf16>, vector<4x256xbf16>, vector<192x256xf32> -> vector<192x256xf32>
    %54 = arith.addf %48, %53 : vector<192x256xf32>
    %c0_57 = arith.constant 0 : index
    %c0_58 = arith.constant 0 : index
    %55 = vector.load %arg4[%c0_57, %c0_58] : memref<1x256xf32, #tpu.memory_space<vmem>>, vector<1x256xf32>
    %56 = vector.broadcast %55 : vector<1x256xf32> to vector<192x256xf32>
    %57 = arith.addf %54, %56 : vector<192x256xf32>
    %cst_59 = arith.constant 0.000000e+00 : f32
    %58 = vector.broadcast %cst_59 : f32 to vector<192x256xf32>
    %59 = arith.maximumf %57, %58 : vector<192x256xf32>
    %60 = arith.truncf %59 : vector<192x256xf32> to vector<192x256xbf16>
    %c0_60 = arith.constant 0 : index
    %c0_61 = arith.constant 0 : index
    %61 = vector.load %arg5[%c0_60, %c0_61] : memref<256x128xbf16, #tpu.memory_space<vmem>>, vector<256x128xbf16>
    %cst_62 = arith.constant dense<0.000000e+00> : vector<192x128xf32>
    %62 = tpu.matmul %60, %61, %cst_62 {dimension_numbers = #tpu.dot_dimension_numbers<[1], [0], [0], [1], [0, 0, 1, 1], [], []>} : vector<192x256xbf16>, vector<256x128xbf16>, vector<192x128xf32> -> vector<192x128xf32>
    %c0_63 = arith.constant 0 : index
    %c0_64 = arith.constant 0 : index
    %63 = vector.load %arg6[%c0_63, %c0_64] : memref<1x128xf32, #tpu.memory_space<vmem>>, vector<1x128xf32>
    %64 = vector.broadcast %63 : vector<1x128xf32> to vector<192x128xf32>
    %65 = arith.addf %62, %64 : vector<192x128xf32>
    %c0_65 = arith.constant 0 : index
    %c0_66 = arith.constant 0 : index
    %c0_67 = arith.constant 0 : index
    %c0_68 = arith.constant 0 : index
    %66 = vector.load %arg7[%c0_65, %c0_66, %c0_67, %c0_68] : memref<1x1x192x128xf32, #tpu.memory_space<vmem>>, vector<1x1x192x128xf32>
    %67 = vector.shape_cast %66 : vector<1x1x192x128xf32> to vector<192x128xf32>
    %68 = vector.shape_cast %65 : vector<192x128xf32> to vector<1x1x192x128xf32>
    tpu.vector_store %arg7[%c0_65, %c0_66, %c0_67, %c0_68], %68 {strides = array<i32>} : memref<1x1x192x128xf32, #tpu.memory_space<vmem>>, vector<1x1x192x128xf32>,
    return
  }
  func.func @transform_0(%arg0: i32, %arg1: i32) -> (i32, i32, i32, i32) {
    %c0_i32 = arith.constant 0 : i32
    %c0_i32_0 = arith.constant 0 : i32
    %c0_i32_1 = arith.constant 0 : i32
    return %arg0, %arg1, %c0_i32, %c0_i32_0 : i32, i32, i32, i32
  }
  func.func @transform_1(%arg0: i32, %arg1: i32) -> (i32, i32, i32) {
    %c0_i32 = arith.constant 0 : i32
    %c0_i32_0 = arith.constant 0 : i32
    %c0_i32_1 = arith.constant 0 : i32
    %c0_i32_2 = arith.constant 0 : i32
    return %c0_i32, %c0_i32_0, %c0_i32_1 : i32, i32, i32
  }
  func.func @transform_2(%arg0: i32, %arg1: i32) -> (i32, i32) {
    %c0_i32 = arith.constant 0 : i32
    %c0_i32_0 = arith.constant 0 : i32
    %c0_i32_1 = arith.constant 0 : i32
    return %c0_i32, %c0_i32_0 : i32, i32
  }
  func.func @transform_3(%arg0: i32, %arg1: i32) -> (i32, i32) {
    %c0_i32 = arith.constant 0 : i32
    %c0_i32_0 = arith.constant 0 : i32
    %c0_i32_1 = arith.constant 0 : i32
    return %c0_i32, %c0_i32_0 : i32, i32
  }
  func.func @transform_4(%arg0: i32, %arg1: i32) -> (i32, i32) {
    %c0_i32 = arith.constant 0 : i32
    %c0_i32_0 = arith.constant 0 : i32
    %c0_i32_1 = arith.constant 0 : i32
    return %c0_i32, %c0_i32_0 : i32, i32
  }
  func.func @transform_5(%arg0: i32, %arg1: i32) -> (i32, i32, i32, i32) {
    %c0_i32 = arith.constant 0 : i32
    %c0_i32_0 = arith.constant 0 : i32
    %c0_i32_1 = arith.constant 0 : i32
    return %arg0, %arg1, %c0_i32, %c0_i32_0 : i32, i32, i32, i32
  }
}

module attributes {stable_mosaic.version = 11 : i64} {
  func.func @_aux_kernel(%arg0: i32, %arg1: i32, %arg2: memref<1x1x264x4xbf16, #tpu.memory_space<vmem>>, %arg3: memref<9x4x256xbf16, #tpu.memory_space<vmem>>, %arg4: memref<1x256xf32, #tpu.memory_space<vmem>>, %arg5: memref<256x128xbf16, #tpu.memory_space<vmem>>, %arg6: memref<1x128xf32, #tpu.memory_space<vmem>>, %arg7: memref<1x1x192x128xf32, #tpu.memory_space<vmem>>) attributes {dimension_semantics = [#tpu.dimension_semantics<parallel>, #tpu.dimension_semantics<parallel>], iteration_bounds = array<i64: 2, 2>, scalar_prefetch = 0 : i64, scratch_operands = 0 : i64, tpu.core_type = #tpu.core_type<tc>, window_params = [{transform_indices = @transform_0, window_bounds = array<i64: 1, 1, 264, 4>}, {pipeline_mode = #tpu.pipeline_mode<synchronous>, transform_indices = @transform_1, window_bounds = array<i64: 9, 4, 256>}, {pipeline_mode = #tpu.pipeline_mode<synchronous>, transform_indices = @transform_2, window_bounds = array<i64: 1, 256>}, {pipeline_mode = #tpu.pipeline_mode<synchronous>, transform_indices = @transform_3, window_bounds = array<i64: 256, 128>}, {pipeline_mode = #tpu.pipeline_mode<synchronous>, transform_indices = @transform_4, window_bounds = array<i64: 1, 128>}, {transform_indices = @transform_5, window_bounds = array<i64: 1, 1, 192, 128>}]} {
    %cst = arith.constant 0.000000e+00 : f32
    %0 = vector.broadcast %cst : f32 to vector<192x256xf32>
    %c0 = arith.constant 0 : index
    %c0_0 = arith.constant 0 : index
    %c0_1 = arith.constant 0 : index
    %c0_2 = arith.constant 0 : index
    %1 = vector.load %arg2[%c0, %c0_0, %c0_1, %c0_2] : memref<1x1x264x4xbf16, #tpu.memory_space<vmem>>, vector<1x1x192x4xbf16>
    %2 = vector.shape_cast %1 : vector<1x1x192x4xbf16> to vector<192x4xbf16>
    %c0_3 = arith.constant 0 : index
    %c0_4 = arith.constant 0 : index
    %c0_5 = arith.constant 0 : index
    %3 = vector.load %arg3[%c0_3, %c0_4, %c0_5] : memref<9x4x256xbf16, #tpu.memory_space<vmem>>, vector<1x4x256xbf16>
    %4 = vector.shape_cast %3 : vector<1x4x256xbf16> to vector<4x256xbf16>
    %cst_6 = arith.constant dense<0.000000e+00> : vector<192x256xf32>
    %5 = tpu.matmul %2, %4, %cst_6 {dimension_numbers = #tpu.dot_dimension_numbers<[1], [0], [0], [1], [0, 0, 1, 1], [], []>} : vector<192x4xbf16>, vector<4x256xbf16>, vector<192x256xf32> -> vector<192x256xf32>
    %6 = arith.addf %0, %5 : vector<192x256xf32>
    %c0_7 = arith.constant 0 : index
    %c0_8 = arith.constant 0 : index
    %c1 = arith.constant 1 : index
    %c0_9 = arith.constant 0 : index
    %7 = vector.load %arg2[%c0_7, %c0_8, %c1, %c0_9] : memref<1x1x264x4xbf16, #tpu.memory_space<vmem>>, vector<1x1x192x4xbf16>
    %8 = vector.shape_cast %7 : vector<1x1x192x4xbf16> to vector<192x4xbf16>
    %c1_10 = arith.constant 1 : index
    %c0_11 = arith.constant 0 : index
    %c0_12 = arith.constant 0 : index
    %9 = vector.load %arg3[%c1_10, %c0_11, %c0_12] : memref<9x4x256xbf16, #tpu.memory_space<vmem>>, vector<1x4x256xbf16>
    %10 = vector.shape_cast %9 : vector<1x4x256xbf16> to vector<4x256xbf16>
    %cst_13 = arith.constant dense<0.000000e+00> : vector<192x256xf32>
    %11 = tpu.matmul %8, %10, %cst_13 {dimension_numbers = #tpu.dot_dimension_numbers<[1], [0], [0], [1], [0, 0, 1, 1], [], []>} : vector<192x4xbf16>, vector<4x256xbf16>, vector<192x256xf32> -> vector<192x256xf32>
    %12 = arith.addf %6, %11 : vector<192x256xf32>
    %c0_14 = arith.constant 0 : index
    %c0_15 = arith.constant 0 : index
    %c2 = arith.constant 2 : index
    %c0_16 = arith.constant 0 : index
    %13 = vector.load %arg2[%c0_14, %c0_15, %c2, %c0_16] : memref<1x1x264x4xbf16, #tpu.memory_space<vmem>>, vector<1x1x192x4xbf16>
    %14 = vector.shape_cast %13 : vector<1x1x192x4xbf16> to vector<192x4xbf16>
    %c2_17 = arith.constant 2 : index
    %c0_18 = arith.constant 0 : index
    %c0_19 = arith.constant 0 : index
    %15 = vector.load %arg3[%c2_17, %c0_18, %c0_19] : memref<9x4x256xbf16, #tpu.memory_space<vmem>>, vector<1x4x256xbf16>
    %16 = vector.shape_cast %15 : vector<1x4x256xbf16> to vector<4x256xbf16>
    %cst_20 = arith.constant dense<0.000000e+00> : vector<192x256xf32>
    %17 = tpu.matmul %14, %16, %cst_20 {dimension_numbers = #tpu.dot_dimension_numbers<[1], [0], [0], [1], [0, 0, 1, 1], [], []>} : vector<192x4xbf16>, vector<4x256xbf16>, vector<192x256xf32> -> vector<192x256xf32>
    %18 = arith.addf %12, %17 : vector<192x256xf32>
    %c0_21 = arith.constant 0 : index
    %c0_22 = arith.constant 0 : index
    %c24 = arith.constant 24 : index
    %c0_23 = arith.constant 0 : index
    %19 = vector.load %arg2[%c0_21, %c0_22, %c24, %c0_23] : memref<1x1x264x4xbf16, #tpu.memory_space<vmem>>, vector<1x1x192x4xbf16>
    %20 = vector.shape_cast %19 : vector<1x1x192x4xbf16> to vector<192x4xbf16>
    %c3 = arith.constant 3 : index
    %c0_24 = arith.constant 0 : index
    %c0_25 = arith.constant 0 : index
    %21 = vector.load %arg3[%c3, %c0_24, %c0_25] : memref<9x4x256xbf16, #tpu.memory_space<vmem>>, vector<1x4x256xbf16>
    %22 = vector.shape_cast %21 : vector<1x4x256xbf16> to vector<4x256xbf16>
    %cst_26 = arith.constant dense<0.000000e+00> : vector<192x256xf32>
    %23 = tpu.matmul %20, %22, %cst_26 {dimension_numbers = #tpu.dot_dimension_numbers<[1], [0], [0], [1], [0, 0, 1, 1], [], []>} : vector<192x4xbf16>, vector<4x256xbf16>, vector<192x256xf32> -> vector<192x256xf32>
    %24 = arith.addf %18, %23 : vector<192x256xf32>
    %c0_27 = arith.constant 0 : index
    %c0_28 = arith.constant 0 : index
    %c25 = arith.constant 25 : index
    %c0_29 = arith.constant 0 : index
    %25 = vector.load %arg2[%c0_27, %c0_28, %c25, %c0_29] : memref<1x1x264x4xbf16, #tpu.memory_space<vmem>>, vector<1x1x192x4xbf16>
    %26 = vector.shape_cast %25 : vector<1x1x192x4xbf16> to vector<192x4xbf16>
    %c4 = arith.constant 4 : index
    %c0_30 = arith.constant 0 : index
    %c0_31 = arith.constant 0 : index
    %27 = vector.load %arg3[%c4, %c0_30, %c0_31] : memref<9x4x256xbf16, #tpu.memory_space<vmem>>, vector<1x4x256xbf16>
    %28 = vector.shape_cast %27 : vector<1x4x256xbf16> to vector<4x256xbf16>
    %cst_32 = arith.constant dense<0.000000e+00> : vector<192x256xf32>
    %29 = tpu.matmul %26, %28, %cst_32 {dimension_numbers = #tpu.dot_dimension_numbers<[1], [0], [0], [1], [0, 0, 1, 1], [], []>} : vector<192x4xbf16>, vector<4x256xbf16>, vector<192x256xf32> -> vector<192x256xf32>
    %30 = arith.addf %24, %29 : vector<192x256xf32>
    %c0_33 = arith.constant 0 : index
    %c0_34 = arith.constant 0 : index
    %c26 = arith.constant 26 : index
    %c0_35 = arith.constant 0 : index
    %31 = vector.load %arg2[%c0_33, %c0_34, %c26, %c0_35] : memref<1x1x264x4xbf16, #tpu.memory_space<vmem>>, vector<1x1x192x4xbf16>
    %32 = vector.shape_cast %31 : vector<1x1x192x4xbf16> to vector<192x4xbf16>
    %c5 = arith.constant 5 : index
    %c0_36 = arith.constant 0 : index
    %c0_37 = arith.constant 0 : index
    %33 = vector.load %arg3[%c5, %c0_36, %c0_37] : memref<9x4x256xbf16, #tpu.memory_space<vmem>>, vector<1x4x256xbf16>
    %34 = vector.shape_cast %33 : vector<1x4x256xbf16> to vector<4x256xbf16>
    %cst_38 = arith.constant dense<0.000000e+00> : vector<192x256xf32>
    %35 = tpu.matmul %32, %34, %cst_38 {dimension_numbers = #tpu.dot_dimension_numbers<[1], [0], [0], [1], [0, 0, 1, 1], [], []>} : vector<192x4xbf16>, vector<4x256xbf16>, vector<192x256xf32> -> vector<192x256xf32>
    %36 = arith.addf %30, %35 : vector<192x256xf32>
    %c0_39 = arith.constant 0 : index
    %c0_40 = arith.constant 0 : index
    %c48 = arith.constant 48 : index
    %c0_41 = arith.constant 0 : index
    %37 = vector.load %arg2[%c0_39, %c0_40, %c48, %c0_41] : memref<1x1x264x4xbf16, #tpu.memory_space<vmem>>, vector<1x1x192x4xbf16>
    %38 = vector.shape_cast %37 : vector<1x1x192x4xbf16> to vector<192x4xbf16>
    %c6 = arith.constant 6 : index
    %c0_42 = arith.constant 0 : index
    %c0_43 = arith.constant 0 : index
    %39 = vector.load %arg3[%c6, %c0_42, %c0_43] : memref<9x4x256xbf16, #tpu.memory_space<vmem>>, vector<1x4x256xbf16>
    %40 = vector.shape_cast %39 : vector<1x4x256xbf16> to vector<4x256xbf16>
    %cst_44 = arith.constant dense<0.000000e+00> : vector<192x256xf32>
    %41 = tpu.matmul %38, %40, %cst_44 {dimension_numbers = #tpu.dot_dimension_numbers<[1], [0], [0], [1], [0, 0, 1, 1], [], []>} : vector<192x4xbf16>, vector<4x256xbf16>, vector<192x256xf32> -> vector<192x256xf32>
    %42 = arith.addf %36, %41 : vector<192x256xf32>
    %c0_45 = arith.constant 0 : index
    %c0_46 = arith.constant 0 : index
    %c49 = arith.constant 49 : index
    %c0_47 = arith.constant 0 : index
    %43 = vector.load %arg2[%c0_45, %c0_46, %c49, %c0_47] : memref<1x1x264x4xbf16, #tpu.memory_space<vmem>>, vector<1x1x192x4xbf16>
    %44 = vector.shape_cast %43 : vector<1x1x192x4xbf16> to vector<192x4xbf16>
    %c7 = arith.constant 7 : index
    %c0_48 = arith.constant 0 : index
    %c0_49 = arith.constant 0 : index
    %45 = vector.load %arg3[%c7, %c0_48, %c0_49] : memref<9x4x256xbf16, #tpu.memory_space<vmem>>, vector<1x4x256xbf16>
    %46 = vector.shape_cast %45 : vector<1x4x256xbf16> to vector<4x256xbf16>
    %cst_50 = arith.constant dense<0.000000e+00> : vector<192x256xf32>
    %47 = tpu.matmul %44, %46, %cst_50 {dimension_numbers = #tpu.dot_dimension_numbers<[1], [0], [0], [1], [0, 0, 1, 1], [], []>} : vector<192x4xbf16>, vector<4x256xbf16>, vector<192x256xf32> -> vector<192x256xf32>
    %48 = arith.addf %42, %47 : vector<192x256xf32>
    %c0_51 = arith.constant 0 : index
    %c0_52 = arith.constant 0 : index
    %c50 = arith.constant 50 : index
    %c0_53 = arith.constant 0 : index
    %49 = vector.load %arg2[%c0_51, %c0_52, %c50, %c0_53] : memref<1x1x264x4xbf16, #tpu.memory_space<vmem>>, vector<1x1x192x4xbf16>
    %50 = vector.shape_cast %49 : vector<1x1x192x4xbf16> to vector<192x4xbf16>
    %c8 = arith.constant 8 : index
    %c0_54 = arith.constant 0 : index
    %c0_55 = arith.constant 0 : index
    %51 = vector.load %arg3[%c8, %c0_54, %c0_55] : memref<9x4x256xbf16, #tpu.memory_space<vmem>>, vector<1x4x256xbf16>
    %52 = vector.shape_cast %51 : vector<1x4x256xbf16> to vector<4x256xbf16>
    %cst_56 = arith.constant dense<0.000000e+00> : vector<192x256xf32>
    %53 = tpu.matmul %50, %52, %cst_56 {dimension_numbers = #tpu.dot_dimension_numbers<[1], [0], [0], [1], [0, 0, 1, 1], [], []>} : vector<192x4xbf16>, vector<4x256xbf16>, vector<192x256xf32> -> vector<192x256xf32>
    %54 = arith.addf %48, %53 : vector<192x256xf32>
    %c0_57 = arith.constant 0 : index
    %c0_58 = arith.constant 0 : index
    %55 = vector.load %arg4[%c0_57, %c0_58] : memref<1x256xf32, #tpu.memory_space<vmem>>, vector<1x256xf32>
    %56 = vector.broadcast %55 : vector<1x256xf32> to vector<192x256xf32>
    %57 = arith.addf %54, %56 : vector<192x256xf32>
    %cst_59 = arith.constant 0.000000e+00 : f32
    %58 = vector.broadcast %cst_59 : f32 to vector<192x256xf32>
    %59 = arith.maximumf %57, %58 : vector<192x256xf32>
    %60 = arith.truncf %59 : vector<192x256xf32> to vector<192x256xbf16>
    %c0_60 = arith.constant 0 : index
    %c0_61 = arith.constant 0 : index
    %61 = vector.load %arg5[%c0_60, %c0_61] : memref<256x128xbf16, #tpu.memory_space<vmem>>, vector<256x128xbf16>
    %cst_62 = arith.constant dense<0.000000e+00> : vector<192x128xf32>
    %62 = tpu.matmul %60, %61, %cst_62 {dimension_numbers = #tpu.dot_dimension_numbers<[1], [0], [0], [1], [0, 0, 1, 1], [], []>} : vector<192x256xbf16>, vector<256x128xbf16>, vector<192x128xf32> -> vector<192x128xf32>
    %c0_63 = arith.constant 0 : index
    %c0_64 = arith.constant 0 : index
    %63 = vector.load %arg6[%c0_63, %c0_64] : memref<1x128xf32, #tpu.memory_space<vmem>>, vector<1x128xf32>
    %64 = vector.broadcast %63 : vector<1x128xf32> to vector<192x128xf32>
    %65 = arith.addf %62, %64 : vector<192x128xf32>
    %c0_65 = arith.constant 0 : index
    %c0_66 = arith.constant 0 : index
    %c0_67 = arith.constant 0 : index
    %c0_68 = arith.constant 0 : index
    %66 = vector.load %arg7[%c0_65, %c0_66, %c0_67, %c0_68] : memref<1x1x192x128xf32, #tpu.memory_space<vmem>>, vector<1x1x192x128xf32>
    %67 = vector.shape_cast %66 : vector<1x1x192x128xf32> to vector<192x128xf32>
    %68 = vector.shape_cast %65 : vector<192x128xf32> to vector<1x1x192x128xf32>
    tpu.vector_store %arg7[%c0_65, %c0_66, %c0_67, %c0_68], %68 {strides = array<i32>} : memref<1x1x192x128xf32, #tpu.memory_space<vmem>>, vector<1x1x192x128xf32>,
    return
  }
  func.func @transform_0(%arg0: i32, %arg1: i32) -> (i32, i32, i32, i32) {
    %c0_i32 = arith.constant 0 : i32
    %c0_i32_0 = arith.constant 0 : i32
    %c0_i32_1 = arith.constant 0 : i32
    return %arg0, %arg1, %c0_i32, %c0_i32_0 : i32, i32, i32, i32
  }
  func.func @transform_1(%arg0: i32, %arg1: i32) -> (i32, i32, i32) {
    %c0_i32 = arith.constant 0 : i32
    %c0_i32_0 = arith.constant 0 : i32
    %c0_i32_1 = arith.constant 0 : i32
    %c0_i32_2 = arith.constant 0 : i32
    return %c0_i32, %c0_i32_0, %c0_i32_1 : i32, i32, i32
  }
  func.func @transform_2(%arg0: i32, %arg1: i32) -> (i32, i32) {
    %c0_i32 = arith.constant 0 : i32
    %c0_i32_0 = arith.constant 0 : i32
    %c0_i32_1 = arith.constant 0 : i32
    return %c0_i32, %c0_i32_0 : i32, i32
  }
  func.func @transform_3(%arg0: i32, %arg1: i32) -> (i32, i32) {
    %c0_i32 = arith.constant 0 : i32
    %c0_i32_0 = arith.constant 0 : i32
    %c0_i32_1 = arith.constant 0 : i32
    return %c0_i32, %c0_i32_0 : i32, i32
  }
  func.func @transform_4(%arg0: i32, %arg1: i32) -> (i32, i32) {
    %c0_i32 = arith.constant 0 : i32
    %c0_i32_0 = arith.constant 0 : i32
    %c0_i32_1 = arith.constant 0 : i32
    return %c0_i32, %c0_i32_0 : i32, i32
  }
  func.func @transform_5(%arg0: i32, %arg1: i32) -> (i32, i32, i32, i32) {
    %c0_i32 = arith.constant 0 : i32
    %c0_i32_0 = arith.constant 0 : i32
    %c0_i32_1 = arith.constant 0 : i32
    return %arg0, %arg1, %c0_i32, %c0_i32_0 : i32, i32, i32, i32
  }
}

</mosaic_0001>

<bundles_post_ra>
// kernel: tpu_custom_call.1
= control target key start
LH: loop header
LB: loop body
LE: loop exit
PB: predicated region body
PF: predicated region fallthrough
CT: control target
= control target key end

     0   :  { %10 = vsyncpa [#allocation3], 0  ;;  %s6183_s0 = inlined_call_operand.vmem [shape: bf16[2,2,264,4], index: 0, kind: input, shape index: {}]   ;;  %s6184_s1 = inlined_call_operand.vmem [shape: bf16[9,4,256], index: 1, kind: input, shape index: {}]   ;;  %s6185_s2 = inlined_call_operand.vmem [shape: f32[1,256], index: 2, kind: input, shape index: {}]   ;;  %s6186_s3 = inlined_call_operand.vmem [shape: bf16[256,128], index: 3, kind: input, shape index: {}]   ;;  %s6187_s4 = inlined_call_operand.vmem [shape: f32[1,128], index: 4, kind: input, shape index: {}]   ;;  %s6188_s5 = inlined_call_operand.hbm [shape: f32[2,2,192,128], index: 5, kind: output, shape index: {}]  }
   0x1   :  { %12 = vsyncpa [#allocation3 + $0x1], 0  ;;  %s4700_s18 = smov 0   ;;  %s4702_s19 = smov 0  }
   0x2   :  { %s4704_s20 = smov 0   ;;  %s4706_s21 = smov 0  }
   0x3   :  { %s4708_s22 = smov 0   ;;  %s4710_s23 = smov 0  }
   0x4   :  { %s4712_s24 = smov 0   ;;  %s4714_s25 = smov 0  }
   0x5 LB: > { %s4025_s26 = sadd.s32 4294967295, %s4664_s25   ;;  %s4026_s27 = sadd.s32 4294967294, %s4664_s25   ;;  %s4664_s25 = sphi %s4714_s25, %s18_s25   ;;  %s4660_s24 = sphi %s4712_s24, %s6306_s24   ;;  %s4656_s23 = sphi %s4710_s23, %s6305_s23   ;;  %s4652_s22 = sphi %s4708_s22, %s6304_s22   ;;  %s4648_s21 = sphi %s4706_s21, %s6303_s21   ;;  %s4644_s20 = sphi %s4704_s20, %s6302_s20   ;;  %s4640_s19 = sphi %s4702_s19, %s6301_s19   ;;  %s4636_s18 = sphi %s4700_s18, %s6300_s18  }
   0x6   : > { %s27_s28 = sadd.s32 1, %s4656_s23  ;;  %s30_s29 = sadd.s32 1, %s4660_s24 }
   0x7   : > { %p28_p0 = scmp.ge.s32.totalorder %s27_s28, 2  ;;  %p161_p1 = scmp.ne.s32.totalorder %s4644_s20, %s4640_s19 }
   0x8   : > { %p162_p2 = scmp.eq.s32.totalorder %s4025_s26, 3  ;;  %p167_p5 = scmp.ne.s32.totalorder %s4640_s19, %s4636_s18 }
   0x9   : > { %s6308_s28 = smov (%p28_p0, %s27_s28), 0  ;;  %s6310_s29 = smov (!%p28_p0, %s30_s29), %s4660_s24 }
   0xa   : > { %s147_s30 = ssub.s32 %s4656_s23, %s6308_s28  ;;  %p4751_p3 = por %p162_p2, %p161_p1 }
   0xb   : > { %p32_p4 = scmp.ge.s32.totalorder %s6310_s29, 2  ;;  %p168_p6 = scmp.eq.s32.totalorder %s4026_s27, 3 }
   0xc   : > { %p4029_p7 = scmp.ge.s32.totalorder %s4664_s25, 1  ;;  %p210_p9 = scmp.lt.s32.totalorder %s4664_s25, 5 }
   0xd   : > { %s6312_s29 = smov (%p32_p4, %s6310_s29), 0  ;;  %p4760_p8 = por %p168_p6, %p167_p5 }
   0xe   : > { %s146_s8 = ssub.s32 %s4660_s24, %s6312_s29  ;;  %s151_s9 = sadd.s32 1, %s4644_s20 }
   0xf   : > { %s148_s10 = sor.u32 %s147_s30, %s146_s8  ;;  %p211_p10 = pnand %p4029_p7, %p210_p9 }
  0x10   : > { %p149_p11 = scmp.eq.s32.totalorder %s148_s10, 0 }
  0x11   : > { %214 = sbr.rel (%p211_p10) target bundleno = 938 (0x3aa), region = 40 }
  0x12   : > { %s4769_s11 = scalar_select %p149_p11, %s4644_s20, %s151_s9  }
  0x16   : > { %v4045_v0 = vld.sshfl [vmem:[%s6184_s1 + $0x4] sm:$0x33 pattern:$0x76325410]  ;;  %vm490_vm0 = vcmask 1041408   ;;  %v6189_v4 = vmov 0  }
  0x17   : > { %v452_v1 = vcombine.high %v4045_v0, %v4045_v0  ;;  %v492_v2 = vsel %vm490_vm0, %v4045_v0, 0  ;;  %v4059_v3 = vld.sshfl [vmem:[%s6184_s1] sm:$0x33 pattern:$0x76325410]  ;;  %529 = vmatprep.mubr.bf16.mxu0 %v6189_v4  ;;  %721 = vmatprep.mubr.bf16.mxu1 %v6189_v4  ;;  %p242_p12 = scmp.lt.s32.totalorder %s4652_s22, 1 }
  0x18   : > { %v658_v5 = vcombine.high %v4059_v3, %v4059_v3  ;;  %v684_v6 = vsel %vm490_vm0, %v4059_v3, 0  ;;  %v4087_v7 = vld.sshfl [vmem:[%s6184_s1 + $0x8] sm:$0x33 pattern:$0x76325410]  ;;  %p244_p13 = scmp.lt.s32.totalorder %s4648_s21, 1 }
  0x19   : > { %4046 = vmatprep.subr.msk.bf16.mxu0 %vm490_vm0, %v452_v1  ;;  %v966_v8 = vcombine.high %v4087_v7, %v4087_v7  ;;  %s243_s26 = scalar_select %p242_p12, %s4652_s22, 1  ;;  %v4114_v9 = vld.sshfl [vmem:[%s6184_s1 + $0xc] sm:$0x33 pattern:$0x76325410]  ;;  %vm453_vm1 = vcmask 31744  }
  0x1a   : > { %512 = vmatpush1.bf16.msra.mxu0 %v492_v2  ;;  %4060 = vmatprep.subr.msk.bf16.mxu1 %vm490_vm0, %v658_v5  ;;  %s245_s27 = scalar_select %p244_p13, %s4648_s21, 1  ;;  %v1304_v10 = vcombine.high %v4114_v9, %v4114_v9  ;;  %v1342_v13 = vsel %vm490_vm0, %v4114_v9, 0  ;;  %v4809_v18 = vld.sshfl [vmem:[%s6184_s1 + $0x10] sm:$0x33 pattern:$0x76325410] }
  0x1b   : > { %704 = vmatpush1.bf16.msra.mxu1 %v684_v6  ;;  %4088 = vmatprep.subr.msk.bf16.mxu0 %vm490_vm0, %v966_v8  ;;  %s4377_s9 = smul.u32 66, %s243_s26  ;;  %vm343_vm2 = vsmask.f32 7424  ;;  %v1004_v24 = vsel %vm490_vm0, %v4087_v7, 0  ;;  %v1746_v25 = vcombine.high %v4809_v18, %v4809_v18  ;;  %vm932_vm3 = vcmask 1046528   ;;  %s239_s15 = sand.u32 1, %s4640_s19  }
  0x1c   : > { %s4376_s10 = smul.u32 33, %s245_s27  ;;  %4115 = vmatprep.subr.msk.bf16.mxu1 %vm490_vm0, %v1304_v10  ;;  %v4170_v6 = vld.sshfl [vmem:[%s6184_s1 + $0x14] sm:$0x33 pattern:$0x76325410]  ;;  %s6132_s14 = scalar_lea.sflag [#allocation3], %s239_s15 }
  0x1d   : > { %v2113_v10 = vcombine.high %v4170_v6, %v4170_v6  ;;  %s4375_s17 = smul.u32 192, %s239_s15  ;;  %s4667_s26 = smov [#allocation2]  }
  0x1e   : > { %s248_s12 = sadd.s32 %s4377_s9, %s4376_s10  ;;  %s4378_s8 = smul.u32 24, %s4648_s21 }
  0x1f   : > { %s4030_s13 = sshll.u32 %s248_s12, 2  ;;  %s6071_s30 = scalar_lea.vmem [#allocation2], %s4375_s17 }
  0x20   : > { %s4798_s16 = scalar_lea.vmem %s6183_s0, %s4030_s13  ;;  %s4379_s9 = smul.u32 48, %s4652_s22 }
  0x21   : > { %v4454_v11 = vld [vmem:[%s4798_s16] sm:$0xff]   ;;  %v4455_v12 = vld [vmem:[%s4798_s16 + $0x8] sm:$0xff]   ;;  %v4456_v17 = vld [vmem:[%s4798_s16 + $0x10] sm:$0xff]   ;;  %s3940_s21 = sshll.u32 %s6071_s30, 4  ;;  %s4576_s27 = sshll.u32 %s4667_s26, 4  ;;  %s6126_s21 = int_to_ptr.vmem [resolvable:$true] %s3940_s21  ;;  %s4577_s27 = int_to_ptr.vmem [resolvable:$false] %s4576_s27 }
  0x22   : > { %v345_v14 = vshrl.u32 %v4454_v11, 16  ;;  %v347_v15 = vshll.u32 %v4454_v11, 16  ;;  %v352_v16 = vshll.u32 %v4455_v12, 16  ;;  %4061 = vmatmul.mubr.msk.bf16.vlgmr.msra.gmra.mxu1 %vm453_vm1, %v4454_v11  ;;  %v356_v22 = vshrl.u32 %v4455_v12, 16  ;;  %v4457_v29 = vld [vmem:[%s4798_s16 + $0x18] sm:$0xff]   ;;  %v4458_v33 = vld [vmem:[%s4798_s16 + $0x20] sm:$0xff]   ;;  %s3937_s10 = sadd.s32 %s4379_s9, %s4378_s8  ;;  %p4579_p4 = scmp.lt.s32.totalorder %s6126_s21, %s4577_s27 }
  0x23   : > { %731 = vmatprep.mubr.bf16.mxu1 %v6189_v4  ;;  %1362 = vmatpush1.bf16.msra.mxu1 %v1342_v13  ;;  %v360_v23 = vshll.u32 %v4456_v17, 16  ;;  %v364_v31 = vshrl.u32 %v4456_v17, 16  ;;  %v368_v32 = vshll.u32 %v4457_v29, 16  ;;  %v372_v36 = vshrl.u32 %v4457_v29, 16  ;;  %v4459_v41 = vld [vmem:[%s4798_s16 + $0x28] sm:$0xff]   ;;  %v4460_v45 = vld [vmem:[%s4798_s16 + $0x30] sm:$0xff]  }
  0x24   : > { %v349_v19 = vrot.slane %v347_v15, 1  ;;  %v354_v20 = vrot.slane %v352_v16, 1  ;;  %v376_v37 = vshll.u32 %v4458_v33, 16  ;;  %v380_v43 = vshrl.u32 %v4458_v33, 16  ;;  %v4461_v51 = vld [vmem:[%s4798_s16 + $0x38] sm:$0xff]   ;;  %v4462_v57 = vld [vmem:[%s4798_s16 + $0x40] sm:$0xff]   ;;  %4171 = vmatprep.subr.msk.bf16.mxu1 %vm490_vm0, %v2113_v10 }
  0x25   : > { %v362_v28 = vrot.slane %v360_v23, 1  ;;  %v370_v35 = vrot.slane %v368_v32, 1  ;;  %v384_v44 = vshll.u32 %v4459_v41, 16  ;;  %v388_v48 = vshrl.u32 %v4459_v41, 16  ;;  %v4463_v63 = vld [vmem:[%s4798_s16 + $0x48] sm:$0xff]   ;;  %v4464_v9 = vld [vmem:[%s4798_s16 + $0x50] sm:$0xff]  }
  0x26   : > { %v350_v21 = vor.u32 %v349_v19, %v345_v14  ;;  %v358_v27 = vor.u32 %v356_v22, %v354_v20  ;;  %v378_v40 = vrot.slane %v376_v37, 1  ;;  %v392_v49 = vshll.u32 %v4460_v45, 16  ;;  %v4465_v16 = vld [vmem:[%s4798_s16 + $0x58] sm:$0xff]   ;;  %v4469_v32 = vld [vmem:[%s4798_s16 + $0xc] sm:$0xff]   ;;  %s4284_s12 = sshll.u32 %s3937_s10, 7  ;;  %s4572_s17 = scalar_lea.vmem %s6126_s21, 3072 }
  0x27   : > { %v366_v34 = vor.u32 %v364_v31, %v362_v28  ;;  %v374_v39 = vor.u32 %v372_v36, %v370_v35  ;;  %v386_v47 = vrot.slane %v384_v44, 1  ;;  %v396_v54 = vshrl.u32 %v4460_v45, 16  ;;  %v4896_v36 = vld.sshfl [vmem:[%s6184_s1 + $0x18] sm:$0x33 pattern:$0x76325410]  ;;  %p4573_p0 = scmp.ne.s32.totalorder %s6126_s21, %s4572_s17 }
  0x28   : > { %v355_v26 = vsel %vm343_vm2, %v350_v21, %v354_v20  ;;  %v363_v30 = vsel %vm343_vm2, %v358_v27, %v362_v28  ;;  %v382_v46 = vor.u32 %v380_v43, %v378_v40  ;;  %v394_v53 = vrot.slane %v392_v49, 1  ;;  %v4466_v21 = vld [vmem:[%s4798_s16 + $0x60] ss:$0 sps:$4 sm:$0x11]   ;;  %v4472_v43 = vld [vmem:[%s4798_s16 + $0x18] sm:$0xff]   ;;  %v4486_v10 = vld [vmem:[%s4798_s16 + $0x50] sm:$0xff]  }
  0x29   : > { %4047 = vmatmul.mubr.msk.bf16.vlgmr.msra.gmra.mxu0 %vm453_vm1, %v355_v26  ;;  %v371_v38 = vsel %vm343_vm2, %v366_v34, %v370_v35  ;;  %v379_v42 = vsel %vm343_vm2, %v374_v39, %v378_v40  ;;  %v390_v52 = vor.u32 %v388_v48, %v386_v47  ;;  %v400_v55 = vshll.u32 %v4461_v51, 16  ;;  %v4471_v40 = vld [vmem:[%s4798_s16 + $0x14] sm:$0xff]   ;;  %v4473_v44 = vld [vmem:[%s4798_s16 + $0x1c] sm:$0xff]   ;;  %v4475_v48 = vld [vmem:[%s4798_s16 + $0x24] sm:$0xff]   ;;  %p4574_p1 = pnand %p4573_p0, %p4751_p3  ;;  %s4578_s8 = scalar_lea.vmem %s4577_s27, 6144 }
  0x2a   : > { %1024 = vmatpush1.bf16.msra.mxu0 %v1004_v24  ;;  %539 = vmatprep.mubr.bf16.mxu0 %v6189_v4  ;;  %v387_v50 = vsel %vm343_vm2, %v382_v46, %v386_v47  ;;  %v398_v58 = vor.u32 %v396_v54, %v394_v53  ;;  %v404_v60 = vshrl.u32 %v4461_v51, 16  ;;  %v408_v61 = vshll.u32 %v4462_v57, 16  ;;  %v4474_v47 = vld [vmem:[%s4798_s16 + $0x20] sm:$0xff]   ;;  %p4580_p5 = scmp.lt.s32.totalorder %s4578_s8, %s4572_s17 }
  0x2b   : > { %4062 = vmatmul.mubr.msk.bf16.gmra.mxu1 %vm453_vm1, %v4455_v12  ;;  %4143 = vmatprep.subr.msk.bf16.mxu0 %vm490_vm0, %v1746_v25  ;;  %v395_v56 = vsel %vm343_vm2, %v390_v52, %v394_v53  ;;  %v402_v59 = vrot.slane %v400_v55, 1  ;;  %v412_v2 = vshrl.u32 %v4462_v57, 16  ;;  %v416_v3 = vshll.u32 %v4463_v63, 16  ;;  %v4477_v52 = vld [vmem:[%s4798_s16 + $0x2c] sm:$0xff]   ;;  %p4575_p2 = pneg %p4574_p1 }
  0x2c   : > { %741 = vmatprep.mubr.bf16.mxu1 %v6189_v4  ;;  %v410_v1 = vrot.slane %v408_v61, 1  ;;  %v420_v12 = vshrl.u32 %v4463_v63, 16  ;;  %v424_v13 = vshll.u32 %v4464_v9, 16  ;;  %v428_v19 = vshrl.u32 %v4464_v9, 16  ;;  %v4478_v55 = vld [vmem:[%s4798_s16 + $0x30] sm:$0xff]   ;;  %p4581_p6 = por %p4580_p5, %p4579_p4 }
  0x2d   : > { %v403_v62 = vsel %vm343_vm2, %v398_v58, %v402_v59  ;;  %v406_v0 = vor.u32 %v404_v60, %v402_v59  ;;  %v418_v8 = vrot.slane %v416_v3, 1  ;;  %v432_v20 = vshll.u32 %v4465_v16, 16  ;;  %v4480_v59 = vld [vmem:[%s4798_s16 + $0x38] sm:$0xff]   ;;  %v4484_v3 = vld [vmem:[%s4798_s16 + $0x48] sm:$0xff]  }
  0x2e   : > { %v414_v7 = vor.u32 %v412_v2, %v410_v1  ;;  %v426_v15 = vrot.slane %v424_v13, 1  ;;  %v436_v25 = vshrl.u32 %v4465_v16, 16  ;;  %v440_v26 = vshll.u32 %v4466_v21, 16  ;;  %v4481_v60 = vld [vmem:[%s4798_s16 + $0x3c] sm:$0xff]   ;;  %v4491_v21 = vld [vmem:[%s4798_s16 + $0x64] sm:$0xff]   ;;  %p4582_p7 = pnand %p4581_p6, %p4575_p2 }
  0x2f   : > { %v411_v5 = vsel %vm343_vm2, %v406_v0, %v410_v1  ;;  %v422_v14 = vor.u32 %v420_v12, %v418_v8  ;;  %v434_v23 = vrot.slane %v432_v20, 1  ;;  %v1784_v39 = vsel %vm490_vm0, %v4809_v18, 0  ;;  %v4483_v0 = vld [vmem:[%s4798_s16 + $0x44] sm:$0xff]   ;;  %v4492_v20 = vld [vmem:[%s4798_s16 + $0xc] sm:$0xff]  }
  0x30   : > { %v419_v11 = vsel %vm343_vm2, %v414_v7, %v418_v8  ;;  %v430_v22 = vor.u32 %v428_v19, %v426_v15  ;;  %v442_v28 = vrot.slane %v440_v26, 1  ;;  %v940_v49 = vrot.slane %v4474_v47, 1  ;;  %v4225_v7 = vld.sshfl [vmem:[%s6184_s1 + $0x1c] sm:$0x33 pattern:$0x76325410] }
  0x31   : > { %4048 = vmatmul.mubr.msk.bf16.gmra.mxu0 %vm453_vm1, %v363_v30  ;;  %v438_v27 = vor.u32 %v436_v25, %v434_v23  ;;  %v4468_v30 = vld [vmem:[%s4798_s16 + $0x8] sm:$0xff]   ;;  %v946_v61 = vrot.slane %v4480_v59, 1  ;;  %v2893_v8 = vcombine.high %v4225_v7, %v4225_v7  ;;  %v952_v12 = vrot.slane %v4486_v10, 1  ;;  %v4490_v19 = vld [vmem:[%s4798_s16 + $0x60] ss:$0 sps:$4 sm:$0x11]  }
  0x32   : > { %549 = vmatprep.mubr.bf16.mxu0 %v6189_v4  ;;  %v435_v24 = vsel %vm343_vm2, %v430_v22, %v434_v23  ;;  %v934_v35 = vrot.slane %v4468_v30, 1  ;;  %v4494_v22 = vld [vmem:[%s4798_s16 + $0xc] sm:$0xfe]   ;;  %v4495_v23 = vld [vmem:[%s4798_s16 + $0x14] sm:$0xff]   ;;  %v1641_v26 = vshll.u32 %v4492_v20, 16  ;;  %v1639_v30 = vshrl.u32 %v4492_v20, 16 }
  0x33   : > { %4063 = vmatmul.mubr.msk.bf16.gmra.mxu1 %vm453_vm1, %v4456_v17  ;;  %v427_v17 = vsel %vm343_vm2, %v422_v14, %v426_v15  ;;  %v443_v31 = vsel %vm343_vm2, %v438_v27, %v442_v28  ;;  %v4488_v14 = vld [vmem:[%s4798_s16 + $0x58] sm:$0xff]   ;;  %v2080_v27 = vrot.slane %v4494_v22, 1  ;;  %v2081_v28 = vrot.slane %v4495_v23, 1 }
  0x34   : > { %751 = vmatprep.mubr.bf16.mxu1 %v6189_v4  ;;  %v4489_v15 = vld [vmem:[%s4798_s16 + $0x5c] sm:$0xff]   ;;  %v4493_v25 = vld [vmem:[%s4798_s16 + $0x14] sm:$0xff]   ;;  %v2489_v47 = vsel %vm490_vm0, %v4896_v36, 0 }
  0x39   : > { %4049 = vmatmul.mubr.msk.bf16.gmra.mxu0 %vm453_vm1, %v371_v38  ;;  %v4470_v38 = vld [vmem:[%s4798_s16 + $0x10] sm:$0xff]  }
  0x3a   : > { %559 = vmatprep.mubr.bf16.mxu0 %v6189_v4 }
  0x3b   : > { %4064 = vmatmul.mubr.msk.bf16.gmra.mxu1 %vm453_vm1, %v4457_v29  ;;  %v4467_v29 = vld [vmem:[%s4798_s16] sm:$0xfe]  }
  0x3c   : > { %761 = vmatprep.mubr.bf16.mxu1 %v6189_v4  ;;  %v933_v34 = vrot.slane %v4467_v29, 1 }
  0x3e   : > { %v935_v37 = vsel %vm932_vm3, %v933_v34, %v934_v35  ;;  %v4497_v34 = vld [vmem:[%s4798_s16 + $0x1c] sm:$0xff]  }
  0x41   : > { %4050 = vmatmul.mubr.msk.bf16.gmra.mxu0 %vm453_vm1, %v379_v42  ;;  %v936_v42 = vrot.slane %v4470_v38, 1 }
  0x42   : > { %569 = vmatprep.mubr.bf16.mxu0 %v6189_v4 }
  0x43   : > { %4065 = vmatmul.mubr.msk.bf16.gmra.mxu1 %vm453_vm1, %v4458_v33  ;;  %v2151_v33 = vsel %vm490_vm0, %v4170_v6, 0  ;;  %v937_v18 = vsel %vm932_vm3, %v934_v35, %v936_v42  ;;  %v950_v6 = vrot.slane %v4484_v3, 1  ;;  %v2931_v35 = vsel %vm490_vm0, %v4225_v7, 0  ;;  %v4501_v7 = vld [vmem:[%s4798_s16 + $0x2c] sm:$0xff]  }
  0x44   : > { %771 = vmatprep.mubr.bf16.mxu1 %v6189_v4 }
  0x45   : > { %v953_v13 = vsel %vm932_vm3, %v950_v6, %v952_v12 }
  0x49   : > { %4051 = vmatmul.mubr.msk.bf16.gmra.mxu0 %vm453_vm1, %v387_v50 }
  0x4a   : > { %579 = vmatprep.mubr.bf16.mxu0 %v6189_v4 }
  0x4b   : > { %4066 = vmatmul.mubr.msk.bf16.gmra.mxu1 %vm453_vm1, %v4459_v41  ;;  %v2451_v41 = vcombine.high %v4896_v36, %v4896_v36 }
  0x4c   : > { %781 = vmatprep.mubr.bf16.mxu1 %v6189_v4 }
  0x51   : > { %4052 = vmatmul.mubr.msk.bf16.gmra.mxu0 %vm453_vm1, %v395_v56  ;;  %v4479_v56 = vld [vmem:[%s4798_s16 + $0x34] sm:$0xff]  }
  0x52   : > { %589 = vmatprep.mubr.bf16.mxu0 %v6189_v4 }
  0x53   : > { %4067 = vmatmul.mubr.msk.bf16.gmra.mxu1 %vm453_vm1, %v4460_v45  ;;  %v938_v45 = vrot.slane %v4472_v43, 1 }
  0x54   : > { %791 = vmatprep.mubr.bf16.mxu1 %v6189_v4 }
  0x55   : > { %v939_v46 = vsel %vm932_vm3, %v936_v42, %v938_v45  ;;  %v941_v50 = vsel %vm932_vm3, %v938_v45, %v940_v49  ;;  %v2083_v42 = vrot.slane %v4497_v34, 1  ;;  %v1650_v45 = vshrl.u32 %v4493_v25, 16 }
  0x59   : > { %4053 = vmatmul.mubr.msk.bf16.gmra.mxu0 %vm453_vm1, %v403_v62 }
  0x5a   : > { %599 = vmatprep.mubr.bf16.mxu0 %v6189_v4 }
  0x5b   : > { %4068 = vmatmul.mubr.msk.bf16.gmra.mxu1 %vm453_vm1, %v4461_v51  ;;  %v4476_v51 = vld [vmem:[%s4798_s16 + $0x28] sm:$0xff]  }
  0x5c   : > { %801 = vmatprep.mubr.bf16.mxu1 %v6189_v4  ;;  %v942_v53 = vrot.slane %v4476_v51, 1  ;;  %v4499_v51 = vld [vmem:[%s4798_s16 + $0x24] sm:$0xff]  }
  0x5d   : > { %v2085_v59 = vrot.slane %v4499_v51, 1  ;;  %v4505_v51 = vld [vmem:[%s4798_s16 + $0x3c] sm:$0xff]  }
  0x5e   : > { %v943_v54 = vsel %vm932_vm3, %v940_v49, %v942_v53 }
  0x61   : > { %4054 = vmatmul.mubr.msk.bf16.gmra.mxu0 %vm453_vm1, %v411_v5  ;;  %v4485_v5 = vld [vmem:[%s4798_s16 + $0x4c] sm:$0xff]  }
  0x62   : > { %609 = vmatprep.mubr.bf16.mxu0 %v6189_v4 }
  0x63   : > { %4069 = vmatmul.mubr.msk.bf16.gmra.mxu1 %vm453_vm1, %v4462_v57  ;;  %v944_v57 = vrot.slane %v4478_v55, 1 }
  0x64   : > { %811 = vmatprep.mubr.bf16.mxu1 %v6189_v4 }
  0x65   : > { %v945_v58 = vsel %vm932_vm3, %v942_v53, %v944_v57  ;;  %v947_v62 = vsel %vm932_vm3, %v944_v57, %v946_v61 }
  0x69   : > { %4055 = vmatmul.mubr.msk.bf16.gmra.mxu0 %vm453_vm1, %v419_v11  ;;  %v4487_v11 = vld [vmem:[%s4798_s16 + $0x54] sm:$0xff]  }
  0x6a   : > { %619 = vmatprep.mubr.bf16.mxu0 %v6189_v4 }
  0x6b   : > { %4070 = vmatmul.mubr.msk.bf16.gmra.mxu1 %vm453_vm1, %v4463_v63  ;;  %v4482_v63 = vld [vmem:[%s4798_s16 + $0x40] sm:$0xff]  }
  0x6c   : > { %821 = vmatprep.mubr.bf16.mxu1 %v6189_v4  ;;  %v948_v1 = vrot.slane %v4482_v63, 1 }
  0x6e   : > { %v949_v2 = vsel %vm932_vm3, %v946_v61, %v948_v1 }
  0x71   : > { %4056 = vmatmul.mubr.msk.bf16.gmra.mxu0 %vm453_vm1, %v427_v17 }
  0x72   : > { %629 = vmatprep.mubr.bf16.mxu0 %v6189_v4 }
  0x73   : > { %4071 = vmatmul.mubr.msk.bf16.gmra.mxu1 %vm453_vm1, %v4464_v9  ;;  %v951_v9 = vsel %vm932_vm3, %v948_v1, %v950_v6  ;;  %v2086_v6 = vsel %vm932_vm3, %v2083_v42, %v2085_v59 }
  0x74   : > { %831 = vmatprep.mubr.bf16.mxu1 %v6189_v4 }
  0x79   : > { %4057 = vmatmul.mubr.msk.bf16.gmra.mxu0 %vm453_vm1, %v435_v24  ;;  %v956_v24 = vrot.slane %v4490_v19, 1 }
  0x7a   : > { %639 = vmatprep.mubr.bf16.mxu0 %v6189_v4 }
  0x7b   : > { %4072 = vmatmul.mubr.msk.bf16.gmra.mxu1 %vm453_vm1, %v4465_v16  ;;  %v954_v16 = vrot.slane %v4488_v14, 1 }
  0x7c   : > { %1379 = vmatprep.mubr.bf16.mxu1 %v6189_v4 }
  0x7d   : > { %v955_v17 = vsel %vm932_vm3, %v952_v12, %v954_v16  ;;  %v957_v29 = vsel %vm932_vm3, %v954_v16, %v956_v24 }
  0x81   : > { %4058 = vmatmul.mubr.msk.bf16.gmra.mxu0 %vm453_vm1, %v443_v31  ;;  %v1643_v31 = vrot.slane %v1641_v26, 1 }
  0x82   : > { %1041 = vmatprep.mubr.bf16.mxu0 %v6189_v4 }
  0x83   : > { %4116 = vmatmul.mubr.msk.bf16.vlgmr.msra.gmra.mxu1 %vm453_vm1, %v4469_v32  ;;  %v1646_v32 = vshll.u32 %v4493_v25, 16  ;;  %v1644_v38 = vor.u32 %v1643_v31, %v1639_v30 }
  0x84   : > { %1389 = vmatprep.mubr.bf16.mxu1 %v6189_v4  ;;  %2171 = vmatpush1.bf16.msra.mxu1 %v2151_v33  ;;  %v2082_v33 = vsel %vm932_vm3, %v2080_v27, %v2081_v28 }
  0x85   : > { %4226 = vmatprep.subr.msk.bf16.mxu1 %vm490_vm0, %v2893_v8 }
  0x89   : > { %4089 = vmatmul.mubr.msk.bf16.vlgmr.msra.gmra.mxu0 %vm453_vm1, %v935_v37 }
  0x8a   : > { %1804 = vmatpush1.bf16.msra.mxu0 %v1784_v39  ;;  %1051 = vmatprep.mubr.bf16.mxu0 %v6189_v4  ;;  %v1648_v39 = vrot.slane %v1646_v32, 1 }
  0x8b   : > { %4117 = vmatmul.mubr.msk.bf16.gmra.mxu1 %vm453_vm1, %v4471_v40  ;;  %4198 = vmatprep.subr.msk.bf16.mxu0 %vm490_vm0, %v2451_v41  ;;  %v4496_v40 = vld [vmem:[%s4798_s16 + $0x1c] sm:$0xff]  }
  0x8c   : > { %1399 = vmatprep.mubr.bf16.mxu1 %v6189_v4  ;;  %v1649_v43 = vsel %vm343_vm2, %v1644_v38, %v1648_v39 }
  0x91   : > { %4090 = vmatmul.mubr.msk.bf16.gmra.mxu0 %vm453_vm1, %v937_v18  ;;  %v5000_v18 = vld.sshfl [vmem:[%s6184_s1 + $0x20] sm:$0x33 pattern:$0x76325410] }
  0x92   : > { %1061 = vmatprep.mubr.bf16.mxu0 %v6189_v4 }
  0x93   : > { %4118 = vmatmul.mubr.msk.bf16.gmra.mxu1 %vm453_vm1, %v4473_v44 }
  0x94   : > { %1409 = vmatprep.mubr.bf16.mxu1 %v6189_v4 }
  0x99   : > { %4091 = vmatmul.mubr.msk.bf16.gmra.mxu0 %vm453_vm1, %v939_v46  ;;  %v1654_v46 = vshll.u32 %v4496_v40, 16 }
  0x9a   : > { %1071 = vmatprep.mubr.bf16.mxu0 %v6189_v4 }
  0x9b   : > { %4119 = vmatmul.mubr.msk.bf16.gmra.mxu1 %vm453_vm1, %v4475_v48  ;;  %v3260_v48 = vcombine.high %v5000_v18, %v5000_v18  ;;  %v1656_v55 = vrot.slane %v1654_v46, 1 }
  0x9c   : > { %1419 = vmatprep.mubr.bf16.mxu1 %v6189_v4 }
  0xa1   : > { %4092 = vmatmul.mubr.msk.bf16.gmra.mxu0 %vm453_vm1, %v941_v50  ;;  %v2084_v50 = vsel %vm932_vm3, %v2081_v28, %v2083_v42 }
  0xa2   : > { %1081 = vmatprep.mubr.bf16.mxu0 %v6189_v4 }
  0xa3   : > { %4120 = vmatmul.mubr.msk.bf16.gmra.mxu1 %vm453_vm1, %v4477_v52 }
  0xa4   : > { %1429 = vmatprep.mubr.bf16.mxu1 %v6189_v4 }
  0xa9   : > { %4093 = vmatmul.mubr.msk.bf16.gmra.mxu0 %vm453_vm1, %v943_v54  ;;  %v1652_v54 = vor.u32 %v1650_v45, %v1648_v39 }
  0xaa   : > { %1091 = vmatprep.mubr.bf16.mxu0 %v6189_v4 }
  0xab   : > { %4121 = vmatmul.mubr.msk.bf16.gmra.mxu1 %vm453_vm1, %v4479_v56  ;;  %v4498_v56 = vld [vmem:[%s4798_s16 + $0x24] sm:$0xff]   ;;  %v1657_v63 = vsel %vm343_vm2, %v1652_v54, %v1656_v55 }
  0xac   : > { %1439 = vmatprep.mubr.bf16.mxu1 %v6189_v4  ;;  %v1662_v1 = vshll.u32 %v4498_v56, 16  ;;  %v1666_v23 = vshrl.u32 %v4498_v56, 16 }
  0xae   : > { %v1664_v12 = vrot.slane %v1662_v1, 1 }
  0xb1   : > { %4094 = vmatmul.mubr.msk.bf16.gmra.mxu0 %vm453_vm1, %v945_v58 }
  0xb2   : > { %1101 = vmatprep.mubr.bf16.mxu0 %v6189_v4 }
  0xb3   : > { %4122 = vmatmul.mubr.msk.bf16.gmra.mxu1 %vm453_vm1, %v4481_v60 }
  0xb4   : > { %1449 = vmatprep.mubr.bf16.mxu1 %v6189_v4 }
  0xb9   : > { %4095 = vmatmul.mubr.msk.bf16.gmra.mxu0 %vm453_vm1, %v947_v62 }
  0xba   : > { %1111 = vmatprep.mubr.bf16.mxu0 %v6189_v4 }
  0xbb   : > { %4123 = vmatmul.mubr.msk.bf16.gmra.mxu1 %vm453_vm1, %v4483_v0  ;;  %v1658_v0 = vshrl.u32 %v4496_v40, 16 }
  0xbc   : > { %1459 = vmatprep.mubr.bf16.mxu1 %v6189_v4 }
  0xc1   : > { %4096 = vmatmul.mubr.msk.bf16.gmra.mxu0 %vm453_vm1, %v949_v2 }
  0xc2   : > { %1121 = vmatprep.mubr.bf16.mxu0 %v6189_v4 }
  0xc3   : > { %4124 = vmatmul.mubr.msk.bf16.gmra.mxu1 %vm453_vm1, %v4485_v5 }
  0xc4   : > { %1469 = vmatprep.mubr.bf16.mxu1 %v6189_v4 }
  0xc9   : > { %4097 = vmatmul.mubr.msk.bf16.gmra.mxu0 %vm453_vm1, %v951_v9 }
  0xca   : > { %1131 = vmatprep.mubr.bf16.mxu0 %v6189_v4 }
  0xcb   : > { %4125 = vmatmul.mubr.msk.bf16.gmra.mxu1 %vm453_vm1, %v4487_v11  ;;  %v1660_v11 = vor.u32 %v1658_v0, %v1656_v55 }
  0xcc   : > { %1479 = vmatprep.mubr.bf16.mxu1 %v6189_v4 }
  0xcd   : > { %v1665_v22 = vsel %vm343_vm2, %v1660_v11, %v1664_v12 }
  0xd1   : > { %4098 = vmatmul.mubr.msk.bf16.gmra.mxu0 %vm453_vm1, %v953_v13  ;;  %v4500_v13 = vld [vmem:[%s4798_s16 + $0x2c] sm:$0xff]  }
  0xd2   : > { %1141 = vmatprep.mubr.bf16.mxu0 %v6189_v4  ;;  %v1670_v24 = vshll.u32 %v4500_v13, 16  ;;  %v1674_v45 = vshrl.u32 %v4500_v13, 16  ;;  %v4507_v13 = vld [vmem:[%s4798_s16 + $0x44] sm:$0xff]  }
  0xd3   : > { %4126 = vmatmul.mubr.msk.bf16.gmra.mxu1 %vm453_vm1, %v4489_v15 }
  0xd4   : > { %1489 = vmatprep.mubr.bf16.mxu1 %v6189_v4  ;;  %v1672_v34 = vrot.slane %v1670_v24, 1 }
  0xd6   : > { %v1676_v56 = vor.u32 %v1674_v45, %v1672_v34 }
  0xd9   : > { %4099 = vmatmul.mubr.msk.bf16.gmra.mxu0 %vm453_vm1, %v955_v17  ;;  %v2087_v17 = vrot.slane %v4501_v7, 1 }
  0xda   : > { %1151 = vmatprep.mubr.bf16.mxu0 %v6189_v4 }
  0xdb   : > { %4127 = vmatmul.mubr.msk.bf16.gmra.mxu1 %vm453_vm1, %v4491_v21  ;;  %v2088_v28 = vsel %vm932_vm3, %v2085_v59, %v2087_v17 }
  0xdc   : > { %2188 = vmatprep.mubr.bf16.mxu1 %v6189_v4 }
  0xe1   : > { %4100 = vmatmul.mubr.msk.bf16.gmra.mxu0 %vm453_vm1, %v957_v29  ;;  %v4503_v29 = vld [vmem:[%s4798_s16 + $0x34] sm:$0xff]  }
  0xe2   : > { %1821 = vmatprep.mubr.bf16.mxu0 %v6189_v4  ;;  %v723_v37 = vpop.f32.mrf.mxu1  ;;  %v2089_v40 = vrot.slane %v4503_v29, 1 }
  0xe3   : > { %4172 = vmatmul.mubr.msk.bf16.vlgmr.msra.gmra.mxu1 %vm453_vm1, %v2082_v33  ;;  %v1668_v33 = vor.u32 %v1666_v23, %v1664_v12 }
  0xe4   : > { %v725_v41 = vpop.f32.mrf.mxu1  ;;  %2198 = vmatprep.mubr.bf16.mxu1 %v6189_v4  ;;  %2951 = vmatpush1.bf16.msra.mxu1 %v2931_v35  ;;  %v4502_v35 = vld [vmem:[%s4798_s16 + $0x34] sm:$0xff]  }
  0xe5   : > { %v1678_v46 = vshll.u32 %v4502_v35, 16 }
  0xe6   : > { %v727_v44 = vpop.f32.mrf.mxu1 }
  0xe8   : > { %v729_v49 = vpop.f32.mrf.mxu1 }
  0xe9   : > { %v531_v52 = vpop.f32.mrf.mxu0  ;;  %4144 = vmatmul.mubr.msk.bf16.vlgmr.msra.gmra.mxu0 %vm453_vm1, %v1649_v43 }
  0xea   : > { %v5010_v53 = vadd.f32 %v723_v37, %v531_v52  ;;  %2509 = vmatpush1.bf16.msra.mxu0 %v2489_v47  ;;  %1831 = vmatprep.mubr.bf16.mxu0 %v6189_v4 }
  0xeb   : > { %v533_v57 = vpop.f32.mrf.mxu0  ;;  %v733_v36 = vpop.f32.mrf.mxu1  ;;  %4173 = vmatmul.mubr.msk.bf16.gmra.mxu1 %vm453_vm1, %v2084_v50  ;;  %4254 = vmatprep.subr.msk.bf16.mxu0 %vm490_vm0, %v3260_v48  ;;  %v2090_v50 = vsel %vm932_vm3, %v2087_v17, %v2089_v40 }
  0xec   : > { %v5016_v58 = vadd.f32 %v725_v41, %v533_v57  ;;  %2208 = vmatprep.mubr.bf16.mxu1 %v6189_v4  ;;  %v1680_v57 = vrot.slane %v1678_v46, 1 }
  0xed   : > { %v535_v60 = vpop.f32.mrf.mxu0  ;;  %v735_v61 = vpop.f32.mrf.mxu1 }
  0xee   : > { %v5019_v62 = vadd.f32 %v727_v44, %v535_v60  ;;  %v1673_v44 = vsel %vm343_vm2, %v1668_v33, %v1672_v34 }
  0xef   : > { %v537_v2 = vpop.f32.mrf.mxu0  ;;  %v737_v3 = vpop.f32.mrf.mxu1 }
  0xf0   : > { %v5022_v5 = vadd.f32 %v729_v49, %v537_v2 }
  0xf1   : > { %v541_v8 = vpop.f32.mrf.mxu0  ;;  %4145 = vmatmul.mubr.msk.bf16.gmra.mxu0 %vm453_vm1, %v1657_v63  ;;  %v739_v9 = vpop.f32.mrf.mxu1  ;;  %v2091_v63 = vrot.slane %v4505_v51, 1 }
  0xf2   : > { %v5027_v10 = vadd.f32 %v733_v36, %v541_v8  ;;  %1841 = vmatprep.mubr.bf16.mxu0 %v6189_v4  ;;  %v4504_v36 = vld [vmem:[%s4798_s16 + $0x3c] sm:$0xff]  }
  0xf3   : > { %v543_v14 = vpop.f32.mrf.mxu0  ;;  %v743_v15 = vpop.f32.mrf.mxu1  ;;  %4174 = vmatmul.mubr.msk.bf16.gmra.mxu1 %vm453_vm1, %v2086_v6  ;;  %v1682_v6 = vshrl.u32 %v4502_v35, 16  ;;  %v1686_v7 = vshll.u32 %v4504_v36, 16  ;;  %v2092_v12 = vsel %vm932_vm3, %v2089_v40, %v2091_v63  ;;  %v1690_v33 = vshrl.u32 %v4504_v36, 16 }
  0xf4   : > { %v5032_v16 = vadd.f32 %v735_v61, %v543_v14  ;;  %2218 = vmatprep.mubr.bf16.mxu1 %v6189_v4 }
  0xf5   : > { %v545_v19 = vpop.f32.mrf.mxu0  ;;  %v745_v20 = vpop.f32.mrf.mxu1 }
  0xf6   : > { %v5035_v21 = vadd.f32 %v737_v3, %v545_v19  ;;  %v1681_v3 = vsel %vm343_vm2, %v1676_v56, %v1680_v57  ;;  %v1684_v19 = vor.u32 %v1682_v6, %v1680_v57 }
  0xf7   : > { %v547_v25 = vpop.f32.mrf.mxu0  ;;  %v747_v26 = vpop.f32.mrf.mxu1 }
  0xf8   : > { %v5038_v27 = vadd.f32 %v739_v9, %v547_v25 }
  0xf9   : > { %v551_v30 = vpop.f32.mrf.mxu0  ;;  %4146 = vmatmul.mubr.msk.bf16.gmra.mxu0 %vm453_vm1, %v1665_v22  ;;  %v749_v31 = vpop.f32.mrf.mxu1  ;;  %v4506_v22 = vld [vmem:[%s4798_s16 + $0x44] sm:$0xff]  }
  0xfa   : > { %v5043_v32 = vadd.f32 %v743_v15, %v551_v30  ;;  %1851 = vmatprep.mubr.bf16.mxu0 %v6189_v4  ;;  %v1694_v34 = vshll.u32 %v4506_v22, 16 }
  0xfb   : > { %v553_v37 = vpop.f32.mrf.mxu0  ;;  %v753_v38 = vpop.f32.mrf.mxu1  ;;  %4175 = vmatmul.mubr.msk.bf16.gmra.mxu1 %vm453_vm1, %v2088_v28 }
  0xfc   : > { %v5048_v39 = vadd.f32 %v745_v20, %v553_v37  ;;  %2228 = vmatprep.mubr.bf16.mxu1 %v6189_v4  ;;  %v1688_v20 = vrot.slane %v1686_v7, 1  ;;  %v4511_v7 = vld [vmem:[%s4798_s16 + $0x54] sm:$0xff]  }
  0xfd   : > { %v555_v41 = vpop.f32.mrf.mxu0  ;;  %v755_v42 = vpop.f32.mrf.mxu1 }
  0xfe   : > { %v5051_v43 = vadd.f32 %v747_v26, %v555_v41  ;;  %v2093_v26 = vrot.slane %v4507_v13, 1  ;;  %v4509_v41 = vld [vmem:[%s4798_s16 + $0x4c] sm:$0xff]   ;;  %v1692_v46 = vor.u32 %v1690_v33, %v1688_v20 }
  0xff   : > { %v557_v47 = vpop.f32.mrf.mxu0  ;;  %v757_v48 = vpop.f32.mrf.mxu1 }
 0x100   : > { %v5054_v49 = vadd.f32 %v749_v31, %v557_v47  ;;  %v1689_v31 = vsel %vm343_vm2, %v1684_v19, %v1688_v20  ;;  %v2094_v40 = vsel %vm932_vm3, %v2091_v63, %v2093_v26  ;;  %v1696_v47 = vrot.slane %v1694_v34, 1 }
 0x101   : > { %v561_v52 = vpop.f32.mrf.mxu0  ;;  %4147 = vmatmul.mubr.msk.bf16.gmra.mxu0 %vm453_vm1, %v1673_v44  ;;  %v759_v54 = vpop.f32.mrf.mxu1 }
 0x102   : > { %v5059_v55 = vadd.f32 %v753_v38, %v561_v52  ;;  %1861 = vmatprep.mubr.bf16.mxu0 %v6189_v4 }
 0x103   : > { %v563_v59 = vpop.f32.mrf.mxu0  ;;  %v763_v60 = vpop.f32.mrf.mxu1  ;;  %4176 = vmatmul.mubr.msk.bf16.gmra.mxu1 %vm453_vm1, %v2090_v50 }
 0x104   : > { %v5064_v61 = vadd.f32 %v755_v42, %v563_v59  ;;  %2238 = vmatprep.mubr.bf16.mxu1 %v6189_v4  ;;  %v1697_v59 = vsel %vm343_vm2, %v1692_v46, %v1696_v47 }
 0x105   : > { %v565_v0 = vpop.f32.mrf.mxu0  ;;  %v765_v1 = vpop.f32.mrf.mxu1 }
 0x106   : > { %v5067_v2 = vadd.f32 %v757_v48, %v565_v0  ;;  %v4508_v48 = vld [vmem:[%s4798_s16 + $0x4c] sm:$0xff]  }
 0x107   : > { %v567_v8 = vpop.f32.mrf.mxu0  ;;  %v767_v9 = vpop.f32.mrf.mxu1  ;;  %v1702_v63 = vshll.u32 %v4508_v48, 16 }
 0x108   : > { %v5070_v11 = vadd.f32 %v759_v54, %v567_v8  ;;  %v2095_v54 = vrot.slane %v4509_v41, 1  ;;  %v4513_v41 = vld [vmem:[%s4798_s16 + $0x5c] sm:$0xff]  }
 0x109   : > { %v571_v14 = vpop.f32.mrf.mxu0  ;;  %4148 = vmatmul.mubr.msk.bf16.gmra.mxu0 %vm453_vm1, %v1681_v3  ;;  %v769_v15 = vpop.f32.mrf.mxu1 }
 0x10a   : > { %v5075_v17 = vadd.f32 %v763_v60, %v571_v14  ;;  %1871 = vmatprep.mubr.bf16.mxu0 %v6189_v4  ;;  %v1698_v60 = vshrl.u32 %v4506_v22, 16  ;;  %v2096_v6 = vsel %vm932_vm3, %v2093_v26, %v2095_v54  ;;  %v1704_v14 = vrot.slane %v1702_v63, 1 }
 0x10b   : > { %v573_v23 = vpop.f32.mrf.mxu0  ;;  %v773_v24 = vpop.f32.mrf.mxu1  ;;  %4177 = vmatmul.mubr.msk.bf16.gmra.mxu1 %vm453_vm1, %v2092_v12 }
 0x10c   : > { %v5080_v25 = vadd.f32 %v765_v1, %v573_v23  ;;  %2248 = vmatprep.mubr.bf16.mxu1 %v6189_v4  ;;  %v1700_v13 = vor.u32 %v1698_v60, %v1696_v47  ;;  %v2097_v23 = vrot.slane %v4511_v7, 1 }
 0x10d   : > { %v575_v28 = vpop.f32.mrf.mxu0  ;;  %v775_v29 = vpop.f32.mrf.mxu1 }
 0x10e   : > { %v5083_v30 = vadd.f32 %v767_v9, %v575_v28 }
 0x10f   : > { %v577_v35 = vpop.f32.mrf.mxu0  ;;  %v777_v37 = vpop.f32.mrf.mxu1 }
 0x110   : > { %v5086_v38 = vadd.f32 %v769_v15, %v577_v35  ;;  %v4510_v15 = vld [vmem:[%s4798_s16 + $0x54] sm:$0xff]  }
 0x111   : > { %v581_v42 = vpop.f32.mrf.mxu0  ;;  %4149 = vmatmul.mubr.msk.bf16.gmra.mxu0 %vm453_vm1, %v1689_v31  ;;  %v779_v44 = vpop.f32.mrf.mxu1  ;;  %v1706_v31 = vshrl.u32 %v4508_v48, 16  ;;  %v1710_v33 = vshll.u32 %v4510_v15, 16 }
 0x112   : > { %v5091_v45 = vadd.f32 %v773_v24, %v581_v42  ;;  %1881 = vmatprep.mubr.bf16.mxu0 %v6189_v4 }
 0x113   : > { %v583_v50 = vpop.f32.mrf.mxu0  ;;  %v783_v51 = vpop.f32.mrf.mxu1  ;;  %4178 = vmatmul.mubr.msk.bf16.gmra.mxu1 %vm453_vm1, %v2094_v40  ;;  %v2098_v40 = vsel %vm932_vm3, %v2095_v54, %v2097_v23  ;;  %v1708_v47 = vor.u32 %v1706_v31, %v1704_v14  ;;  %v2099_v54 = vrot.slane %v4513_v41, 1 }
 0x114   : > { %v5096_v52 = vadd.f32 %v775_v29, %v583_v50  ;;  %2258 = vmatprep.mubr.bf16.mxu1 %v6189_v4  ;;  %v1705_v29 = vsel %vm343_vm2, %v1700_v13, %v1704_v14  ;;  %v1712_v50 = vrot.slane %v1710_v33, 1  ;;  %v4515_v14 = vld [vmem:[%s4798_s16 + $0x64] sm:$0xff]  }
 0x115   : > { %v585_v56 = vpop.f32.mrf.mxu0  ;;  %v785_v57 = vpop.f32.mrf.mxu1  ;;  %v2100_v13 = vsel %vm932_vm3, %v2097_v23, %v2099_v54  ;;  %v2101_v23 = vrot.slane %v4515_v14, 1 }
 0x116   : > { %v5099_v36 = vadd.f32 %v777_v37, %v585_v56 }
 0x117   : > { %v587_v0 = vpop.f32.mrf.mxu0  ;;  %v787_v1 = vpop.f32.mrf.mxu1 }
 0x118   : > { %v5102_v3 = vadd.f32 %v779_v44, %v587_v0  ;;  %v1713_v0 = vsel %vm343_vm2, %v1708_v47, %v1712_v50 }
 0x119   : > { %v591_v8 = vpop.f32.mrf.mxu0  ;;  %4150 = vmatmul.mubr.msk.bf16.gmra.mxu0 %vm453_vm1, %v1697_v59  ;;  %v789_v9 = vpop.f32.mrf.mxu1 }
 0x11a   : > { %v5107_v12 = vadd.f32 %v783_v51, %v591_v8  ;;  %1891 = vmatprep.mubr.bf16.mxu0 %v6189_v4  ;;  %v4512_v51 = vld [vmem:[%s4798_s16 + $0x5c] sm:$0xff]  }
 0x11b   : > { %v593_v19 = vpop.f32.mrf.mxu0  ;;  %v793_v20 = vpop.f32.mrf.mxu1  ;;  %4179 = vmatmul.mubr.msk.bf16.gmra.mxu1 %vm453_vm1, %v2096_v6  ;;  %v1718_v6 = vshll.u32 %v4512_v51, 16 }
 0x11c   : > { %v5112_v22 = vadd.f32 %v785_v57, %v593_v19  ;;  %2268 = vmatprep.mubr.bf16.mxu1 %v6189_v4 }
 0x11d   : > { %v595_v24 = vpop.f32.mrf.mxu0  ;;  %v795_v26 = vpop.f32.mrf.mxu1 }
 0x11e   : > { %v5115_v28 = vadd.f32 %v787_v1, %v595_v24  ;;  %v1714_v1 = vshrl.u32 %v4510_v15, 16  ;;  %v4514_v15 = vld [vmem:[%s4798_s16 + $0x64] sm:$0xff]  }
 0x11f   : > { %v597_v34 = vpop.f32.mrf.mxu0  ;;  %v797_v35 = vpop.f32.mrf.mxu1  ;;  %v1726_v47 = vshll.u32 %v4514_v15, 16 }
 0x120   : > { %v5118_v37 = vadd.f32 %v789_v9, %v597_v34 }
 0x121   : > { %v601_v42 = vpop.f32.mrf.mxu0  ;;  %4151 = vmatmul.mubr.msk.bf16.gmra.mxu0 %vm453_vm1, %v1705_v29  ;;  %v799_v44 = vpop.f32.mrf.mxu1  ;;  %v1720_v29 = vrot.slane %v1718_v6, 1 }
 0x122   : > { %v5123_v46 = vadd.f32 %v793_v20, %v601_v42  ;;  %1901 = vmatprep.mubr.bf16.mxu0 %v6189_v4 }
 0x123   : > { %v603_v48 = vpop.f32.mrf.mxu0  ;;  %v803_v56 = vpop.f32.mrf.mxu1  ;;  %4180 = vmatmul.mubr.msk.bf16.gmra.mxu1 %vm453_vm1, %v2098_v40 }
 0x124   : > { %v5128_v57 = vadd.f32 %v795_v26, %v603_v48  ;;  %2278 = vmatprep.mubr.bf16.mxu1 %v6189_v4  ;;  %v1716_v26 = vor.u32 %v1714_v1, %v1712_v50 }
 0x125   : > { %v605_v59 = vpop.f32.mrf.mxu0  ;;  %v805_v60 = vpop.f32.mrf.mxu1 }
 0x126   : > { %v5131_v63 = vadd.f32 %v797_v35, %v605_v59  ;;  %v1721_v42 = vsel %vm343_vm2, %v1716_v26, %v1720_v29 }
 0x127   : > { %v607_v7 = vpop.f32.mrf.mxu0  ;;  %v807_v8 = vpop.f32.mrf.mxu1 }
 0x128   : > { %v5134_v9 = vadd.f32 %v799_v44, %v607_v7  ;;  %v1722_v44 = vshrl.u32 %v4512_v51, 16  ;;  %v1728_v51 = vrot.slane %v1726_v47, 1 }
 0x129   : > { %v611_v19 = vpop.f32.mrf.mxu0  ;;  %4152 = vmatmul.mubr.msk.bf16.gmra.mxu0 %vm453_vm1, %v1713_v0  ;;  %v809_v20 = vpop.f32.mrf.mxu1  ;;  %v4519_v0 = vld [vmem:[%s4798_s16 + $0x18] sm:$0xff]  }
 0x12a   : > { %v5139_v24 = vadd.f32 %v803_v56, %v611_v19  ;;  %1911 = vmatprep.mubr.bf16.mxu0 %v6189_v4  ;;  %v4517_v56 = vld [vmem:[%s4798_s16 + $0x6c] ss:$0 sps:$4 sm:$0x11]  }
 0x12b   : > { %v613_v31 = vpop.f32.mrf.mxu0  ;;  %v813_v33 = vpop.f32.mrf.mxu1  ;;  %4181 = vmatmul.mubr.msk.bf16.gmra.mxu1 %vm453_vm1, %v2100_v13  ;;  %v4516_v13 = vld [vmem:[%s4798_s16 + $0x6c] ss:$0 sps:$4 sm:$0x11]  }
 0x12c   : > { %v5144_v34 = vadd.f32 %v805_v60, %v613_v31  ;;  %2288 = vmatprep.mubr.bf16.mxu1 %v6189_v4  ;;  %v2102_v60 = vsel %vm932_vm3, %v2099_v54, %v2101_v23  ;;  %v4520_v54 = vld [vmem:[%s4798_s16 + $0x20] sm:$0xff]   ;;  %v2788_v31 = vshll.u32 %v4519_v0, 16 }
 0x12d   : > { %v615_v35 = vpop.f32.mrf.mxu0  ;;  %v815_v40 = vpop.f32.mrf.mxu1 }
 0x12e   : > { %v5147_v41 = vadd.f32 %v807_v8, %v615_v35  ;;  %v1724_v8 = vor.u32 %v1722_v44, %v1720_v29  ;;  %v1730_v29 = vshrl.u32 %v4514_v15, 16  ;;  %v1734_v44 = vshll.u32 %v4516_v13, 16 }
 0x12f   : > { %v617_v50 = vpop.f32.mrf.mxu0  ;;  %v817_v48 = vpop.f32.mrf.mxu1 }
 0x130   : > { %v5151_v59 = vadd.f32 %v809_v20, %v617_v50  ;;  %v2103_v20 = vrot.slane %v4517_v56, 1  ;;  %v1729_v50 = vsel %vm343_vm2, %v1724_v8, %v1728_v51  ;;  %v2790_v56 = vrot.slane %v2788_v31, 1 }
 0x131   : > { %v621_v1 = vpop.f32.mrf.mxu0  ;;  %4153 = vmatmul.mubr.msk.bf16.gmra.mxu0 %vm453_vm1, %v1721_v42  ;;  %v819_v6 = vpop.f32.mrf.mxu1  ;;  %v1732_v15 = vor.u32 %v1730_v29, %v1728_v51  ;;  %v1736_v8 = vrot.slane %v1734_v44, 1 }
 0x132   : > { %v5156_v7 = vadd.f32 %v813_v33, %v621_v1  ;;  %1921 = vmatprep.mubr.bf16.mxu0 %v6189_v4 }
 0x133   : > { %v623_v14 = vpop.f32.mrf.mxu0  ;;  %v823_v19 = vpop.f32.mrf.mxu1  ;;  %4182 = vmatmul.mubr.msk.bf16.gmra.mxu1 %vm453_vm1, %v2102_v60 }
 0x134   : > { %6193 = vst [vmem:[#allocation5_spill] sm:$0xff] %v5156_v7  ;;  %v5161_v26 = vadd.f32 %v815_v40, %v623_v14  ;;  %2298 = vmatprep.mubr.bf16.mxu1 %v6189_v4  ;;  %v2104_v7 = vsel %vm932_vm3, %v2101_v23, %v2103_v20  ;;  %v2786_v40 = vshrl.u32 %v4519_v0, 16  ;;  %v2793_v14 = vshll.u32 %v4520_v54, 16  ;;  %v4522_v20 = vld [vmem:[%s4798_s16 + $0x28] sm:$0xff]  }
 0x135   : > { %v625_v35 = vpop.f32.mrf.mxu0  ;;  %v825_v42 = vpop.f32.mrf.mxu1  ;;  %v2801_v44 = vshll.u32 %v4522_v20, 16 }
 0x136   : > { %6194 = vst [vmem:[#allocation6_spill] sm:$0xff] %v5161_v26  ;;  %v5165_v33 = vadd.f32 %v817_v48, %v625_v35  ;;  %v6196_v35 = vmov 0   ;;  %v2791_v0 = vor.u32 %v2790_v56, %v2786_v40 }
 0x137   : > { %v627_v47 = vpop.f32.mrf.mxu0  ;;  %v827_v1 = vpop.f32.mrf.mxu1 }
 0x138   : > { %6195 = vst [vmem:[#allocation7_spill] sm:$0xff] %v5165_v33  ;;  %v5169_v60 = vadd.f32 %v819_v6, %v627_v47  ;;  %v2795_v6 = vrot.slane %v2793_v14, 1 }
 0x139   : > { %v631_v4 = vpop.f32.mrf.mxu0  ;;  %4154 = vmatmul.mubr.msk.bf16.gmra.mxu0 %vm453_vm1, %v1729_v50  ;;  %v829_v26 = vpop.f32.mrf.mxu1 }
 0x13a   : > { %v5172_v48 = vadd.f32 %v823_v19, %v631_v4  ;;  %1931 = vmatprep.mubr.bf16.mxu0 %v6196_v35  ;;  %v1737_v4 = vsel %vm343_vm2, %v1732_v15, %v1736_v8  ;;  %v4524_v15 = vld [vmem:[%s4798_s16 + $0x30] sm:$0xff]   ;;  %v2803_v8 = vrot.slane %v2801_v44, 1 }
 0x13b   : > { %v633_v13 = vpop.f32.mrf.mxu0  ;;  %v833_v33 = vpop.f32.mrf.mxu1  ;;  %4183 = vmatmul.mubr.msk.bf16.gmra.mxu1 %vm453_vm1, %v2104_v7  ;;  %v2796_v7 = vsel %vm343_vm2, %v2791_v0, %v2795_v6 }
 0x13c   : > { %v5176_v23 = vadd.f32 %v825_v42, %v633_v13  ;;  %2968 = vmatprep.mubr.bf16.mxu1 %v6196_v35  ;;  %v2797_v42 = vshrl.u32 %v4520_v54, 16 }
 0x13d   : > { %v635_v31 = vpop.f32.mrf.mxu0  ;;  %v835_v50 = vpop.f32.mrf.mxu1 }
 0x13e   : > { %v5180_v47 = vadd.f32 %v827_v1, %v635_v31  ;;  %v2799_v54 = vor.u32 %v2797_v42, %v2795_v6  ;;  %v4518_v31 = vld [vmem:[%s4798_s16 + $0x18] sm:$0xff]  }
 0x13f   : > { %v637_v51 = vpop.f32.mrf.mxu0  ;;  %v837_v19 = vpop.f32.mrf.mxu1 }
 0x140   : > { %6197 = vst [vmem:[#allocation8_spill] sm:$0xff] %v5180_v47  ;;  %v5183_v29 = vadd.f32 %v829_v26, %v637_v51  ;;  %v2809_v47 = vshll.u32 %v4524_v15, 16 }
 0x141   : > { %v641_v13 = vpop.f32.mrf.mxu0  ;;  %4155 = vmatmul.mubr.msk.bf16.gmra.mxu0 %vm453_vm1, %v1737_v4  ;;  %v839_v40 = vpop.f32.mrf.mxu1 }
 0x142   : > { %6198 = vst [vmem:[#allocation9_spill] sm:$0xff] %v5183_v29  ;;  %v5187_v56 = vadd.f32 %v833_v33, %v641_v13  ;;  %2526 = vmatprep.mubr.bf16.mxu0 %v6196_v35  ;;  %v3298_v13 = vsel %vm490_vm0, %v5000_v18, 0  ;;  %v2805_v29 = vshrl.u32 %v4522_v20, 16  ;;  %v2811_v44 = vrot.slane %v2809_v47, 1 }
 0x143   : > { %v643_v1 = vpop.f32.mrf.mxu0  ;;  %v1381_v14 = vpop.f32.mrf.mxu1  ;;  %4227 = vmatmul.mubr.msk.bf16.vlgmr.msra.gmra.mxu1 %vm453_vm1, %v2796_v7 }
 0x144   : > { %6199 = vst [vmem:[#allocation10_spill] sm:$0xff] %v5187_v56  ;;  %v5192_v26 = vadd.f32 %v835_v50, %v643_v1  ;;  %2978 = vmatprep.mubr.bf16.mxu1 %v6196_v35  ;;  %v2804_v50 = vsel %vm343_vm2, %v2799_v54, %v2803_v8  ;;  %v2807_v20 = vor.u32 %v2805_v29, %v2803_v8  ;;  %v4526_v54 = vld [vmem:[%s4798_s16 + $0x38] sm:$0xff]  }
 0x145   : > { %v645_v0 = vpop.f32.mrf.mxu0  ;;  %v1383_v51 = vpop.f32.mrf.mxu1  ;;  %v2817_v8 = vshll.u32 %v4526_v54, 16 }
 0x146   : > { %v5196_v4 = vadd.f32 %v837_v19, %v645_v0  ;;  %v2812_v29 = vsel %vm343_vm2, %v2807_v20, %v2811_v44 }
 0x147   : > { %v647_v33 = vpop.f32.mrf.mxu0  ;;  %v1385_v56 = vpop.f32.mrf.mxu1 }
 0x148   : > { %6200 = vst [vmem:[#allocation11_spill] sm:$0xff] %v5196_v4  ;;  %v5200_v7 = vadd.f32 %v839_v40, %v647_v33  ;;  %v4521_v33 = vld [vmem:[%s4798_s16 + $0x20] sm:$0xff]  }
 0x149   : > { %v1043_v1 = vpop.f32.mrf.mxu0  ;;  %4199 = vmatmul.mubr.msk.bf16.vlgmr.msra.gmra.mxu0 %vm453_vm1, %v4518_v31  ;;  %v1387_v6 = vpop.f32.mrf.mxu1 }
 0x14a   : > { %6201 = vst [vmem:[#allocation12_spill] sm:$0xff] %v5200_v7  ;;  %v1162_v19 = vadd.f32 %v1043_v1, %v5010_v53  ;;  %3318 = vmatpush1.bf16.msra.mxu0 %v3298_v13  ;;  %2536 = vmatprep.mubr.bf16.mxu0 %v6196_v35 }
 0x14b   : > { %v1045_v42 = vpop.f32.mrf.mxu0  ;;  %v1391_v18 = vpop.f32.mrf.mxu1  ;;  %4228 = vmatmul.mubr.msk.bf16.gmra.mxu1 %vm453_vm1, %v2804_v50 }
 0x14c   : > { %v1163_v40 = vadd.f32 %v1045_v42, %v5016_v58  ;;  %v5208_v0 = vadd.f32 %v1381_v14, %v1162_v19  ;;  %2988 = vmatprep.mubr.bf16.mxu1 %v6196_v35  ;;  %v2813_v14 = vshrl.u32 %v4524_v15, 16 }
 0x14d   : > { %v1047_v31 = vpop.f32.mrf.mxu0  ;;  %v1393_v7 = vpop.f32.mrf.mxu1 }
 0x14e   : > { %v1164_v53 = vadd.f32 %v1047_v31, %v5019_v62  ;;  %v5214_v13 = vadd.f32 %v1383_v51, %v1163_v40  ;;  %v2815_v20 = vor.u32 %v2813_v14, %v2811_v44  ;;  %v2819_v31 = vrot.slane %v2817_v8, 1 }
 0x14f   : > { %v1049_v1 = vpop.f32.mrf.mxu0  ;;  %v1395_v4 = vpop.f32.mrf.mxu1 }
 0x150   : > { %v1165_v47 = vadd.f32 %v1049_v1, %v5022_v5  ;;  %v5218_v58 = vadd.f32 %v1385_v56, %v1164_v53  ;;  %v4528_v5 = vld [vmem:[%s4798_s16 + $0x40] sm:$0xff]   ;;  %v4523_v53 = vld [vmem:[%s4798_s16 + $0x28] sm:$0xff]  }
 0x151   : > { %v1053_v50 = vpop.f32.mrf.mxu0  ;;  %4200 = vmatmul.mubr.msk.bf16.gmra.mxu0 %vm453_vm1, %v4521_v33  ;;  %v1397_v19 = vpop.f32.mrf.mxu1 }
 0x152   : > { %6202 = vst [vmem:[#allocation13_spill] sm:$0xff] %v5218_v58  ;;  %v1166_v62 = vadd.f32 %v1053_v50, %v5027_v10  ;;  %v5222_v51 = vadd.f32 %v1387_v6, %v1165_v47  ;;  %2546 = vmatprep.mubr.bf16.mxu0 %v6196_v35 }
 0x153   : > { %v1055_v42 = vpop.f32.mrf.mxu0  ;;  %v1401_v40 = vpop.f32.mrf.mxu1  ;;  %4229 = vmatmul.mubr.msk.bf16.gmra.mxu1 %vm453_vm1, %v2812_v29  ;;  %v2825_v29 = vshll.u32 %v4528_v5, 16 }
 0x154   : > { %6203 = vst [vmem:[#allocation14_spill] sm:$0xff] %v5222_v51  ;;  %v1167_v56 = vadd.f32 %v1055_v42, %v5032_v16  ;;  %v5228_v15 = vadd.f32 %v1391_v18, %v1166_v62  ;;  %2998 = vmatprep.mubr.bf16.mxu1 %v6196_v35  ;;  %v2821_v51 = vshrl.u32 %v4526_v54, 16  ;;  %v2820_v18 = vsel %vm343_vm2, %v2815_v20, %v2819_v31 }
 0x155   : > { %v1057_v33 = vpop.f32.mrf.mxu0  ;;  %v1403_v10 = vpop.f32.mrf.mxu1 }
 0x156   : > { %v1168_v6 = vadd.f32 %v1057_v33, %v5035_v21  ;;  %v5233_v1 = vadd.f32 %v1393_v7, %v1167_v56  ;;  %v4530_v56 = vld [vmem:[%s4798_s16 + $0x48] sm:$0xff]   ;;  %v4525_v33 = vld [vmem:[%s4798_s16 + $0x30] sm:$0xff]  }
 0x157   : > { %v1059_v47 = vpop.f32.mrf.mxu0  ;;  %v1405_v50 = vpop.f32.mrf.mxu1 }
 0x158   : > { %v1169_v58 = vadd.f32 %v1059_v47, %v5038_v27  ;;  %v5236_v16 = vadd.f32 %v1395_v4, %v1168_v6  ;;  %v2823_v27 = vor.u32 %v2821_v51, %v2819_v31  ;;  %v2827_v4 = vrot.slane %v2825_v29, 1 }
 0x159   : > { %v1063_v44 = vpop.f32.mrf.mxu0  ;;  %4201 = vmatmul.mubr.msk.bf16.gmra.mxu0 %vm453_vm1, %v4523_v53  ;;  %v1407_v14 = vpop.f32.mrf.mxu1  ;;  %v2833_v47 = vshll.u32 %v4530_v56, 16 }
 0x15a   : > { %v1170_v21 = vadd.f32 %v1063_v44, %v5043_v32  ;;  %v5241_v7 = vadd.f32 %v1397_v19, %v1169_v58  ;;  %2556 = vmatprep.mubr.bf16.mxu0 %v6196_v35  ;;  %v2828_v51 = vsel %vm343_vm2, %v2823_v27, %v2827_v4 }
 0x15b   : > { %v1065_v54 = vpop.f32.mrf.mxu0  ;;  %v1411_v8 = vpop.f32.mrf.mxu1  ;;  %4230 = vmatmul.mubr.msk.bf16.gmra.mxu1 %vm453_vm1, %v2820_v18  ;;  %v2835_v27 = vrot.slane %v2833_v47, 1 }
 0x15c   : > { %v1171_v62 = vadd.f32 %v1065_v54, %v5048_v39  ;;  %v5246_v42 = vadd.f32 %v1401_v40, %v1170_v21  ;;  %3008 = vmatprep.mubr.bf16.mxu1 %v6196_v35  ;;  %v2829_v40 = vshrl.u32 %v4528_v5, 16 }
 0x15d   : > { %v1067_v20 = vpop.f32.mrf.mxu0  ;;  %v1413_v32 = vpop.f32.mrf.mxu1 }
 0x15e   : > { %v1172_v58 = vadd.f32 %v1067_v20, %v5051_v43  ;;  %v5252_v19 = vadd.f32 %v1403_v10, %v1171_v62  ;;  %v2831_v54 = vor.u32 %v2829_v40, %v2827_v4  ;;  %v4527_v20 = vld [vmem:[%s4798_s16 + $0x38] sm:$0xff]  }
 0x15f   : > { %v1069_v53 = vpop.f32.mrf.mxu0  ;;  %v1415_v6 = vpop.f32.mrf.mxu1 }
 0x160   : > { %v1173_v31 = vadd.f32 %v1069_v53, %v5054_v49  ;;  %v5256_v39 = vadd.f32 %v1405_v50, %v1172_v58  ;;  %v4532_v49 = vld [vmem:[%s4798_s16 + $0x50] sm:$0xff]  }
 0x161   : > { %v1073_v29 = vpop.f32.mrf.mxu0  ;;  %4202 = vmatmul.mubr.msk.bf16.gmra.mxu0 %vm453_vm1, %v4525_v33  ;;  %v1417_v18 = vpop.f32.mrf.mxu1 }
 0x162   : > { %v1174_v43 = vadd.f32 %v1073_v29, %v5059_v55  ;;  %v5260_v10 = vadd.f32 %v1407_v14, %v1173_v31  ;;  %2566 = vmatprep.mubr.bf16.mxu0 %v6196_v35  ;;  %v2837_v31 = vshrl.u32 %v4530_v56, 16 }
 0x163   : > { %v1075_v44 = vpop.f32.mrf.mxu0  ;;  %v1421_v21 = vpop.f32.mrf.mxu1  ;;  %4231 = vmatmul.mubr.msk.bf16.gmra.mxu1 %vm453_vm1, %v2828_v51  ;;  %v2841_v51 = vshll.u32 %v4532_v49, 16 }
 0x164   : > { %v1175_v50 = vadd.f32 %v1075_v44, %v5064_v61  ;;  %v5266_v5 = vadd.f32 %v1411_v8, %v1174_v43  ;;  %3018 = vmatprep.mubr.bf16.mxu1 %v6196_v35  ;;  %v2836_v8 = vsel %vm343_vm2, %v2831_v54, %v2835_v27 }
 0x165   : > { %v1077_v62 = vpop.f32.mrf.mxu0  ;;  %v1423_v55 = vpop.f32.mrf.mxu1 }
 0x166   : > { %v1176_v14 = vadd.f32 %v1077_v62, %v5067_v2  ;;  %v5271_v33 = vadd.f32 %v1413_v32, %v1175_v50  ;;  %v4534_v50 = vld [vmem:[%s4798_s16 + $0x58] sm:$0xff]   ;;  %v4529_v62 = vld [vmem:[%s4798_s16 + $0x40] sm:$0xff]  }
 0x167   : > { %v1079_v58 = vpop.f32.mrf.mxu0  ;;  %v1425_v53 = vpop.f32.mrf.mxu1 }
 0x168   : > { %v1177_v29 = vadd.f32 %v1079_v58, %v5070_v11  ;;  %v5274_v61 = vadd.f32 %v1415_v6, %v1176_v14  ;;  %v2839_v11 = vor.u32 %v2837_v31, %v2835_v27  ;;  %v2843_v6 = vrot.slane %v2841_v51, 1 }
 0x169   : > { %v1083_v4 = vpop.f32.mrf.mxu0  ;;  %4203 = vmatmul.mubr.msk.bf16.gmra.mxu0 %vm453_vm1, %v4527_v20  ;;  %v1427_v40 = vpop.f32.mrf.mxu1  ;;  %v2849_v51 = vshll.u32 %v4534_v50, 16 }
 0x16a   : > { %v1178_v2 = vadd.f32 %v1083_v4, %v5075_v17  ;;  %v5279_v32 = vadd.f32 %v1417_v18, %v1177_v29  ;;  %2576 = vmatprep.mubr.bf16.mxu0 %v6196_v35  ;;  %v2844_v27 = vsel %vm343_vm2, %v2839_v11, %v2843_v6 }
 0x16b   : > { %v1085_v56 = vpop.f32.mrf.mxu0  ;;  %v1431_v47 = vpop.f32.mrf.mxu1  ;;  %4232 = vmatmul.mubr.msk.bf16.gmra.mxu1 %vm453_vm1, %v2836_v8  ;;  %v2851_v11 = vrot.slane %v2849_v51, 1 }
 0x16c   : > { %v1179_v43 = vadd.f32 %v1085_v56, %v5080_v25  ;;  %v5284_v44 = vadd.f32 %v1421_v21, %v1178_v2  ;;  %3028 = vmatprep.mubr.bf16.mxu1 %v6196_v35  ;;  %v2845_v21 = vshrl.u32 %v4532_v49, 16 }
 0x16d   : > { %v1087_v54 = vpop.f32.mrf.mxu0  ;;  %v1433_v17 = vpop.f32.mrf.mxu1 }
 0x16e   : > { %v1180_v18 = vadd.f32 %v1087_v54, %v5083_v30  ;;  %v5290_v20 = vadd.f32 %v1423_v55, %v1179_v43  ;;  %v2847_v56 = vor.u32 %v2845_v21, %v2843_v6  ;;  %v4531_v54 = vld [vmem:[%s4798_s16 + $0x48] sm:$0xff]  }
 0x16f   : > { %v1089_v14 = vpop.f32.mrf.mxu0  ;;  %v1435_v58 = vpop.f32.mrf.mxu1 }
 0x170   : > { %v1181_v31 = vadd.f32 %v1089_v14, %v5086_v38  ;;  %v5294_v25 = vadd.f32 %v1425_v53, %v1180_v18  ;;  %v4536_v38 = vld [vmem:[%s4798_s16 + $0x60] sm:$0xff]  }
 0x171   : > { %v1093_v29 = vpop.f32.mrf.mxu0  ;;  %4204 = vmatmul.mubr.msk.bf16.gmra.mxu0 %vm453_vm1, %v4529_v62  ;;  %v1437_v8 = vpop.f32.mrf.mxu1 }
 0x172   : > { %v1182_v30 = vadd.f32 %v1093_v29, %v5091_v45  ;;  %v5298_v55 = vadd.f32 %v1427_v40, %v1181_v31  ;;  %2586 = vmatprep.mubr.bf16.mxu0 %v6196_v35  ;;  %v2853_v31 = vshrl.u32 %v4534_v50, 16 }
 0x173   : > { %v1095_v4 = vpop.f32.mrf.mxu0  ;;  %v1441_v2 = vpop.f32.mrf.mxu1  ;;  %4233 = vmatmul.mubr.msk.bf16.gmra.mxu1 %vm453_vm1, %v2844_v27  ;;  %v2857_v27 = vshll.u32 %v4536_v38, 16 }
 0x174   : > { %v1183_v53 = vadd.f32 %v1095_v4, %v5096_v52  ;;  %v5304_v49 = vadd.f32 %v1431_v47, %v1182_v30  ;;  %3038 = vmatprep.mubr.bf16.mxu1 %v6196_v35  ;;  %v2852_v47 = vsel %vm343_vm2, %v2847_v56, %v2851_v11 }
 0x175   : > { %v1097_v43 = vpop.f32.mrf.mxu0  ;;  %v1443_v45 = vpop.f32.mrf.mxu1 }
 0x176   : > { %v1184_v40 = vadd.f32 %v1097_v43, %v5099_v36  ;;  %v5309_v62 = vadd.f32 %v1433_v17, %v1183_v53  ;;  %v4538_v53 = vld [vmem:[%s4798_s16 + $0x68] sm:$0xff]   ;;  %v4533_v43 = vld [vmem:[%s4798_s16 + $0x50] sm:$0xff]  }
 0x177   : > { %v1099_v18 = vpop.f32.mrf.mxu0  ;;  %v1445_v14 = vpop.f32.mrf.mxu1 }
 0x178   : > { %v1185_v29 = vadd.f32 %v1099_v18, %v5102_v3  ;;  %v5312_v52 = vadd.f32 %v1435_v58, %v1184_v40  ;;  %v2855_v3 = vor.u32 %v2853_v31, %v2851_v11  ;;  %v2859_v58 = vrot.slane %v2857_v27, 1 }
 0x179   : > { %v1103_v6 = vpop.f32.mrf.mxu0  ;;  %4205 = vmatmul.mubr.msk.bf16.gmra.mxu0 %vm453_vm1, %v4531_v54  ;;  %v1447_v21 = vpop.f32.mrf.mxu1  ;;  %v2865_v27 = vshll.u32 %v4538_v53, 16 }
 0x17a   : > { %v1186_v36 = vadd.f32 %v1103_v6, %v5107_v12  ;;  %v5317_v17 = vadd.f32 %v1437_v8, %v1185_v29  ;;  %2596 = vmatprep.mubr.bf16.mxu0 %v6196_v35  ;;  %v2860_v11 = vsel %vm343_vm2, %v2855_v3, %v2859_v58 }
 0x17b   : > { %v1105_v50 = vpop.f32.mrf.mxu0  ;;  %v1451_v51 = vpop.f32.mrf.mxu1  ;;  %4234 = vmatmul.mubr.msk.bf16.gmra.mxu1 %vm453_vm1, %v2852_v47  ;;  %v2867_v3 = vrot.slane %v2865_v27, 1 }
 0x17c   : > { %v1187_v30 = vadd.f32 %v1105_v50, %v5112_v22  ;;  %v5322_v4 = vadd.f32 %v1441_v2, %v1186_v36  ;;  %3048 = vmatprep.mubr.bf16.mxu1 %v6196_v35  ;;  %v2861_v2 = vshrl.u32 %v4536_v38, 16 }
 0x17d   : > { %v1107_v56 = vpop.f32.mrf.mxu0  ;;  %v1453_v12 = vpop.f32.mrf.mxu1 }
 0x17e   : > { %v1188_v8 = vadd.f32 %v1107_v56, %v5115_v28  ;;  %v5328_v54 = vadd.f32 %v1443_v45, %v1187_v30  ;;  %v2863_v50 = vor.u32 %v2861_v2, %v2859_v58  ;;  %v4535_v56 = vld [vmem:[%s4798_s16 + $0x58] sm:$0xff]  }
 0x17f   : > { %v1109_v40 = vpop.f32.mrf.mxu0  ;;  %v1455_v18 = vpop.f32.mrf.mxu1 }
 0x180   : > { %v1189_v31 = vadd.f32 %v1109_v40, %v5118_v37  ;;  %v5332_v22 = vadd.f32 %v1445_v14, %v1188_v8  ;;  %v4540_v37 = vld [vmem:[%s4798_s16 + $0x70] sm:$0xff]  }
 0x181   : > { %v1113_v29 = vpop.f32.mrf.mxu0  ;;  %4206 = vmatmul.mubr.msk.bf16.gmra.mxu0 %vm453_vm1, %v4533_v43  ;;  %v1457_v47 = vpop.f32.mrf.mxu1 }
 0x182   : > { %v1190_v28 = vadd.f32 %v1113_v29, %v5123_v46  ;;  %v5336_v45 = vadd.f32 %v1447_v21, %v1189_v31  ;;  %2606 = vmatprep.mubr.bf16.mxu0 %v6196_v35  ;;  %v2869_v31 = vshrl.u32 %v4538_v53, 16 }
 0x183   : > { %v1115_v6 = vpop.f32.mrf.mxu0  ;;  %v1461_v36 = vpop.f32.mrf.mxu1  ;;  %4235 = vmatmul.mubr.msk.bf16.gmra.mxu1 %vm453_vm1, %v2860_v11  ;;  %v2873_v11 = vshll.u32 %v4540_v37, 16 }
 0x184   : > { %v1191_v14 = vadd.f32 %v1115_v6, %v5128_v57  ;;  %v5342_v38 = vadd.f32 %v1451_v51, %v1190_v28  ;;  %3058 = vmatprep.mubr.bf16.mxu1 %v6196_v35  ;;  %v2868_v51 = vsel %vm343_vm2, %v2863_v50, %v2867_v3 }
 0x185   : > { %v1117_v30 = vpop.f32.mrf.mxu0  ;;  %v1463_v46 = vpop.f32.mrf.mxu1 }
 0x186   : > { %v1192_v21 = vadd.f32 %v1117_v30, %v5131_v63  ;;  %v5347_v43 = vadd.f32 %v1453_v12, %v1191_v14  ;;  %v4542_v14 = vld [vmem:[%s4798_s16 + $0x78] ss:$0 sps:$4 sm:$0x11]   ;;  %v4537_v30 = vld [vmem:[%s4798_s16 + $0x60] sm:$0xff]  }
 0x187   : > { %v1119_v8 = vpop.f32.mrf.mxu0  ;;  %v1465_v40 = vpop.f32.mrf.mxu1 }
 0x188   : > { %v1193_v29 = vadd.f32 %v1119_v8, %v5134_v9  ;;  %v5350_v57 = vadd.f32 %v1455_v18, %v1192_v21  ;;  %v2871_v9 = vor.u32 %v2869_v31, %v2867_v3  ;;  %v2875_v18 = vrot.slane %v2873_v11, 1 }
 0x189   : > { %v1123_v58 = vpop.f32.mrf.mxu0  ;;  %4207 = vmatmul.mubr.msk.bf16.gmra.mxu0 %vm453_vm1, %v4535_v56  ;;  %v5354_v2 = vpop.f32.mrf.mxu1  ;;  %v2881_v31 = vshll.u32 %v4542_v14, 16  ;;  %v4539_v14 = vld [vmem:[%s4798_s16 + $0x68] sm:$0xff]  }
 0x18a   : > { %v1194_v63 = vadd.f32 %v1123_v58, %v5139_v24  ;;  %v5357_v12 = vadd.f32 %v1457_v47, %v1193_v29  ;;  %2616 = vmatprep.mubr.bf16.mxu0 %v6196_v35  ;;  %v2876_v29 = vsel %vm343_vm2, %v2871_v9, %v2875_v18 }
 0x18b   : > { %v1125_v53 = vpop.f32.mrf.mxu0  ;;  %v1471_v27 = vpop.f32.mrf.mxu1  ;;  %4236 = vmatmul.mubr.msk.bf16.gmra.mxu1 %vm453_vm1, %v2868_v51  ;;  %v2883_v9 = vrot.slane %v2881_v31, 1 }
 0x18c   : > { %v1195_v28 = vadd.f32 %v1125_v53, %v5144_v34  ;;  %v5362_v6 = vadd.f32 %v1461_v36, %v1194_v63  ;;  %3068 = vmatprep.mubr.bf16.mxu1 %v6196_v35  ;;  %v2877_v36 = vshrl.u32 %v4540_v37, 16 }
 0x18d   : > { %v1127_v50 = vpop.f32.mrf.mxu0  ;;  %v1473_v24 = vpop.f32.mrf.mxu1 }
 0x18e   : > { %v1196_v47 = vadd.f32 %v1127_v50, %v5147_v41  ;;  %v5368_v56 = vadd.f32 %v1463_v46, %v1195_v28  ;;  %v6205_v41 = vld [vmem:[#allocation5_spill] sm:$0xff]  ;;  %v2879_v37 = vor.u32 %v2877_v36, %v2875_v18  ;;  %v4556_v18 = vld [vmem:[%s6186_s3 + $0x78] sm:$0xff]  }
 0x18f   : > { %v1129_v21 = vpop.f32.mrf.mxu0  ;;  %v1475_v8 = vpop.f32.mrf.mxu1  ;;  %4287 = vmatprep.subr.bf16.mxu1 %v4556_v18 }
 0x190   : > { %v5372_v3 = vadd.f32 %v1129_v21, %v5151_v59  ;;  %v5374_v34 = vadd.f32 %v1465_v40, %v1196_v47  ;;  %v6206_v59 = vld [vmem:[#allocation6_spill] sm:$0xff] }
 0x191   : > { %v1133_v11 = vpop.f32.mrf.mxu0  ;;  %4208 = vmatmul.mubr.msk.bf16.gmra.mxu0 %vm453_vm1, %v4537_v30  ;;  %v5377_v51 = vpop.f32.mrf.mxu1  ;;  %v6207_v30 = vld [vmem:[#allocation7_spill] sm:$0xff] }
 0x192   : > { %6204 = vst [vmem:[#allocation15_spill] sm:$0xff] %v5377_v51  ;;  %v1198_v46 = vadd.f32 %v1133_v11, %v6205_v41  ;;  %2626 = vmatprep.mubr.bf16.mxu0 %v6196_v35 }
 0x193   : > { %v1135_v58 = vpop.f32.mrf.mxu0  ;;  %v1481_v63 = vpop.f32.mrf.mxu1  ;;  %4237 = vmatmul.mubr.msk.bf16.gmra.mxu1 %vm453_vm1, %v2876_v29 }
 0x194   : > { %v1199_v53 = vadd.f32 %v1135_v58, %v6206_v59  ;;  %v5383_v40 = vadd.f32 %v1471_v27, %v1198_v46  ;;  %3078 = vmatprep.mubr.bf16.mxu1 %v6196_v35  ;;  %v2884_v27 = vsel %vm343_vm2, %v2879_v37, %v2883_v9  ;;  %v4541_v37 = vld [vmem:[%s4798_s16 + $0x70] sm:$0xff]   ;;  %v6209_v9 = vld [vmem:[#allocation8_spill] sm:$0xff] }
 0x195   : > { %v1137_v28 = vpop.f32.mrf.mxu0  ;;  %v1483_v50 = vpop.f32.mrf.mxu1 }
 0x196   : > { %v1200_v47 = vadd.f32 %v1137_v28, %v6207_v30  ;;  %v5388_v21 = vadd.f32 %v1473_v24, %v1199_v53  ;;  %v4543_v30 = vld [vmem:[%s4798_s16 + $0x18] sm:$0xfe]  }
 0x197   : > { %v1139_v11 = vpop.f32.mrf.mxu0  ;;  %v1485_v41 = vpop.f32.mrf.mxu1 }
 0x198   : > { %v5391_v51 = vadd.f32 %v1139_v11, %v5169_v60  ;;  %v5393_v29 = vadd.f32 %v1475_v8, %v1200_v47  ;;  %v4557_v60 = vld [vmem:[%s6186_s3 + $0x38] sm:$0xff]   ;;  %v4544_v47 = vld [vmem:[%s4798_s16 + $0x20] sm:$0xff]  }
 0x199   : > { %v1143_v36 = vpop.f32.mrf.mxu0  ;;  %4209 = vmatmul.mubr.msk.bf16.gmra.mxu0 %vm453_vm1, %v4539_v14  ;;  %v5400_v31 = vpop.f32.mrf.mxu1  ;;  %4288 = vmatpush3.bf16.msra.mxu1 %v4557_v60 }
 0x19a   : > { %6208 = vst [vmem:[#allocation5_spill] sm:$0xff] %v5400_v31  ;;  %v1202_v24 = vadd.f32 %v1143_v36, %v5172_v48  ;;  %2636 = vmatprep.mubr.bf16.mxu0 %v6196_v35  ;;  %v6210_v36 = vld [vmem:[#allocation9_spill] sm:$0xff] }
 0x19b   : > { %v1145_v8 = vpop.f32.mrf.mxu0  ;;  %v1491_v46 = vpop.f32.mrf.mxu1  ;;  %4238 = vmatmul.mubr.msk.bf16.gmra.mxu1 %vm453_vm1, %v2884_v27 }
 0x19c   : > { %v1203_v58 = vadd.f32 %v1145_v8, %v5176_v23  ;;  %v5409_v59 = vadd.f32 %v1481_v63, %v1202_v24  ;;  %v6213_v24 = vld [vmem:[#allocation10_spill] sm:$0xff]  ;;  %v3228_v8 = vrot.slane %v4544_v47, 1 }
 0x19d   : > { %v1147_v53 = vpop.f32.mrf.mxu0  ;;  %v1493_v48 = vpop.f32.mrf.mxu1 }
 0x19e   : > { %v1204_v28 = vadd.f32 %v1147_v53, %v6209_v9  ;;  %v5413_v14 = vadd.f32 %v1483_v50, %v1203_v58  ;;  %v3227_v50 = vrot.slane %v4543_v30, 1  ;;  %v4545_v30 = vld [vmem:[%s4798_s16 + $0x28] sm:$0xff]  }
 0x19f   : > { %v1149_v11 = vpop.f32.mrf.mxu0  ;;  %v1495_v18 = vpop.f32.mrf.mxu1 }
 0x1a0   : > { %v5418_v31 = vadd.f32 %v1149_v11, %v6210_v36  ;;  %v5420_v27 = vadd.f32 %v1485_v41, %v1204_v28  ;;  %v4558_v41 = vld [vmem:[%s6186_s3 + $0x70] sm:$0xff]  }
 0x1a1   : > { %v1153_v23 = vpop.f32.mrf.mxu0  ;;  %4210 = vmatmul.mubr.msk.bf16.gmra.mxu0 %vm453_vm1, %v4541_v37  ;;  %v5423_v63 = vpop.f32.mrf.mxu1  ;;  %v6215_v36 = vld [vmem:[#allocation11_spill] sm:$0xff]  ;;  %4289 = vmatprep.subr.bf16.mxu1 %v4558_v41 }
 0x1a2   : > { %6211 = vst [vmem:[#allocation6_spill] sm:$0xff] %v5420_v27  ;;  %6212 = vst [vmem:[#allocation7_spill] sm:$0xff] %v5423_v63  ;;  %v1206_v60 = vadd.f32 %v1153_v23, %v6213_v24  ;;  %3335 = vmatprep.mubr.bf16.mxu0 %v6196_v35  ;;  %v3229_v23 = vsel %vm932_vm3, %v3227_v50, %v3228_v8  ;;  %v6217_v24 = vld [vmem:[#allocation12_spill] sm:$0xff] }
 0x1a3   : > { %v1155_v58 = vpop.f32.mrf.mxu0  ;;  %v2190_v53 = vpop.f32.mrf.mxu1 }
 0x1a4   : > { %v1207_v9 = vadd.f32 %v1155_v58, %v5192_v26  ;;  %v5428_v11 = vadd.f32 %v1491_v46, %v1206_v60  ;;  %v4559_v26 = vld [vmem:[%s6186_s3 + $0x30] sm:$0xff]  }
 0x1a5   : > { %v1157_v37 = vpop.f32.mrf.mxu0  ;;  %v2192_v28 = vpop.f32.mrf.mxu1  ;;  %4290 = vmatpush3.bf16.msra.mxu1 %v4559_v26  ;;  %v6221_v26 = vld [vmem:[#allocation13_spill] sm:$0xff] }
 0x1a6   : > { %6214 = vst [vmem:[#allocation8_spill] sm:$0xff] %v5428_v11  ;;  %v1208_v63 = vadd.f32 %v1157_v37, %v6215_v36  ;;  %v5434_v27 = vadd.f32 %v1493_v48, %v1207_v9  ;;  %v3230_v9 = vrot.slane %v4545_v30, 1 }
 0x1a7   : > { %v1159_v46 = vpop.f32.mrf.mxu0  ;;  %v2194_v47 = vpop.f32.mrf.mxu1 }
 0x1a8   : > { %6216 = vst [vmem:[#allocation9_spill] sm:$0xff] %v5434_v27  ;;  %v5442_v60 = vadd.f32 %v1159_v46, %v6217_v24  ;;  %v5444_v58 = vadd.f32 %v1495_v18, %v1208_v63 }
 0x1a9   : > { %v1823_v37 = vpop.f32.mrf.mxu0  ;;  %4255 = vmatmul.mubr.msk.bf16.vlgmr.msra.gmra.mxu0 %vm453_vm1, %v3229_v23  ;;  %v5447_v48 = vpop.f32.mrf.mxu1  ;;  %v3231_v23 = vsel %vm932_vm3, %v3228_v8, %v3230_v9 }
 0x1aa   : > { %6218 = vst [vmem:[#allocation10_spill] sm:$0xff] %v5442_v60  ;;  %6219 = vst [vmem:[#allocation11_spill] sm:$0xff] %v5444_v58  ;;  %v1942_v50 = vadd.f32 %v1823_v37, %v5208_v0  ;;  %3345 = vmatprep.mubr.bf16.mxu0 %v6196_v35  ;;  %v6222_v37 = vld [vmem:[#allocation14_spill] sm:$0xff] }
 0x1ab   : > { %6220 = vst [vmem:[#allocation12_spill] sm:$0xff] %v5447_v48  ;;  %v1825_v41 = vpop.f32.mrf.mxu0  ;;  %v2200_v36 = vpop.f32.mrf.mxu1  ;;  %v4546_v48 = vld [vmem:[%s4798_s16 + $0x30] sm:$0xff]  }
 0x1ac   : > { %v1943_v27 = vadd.f32 %v1825_v41, %v5214_v13  ;;  %v5452_v46 = vadd.f32 %v2190_v53, %v1942_v50  ;;  %v4560_v13 = vld [vmem:[%s6186_s3 + $0x68] sm:$0xff]   ;;  %v3232_v8 = vrot.slane %v4546_v48, 1 }
 0x1ad   : > { %v1827_v18 = vpop.f32.mrf.mxu0  ;;  %v2202_v63 = vpop.f32.mrf.mxu1  ;;  %4291 = vmatprep.subr.bf16.mxu1 %v4560_v13 }
 0x1ae   : > { %v1944_v24 = vadd.f32 %v1827_v18, %v6221_v26  ;;  %v5455_v58 = vadd.f32 %v2192_v28, %v1943_v27  ;;  %v4561_v28 = vld [vmem:[%s6186_s3 + $0x28] sm:$0xff]   ;;  %v3233_v48 = vsel %vm932_vm3, %v3230_v9, %v3232_v8 }
 0x1af   : > { %v1829_v60 = vpop.f32.mrf.mxu0  ;;  %v2204_v0 = vpop.f32.mrf.mxu1  ;;  %4292 = vmatpush3.bf16.msra.mxu1 %v4561_v28 }
 0x1b0   : > { %v5460_v11 = vadd.f32 %v1829_v60, %v6222_v37  ;;  %v5462_v30 = vadd.f32 %v2194_v47, %v1944_v24  ;;  %v4547_v37 = vld [vmem:[%s4798_s16 + $0x38] sm:$0xff]  }
 0x1b1   : > { %v1833_v53 = vpop.f32.mrf.mxu0  ;;  %4256 = vmatmul.mubr.msk.bf16.gmra.mxu0 %vm453_vm1, %v3231_v23  ;;  %v5468_v50 = vpop.f32.mrf.mxu1 }
 0x1b2   : > { %6223 = vst [vmem:[#allocation13_spill] sm:$0xff] %v5462_v30  ;;  %6224 = vst [vmem:[#allocation14_spill] sm:$0xff] %v5468_v50  ;;  %v1946_v27 = vadd.f32 %v1833_v53, %v5228_v15  ;;  %3355 = vmatprep.mubr.bf16.mxu0 %v6196_v35 }
 0x1b3   : > { %v1835_v47 = vpop.f32.mrf.mxu0  ;;  %v2210_v60 = vpop.f32.mrf.mxu1 }
 0x1b4   : > { %v1947_v41 = vadd.f32 %v1835_v47, %v5233_v1  ;;  %v5476_v18 = vadd.f32 %v2200_v36, %v1946_v27 }
 0x1b5   : > { %v1837_v26 = vpop.f32.mrf.mxu0  ;;  %v2212_v24 = vpop.f32.mrf.mxu1 }
 0x1b6   : > { %v1948_v23 = vadd.f32 %v1837_v26, %v5236_v16  ;;  %v5479_v15 = vadd.f32 %v2202_v63, %v1947_v41  ;;  %v3234_v63 = vrot.slane %v4547_v37, 1 }
 0x1b7   : > { %v1839_v13 = vpop.f32.mrf.mxu0  ;;  %v2214_v53 = vpop.f32.mrf.mxu1 }
 0x1b8   : > { %v5484_v50 = vadd.f32 %v1839_v13, %v5241_v7  ;;  %v5486_v30 = vadd.f32 %v2204_v0, %v1948_v23  ;;  %v4562_v7 = vld [vmem:[%s6186_s3 + $0x60] sm:$0xff]  }
 0x1b9   : > { %v1843_v1 = vpop.f32.mrf.mxu0  ;;  %4257 = vmatmul.mubr.msk.bf16.gmra.mxu0 %vm453_vm1, %v3233_v48  ;;  %v5489_v36 = vpop.f32.mrf.mxu1  ;;  %v4548_v48 = vld [vmem:[%s4798_s16 + $0x40] sm:$0xff]   ;;  %4293 = vmatprep.subr.bf16.mxu1 %v4562_v7 }
 0x1ba   : > { %v1950_v16 = vadd.f32 %v1843_v1, %v5246_v42  ;;  %3365 = vmatprep.mubr.bf16.mxu0 %v6196_v35  ;;  %v3235_v42 = vsel %vm932_vm3, %v3232_v8, %v3234_v63 }
 0x1bb   : > { %v1845_v9 = vpop.f32.mrf.mxu0  ;;  %v2220_v27 = vpop.f32.mrf.mxu1 }
 0x1bc   : > { %v1951_v28 = vadd.f32 %v1845_v9, %v5252_v19  ;;  %v5494_v47 = vadd.f32 %v2210_v60, %v1950_v16  ;;  %v4563_v19 = vld [vmem:[%s6186_s3 + $0x20] sm:$0xff]   ;;  %v3236_v16 = vrot.slane %v4548_v48, 1 }
 0x1bd   : > { %v1847_v0 = vpop.f32.mrf.mxu0  ;;  %v2222_v41 = vpop.f32.mrf.mxu1  ;;  %4294 = vmatpush3.bf16.msra.mxu1 %v4563_v19 }
 0x1be   : > { %v1952_v26 = vadd.f32 %v1847_v0, %v5256_v39  ;;  %v5500_v23 = vadd.f32 %v2212_v24, %v1951_v28 }
 0x1bf   : > { %v1849_v60 = vpop.f32.mrf.mxu0  ;;  %v2224_v37 = vpop.f32.mrf.mxu1 }
 0x1c0   : > { %v5508_v13 = vadd.f32 %v1849_v60, %v5260_v10  ;;  %v5510_v1 = vadd.f32 %v2214_v53, %v1952_v26  ;;  %v4549_v60 = vld [vmem:[%s4798_s16 + $0x48] sm:$0xff]  }
 0x1c1   : > { %v1853_v39 = vpop.f32.mrf.mxu0  ;;  %4258 = vmatmul.mubr.msk.bf16.gmra.mxu0 %vm453_vm1, %v3235_v42  ;;  %v5513_v24 = vpop.f32.mrf.mxu1  ;;  %v3237_v42 = vsel %vm932_vm3, %v3234_v63, %v3236_v16 }
 0x1c2   : > { %6225 = vst [vmem:[#allocation16_spill] sm:$0xff] %v5513_v24  ;;  %v1954_v8 = vadd.f32 %v1853_v39, %v5266_v5  ;;  %3375 = vmatprep.mubr.bf16.mxu0 %v6196_v35 }
 0x1c3   : > { %v1855_v9 = vpop.f32.mrf.mxu0  ;;  %v2230_v28 = vpop.f32.mrf.mxu1 }
 0x1c4   : > { %v1955_v7 = vadd.f32 %v1855_v9, %v5271_v33  ;;  %v5518_v10 = vadd.f32 %v2220_v27, %v1954_v8  ;;  %v4564_v33 = vld [vmem:[%s6186_s3 + $0x58] sm:$0xff]  }
 0x1c5   : > { %v1857_v53 = vpop.f32.mrf.mxu0  ;;  %v2232_v0 = vpop.f32.mrf.mxu1  ;;  %4295 = vmatprep.subr.bf16.mxu1 %v4564_v33 }
 0x1c6   : > { %v1956_v26 = vadd.f32 %v1857_v53, %v5274_v61  ;;  %v5521_v19 = vadd.f32 %v2222_v41, %v1955_v7  ;;  %v3238_v41 = vrot.slane %v4549_v60, 1  ;;  %v4550_v60 = vld [vmem:[%s4798_s16 + $0x50] sm:$0xff]  }
 0x1c7   : > { %v1859_v24 = vpop.f32.mrf.mxu0  ;;  %v2234_v5 = vpop.f32.mrf.mxu1 }
 0x1c8   : > { %v5526_v39 = vadd.f32 %v1859_v24, %v5279_v32  ;;  %v5528_v48 = vadd.f32 %v2224_v37, %v1956_v26  ;;  %v4565_v32 = vld [vmem:[%s6186_s3 + $0x18] sm:$0xff]  }
 0x1c9   : > { %v1863_v27 = vpop.f32.mrf.mxu0  ;;  %4259 = vmatmul.mubr.msk.bf16.gmra.mxu0 %vm453_vm1, %v3237_v42  ;;  %v5534_v61 = vpop.f32.mrf.mxu1  ;;  %4296 = vmatpush3.bf16.msra.mxu1 %v4565_v32  ;;  %v3239_v42 = vsel %vm932_vm3, %v3236_v16, %v3238_v41 }
 0x1ca   : > { %6226 = vst [vmem:[#allocation17_spill] sm:$0xff] %v5528_v48  ;;  %6227 = vst [vmem:[#allocation18_spill] sm:$0xff] %v5534_v61  ;;  %v1958_v63 = vadd.f32 %v1863_v27, %v5284_v44  ;;  %3385 = vmatprep.mubr.bf16.mxu0 %v6196_v35 }
 0x1cb   : > { %v1865_v37 = vpop.f32.mrf.mxu0  ;;  %v2240_v24 = vpop.f32.mrf.mxu1 }
 0x1cc   : > { %v1959_v8 = vadd.f32 %v1865_v37, %v5290_v20  ;;  %v5542_v9 = vadd.f32 %v2230_v28, %v1958_v63 }
 0x1cd   : > { %v1867_v7 = vpop.f32.mrf.mxu0  ;;  %v2242_v53 = vpop.f32.mrf.mxu1 }
 0x1ce   : > { %v1960_v26 = vadd.f32 %v1867_v7, %v5294_v25  ;;  %v5545_v44 = vadd.f32 %v2232_v0, %v1959_v8  ;;  %v3240_v0 = vrot.slane %v4550_v60, 1 }
 0x1cf   : > { %v1869_v33 = vpop.f32.mrf.mxu0  ;;  %v2244_v27 = vpop.f32.mrf.mxu1 }
 0x1d0   : > { %v5550_v61 = vadd.f32 %v1869_v33, %v5298_v55  ;;  %v5552_v48 = vadd.f32 %v2234_v5, %v1960_v26  ;;  %v4566_v55 = vld [vmem:[%s6186_s3 + $0x50] sm:$0xff]  }
 0x1d1   : > { %v1873_v20 = vpop.f32.mrf.mxu0  ;;  %4260 = vmatmul.mubr.msk.bf16.gmra.mxu0 %vm453_vm1, %v3239_v42  ;;  %v5555_v28 = vpop.f32.mrf.mxu1  ;;  %v4551_v42 = vld [vmem:[%s4798_s16 + $0x58] sm:$0xff]   ;;  %4297 = vmatprep.subr.bf16.mxu1 %v4566_v55 }
 0x1d2   : > { %v1962_v25 = vadd.f32 %v1873_v20, %v5304_v49  ;;  %3395 = vmatprep.mubr.bf16.mxu0 %v6196_v35  ;;  %v3241_v49 = vsel %vm932_vm3, %v3238_v41, %v3240_v0 }
 0x1d3   : > { %v1875_v16 = vpop.f32.mrf.mxu0  ;;  %v2250_v63 = vpop.f32.mrf.mxu1 }
 0x1d4   : > { %v1963_v32 = vadd.f32 %v1875_v16, %v5309_v62  ;;  %v5560_v37 = vadd.f32 %v2240_v24, %v1962_v25  ;;  %v4567_v62 = vld [vmem:[%s6186_s3 + $0x10] sm:$0xff]   ;;  %v3242_v25 = vrot.slane %v4551_v42, 1 }
 0x1d5   : > { %v1877_v5 = vpop.f32.mrf.mxu0  ;;  %v2252_v8 = vpop.f32.mrf.mxu1  ;;  %4298 = vmatpush3.bf16.msra.mxu1 %v4567_v62 }
 0x1d6   : > { %v1964_v7 = vadd.f32 %v1877_v5, %v5312_v52  ;;  %v5566_v26 = vadd.f32 %v2242_v53, %v1963_v32 }
 0x1d7   : > { %v1879_v24 = vpop.f32.mrf.mxu0  ;;  %v2254_v60 = vpop.f32.mrf.mxu1 }
 0x1d8   : > { %v5574_v33 = vadd.f32 %v1879_v24, %v5317_v17  ;;  %v5576_v20 = vadd.f32 %v2244_v27, %v1964_v7  ;;  %v4552_v24 = vld [vmem:[%s4798_s16 + $0x60] sm:$0xff]  }
 0x1d9   : > { %v1883_v52 = vpop.f32.mrf.mxu0  ;;  %4261 = vmatmul.mubr.msk.bf16.gmra.mxu0 %vm453_vm1, %v3241_v49  ;;  %v5579_v53 = vpop.f32.mrf.mxu1  ;;  %v3243_v49 = vsel %vm932_vm3, %v3240_v0, %v3242_v25 }
 0x1da   : > { %6228 = vst [vmem:[#allocation19_spill] sm:$0xff] %v5579_v53  ;;  %v1966_v41 = vadd.f32 %v1883_v52, %v5322_v4  ;;  %3405 = vmatprep.mubr.bf16.mxu0 %v6196_v35 }
 0x1db   : > { %v1885_v16 = vpop.f32.mrf.mxu0  ;;  %v2260_v32 = vpop.f32.mrf.mxu1 }
 0x1dc   : > { %v1967_v55 = vadd.f32 %v1885_v16, %v5328_v54  ;;  %v5584_v17 = vadd.f32 %v2250_v63, %v1966_v41  ;;  %v4568_v54 = vld [vmem:[%s6186_s3 + $0x48] sm:$0xff]  }
 0x1dd   : > { %v1887_v27 = vpop.f32.mrf.mxu0  ;;  %v2262_v5 = vpop.f32.mrf.mxu1  ;;  %4299 = vmatprep.subr.bf16.mxu1 %v4568_v54 }
 0x1de   : > { %v1968_v7 = vadd.f32 %v1887_v27, %v5332_v22  ;;  %v5587_v62 = vadd.f32 %v2252_v8, %v1967_v55  ;;  %v3244_v8 = vrot.slane %v4552_v24, 1  ;;  %v4553_v24 = vld [vmem:[%s4798_s16 + $0x68] sm:$0xff]  }
 0x1df   : > { %v1889_v53 = vpop.f32.mrf.mxu0  ;;  %v2264_v4 = vpop.f32.mrf.mxu1 }
 0x1e0   : > { %v5592_v52 = vadd.f32 %v1889_v53, %v5336_v45  ;;  %v5594_v42 = vadd.f32 %v2254_v60, %v1968_v7  ;;  %v4569_v45 = vld [vmem:[%s6186_s3 + $0x8] sm:$0xff]  }
 0x1e1   : > { %v1893_v63 = vpop.f32.mrf.mxu0  ;;  %4262 = vmatmul.mubr.msk.bf16.gmra.mxu0 %vm453_vm1, %v3243_v49  ;;  %v5600_v22 = vpop.f32.mrf.mxu1  ;;  %4300 = vmatpush3.bf16.msra.mxu1 %v4569_v45  ;;  %v3245_v49 = vsel %vm932_vm3, %v3242_v25, %v3244_v8 }
 0x1e2   : > { %6229 = vst [vmem:[#allocation20_spill] sm:$0xff] %v5594_v42  ;;  %6230 = vst [vmem:[#allocation21_spill] sm:$0xff] %v5600_v22  ;;  %v1970_v0 = vadd.f32 %v1893_v63, %v5342_v38  ;;  %3415 = vmatprep.mubr.bf16.mxu0 %v6196_v35 }
 0x1e3   : > { %v1895_v60 = vpop.f32.mrf.mxu0  ;;  %v2270_v53 = vpop.f32.mrf.mxu1 }
 0x1e4   : > { %v1971_v41 = vadd.f32 %v1895_v60, %v5347_v43  ;;  %v5608_v16 = vadd.f32 %v2260_v32, %v1970_v0 }
 0x1e5   : > { %v1897_v55 = vpop.f32.mrf.mxu0  ;;  %v2272_v27 = vpop.f32.mrf.mxu1 }
 0x1e6   : > { %v1972_v7 = vadd.f32 %v1897_v55, %v5350_v57  ;;  %v5611_v38 = vadd.f32 %v2262_v5, %v1971_v41  ;;  %v3246_v57 = vrot.slane %v4553_v24, 1 }
 0x1e7   : > { %v1899_v54 = vpop.f32.mrf.mxu0  ;;  %v2274_v63 = vpop.f32.mrf.mxu1 }
 0x1e8   : > { %v5616_v22 = vadd.f32 %v1899_v54, %v5357_v12  ;;  %v5618_v42 = vadd.f32 %v2264_v4, %v1972_v7  ;;  %v1535_v4 = vadd.f32 %v5354_v2, %v5372_v3 }
 0x1e9   : > { %v1903_v43 = vpop.f32.mrf.mxu0  ;;  %4263 = vmatmul.mubr.msk.bf16.gmra.mxu0 %vm453_vm1, %v3245_v49  ;;  %v2276_v32 = vpop.f32.mrf.mxu1  ;;  %v4554_v49 = vld [vmem:[%s4798_s16 + $0x70] sm:$0xff]  }
 0x1ea   : > { %6231 = vst [vmem:[#allocation22_spill] sm:$0xff] %v5618_v42  ;;  %v1974_v0 = vadd.f32 %v1903_v43, %v5362_v6  ;;  %3425 = vmatprep.mubr.bf16.mxu0 %v6196_v35  ;;  %v3247_v6 = vsel %vm932_vm3, %v3244_v8, %v3246_v57  ;;  %v3248_v8 = vrot.slane %v4554_v49, 1 }
 0x1eb   : > { %v1905_v5 = vpop.f32.mrf.mxu0  ;;  %v2280_v25 = vpop.f32.mrf.mxu1 }
 0x1ec   : > { %v1975_v45 = vadd.f32 %v1905_v5, %v5368_v56  ;;  %v5624_v60 = vadd.f32 %v2270_v53, %v1974_v0  ;;  %v4570_v56 = vld [vmem:[%s6186_s3 + $0x40] sm:$0xff]   ;;  %v3249_v49 = vsel %vm932_vm3, %v3246_v57, %v3248_v8 }
 0x1ed   : > { %v1907_v12 = vpop.f32.mrf.mxu0  ;;  %v2282_v41 = vpop.f32.mrf.mxu1  ;;  %4301 = vmatprep.subr.bf16.mxu1 %v4570_v56 }
 0x1ee   : > { %v1976_v55 = vadd.f32 %v1907_v12, %v5374_v34  ;;  %v5629_v7 = vadd.f32 %v2272_v27, %v1975_v45  ;;  %v4571_v45 = vld [vmem:[%s6186_s3] sm:$0xff]  }
 0x1ef   : > { %v1909_v54 = vpop.f32.mrf.mxu0  ;;  %v2284_v24 = vpop.f32.mrf.mxu1  ;;  %4302 = vmatpush3.bf16.msra.mxu1 %v4571_v45 }
 0x1f0   : > { %v1977_v43 = vadd.f32 %v1909_v54, %v1535_v4  ;;  %v5633_v42 = vadd.f32 %v2274_v63, %v1976_v55  ;;  %v4555_v54 = vld [vmem:[%s4798_s16 + $0x78] ss:$0 sps:$4 sm:$0x11]   ;;  %s6124_s16 = scalar_lea.hbm %s6188_s5, %s4284_s12 }
 0x1f1   : > { %v1913_v53 = vpop.f32.mrf.mxu0  ;;  %4264 = vmatmul.mubr.msk.bf16.gmra.mxu0 %vm453_vm1, %v3247_v6  ;;  %v2286_v2 = vpop.f32.mrf.mxu1 }
 0x1f2   : > { %v1978_v3 = vadd.f32 %v1913_v53, %v5383_v40  ;;  %v5640_v34 = vadd.f32 %v2276_v32, %v1977_v43  ;;  %3435 = vmatprep.mubr.bf16.mxu0 %v6196_v35  ;;  %v6232_v40 = vld [vmem:[#allocation15_spill] sm:$0xff] }
 0x1f3   : > { %v1915_v27 = vpop.f32.mrf.mxu0  ;;  %v2290_v63 = vpop.f32.mrf.mxu1  ;;  %v1539_v32 = vadd.f32 %v6232_v40, %v5391_v51  ;;  %v6233_v40 = vld [vmem:[#allocation5_spill] sm:$0xff] }
 0x1f4   : > { %v1979_v0 = vadd.f32 %v1915_v27, %v5388_v21  ;;  %v5644_v5 = vadd.f32 %v2280_v25, %v1978_v3 }
 0x1f5   : > { %v1917_v12 = vpop.f32.mrf.mxu0  ;;  %v2292_v4 = vpop.f32.mrf.mxu1 }
 0x1f6   : > { %v1980_v55 = vadd.f32 %v1917_v12, %v5393_v29  ;;  %v5652_v6 = vadd.f32 %v2282_v41, %v1979_v0  ;;  %v3250_v29 = vrot.slane %v4555_v54, 1 }
 0x1f7   : > { %v1919_v21 = vpop.f32.mrf.mxu0  ;;  %v2294_v25 = vpop.f32.mrf.mxu1 }
 0x1f8   : > { %v1981_v43 = vadd.f32 %v1919_v21, %v1539_v32  ;;  %v5656_v56 = vadd.f32 %v2284_v24, %v1980_v55  ;;  %v1543_v32 = vadd.f32 %v6233_v40, %v5418_v31  ;;  %v6234_v55 = vld [vmem:[#allocation6_spill] sm:$0xff]  ;;  %v6236_v40 = vld [vmem:[#allocation9_spill] sm:$0xff] }
 0x1f9   : > { %v1923_v53 = vpop.f32.mrf.mxu0  ;;  %4265 = vmatmul.mubr.msk.bf16.gmra.mxu0 %vm453_vm1, %v3249_v49  ;;  %v2296_v3 = vpop.f32.mrf.mxu1 }
 0x1fa   : > { %v1982_v27 = vadd.f32 %v1923_v53, %v5409_v59  ;;  %v5660_v51 = vadd.f32 %v2286_v2, %v1981_v43  ;;  %3445 = vmatprep.mubr.bf16.mxu0 %v6196_v35  ;;  %v3251_v59 = vsel %vm932_vm3, %v3248_v8, %v3250_v29  ;;  %v6237_v8 = vld [vmem:[#allocation10_spill] sm:$0xff]  ;;  %v6238_v29 = vld [vmem:[#allocation7_spill] sm:$0xff] }
 0x1fb   : > { %v1925_v41 = vpop.f32.mrf.mxu0  ;;  %v2300_v57 = vpop.f32.mrf.mxu1 }
 0x1fc   : > { %v1983_v0 = vadd.f32 %v1925_v41, %v5413_v14  ;;  %v5664_v45 = vadd.f32 %v2290_v63, %v1982_v27  ;;  %v6235_v14 = vld [vmem:[#allocation8_spill] sm:$0xff] }
 0x1fd   : > { %v1927_v12 = vpop.f32.mrf.mxu0  ;;  %v2302_v24 = vpop.f32.mrf.mxu1 }
 0x1fe   : > { %v1984_v49 = vadd.f32 %v1927_v12, %v6234_v55  ;;  %v5669_v21 = vadd.f32 %v2292_v4, %v1983_v0  ;;  %v1547_v55 = vadd.f32 %v6238_v29, %v6237_v8  ;;  %v6241_v8 = vld [vmem:[#allocation13_spill] sm:$0xff] }
 0x1ff   : > { %v1929_v2 = vpop.f32.mrf.mxu0  ;;  %v2304_v35 = vpop.f32.mrf.mxu1 }
 0x200   : > { %v1985_v54 = vadd.f32 %v1929_v2, %v1543_v32  ;;  %v5672_v43 = vadd.f32 %v2294_v25, %v1984_v49  ;;  %v6239_v32 = vld [vmem:[#allocation11_spill] sm:$0xff] }
 0x201   : > { %v1933_v53 = vpop.f32.mrf.mxu0  ;;  %4266 = vmatmul.mubr.msk.bf16.gmra.mxu0 %vm453_vm1, %v3251_v59  ;;  %v2306_v31 = vpop.f32.mrf.mxu1 }
 0x202   : > { %v1986_v63 = vadd.f32 %v1933_v53, %v6235_v14  ;;  %v5676_v27 = vadd.f32 %v2296_v3, %v1985_v54 }
 0x203   : > { %v1935_v41 = vpop.f32.mrf.mxu0  ;;  %v5686_v59 = vpop.f32.mrf.mxu1 }
 0x204   : > { %v1987_v12 = vadd.f32 %v1935_v41, %v6236_v40  ;;  %v5679_v4 = vadd.f32 %v2300_v57, %v1986_v63 }
 0x205   : > { %v1937_v0 = vpop.f32.mrf.mxu0  ;;  %v5695_v41 = vpop.f32.mrf.mxu1 }
 0x206   : > { %v1988_v25 = vadd.f32 %v1937_v0, %v6239_v32  ;;  %v5684_v49 = vadd.f32 %v2302_v24, %v1987_v12  ;;  %v6240_v12 = vld [vmem:[#allocation12_spill] sm:$0xff] }
 0x207   : > { %v1939_v2 = vpop.f32.mrf.mxu0  ;;  %v2312_v0 = vadd.f32 %v6240_v12, %v5460_v11  ;;  %v6242_v11 = vld [vmem:[#allocation14_spill] sm:$0xff] }
 0x208   : > { %v1989_v53 = vadd.f32 %v1939_v2, %v1547_v55  ;;  %v5688_v3 = vadd.f32 %v2304_v35, %v1988_v25  ;;  %v5705_v55 = vpop.f32.mrf.mxu1 }
 0x209   : > { %v2528_v54 = vpop.f32.mrf.mxu0 }
 0x20a   : > { %v5690_v14 = vadd.f32 %v2306_v31, %v1989_v53  ;;  %v5693_v57 = vadd.f32 %v2528_v54, %v5452_v46  ;;  %v5712_v25 = vpop.f32.mrf.mxu1  ;;  %v2316_v54 = vadd.f32 %v6242_v11, %v5484_v50 }
 0x20b   : > { %v2530_v63 = vpop.f32.mrf.mxu0 }
 0x20c   : > { %v5698_v40 = vadd.f32 %v2530_v63, %v5455_v58 }
 0x20d   : > { %v2532_v24 = vpop.f32.mrf.mxu0 }
 0x20e   : > { %v5703_v29 = vadd.f32 %v2532_v24, %v6241_v8  ;;  %v5722_v24 = vpop.f32.mrf.mxu1 }
 0x20f   : > { %v2534_v35 = vpop.f32.mrf.mxu0 }
 0x210   : > { %v5707_v31 = vadd.f32 %v2534_v35, %v2312_v0  ;;  %v5729_v35 = vpop.f32.mrf.mxu1 }
 0x211   : > { %v2538_v46 = vpop.f32.mrf.mxu0 }
 0x212   : > { %v5710_v32 = vadd.f32 %v2538_v46, %v5476_v18 }
 0x213   : > { %v2540_v58 = vpop.f32.mrf.mxu0 }
 0x214   : > { %v5715_v2 = vadd.f32 %v2540_v58, %v5479_v15 }
 0x215   : > { %v2542_v53 = vpop.f32.mrf.mxu0 }
 0x216   : > { %v5720_v63 = vadd.f32 %v2542_v53, %v5486_v30  ;;  %v2320_v30 = vadd.f32 %v5489_v36, %v5508_v13  ;;  %v5739_v53 = vpop.f32.mrf.mxu1  ;;  %v6247_v36 = vld [vmem:[#allocation16_spill] sm:$0xff] }
 0x217   : > { %v2544_v12 = vpop.f32.mrf.mxu0  ;;  %v2324_v13 = vadd.f32 %v6247_v36, %v5526_v39  ;;  %v6251_v39 = vld [vmem:[#allocation18_spill] sm:$0xff] }
 0x218   : > { %v5724_v0 = vadd.f32 %v2544_v12, %v2316_v54 }
 0x219   : > { %v2548_v18 = vpop.f32.mrf.mxu0 }
 0x21a   : > { %v5727_v8 = vadd.f32 %v2548_v18, %v5494_v47  ;;  %v5746_v18 = vpop.f32.mrf.mxu1 }
 0x21b   : > { %v2550_v15 = vpop.f32.mrf.mxu0 }
 0x21c   : > { %v5732_v46 = vadd.f32 %v2550_v15, %v5500_v23 }
 0x21d   : > { %v2552_v58 = vpop.f32.mrf.mxu0 }
 0x21e   : > { %6243 = vst [vmem:[#allocation15_spill] sm:$0xff] %v5732_v46  ;;  %v5737_v50 = vadd.f32 %v2552_v58, %v5510_v1  ;;  %v6248_v1 = vld [vmem:[#allocation17_spill] sm:$0xff] }
 0x21f   : > { %v2554_v11 = vpop.f32.mrf.mxu0 }
 0x220   : > { %6244 = vst [vmem:[#allocation5_spill] sm:$0xff] %v5737_v50  ;;  %v5741_v54 = vadd.f32 %v2554_v11, %v2320_v30  ;;  %v5756_v50 = vpop.f32.mrf.mxu1 }
 0x221   : > { %v2558_v47 = vpop.f32.mrf.mxu0 }
 0x222   : > { %v5744_v12 = vadd.f32 %v2558_v47, %v5518_v10 }
 0x223   : > { %v2560_v23 = vpop.f32.mrf.mxu0 }
 0x224   : > { %6245 = vst [vmem:[#allocation6_spill] sm:$0xff] %v5744_v12  ;;  %v5749_v15 = vadd.f32 %v2560_v23, %v5521_v19  ;;  %v5763_v12 = vpop.f32.mrf.mxu1 }
 0x225   : > { %v2562_v46 = vpop.f32.mrf.mxu0 }
 0x226   : > { %6246 = vst [vmem:[#allocation8_spill] sm:$0xff] %v5749_v15  ;;  %v5754_v58 = vadd.f32 %v2562_v46, %v6248_v1  ;;  %v2328_v46 = vadd.f32 %v6251_v39, %v5550_v61  ;;  %v5773_v1 = vpop.f32.mrf.mxu1 }
 0x227   : > { %v2564_v30 = vpop.f32.mrf.mxu0 }
 0x228   : > { %v5758_v11 = vadd.f32 %v2564_v30, %v2324_v13 }
 0x229   : > { %v2568_v10 = vpop.f32.mrf.mxu0 }
 0x22a   : > { %v5761_v47 = vadd.f32 %v2568_v10, %v5542_v9 }
 0x22b   : > { %v2570_v19 = vpop.f32.mrf.mxu0 }
 0x22c   : > { %6249 = vst [vmem:[#allocation9_spill] sm:$0xff] %v5761_v47  ;;  %v5766_v23 = vadd.f32 %v2570_v19, %v5545_v44  ;;  %v5780_v47 = vpop.f32.mrf.mxu1 }
 0x22d   : > { %v2572_v15 = vpop.f32.mrf.mxu0 }
 0x22e   : > { %6250 = vst [vmem:[#allocation10_spill] sm:$0xff] %v5766_v23  ;;  %v5771_v36 = vadd.f32 %v2572_v15, %v5552_v48  ;;  %v2332_v48 = vadd.f32 %v5555_v28, %v5574_v33  ;;  %v5790_v15 = vpop.f32.mrf.mxu1  ;;  %v6256_v28 = vld [vmem:[#allocation19_spill] sm:$0xff] }
 0x22f   : > { %v2574_v13 = vpop.f32.mrf.mxu0  ;;  %v2336_v33 = vadd.f32 %v6256_v28, %v5592_v52  ;;  %v6261_v52 = vld [vmem:[#allocation21_spill] sm:$0xff]  ;;  %v6262_v28 = vld [vmem:[#allocation22_spill] sm:$0xff] }
 0x230   : > { %v5775_v30 = vadd.f32 %v2574_v13, %v2328_v46 }
 0x231   : > { %v2578_v9 = vpop.f32.mrf.mxu0 }
 0x232   : > { %v5778_v10 = vadd.f32 %v2578_v9, %v5560_v37  ;;  %v5797_v9 = vpop.f32.mrf.mxu1 }
 0x233   : > { %v2580_v44 = vpop.f32.mrf.mxu0 }
 0x234   : > { %v5783_v19 = vadd.f32 %v2580_v44, %v5566_v26 }
 0x235   : > { %v2582_v23 = vpop.f32.mrf.mxu0 }
 0x236   : > { %6252 = vst [vmem:[#allocation7_spill] sm:$0xff] %v5783_v19  ;;  %v5788_v61 = vadd.f32 %v2582_v23, %v5576_v20  ;;  %v6257_v20 = vld [vmem:[#allocation20_spill] sm:$0xff] }
 0x237   : > { %v2584_v39 = vpop.f32.mrf.mxu0 }
 0x238   : > { %6253 = vst [vmem:[#allocation11_spill] sm:$0xff] %v5788_v61  ;;  %v5792_v46 = vadd.f32 %v2584_v39, %v2332_v48  ;;  %v5807_v61 = vpop.f32.mrf.mxu1 }
 0x239   : > { %v2588_v37 = vpop.f32.mrf.mxu0 }
 0x23a   : > { %v5795_v13 = vadd.f32 %v2588_v37, %v5584_v17 }
 0x23b   : > { %v2590_v26 = vpop.f32.mrf.mxu0 }
 0x23c   : > { %6254 = vst [vmem:[#allocation12_spill] sm:$0xff] %v5795_v13  ;;  %v5800_v44 = vadd.f32 %v2590_v26, %v5587_v62  ;;  %v5814_v13 = vpop.f32.mrf.mxu1 }
 0x23d   : > { %v2592_v19 = vpop.f32.mrf.mxu0 }
 0x23e   : > { %6255 = vst [vmem:[#allocation13_spill] sm:$0xff] %v5800_v44  ;;  %v5805_v23 = vadd.f32 %v2592_v19, %v6257_v20  ;;  %v2340_v19 = vadd.f32 %v6261_v52, %v5616_v22 }
 0x23f   : > { %v2594_v48 = vpop.f32.mrf.mxu0 }
 0x240   : > { %6258 = vst [vmem:[#allocation14_spill] sm:$0xff] %v5805_v23  ;;  %v5809_v39 = vadd.f32 %v2594_v48, %v2336_v33  ;;  %v5824_v23 = vpop.f32.mrf.mxu1 }
 0x241   : > { %v2598_v17 = vpop.f32.mrf.mxu0 }
 0x242   : > { %v5812_v37 = vadd.f32 %v2598_v17, %v5608_v16 }
 0x243   : > { %v2600_v62 = vpop.f32.mrf.mxu0 }
 0x244   : > { %6259 = vst [vmem:[#allocation16_spill] sm:$0xff] %v5812_v37  ;;  %v5817_v26 = vadd.f32 %v2600_v62, %v5611_v38  ;;  %v5831_v37 = vpop.f32.mrf.mxu1 }
 0x245   : > { %v2602_v44 = vpop.f32.mrf.mxu0 }
 0x246   : > { %6260 = vst [vmem:[#allocation17_spill] sm:$0xff] %v5817_v26  ;;  %v5822_v20 = vadd.f32 %v2602_v44, %v6262_v28  ;;  %v5839_v44 = vpop.f32.mrf.mxu1 }
 0x247   : > { %v2604_v33 = vpop.f32.mrf.mxu0 }
 0x248   : > { %v5826_v48 = vadd.f32 %v2604_v33, %v2340_v19  ;;  %v5847_v33 = vpop.f32.mrf.mxu1 }
 0x249   : > { %v2608_v16 = vpop.f32.mrf.mxu0 }
 0x24a   : > { %v5829_v17 = vadd.f32 %v2608_v16, %v5624_v60 }
 0x24b   : > { %v2610_v38 = vpop.f32.mrf.mxu0 }
 0x24c   : > { %v5834_v62 = vadd.f32 %v2610_v38, %v5629_v7 }
 0x24d   : > { %v2612_v26 = vpop.f32.mrf.mxu0 }
 0x24e   : > { %v5837_v22 = vadd.f32 %v2612_v26, %v5633_v42  ;;  %v5855_v26 = vpop.f32.mrf.mxu1 }
 0x24f   : > { %v2614_v52 = vpop.f32.mrf.mxu0 }
 0x250   : > { %6263 = vst [vmem:[#allocation18_spill] sm:$0xff] %v5837_v22  ;;  %v5842_v19 = vadd.f32 %v2614_v52, %v5640_v34 }
 0x251   : > { %v2618_v28 = vpop.f32.mrf.mxu0 }
 0x252   : > { %v5845_v60 = vadd.f32 %v2618_v28, %v5644_v5  ;;  %v5863_v28 = vpop.f32.mrf.mxu1 }
 0x253   : > { %v2620_v16 = vpop.f32.mrf.mxu0 }
 0x254   : > { %6264 = vst [vmem:[#allocation19_spill] sm:$0xff] %v5845_v60  ;;  %v5850_v7 = vadd.f32 %v2620_v16, %v5652_v6 }
 0x255   : > { %v2622_v38 = vpop.f32.mrf.mxu0 }
 0x256   : > { %6265 = vst [vmem:[#allocation20_spill] sm:$0xff] %v5850_v7  ;;  %v5853_v42 = vadd.f32 %v2622_v38, %v5656_v56  ;;  %v3506_v38 = vlaneseq }
 0x257   : > { %v2624_v22 = vpop.f32.mrf.mxu0 }
 0x258   : > { %6266 = vst [vmem:[#allocation21_spill] sm:$0xff] %v5853_v42  ;;  %v5858_v34 = vadd.f32 %v2624_v22, %v5660_v51  ;;  %v5871_v42 = vpop.f32.mrf.mxu1 }
 0x259   : > { %v2628_v52 = vpop.f32.mrf.mxu0 }
 0x25a   : > { %6267 = vst [vmem:[#allocation22_spill] sm:$0xff] %v5858_v34  ;;  %v5861_v5 = vadd.f32 %v2628_v52, %v5664_v45  ;;  %v3507_v52 = vshrl.u32 %v3506_v38, 7 }
 0x25b   : > { %v2630_v60 = vpop.f32.mrf.mxu0 }
 0x25c   : > { %6268 = vst [vmem:[#allocation23_spill] sm:$0xff] %v5861_v5  ;;  %v5866_v6 = vadd.f32 %v2630_v60, %v5669_v21  ;;  %v5879_v5 = vpop.f32.mrf.mxu1 }
 0x25d   : > { %v2632_v16 = vpop.f32.mrf.mxu0 }
 0x25e   : > { %6269 = vst [vmem:[#allocation24_spill] sm:$0xff] %v5866_v6  ;;  %v5869_v56 = vadd.f32 %v2632_v16, %v5672_v43  ;;  %v5887_v6 = vpop.f32.mrf.mxu1 }
 0x25f   : > { %v2634_v7 = vpop.f32.mrf.mxu0 }
 0x260   : > { %6270 = vst [vmem:[#allocation25_spill] sm:$0xff] %v5869_v56  ;;  %v5874_v51 = vadd.f32 %v2634_v7, %v5676_v27  ;;  %v3508_v56 = vsub.s32 0, %v3507_v52  ;;  %v3089_v7 = vadd.f32 %v5686_v59, %v5693_v57 }
 0x261   : > { %v2638_v22 = vpop.f32.mrf.mxu0 }
 0x262   : > { %6271 = vst [vmem:[#allocation26_spill] sm:$0xff] %v5874_v51  ;;  %v5877_v45 = vadd.f32 %v2638_v22, %v5679_v4  ;;  %v3504_v4 = vld [vmem:[%s6185_s2] sm:$0x3] }
 0x263   : > { %v2640_v21 = vpop.f32.mrf.mxu0 }
 0x264   : > { %6272 = vst [vmem:[#allocation27_spill] sm:$0xff] %v5877_v45  ;;  %v5882_v60 = vadd.f32 %v2640_v21, %v5684_v49  ;;  %v3512_v49 = vsub.s32 1, %v3507_v52  ;;  %v3091_v45 = vadd.f32 %v5705_v55, %v5703_v29 }
 0x265   : > { %v2642_v43 = vpop.f32.mrf.mxu0 }
 0x266   : > { %6273 = vst [vmem:[#allocation28_spill] sm:$0xff] %v5882_v60  ;;  %v5885_v16 = vadd.f32 %v2642_v43, %v5688_v3  ;;  %v3090_v3 = vadd.f32 %v5695_v41, %v5698_v40  ;;  %v5899_v43 = vrot.slane %v3504_v4, %v3508_v56  ;;  %v5905_v34 = vrot.slane %v3504_v4, %v3512_v49 }
 0x267   : > { %v2644_v27 = vpop.f32.mrf.mxu0  ;;  %v3093_v56 = vadd.f32 %v5722_v24, %v5710_v32  ;;  %v3095_v49 = vadd.f32 %v5739_v53, %v5720_v63  ;;  %v3097_v63 = vadd.f32 %v5756_v50, %v5727_v8 }
 0x268   : > { %6274 = vst [vmem:[#allocation29_spill] sm:$0xff] %v5885_v16  ;;  %v5895_v38 = vadd.f32 %v2644_v27, %v5690_v14  ;;  %v5901_v16 = vpop.f32.mrf.mxu1  ;;  %v3092_v14 = vadd.f32 %v5712_v25, %v5707_v31 }
 0x269   : > { %v3337_v22 = vpop.f32.mrf.mxu0 }
 0x26a   : > { %v3456_v21 = vadd.f32 %v3337_v22, %v3089_v7  ;;  %v5910_v41 = vpop.f32.mrf.mxu1 }
 0x26b   : > { %v3339_v60 = vpop.f32.mrf.mxu0 }
 0x26c   : > { %v3457_v51 = vadd.f32 %v3339_v60, %v3090_v3  ;;  %v3516_v57 = vadd.f32 %v5899_v43, %v3456_v21  ;;  %v3094_v60 = vadd.f32 %v5729_v35, %v5715_v2  ;;  %v5921_v22 = vpop.f32.mrf.mxu1  ;;  %v3096_v2 = vadd.f32 %v5746_v18, %v5724_v0 }
 0x26d   : > { %v3341_v59 = vpop.f32.mrf.mxu0 }
 0x26e   : > { %v3458_v52 = vadd.f32 %v3341_v59, %v3091_v45  ;;  %v3517_v27 = vadd.f32 %v5905_v34, %v3457_v51  ;;  %v3564_v7 = vmax.f32 %v3516_v57, 0.0 }
 0x26f   : > { %v3343_v40 = vpop.f32.mrf.mxu0 }
 0x270   : > { %v3518_v29 = vadd.f32 %v5899_v43, %v3458_v52  ;;  %v3459_v55 = vadd.f32 %v3343_v40, %v3092_v14  ;;  %v3565_v24 = vmax.f32 %v3517_v27, 0.0  ;;  %v5926_v52 = vpop.f32.mrf.mxu1 }
 0x271   : > { %v3347_v4 = vpop.f32.mrf.mxu0 }
 0x272   : > { %v3566_v31 = vmax.f32 %v3518_v29, 0.0  ;;  %v3519_v25 = vadd.f32 %v5905_v34, %v3459_v55  ;;  %v3460_v45 = vadd.f32 %v3347_v4, %v3093_v56  ;;  %v6275_v29 = vld [vmem:[#allocation15_spill] sm:$0xff]  ;;  %v5937_v8 = vpop.f32.mrf.mxu1 }
 0x273   : > { %v3349_v32 = vpop.f32.mrf.mxu0  ;;  %v3098_v55 = vadd.f32 %v5763_v12, %v6275_v29  ;;  %v3100_v12 = vadd.f32 %v5780_v47, %v5741_v54 }
 0x274   : > { %v3612_v51 = vpack.c.bf16 %v3566_v31, %v3564_v7  ;;  %v3567_v3 = vmax.f32 %v3519_v25, 0.0  ;;  %v3461_v21 = vadd.f32 %v3349_v32, %v3094_v60  ;;  %v3520_v35 = vadd.f32 %v5899_v43, %v3460_v45  ;;  %v6276_v31 = vld [vmem:[#allocation5_spill] sm:$0xff] }
 0x275   : > { %v3351_v59 = vpop.f32.mrf.mxu0  ;;  %v3099_v25 = vadd.f32 %v5773_v1, %v6276_v31 }
 0x276   : > { %v3462_v14 = vadd.f32 %v3351_v59, %v3095_v49  ;;  %v3613_v57 = vpack.c.bf16 %v3567_v3, %v3565_v24  ;;  %v3521_v53 = vadd.f32 %v5905_v34, %v3461_v21  ;;  %v3568_v18 = vmax.f32 %v3520_v35, 0.0 }
 0x277   : > { %v3353_v40 = vpop.f32.mrf.mxu0 }
 0x278   : > { %v3522_v56 = vadd.f32 %v5899_v43, %v3462_v14  ;;  %v3463_v27 = vadd.f32 %v3353_v40, %v3096_v2  ;;  %3803 = vmatprep.mubr.bf16.mxu1 %v3613_v57  ;;  %v3569_v45 = vmax.f32 %v3521_v53, 0.0  ;;  %v5942_v2 = vpop.f32.mrf.mxu1  ;;  %v6277_v14 = vld [vmem:[#allocation6_spill] sm:$0xff]  ;;  %v6278_v53 = vld [vmem:[#allocation8_spill] sm:$0xff] }
 0x279   : > { %v3357_v0 = vpop.f32.mrf.mxu0  ;;  %3804 = vmatmul.mubr.bf16.vlgmr.msra.gmra.mxu1 %v3612_v51  ;;  %v3101_v1 = vadd.f32 %v5790_v15, %v6277_v14 }
 0x27a   : > { %v3570_v60 = vmax.f32 %v3522_v56, 0.0  ;;  %v3523_v4 = vadd.f32 %v5905_v34, %v3463_v27  ;;  %v3464_v7 = vadd.f32 %v3357_v0, %v3097_v63  ;;  %v3102_v56 = vadd.f32 %v5797_v9, %v6278_v53  ;;  %v5953_v15 = vpop.f32.mrf.mxu1 }
 0x27b   : > { %v3359_v50 = vpop.f32.mrf.mxu0  ;;  %v3103_v0 = vadd.f32 %v5807_v61, %v5754_v58  ;;  %v3104_v9 = vadd.f32 %v5814_v13, %v5758_v11 }
 0x27c   : > { %v3614_v49 = vpack.c.bf16 %v3570_v60, %v3568_v18  ;;  %v3571_v32 = vmax.f32 %v3523_v4, 0.0  ;;  %v3465_v24 = vadd.f32 %v3359_v50, %v3098_v55  ;;  %v3524_v51 = vadd.f32 %v5899_v43, %v3464_v7 }
 0x27d   : > { %v3361_v3 = vpop.f32.mrf.mxu0 }
 0x27e   : > { %v3466_v21 = vadd.f32 %v3361_v3, %v3099_v25  ;;  %v3615_v59 = vpack.c.bf16 %v3571_v32, %v3569_v45  ;;  %v3525_v57 = vadd.f32 %v5905_v34, %v3465_v24  ;;  %v3572_v47 = vmax.f32 %v3524_v51, 0.0  ;;  %v5958_v32 = vpop.f32.mrf.mxu1  ;;  %v6279_v3 = vld [vmem:[#allocation9_spill] sm:$0xff] }
 0x27f   : > { %v3363_v35 = vpop.f32.mrf.mxu0  ;;  %v3105_v58 = vadd.f32 %v5824_v23, %v6279_v3 }
 0x280   : > { %v3526_v40 = vadd.f32 %v5899_v43, %v3466_v21  ;;  %v3467_v63 = vadd.f32 %v3363_v35, %v3100_v12  ;;  %3811 = vmatprep.mubr.bf16.mxu1 %v3615_v59  ;;  %v3573_v60 = vmax.f32 %v3525_v57, 0.0  ;;  %v6280_v21 = vld [vmem:[#allocation10_spill] sm:$0xff]  ;;  %v3107_v57 = vadd.f32 %v5839_v44, %v5771_v36  ;;  %v5969_v23 = vpop.f32.mrf.mxu1 }
 0x281   : > { %v3367_v54 = vpop.f32.mrf.mxu0  ;;  %3812 = vmatmul.mubr.bf16.gmra.mxu1 %v3614_v49  ;;  %v3106_v59 = vadd.f32 %v5831_v37, %v6280_v21  ;;  %v3108_v37 = vadd.f32 %v5847_v33, %v5775_v30  ;;  %v3109_v36 = vadd.f32 %v5855_v26, %v5778_v10 }
 0x282   : > { %v3574_v27 = vmax.f32 %v3526_v40, 0.0  ;;  %v3527_v29 = vadd.f32 %v5905_v34, %v3467_v63  ;;  %v3468_v55 = vadd.f32 %v3367_v54, %v3101_v1 }
 0x283   : > { %v3369_v18 = vpop.f32.mrf.mxu0 }
 0x284   : > { %v3616_v4 = vpack.c.bf16 %v3574_v27, %v3572_v47  ;;  %v3575_v7 = vmax.f32 %v3527_v29, 0.0  ;;  %v3469_v31 = vadd.f32 %v3369_v18, %v3102_v56  ;;  %v3528_v50 = vadd.f32 %v5899_v43, %v3468_v55 }
 0x285   : > { %v3371_v25 = vpop.f32.mrf.mxu0 }
 0x286   : > { %v3470_v45 = vadd.f32 %v3371_v25, %v3103_v0  ;;  %v3617_v49 = vpack.c.bf16 %v3575_v7, %v3573_v60  ;;  %v3529_v61 = vadd.f32 %v5905_v34, %v3469_v31  ;;  %v3576_v13 = vmax.f32 %v3528_v50, 0.0  ;;  %v5974_v0 = vpop.f32.mrf.mxu1  ;;  %v6281_v7 = vld [vmem:[#allocation7_spill] sm:$0xff] }
 0x287   : > { %v3373_v24 = vpop.f32.mrf.mxu0  ;;  %v3110_v31 = vadd.f32 %v5863_v28, %v6281_v7  ;;  %v3112_v28 = vadd.f32 %v5879_v5, %v5792_v46 }
 0x288   : > { %v3530_v12 = vadd.f32 %v5899_v43, %v3470_v45  ;;  %v3471_v51 = vadd.f32 %v3373_v24, %v3104_v9  ;;  %3819 = vmatprep.mubr.bf16.mxu1 %v3617_v49  ;;  %v3577_v63 = vmax.f32 %v3529_v61, 0.0  ;;  %v6282_v45 = vld [vmem:[#allocation11_spill] sm:$0xff]  ;;  %v5985_v10 = vpop.f32.mrf.mxu1 }
 0x289   : > { %v3377_v11 = vpop.f32.mrf.mxu0  ;;  %3820 = vmatmul.mubr.bf16.gmra.mxu1 %v3616_v4  ;;  %v3111_v49 = vadd.f32 %v5871_v42, %v6282_v45  ;;  %v6287_v45 = vld [vmem:[#allocation17_spill] sm:$0xff] }
 0x28a   : > { %v3578_v35 = vmax.f32 %v3530_v12, 0.0  ;;  %v3531_v14 = vadd.f32 %v5905_v34, %v3471_v51  ;;  %v3472_v1 = vadd.f32 %v3377_v11, %v3105_v58  ;;  %v5990_v11 = vpop.f32.mrf.mxu1 }
 0x28b   : > { %v3379_v40 = vpop.f32.mrf.mxu0 }
 0x28c   : > { %v3618_v53 = vpack.c.bf16 %v3578_v35, %v3576_v13  ;;  %v3579_v56 = vmax.f32 %v3531_v14, 0.0  ;;  %v3473_v54 = vadd.f32 %v3379_v40, %v3106_v59  ;;  %v3532_v27 = vadd.f32 %v5899_v43, %v3472_v1  ;;  %v6283_v35 = vld [vmem:[#allocation12_spill] sm:$0xff]  ;;  %v6284_v40 = vld [vmem:[#allocation13_spill] sm:$0xff] }
 0x28d   : > { %v3381_v47 = vpop.f32.mrf.mxu0  ;;  %v3113_v42 = vadd.f32 %v5887_v6, %v6283_v35  ;;  %v6001_v6 = vpop.f32.mrf.mxu1 }
 0x28e   : > { %v3474_v29 = vadd.f32 %v3381_v47, %v3107_v57  ;;  %v3619_v55 = vpack.c.bf16 %v3579_v56, %v3577_v63  ;;  %v3533_v44 = vadd.f32 %v5905_v34, %v3473_v54  ;;  %v3580_v33 = vmax.f32 %v3532_v27, 0.0  ;;  %v6285_v47 = vld [vmem:[#allocation14_spill] sm:$0xff] }
 0x28f   : > { %v3383_v18 = vpop.f32.mrf.mxu0  ;;  %v3114_v63 = vadd.f32 %v5901_v16, %v6284_v40  ;;  %v3116_v16 = vadd.f32 %v5921_v22, %v5809_v39 }
 0x290   : > { %v3534_v60 = vadd.f32 %v5899_v43, %v3474_v29  ;;  %v3475_v4 = vadd.f32 %v3383_v18, %v3108_v37  ;;  %3827 = vmatprep.mubr.bf16.mxu1 %v3619_v55  ;;  %v3581_v24 = vmax.f32 %v3533_v44, 0.0  ;;  %v3115_v37 = vadd.f32 %v5910_v41, %v6285_v47 }
 0x291   : > { %v3387_v30 = vpop.f32.mrf.mxu0  ;;  %3828 = vmatmul.mubr.bf16.gmra.mxu1 %v3618_v53 }
 0x292   : > { %v3582_v25 = vmax.f32 %v3534_v60, 0.0  ;;  %v3535_v9 = vadd.f32 %v5905_v34, %v3475_v4  ;;  %v3476_v50 = vadd.f32 %v3387_v30, %v3109_v36 }
 0x293   : > { %v3389_v26 = vpop.f32.mrf.mxu0 }
 0x294   : > { %v3620_v3 = vpack.c.bf16 %v3582_v25, %v3580_v33  ;;  %v3583_v58 = vmax.f32 %v3535_v9, 0.0  ;;  %v3477_v61 = vadd.f32 %v3389_v26, %v3110_v31  ;;  %v3536_v51 = vadd.f32 %v5899_v43, %v3476_v50  ;;  %v6006_v31 = vpop.f32.mrf.mxu1  ;;  %v6286_v33 = vld [vmem:[#allocation16_spill] sm:$0xff] }
 0x295   : > { %v3391_v12 = vpop.f32.mrf.mxu0  ;;  %v3117_v41 = vadd.f32 %v5926_v52, %v6286_v33  ;;  %v6290_v33 = vld [vmem:[#allocation20_spill] sm:$0xff] }
 0x296   : > { %v3478_v21 = vadd.f32 %v3391_v12, %v3111_v49  ;;  %v3621_v59 = vpack.c.bf16 %v3583_v58, %v3581_v24  ;;  %v3537_v14 = vadd.f32 %v5905_v34, %v3477_v61  ;;  %v3584_v5 = vmax.f32 %v3536_v51, 0.0  ;;  %v3066_v52 = vpop.f32.mrf.mxu1 }
 0x297   : > { %v3393_v13 = vpop.f32.mrf.mxu0  ;;  %v3118_v49 = vadd.f32 %v5937_v8, %v6287_v45  ;;  %v3119_v58 = vadd.f32 %v5942_v2, %v5822_v20  ;;  %v3120_v8 = vadd.f32 %v5953_v15, %v5826_v48  ;;  %v6291_v45 = vld [vmem:[#allocation21_spill] sm:$0xff] }
 0x298   : > { %v3538_v1 = vadd.f32 %v5899_v43, %v3478_v21  ;;  %v3479_v57 = vadd.f32 %v3393_v13, %v3112_v28  ;;  %3835 = vmatprep.mubr.bf16.mxu1 %v3621_v59  ;;  %v3585_v29 = vmax.f32 %v3537_v14, 0.0  ;;  %v3070_v14 = vpop.f32.mrf.mxu1 }
 0x299   : > { %v3397_v46 = vpop.f32.mrf.mxu0  ;;  %3836 = vmatmul.mubr.bf16.gmra.mxu1 %v3620_v3 }
 0x29a   : > { %v3586_v53 = vmax.f32 %v3538_v1, 0.0  ;;  %v3539_v56 = vadd.f32 %v5905_v34, %v3479_v57  ;;  %v3480_v54 = vadd.f32 %v3397_v46, %v3113_v42  ;;  %v3121_v57 = vadd.f32 %v5958_v32, %v5829_v17  ;;  %v3072_v17 = vpop.f32.mrf.mxu1 }
 0x29b   : > { %v3399_v27 = vpop.f32.mrf.mxu0 }
 0x29c   : > { %v3622_v55 = vpack.c.bf16 %v3586_v53, %v3584_v5  ;;  %v3587_v18 = vmax.f32 %v3539_v56, 0.0  ;;  %v3481_v36 = vadd.f32 %v3399_v27, %v3114_v63  ;;  %v3540_v60 = vadd.f32 %v5899_v43, %v3480_v54  ;;  %v6288_v56 = vld [vmem:[#allocation18_spill] sm:$0xff] }
 0x29d   : > { %v3401_v44 = vpop.f32.mrf.mxu0  ;;  %v3122_v63 = vadd.f32 %v5969_v23, %v5834_v62  ;;  %v3123_v54 = vadd.f32 %v5974_v0, %v6288_v56  ;;  %v3124_v62 = vadd.f32 %v5985_v10, %v5842_v19 }
 0x29e   : > { %v3482_v4 = vadd.f32 %v3401_v44, %v3115_v37  ;;  %v3623_v7 = vpack.c.bf16 %v3587_v18, %v3585_v29  ;;  %v3541_v25 = vadd.f32 %v5905_v34, %v3481_v36  ;;  %v3588_v22 = vmax.f32 %v3540_v60, 0.0  ;;  %v3074_v44 = vpop.f32.mrf.mxu1  ;;  %v6289_v60 = vld [vmem:[#allocation19_spill] sm:$0xff] }
 0x29f   : > { %v3403_v30 = vpop.f32.mrf.mxu0 }
 0x2a0   : > { %v3542_v9 = vadd.f32 %v5899_v43, %v3482_v4  ;;  %v3483_v50 = vadd.f32 %v3403_v30, %v3116_v16  ;;  %3843 = vmatprep.mubr.bf16.mxu1 %v3623_v7  ;;  %v3589_v12 = vmax.f32 %v3541_v25, 0.0  ;;  %v3125_v4 = vadd.f32 %v5990_v11, %v6289_v60  ;;  %v3076_v11 = vpop.f32.mrf.mxu1  ;;  %v6298_v60 = vld [vmem:[#allocation28_spill] sm:$0xff] }
 0x2a1   : > { %v3407_v39 = vpop.f32.mrf.mxu0  ;;  %3844 = vmatmul.mubr.bf16.gmra.mxu1 %v3622_v55 }
 0x2a2   : > { %v3590_v26 = vmax.f32 %v3542_v9, 0.0  ;;  %v3543_v24 = vadd.f32 %v5905_v34, %v3483_v50  ;;  %v3484_v3 = vadd.f32 %v3407_v39, %v3117_v41  ;;  %v3126_v41 = vadd.f32 %v6001_v6, %v6290_v33 }
 0x2a3   : > { %v3409_v61 = vpop.f32.mrf.mxu0 }
 0x2a4   : > { %v3624_v28 = vpack.c.bf16 %v3590_v26, %v3588_v22  ;;  %v3591_v51 = vmax.f32 %v3543_v24, 0.0  ;;  %v3485_v21 = vadd.f32 %v3409_v61, %v3118_v49  ;;  %v3544_v13 = vadd.f32 %v5899_v43, %v3484_v3  ;;  %v6292_v61 = vld [vmem:[#allocation22_spill] sm:$0xff] }
 0x2a5   : > { %v3411_v59 = vpop.f32.mrf.mxu0  ;;  %v3127_v49 = vadd.f32 %v6006_v31, %v6291_v45 }
 0x2a6   : > { %v3486_v35 = vadd.f32 %v3411_v59, %v3119_v58  ;;  %v3625_v42 = vpack.c.bf16 %v3591_v51, %v3589_v12  ;;  %v3545_v20 = vadd.f32 %v5905_v34, %v3485_v21  ;;  %v3592_v48 = vmax.f32 %v3544_v13, 0.0  ;;  %v3080_v21 = vpop.f32.mrf.mxu1 }
 0x2a7   : > { %v3413_v1 = vpop.f32.mrf.mxu0  ;;  %v3128_v12 = vadd.f32 %v3066_v52, %v6292_v61 }
 0x2a8   : > { %v3546_v2 = vadd.f32 %v5899_v43, %v3486_v35  ;;  %v3487_v40 = vadd.f32 %v3413_v1, %v3120_v8  ;;  %3851 = vmatprep.mubr.bf16.mxu1 %v3625_v42  ;;  %v3593_v47 = vmax.f32 %v3545_v20, 0.0  ;;  %v6293_v8 = vld [vmem:[#allocation23_spill] sm:$0xff]  ;;  %v6294_v1 = vld [vmem:[#allocation24_spill] sm:$0xff] }
 0x2a9   : > { %v3417_v46 = vpop.f32.mrf.mxu0  ;;  %3852 = vmatmul.mubr.bf16.gmra.mxu1 %v3624_v28  ;;  %v3129_v13 = vadd.f32 %v3070_v14, %v6293_v8 }
 0x2aa   : > { %v3594_v15 = vmax.f32 %v3546_v2, 0.0  ;;  %v3547_v5 = vadd.f32 %v5905_v34, %v3487_v40  ;;  %v3488_v53 = vadd.f32 %v3417_v46, %v3121_v57  ;;  %v3130_v57 = vadd.f32 %v3072_v17, %v6294_v1  ;;  %v6295_v46 = vld [vmem:[#allocation25_spill] sm:$0xff] }
 0x2ab   : > { %v3419_v32 = vpop.f32.mrf.mxu0 }
 0x2ac   : > { %v3626_v37 = vpack.c.bf16 %v3594_v15, %v3592_v48  ;;  %v3595_v27 = vmax.f32 %v3547_v5, 0.0  ;;  %v3489_v29 = vadd.f32 %v3419_v32, %v3122_v63  ;;  %v3548_v23 = vadd.f32 %v5899_v43, %v3488_v53  ;;  %v3082_v15 = vpop.f32.mrf.mxu1 }
 0x2ad   : > { %v3421_v55 = vpop.f32.mrf.mxu0  ;;  %v3131_v48 = vadd.f32 %v3074_v44, %v6295_v46 }
 0x2ae   : > { %v3490_v18 = vadd.f32 %v3421_v55, %v3123_v54  ;;  %v3627_v36 = vpack.c.bf16 %v3595_v27, %v3593_v47  ;;  %v3549_v0 = vadd.f32 %v5905_v34, %v3489_v29  ;;  %v3596_v19 = vmax.f32 %v3548_v23, 0.0  ;;  %v6296_v47 = vld [vmem:[#allocation26_spill] sm:$0xff]  ;;  %v3084_v55 = vpop.f32.mrf.mxu1  ;;  %v6297_v23 = vld [vmem:[#allocation27_spill] sm:$0xff] }
 0x2af   : > { %v3423_v16 = vpop.f32.mrf.mxu0 }
 0x2b0   : > { %v3550_v7 = vadd.f32 %v5899_v43, %v3490_v18  ;;  %v3491_v30 = vadd.f32 %v3423_v16, %v3124_v62  ;;  %3859 = vmatprep.mubr.bf16.mxu1 %v3627_v36  ;;  %v3597_v22 = vmax.f32 %v3549_v0, 0.0  ;;  %v3133_v18 = vadd.f32 %v3080_v21, %v6297_v23 }
 0x2b1   : > { %v3427_v25 = vpop.f32.mrf.mxu0  ;;  %3860 = vmatmul.mubr.bf16.gmra.mxu1 %v3626_v37  ;;  %v3132_v37 = vadd.f32 %v3076_v11, %v6296_v47 }
 0x2b2   : > { %v3598_v10 = vmax.f32 %v3550_v7, 0.0  ;;  %v3551_v9 = vadd.f32 %v5905_v34, %v3491_v30  ;;  %v3492_v50 = vadd.f32 %v3427_v25, %v3125_v4  ;;  %v3134_v4 = vadd.f32 %v3082_v15, %v6298_v60  ;;  %v6299_v25 = vld [vmem:[#allocation29_spill] sm:$0xff] }
 0x2b3   : > { %v3429_v39 = vpop.f32.mrf.mxu0 }
 0x2b4   : > { %v3628_v26 = vpack.c.bf16 %v3598_v10, %v3596_v19  ;;  %v3599_v24 = vmax.f32 %v3551_v9, 0.0  ;;  %v3493_v3 = vadd.f32 %v3429_v39, %v3126_v41  ;;  %v3552_v6 = vadd.f32 %v5899_v43, %v3492_v50  ;;  %v3086_v10 = vpop.f32.mrf.mxu1 }
 0x2b5   : > { %v3431_v58 = vpop.f32.mrf.mxu0  ;;  %v3135_v19 = vadd.f32 %v3084_v55, %v6299_v25 }
 0x2b6   : > { %v3494_v28 = vadd.f32 %v3431_v58, %v3127_v49  ;;  %v3629_v51 = vpack.c.bf16 %v3599_v24, %v3597_v22  ;;  %v3553_v35 = vadd.f32 %v5905_v34, %v3493_v3  ;;  %v3600_v2 = vmax.f32 %v3552_v6, 0.0 }
 0x2b7   : > { %v3433_v59 = vpop.f32.mrf.mxu0  ;;  %v3136_v22 = vadd.f32 %v3086_v10, %v5895_v38 }
 0x2b8   : > { %v3554_v31 = vadd.f32 %v5899_v43, %v3494_v28  ;;  %v3495_v42 = vadd.f32 %v3433_v59, %v3128_v12  ;;  %3867 = vmatprep.mubr.bf16.mxu1 %v3629_v51  ;;  %v3601_v14 = vmax.f32 %v3553_v35, 0.0 }
 0x2b9   : > { %v3437_v20 = vpop.f32.mrf.mxu0  ;;  %3868 = vmatmul.mubr.bf16.gmra.mxu1 %v3628_v26 }
 0x2ba   : > { %v3602_v52 = vmax.f32 %v3554_v31, 0.0  ;;  %v3555_v40 = vadd.f32 %v5905_v34, %v3495_v42  ;;  %v3496_v63 = vadd.f32 %v3437_v20, %v3129_v13 }
 0x2bb   : > { %v3439_v5 = vpop.f32.mrf.mxu0 }
 0x2bc   : > { %v3630_v53 = vpack.c.bf16 %v3602_v52, %v3600_v2  ;;  %v3603_v56 = vmax.f32 %v3555_v40, 0.0  ;;  %v3497_v54 = vadd.f32 %v3439_v5, %v3130_v57  ;;  %v3556_v17 = vadd.f32 %v5899_v43, %v3496_v63 }
 0x2bd   : > { %v3441_v32 = vpop.f32.mrf.mxu0 }
 0x2be   : > { %v3498_v27 = vadd.f32 %v3441_v32, %v3131_v48  ;;  %v3631_v29 = vpack.c.bf16 %v3603_v56, %v3601_v14  ;;  %v3557_v36 = vadd.f32 %v5905_v34, %v3497_v54  ;;  %v3604_v7 = vmax.f32 %v3556_v17, 0.0 }
 0x2bf   : > { %v3443_v62 = vpop.f32.mrf.mxu0 }
 0x2c0   : > { %v3558_v44 = vadd.f32 %v5899_v43, %v3498_v27  ;;  %v3499_v16 = vadd.f32 %v3443_v62, %v3132_v37  ;;  %3875 = vmatprep.mubr.bf16.mxu1 %v3631_v29  ;;  %v3605_v50 = vmax.f32 %v3557_v36, 0.0 }
 0x2c1   : > { %v3447_v0 = vpop.f32.mrf.mxu0  ;;  %3876 = vmatmul.mubr.bf16.gmra.mxu1 %v3630_v53 }
 0x2c2   : > { %v3606_v30 = vmax.f32 %v3558_v44, 0.0  ;;  %v3559_v33 = vadd.f32 %v5905_v34, %v3499_v16  ;;  %v3500_v41 = vadd.f32 %v3447_v0, %v3133_v18 }
 0x2c3   : > { %v3449_v9 = vpop.f32.mrf.mxu0 }
 0x2c4   : > { %v3632_v45 = vpack.c.bf16 %v3606_v30, %v3604_v7  ;;  %v3607_v49 = vmax.f32 %v3559_v33, 0.0  ;;  %v3501_v11 = vadd.f32 %v3449_v9, %v3134_v4  ;;  %v3560_v26 = vadd.f32 %v5899_v43, %v3500_v41 }
 0x2c5   : > { %v3451_v39 = vpop.f32.mrf.mxu0 }
 0x2c6   : > { %v3502_v24 = vadd.f32 %v3451_v39, %v3135_v19  ;;  %v3633_v3 = vpack.c.bf16 %v3607_v49, %v3605_v50  ;;  %v3561_v61 = vadd.f32 %v5905_v34, %v3501_v11  ;;  %v3608_v28 = vmax.f32 %v3560_v26, 0.0 }
 0x2c7   : > { %v3453_v58 = vpop.f32.mrf.mxu0 }
 0x2c8   : > { %v3562_v12 = vadd.f32 %v5899_v43, %v3502_v24  ;;  %v3503_v6 = vadd.f32 %v3453_v58, %v3136_v22  ;;  %3883 = vmatprep.mubr.bf16.mxu1 %v3633_v3  ;;  %v3609_v59 = vmax.f32 %v3561_v61, 0.0  ;;  %v6068_v43 = vld [vmem:[%s6187_s4] ss:$0 sm:$0xff] }
 0x2c9   : > { %3884 = vmatmul.mubr.bf16.gmra.mxu1 %v3632_v45 }
 0x2ca   : > { %v3610_v51 = vmax.f32 %v3562_v12, 0.0  ;;  %v3563_v21 = vadd.f32 %v5905_v34, %v3503_v6 }
 0x2cc   : > { %v3634_v38 = vpack.c.bf16 %v3610_v51, %v3608_v28  ;;  %v3611_v8 = vmax.f32 %v3563_v21, 0.0 }
 0x2ce   : > { %v3635_v13 = vpack.c.bf16 %v3611_v8, %v3609_v59 }
 0x2d0   : > { %3891 = vmatprep.mubr.bf16.mxu1 %v3635_v13 }
 0x2d1   : > { %3892 = vmatmul.mubr.bf16.gmra.mxu1 %v3634_v38 }
 0x339   : > { %v4303_v35 = vpop.f32.mrf.mxu1 }
 0x33b   : > { %v4304_v31 = vpop.f32.mrf.mxu1 }
 0x33c   : > { %v4305_v42 = vadd.f32 %v4304_v31, %v4303_v35 }
 0x33d   : > { %v4306_v1 = vpop.f32.mrf.mxu1 }
 0x33e   : > { %v3806_v34 = vadd.f32 %v4305_v42, %v6068_v43 }
 0x33f   : > { %v4307_v57 = vpop.f32.mrf.mxu1 }
 0x340   : > { %3900 = vst [vmem:[%s6071_s30] sm:$0xff] %v3806_v34  ;;  %v4308_v20 = vadd.f32 %v4307_v57, %v4306_v1 }
 0x341   : > { %v4309_v2 = vpop.f32.mrf.mxu1 }
 0x342   : > { %v3809_v52 = vadd.f32 %v4308_v20, %v6068_v43 }
 0x343   : > { %v4310_v40 = vpop.f32.mrf.mxu1 }
 0x344   : > { %3901 = vst [vmem:[%s6071_s30 + $0x8] sm:$0xff] %v3809_v52  ;;  %v4311_v63 = vadd.f32 %v4310_v40, %v4309_v2 }
 0x345   : > { %v4312_v46 = vpop.f32.mrf.mxu1 }
 0x346   : > { %v3814_v48 = vadd.f32 %v4311_v63, %v6068_v43 }
 0x347   : > { %v4313_v15 = vpop.f32.mrf.mxu1 }
 0x348   : > { %3902 = vst [vmem:[%s6071_s30 + $0x10] sm:$0xff] %v3814_v48  ;;  %v4314_v5 = vadd.f32 %v4313_v15, %v4312_v46 }
 0x349   : > { %v4315_v14 = vpop.f32.mrf.mxu1 }
 0x34a   : > { %v3817_v53 = vadd.f32 %v4314_v5, %v6068_v43 }
 0x34b   : > { %v4316_v56 = vpop.f32.mrf.mxu1 }
 0x34c   : > { %3903 = vst [vmem:[%s6071_s30 + $0x18] sm:$0xff] %v3817_v53  ;;  %v4317_v54 = vadd.f32 %v4316_v56, %v4315_v14 }
 0x34d   : > { %v4318_v32 = vpop.f32.mrf.mxu1 }
 0x34e   : > { %v3822_v47 = vadd.f32 %v4317_v54, %v6068_v43 }
 0x34f   : > { %v4319_v37 = vpop.f32.mrf.mxu1 }
 0x350   : > { %3904 = vst [vmem:[%s6071_s30 + $0x20] sm:$0xff] %v3822_v47  ;;  %v4320_v17 = vadd.f32 %v4319_v37, %v4318_v32 }
 0x351   : > { %v4321_v27 = vpop.f32.mrf.mxu1 }
 0x352   : > { %v3825_v29 = vadd.f32 %v4320_v17, %v6068_v43 }
 0x353   : > { %v4322_v55 = vpop.f32.mrf.mxu1 }
 0x354   : > { %3905 = vst [vmem:[%s6071_s30 + $0x28] sm:$0xff] %v3825_v29  ;;  %v4323_v62 = vadd.f32 %v4322_v55, %v4321_v27 }
 0x355   : > { %v4324_v23 = vpop.f32.mrf.mxu1 }
 0x356   : > { %v3830_v18 = vadd.f32 %v4323_v62, %v6068_v43 }
 0x357   : > { %v4325_v36 = vpop.f32.mrf.mxu1 }
 0x358   : > { %3906 = vst [vmem:[%s6071_s30 + $0x30] sm:$0xff] %v3830_v18  ;;  %v4326_v44 = vadd.f32 %v4325_v36, %v4324_v23 }
 0x359   : > { %v4327_v16 = vpop.f32.mrf.mxu1 }
 0x35a   : > { %v3833_v60 = vadd.f32 %v4326_v44, %v6068_v43 }
 0x35b   : > { %v4328_v4 = vpop.f32.mrf.mxu1 }
 0x35c   : > { %3907 = vst [vmem:[%s6071_s30 + $0x38] sm:$0xff] %v3833_v60  ;;  %v4329_v0 = vadd.f32 %v4328_v4, %v4327_v16 }
 0x35d   : > { %v4330_v7 = vpop.f32.mrf.mxu1 }
 0x35e   : > { %v3838_v30 = vadd.f32 %v4329_v0, %v6068_v43 }
 0x35f   : > { %v4331_v33 = vpop.f32.mrf.mxu1 }
 0x360   : > { %3908 = vst [vmem:[%s6071_s30 + $0x40] sm:$0xff] %v3838_v30  ;;  %v4332_v41 = vadd.f32 %v4331_v33, %v4330_v7 }
 0x361   : > { %v4333_v25 = vpop.f32.mrf.mxu1 }
 0x362   : > { %v3841_v19 = vadd.f32 %v4332_v41, %v6068_v43 }
 0x363   : > { %v4334_v10 = vpop.f32.mrf.mxu1 }
 0x364   : > { %3909 = vst [vmem:[%s6071_s30 + $0x48] sm:$0xff] %v3841_v19  ;;  %v4335_v9 = vadd.f32 %v4334_v10, %v4333_v25 }
 0x365   : > { %v4336_v50 = vpop.f32.mrf.mxu1 }
 0x366   : > { %v3846_v45 = vadd.f32 %v4335_v9, %v6068_v43 }
 0x367   : > { %v4337_v49 = vpop.f32.mrf.mxu1 }
 0x368   : > { %3910 = vst [vmem:[%s6071_s30 + $0x50] sm:$0xff] %v3846_v45  ;;  %v4338_v11 = vadd.f32 %v4337_v49, %v4336_v50 }
 0x369   : > { %v4339_v39 = vpop.f32.mrf.mxu1 }
 0x36a   : > { %v3849_v22 = vadd.f32 %v4338_v11, %v6068_v43 }
 0x36b   : > { %v4340_v26 = vpop.f32.mrf.mxu1 }
 0x36c   : > { %3911 = vst [vmem:[%s6071_s30 + $0x58] sm:$0xff] %v3849_v22  ;;  %v4341_v24 = vadd.f32 %v4340_v26, %v4339_v39 }
 0x36d   : > { %v4342_v3 = vpop.f32.mrf.mxu1 }
 0x36e   : > { %v3854_v58 = vadd.f32 %v4341_v24, %v6068_v43 }
 0x36f   : > { %v4343_v61 = vpop.f32.mrf.mxu1 }
 0x370   : > { %3912 = vst [vmem:[%s6071_s30 + $0x60] sm:$0xff] %v3854_v58  ;;  %v4344_v12 = vadd.f32 %v4343_v61, %v4342_v3 }
 0x371   : > { %v4345_v6 = vpop.f32.mrf.mxu1 }
 0x372   : > { %v3857_v28 = vadd.f32 %v4344_v12, %v6068_v43 }
 0x373   : > { %v4346_v51 = vpop.f32.mrf.mxu1 }
 0x374   : > { %3913 = vst [vmem:[%s6071_s30 + $0x68] sm:$0xff] %v3857_v28  ;;  %v4347_v21 = vadd.f32 %v4346_v51, %v4345_v6 }
 0x375   : > { %v4348_v59 = vpop.f32.mrf.mxu1 }
 0x376   : > { %v3862_v38 = vadd.f32 %v4347_v21, %v6068_v43 }
 0x377   : > { %v4349_v8 = vpop.f32.mrf.mxu1 }
 0x378   : > { %3914 = vst [vmem:[%s6071_s30 + $0x70] sm:$0xff] %v3862_v38  ;;  %v4350_v13 = vadd.f32 %v4349_v8, %v4348_v59 }
 0x379   : > { %v4351_v35 = vpop.f32.mrf.mxu1 }
 0x37a   : > { %v3865_v31 = vadd.f32 %v4350_v13, %v6068_v43 }
 0x37b   : > { %v4352_v42 = vpop.f32.mrf.mxu1 }
 0x37c   : > { %3915 = vst [vmem:[%s6071_s30 + $0x78] sm:$0xff] %v3865_v31  ;;  %v4353_v1 = vadd.f32 %v4352_v42, %v4351_v35 }
 0x37d   : > { %v4354_v34 = vpop.f32.mrf.mxu1 }
 0x37e   : > { %v3870_v57 = vadd.f32 %v4353_v1, %v6068_v43 }
 0x37f   : > { %v4355_v20 = vpop.f32.mrf.mxu1 }
 0x380   : > { %3916 = vst [vmem:[%s6071_s30 + $0x80] sm:$0xff] %v3870_v57  ;;  %v4356_v2 = vadd.f32 %v4355_v20, %v4354_v34 }
 0x381   : > { %v4357_v52 = vpop.f32.mrf.mxu1 }
 0x382   : > { %v3873_v40 = vadd.f32 %v4356_v2, %v6068_v43 }
 0x383   : > { %v4358_v63 = vpop.f32.mrf.mxu1 }
 0x384   : > { %3917 = vst [vmem:[%s6071_s30 + $0x88] sm:$0xff] %v3873_v40  ;;  %v4359_v46 = vadd.f32 %v4358_v63, %v4357_v52 }
 0x385   : > { %v4360_v48 = vpop.f32.mrf.mxu1 }
 0x386   : > { %v3878_v15 = vadd.f32 %v4359_v46, %v6068_v43 }
 0x387   : > { %v4361_v5 = vpop.f32.mrf.mxu1 }
 0x388   : > { %3918 = vst [vmem:[%s6071_s30 + $0x90] sm:$0xff] %v3878_v15  ;;  %v4362_v14 = vadd.f32 %v4361_v5, %v4360_v48 }
 0x389   : > { %v4363_v53 = vpop.f32.mrf.mxu1 }
 0x38a   : > { %v3881_v56 = vadd.f32 %v4362_v14, %v6068_v43 }
 0x38b   : > { %v4364_v54 = vpop.f32.mrf.mxu1 }
 0x38c   : > { %3919 = vst [vmem:[%s6071_s30 + $0x98] sm:$0xff] %v3881_v56  ;;  %v4365_v32 = vadd.f32 %v4364_v54, %v4363_v53 }
 0x38d   : > { %v4366_v47 = vpop.f32.mrf.mxu1 }
 0x38e   : > { %v3886_v37 = vadd.f32 %v4365_v32, %v6068_v43 }
 0x38f   : > { %v4367_v17 = vpop.f32.mrf.mxu1 }
 0x390   : > { %3920 = vst [vmem:[%s6071_s30 + $0xa0] sm:$0xff] %v3886_v37  ;;  %v4368_v27 = vadd.f32 %v4367_v17, %v4366_v47 }
 0x391   : > { %v4369_v29 = vpop.f32.mrf.mxu1 }
 0x392   : > { %v3889_v55 = vadd.f32 %v4368_v27, %v6068_v43 }
 0x393   : > { %v4370_v62 = vpop.f32.mrf.mxu1 }
 0x394   : > { %3921 = vst [vmem:[%s6071_s30 + $0xa8] sm:$0xff] %v3889_v55  ;;  %v4371_v23 = vadd.f32 %v4370_v62, %v4369_v29 }
 0x395   : > { %v4372_v18 = vpop.f32.mrf.mxu1 }
 0x396   : > { %v3894_v36 = vadd.f32 %v4371_v23, %v6068_v43 }
 0x397   : > { %v4373_v44 = vpop.f32.mrf.mxu1 }
 0x398   : > { %3922 = vst [vmem:[%s6071_s30 + $0xb0] sm:$0xff] %v3894_v36  ;;  %v4374_v16 = vadd.f32 %v4373_v44, %v4372_v18 }
 0x39a   : > { %v3897_v60 = vadd.f32 %v4374_v16, %v6068_v43 }
 0x39c   : > { %3923 = vst [vmem:[%s6071_s30 + $0xb8] sm:$0xff] %v3897_v60 }
 0x39d   : > { %4585 = shalt.err (!%p4582_p7)
}
 0x39e   : > { %s4586_s15 = scalar_lea.hbm %s6124_s16, 3072  ;;  %s4590_s10 = scalar_lea.hbm %s6188_s5, 12288 }
 0x39f   : > { %p4587_p9 = scmp.ne.s32.totalorder %s6124_s16, %s4586_s15  ;;  %p4591_p12 = scmp.lt.s32.totalorder %s6124_s16, %s6188_s5 }
 0x3a0   : > { %p4592_p13 = scmp.lt.s32.totalorder %s4590_s10, %s4586_s15 }
 0x3a1   : > { %p4588_p10 = pnand %p4587_p9, %p4751_p3 }
 0x3a2   : > { %p4593_p0 = por %p4592_p13, %p4591_p12 }
 0x3a3   : > { %p4589_p11 = pneg %p4588_p10 }
 0x3a5   : > { %p4594_p1 = pnand %p4593_p0, %p4589_p11 }
 0x3a7   : > { %4597 = shalt.err (!%p4594_p1)
}
 0x3a8   : > { %s4668_s13 = smov 128   ;;  %s4669_s17 = smov 8  }
 0x3a9   : > { %4380 = dma.vmem_to_hbm [thread:$0]  (%p4751_p3), %s6126_s21, 3072, %s6124_s16, %s6132_s14, %s4668_s13, %s4668_s13, %s4669_s17  }
 0x3aa PF: > { %p4386_p2 = scmp.ge.s32.totalorder %s4664_s25, 2  ;;  %s3955_s26 = sand.u32 1, %s4636_s18  }
 0x3ab   : > { %s3956_s27 = scalar_lea.sflag [#allocation3], %s3955_s26 }
 0x3ac   : > { %p4383_p4 = pnand %p4386_p2, %p4760_p8 }
 0x3ae   : > { %p4384_p5 = pneg %p4383_p4 }
 0x3b0   : > { %4631 = dma.done.wait (%p4384_p5), %s3956_s27, 3072  }
 0x3b1   : > { %4633 = vsyncadd (%p4384_p5), %s3956_s27, 4294964224  ;;  %s18_s25 = sadd.s32 1, %s4664_s25   ;;  %s6300_s18 = smov %s4640_s19 }
 0x3b2   : > { %p15_p6 = scmp.ge.s32.totalorder %s18_s25, 6   ;;  %s6301_s19 = smov %s4644_s20 }
 0x3b3   : > { %s6302_s20 = smov %s4769_s11  ;;  %s6303_s21 = smov %s4656_s23 }
 0x3b4   : > { %s6304_s22 = smov %s4660_s24  ;;  %s6305_s23 = smov %s6308_s28 }
 0x3b5   : > { %s6306_s24 = smov %s6312_s29  ;;  %17 = sbr.rel (!%p15_p6) target bundleno = 5 (0x5), region = 83 }
 0x3ba   :  { %3961 = vsyncpa [#allocation3], 1 }
 0x3bb   :  { %3963 = vsyncpa [#allocation3 + $0x1], 1 }

// kernel: tpu_custom_call.1
= control target key start
LH: loop header
LB: loop body
LE: loop exit
PB: predicated region body
PF: predicated region fallthrough
CT: control target
= control target key end

     0   :  { %10 = vsyncpa [#allocation3], 0  ;;  %s6183_s0 = inlined_call_operand.vmem [shape: bf16[2,2,264,4], index: 0, kind: input, shape index: {}]   ;;  %s6184_s1 = inlined_call_operand.vmem [shape: bf16[9,4,256], index: 1, kind: input, shape index: {}]   ;;  %s6185_s2 = inlined_call_operand.vmem [shape: f32[1,256], index: 2, kind: input, shape index: {}]   ;;  %s6186_s3 = inlined_call_operand.vmem [shape: bf16[256,128], index: 3, kind: input, shape index: {}]   ;;  %s6187_s4 = inlined_call_operand.vmem [shape: f32[1,128], index: 4, kind: input, shape index: {}]   ;;  %s6188_s5 = inlined_call_operand.hbm [shape: f32[2,2,192,128], index: 5, kind: output, shape index: {}]  }
   0x1   :  { %12 = vsyncpa [#allocation3 + $0x1], 0  ;;  %s4700_s18 = smov 0   ;;  %s4702_s19 = smov 0  }
   0x2   :  { %s4704_s20 = smov 0   ;;  %s4706_s21 = smov 0  }
   0x3   :  { %s4708_s22 = smov 0   ;;  %s4710_s23 = smov 0  }
   0x4   :  { %s4712_s24 = smov 0   ;;  %s4714_s25 = smov 0  }
   0x5 LB: > { %s4025_s26 = sadd.s32 4294967295, %s4664_s25   ;;  %s4026_s27 = sadd.s32 4294967294, %s4664_s25   ;;  %s4664_s25 = sphi %s4714_s25, %s18_s25   ;;  %s4660_s24 = sphi %s4712_s24, %s6306_s24   ;;  %s4656_s23 = sphi %s4710_s23, %s6305_s23   ;;  %s4652_s22 = sphi %s4708_s22, %s6304_s22   ;;  %s4648_s21 = sphi %s4706_s21, %s6303_s21   ;;  %s4644_s20 = sphi %s4704_s20, %s6302_s20   ;;  %s4640_s19 = sphi %s4702_s19, %s6301_s19   ;;  %s4636_s18 = sphi %s4700_s18, %s6300_s18  }
   0x6   : > { %s27_s28 = sadd.s32 1, %s4656_s23  ;;  %s30_s29 = sadd.s32 1, %s4660_s24 }
   0x7   : > { %p28_p0 = scmp.ge.s32.totalorder %s27_s28, 2  ;;  %p161_p1 = scmp.ne.s32.totalorder %s4644_s20, %s4640_s19 }
   0x8   : > { %p162_p2 = scmp.eq.s32.totalorder %s4025_s26, 3  ;;  %p167_p5 = scmp.ne.s32.totalorder %s4640_s19, %s4636_s18 }
   0x9   : > { %s6308_s28 = smov (%p28_p0, %s27_s28), 0  ;;  %s6310_s29 = smov (!%p28_p0, %s30_s29), %s4660_s24 }
   0xa   : > { %s147_s30 = ssub.s32 %s4656_s23, %s6308_s28  ;;  %p4751_p3 = por %p162_p2, %p161_p1 }
   0xb   : > { %p32_p4 = scmp.ge.s32.totalorder %s6310_s29, 2  ;;  %p168_p6 = scmp.eq.s32.totalorder %s4026_s27, 3 }
   0xc   : > { %p4029_p7 = scmp.ge.s32.totalorder %s4664_s25, 1  ;;  %p210_p9 = scmp.lt.s32.totalorder %s4664_s25, 5 }
   0xd   : > { %s6312_s29 = smov (%p32_p4, %s6310_s29), 0  ;;  %p4760_p8 = por %p168_p6, %p167_p5 }
   0xe   : > { %s146_s8 = ssub.s32 %s4660_s24, %s6312_s29  ;;  %s151_s9 = sadd.s32 1, %s4644_s20 }
   0xf   : > { %s148_s10 = sor.u32 %s147_s30, %s146_s8  ;;  %p211_p10 = pnand %p4029_p7, %p210_p9 }
  0x10   : > { %p149_p11 = scmp.eq.s32.totalorder %s148_s10, 0 }
  0x11   : > { %214 = sbr.rel (%p211_p10) target bundleno = 938 (0x3aa), region = 40 }
  0x12   : > { %s4769_s11 = scalar_select %p149_p11, %s4644_s20, %s151_s9  }
  0x16   : > { %v4045_v0 = vld.sshfl [vmem:[%s6184_s1 + $0x4] sm:$0x33 pattern:$0x76325410]  ;;  %vm490_vm0 = vcmask 1041408   ;;  %v6189_v4 = vmov 0  }
  0x17   : > { %v452_v1 = vcombine.high %v4045_v0, %v4045_v0  ;;  %v492_v2 = vsel %vm490_vm0, %v4045_v0, 0  ;;  %v4059_v3 = vld.sshfl [vmem:[%s6184_s1] sm:$0x33 pattern:$0x76325410]  ;;  %529 = vmatprep.mubr.bf16.mxu0 %v6189_v4  ;;  %721 = vmatprep.mubr.bf16.mxu1 %v6189_v4  ;;  %p242_p12 = scmp.lt.s32.totalorder %s4652_s22, 1 }
  0x18   : > { %v658_v5 = vcombine.high %v4059_v3, %v4059_v3  ;;  %v684_v6 = vsel %vm490_vm0, %v4059_v3, 0  ;;  %v4087_v7 = vld.sshfl [vmem:[%s6184_s1 + $0x8] sm:$0x33 pattern:$0x76325410]  ;;  %p244_p13 = scmp.lt.s32.totalorder %s4648_s21, 1 }
  0x19   : > { %4046 = vmatprep.subr.msk.bf16.mxu0 %vm490_vm0, %v452_v1  ;;  %v966_v8 = vcombine.high %v4087_v7, %v4087_v7  ;;  %s243_s26 = scalar_select %p242_p12, %s4652_s22, 1  ;;  %v4114_v9 = vld.sshfl [vmem:[%s6184_s1 + $0xc] sm:$0x33 pattern:$0x76325410]  ;;  %vm453_vm1 = vcmask 31744  }
  0x1a   : > { %512 = vmatpush1.bf16.msra.mxu0 %v492_v2  ;;  %4060 = vmatprep.subr.msk.bf16.mxu1 %vm490_vm0, %v658_v5  ;;  %s245_s27 = scalar_select %p244_p13, %s4648_s21, 1  ;;  %v1304_v10 = vcombine.high %v4114_v9, %v4114_v9  ;;  %v1342_v13 = vsel %vm490_vm0, %v4114_v9, 0  ;;  %v4809_v18 = vld.sshfl [vmem:[%s6184_s1 + $0x10] sm:$0x33 pattern:$0x76325410] }
  0x1b   : > { %704 = vmatpush1.bf16.msra.mxu1 %v684_v6  ;;  %4088 = vmatprep.subr.msk.bf16.mxu0 %vm490_vm0, %v966_v8  ;;  %s4377_s9 = smul.u32 66, %s243_s26  ;;  %vm343_vm2 = vsmask.f32 7424  ;;  %v1004_v24 = vsel %vm490_vm0, %v4087_v7, 0  ;;  %v1746_v25 = vcombine.high %v4809_v18, %v4809_v18  ;;  %vm932_vm3 = vcmask 1046528   ;;  %s239_s15 = sand.u32 1, %s4640_s19  }
  0x1c   : > { %s4376_s10 = smul.u32 33, %s245_s27  ;;  %4115 = vmatprep.subr.msk.bf16.mxu1 %vm490_vm0, %v1304_v10  ;;  %v4170_v6 = vld.sshfl [vmem:[%s6184_s1 + $0x14] sm:$0x33 pattern:$0x76325410]  ;;  %s6132_s14 = scalar_lea.sflag [#allocation3], %s239_s15 }
  0x1d   : > { %v2113_v10 = vcombine.high %v4170_v6, %v4170_v6  ;;  %s4375_s17 = smul.u32 192, %s239_s15  ;;  %s4667_s26 = smov [#allocation2]  }
  0x1e   : > { %s248_s12 = sadd.s32 %s4377_s9, %s4376_s10  ;;  %s4378_s8 = smul.u32 24, %s4648_s21 }
  0x1f   : > { %s4030_s13 = sshll.u32 %s248_s12, 2  ;;  %s6071_s30 = scalar_lea.vmem [#allocation2], %s4375_s17 }
  0x20   : > { %s4798_s16 = scalar_lea.vmem %s6183_s0, %s4030_s13  ;;  %s4379_s9 = smul.u32 48, %s4652_s22 }
  0x21   : > { %v4454_v11 = vld [vmem:[%s4798_s16] sm:$0xff]   ;;  %v4455_v12 = vld [vmem:[%s4798_s16 + $0x8] sm:$0xff]   ;;  %v4456_v17 = vld [vmem:[%s4798_s16 + $0x10] sm:$0xff]   ;;  %s3940_s21 = sshll.u32 %s6071_s30, 4  ;;  %s4576_s27 = sshll.u32 %s4667_s26, 4  ;;  %s6126_s21 = int_to_ptr.vmem [resolvable:$true] %s3940_s21  ;;  %s4577_s27 = int_to_ptr.vmem [resolvable:$false] %s4576_s27 }
  0x22   : > { %v345_v14 = vshrl.u32 %v4454_v11, 16  ;;  %v347_v15 = vshll.u32 %v4454_v11, 16  ;;  %v352_v16 = vshll.u32 %v4455_v12, 16  ;;  %4061 = vmatmul.mubr.msk.bf16.vlgmr.msra.gmra.mxu1 %vm453_vm1, %v4454_v11  ;;  %v356_v22 = vshrl.u32 %v4455_v12, 16  ;;  %v4457_v29 = vld [vmem:[%s4798_s16 + $0x18] sm:$0xff]   ;;  %v4458_v33 = vld [vmem:[%s4798_s16 + $0x20] sm:$0xff]   ;;  %s3937_s10 = sadd.s32 %s4379_s9, %s4378_s8  ;;  %p4579_p4 = scmp.lt.s32.totalorder %s6126_s21, %s4577_s27 }
  0x23   : > { %731 = vmatprep.mubr.bf16.mxu1 %v6189_v4  ;;  %1362 = vmatpush1.bf16.msra.mxu1 %v1342_v13  ;;  %v360_v23 = vshll.u32 %v4456_v17, 16  ;;  %v364_v31 = vshrl.u32 %v4456_v17, 16  ;;  %v368_v32 = vshll.u32 %v4457_v29, 16  ;;  %v372_v36 = vshrl.u32 %v4457_v29, 16  ;;  %v4459_v41 = vld [vmem:[%s4798_s16 + $0x28] sm:$0xff]   ;;  %v4460_v45 = vld [vmem:[%s4798_s16 + $0x30] sm:$0xff]  }
  0x24   : > { %v349_v19 = vrot.slane %v347_v15, 1  ;;  %v354_v20 = vrot.slane %v352_v16, 1  ;;  %v376_v37 = vshll.u32 %v4458_v33, 16  ;;  %v380_v43 = vshrl.u32 %v4458_v33, 16  ;;  %v4461_v51 = vld [vmem:[%s4798_s16 + $0x38] sm:$0xff]   ;;  %v4462_v57 = vld [vmem:[%s4798_s16 + $0x40] sm:$0xff]   ;;  %4171 = vmatprep.subr.msk.bf16.mxu1 %vm490_vm0, %v2113_v10 }
  0x25   : > { %v362_v28 = vrot.slane %v360_v23, 1  ;;  %v370_v35 = vrot.slane %v368_v32, 1  ;;  %v384_v44 = vshll.u32 %v4459_v41, 16  ;;  %v388_v48 = vshrl.u32 %v4459_v41, 16  ;;  %v4463_v63 = vld [vmem:[%s4798_s16 + $0x48] sm:$0xff]   ;;  %v4464_v9 = vld [vmem:[%s4798_s16 + $0x50] sm:$0xff]  }
  0x26   : > { %v350_v21 = vor.u32 %v349_v19, %v345_v14  ;;  %v358_v27 = vor.u32 %v356_v22, %v354_v20  ;;  %v378_v40 = vrot.slane %v376_v37, 1  ;;  %v392_v49 = vshll.u32 %v4460_v45, 16  ;;  %v4465_v16 = vld [vmem:[%s4798_s16 + $0x58] sm:$0xff]   ;;  %v4469_v32 = vld [vmem:[%s4798_s16 + $0xc] sm:$0xff]   ;;  %s4284_s12 = sshll.u32 %s3937_s10, 7  ;;  %s4572_s17 = scalar_lea.vmem %s6126_s21, 3072 }
  0x27   : > { %v366_v34 = vor.u32 %v364_v31, %v362_v28  ;;  %v374_v39 = vor.u32 %v372_v36, %v370_v35  ;;  %v386_v47 = vrot.slane %v384_v44, 1  ;;  %v396_v54 = vshrl.u32 %v4460_v45, 16  ;;  %v4896_v36 = vld.sshfl [vmem:[%s6184_s1 + $0x18] sm:$0x33 pattern:$0x76325410]  ;;  %p4573_p0 = scmp.ne.s32.totalorder %s6126_s21, %s4572_s17 }
  0x28   : > { %v355_v26 = vsel %vm343_vm2, %v350_v21, %v354_v20  ;;  %v363_v30 = vsel %vm343_vm2, %v358_v27, %v362_v28  ;;  %v382_v46 = vor.u32 %v380_v43, %v378_v40  ;;  %v394_v53 = vrot.slane %v392_v49, 1  ;;  %v4466_v21 = vld [vmem:[%s4798_s16 + $0x60] ss:$0 sps:$4 sm:$0x11]   ;;  %v4472_v43 = vld [vmem:[%s4798_s16 + $0x18] sm:$0xff]   ;;  %v4486_v10 = vld [vmem:[%s4798_s16 + $0x50] sm:$0xff]  }
  0x29   : > { %4047 = vmatmul.mubr.msk.bf16.vlgmr.msra.gmra.mxu0 %vm453_vm1, %v355_v26  ;;  %v371_v38 = vsel %vm343_vm2, %v366_v34, %v370_v35  ;;  %v379_v42 = vsel %vm343_vm2, %v374_v39, %v378_v40  ;;  %v390_v52 = vor.u32 %v388_v48, %v386_v47  ;;  %v400_v55 = vshll.u32 %v4461_v51, 16  ;;  %v4471_v40 = vld [vmem:[%s4798_s16 + $0x14] sm:$0xff]   ;;  %v4473_v44 = vld [vmem:[%s4798_s16 + $0x1c] sm:$0xff]   ;;  %v4475_v48 = vld [vmem:[%s4798_s16 + $0x24] sm:$0xff]   ;;  %p4574_p1 = pnand %p4573_p0, %p4751_p3  ;;  %s4578_s8 = scalar_lea.vmem %s4577_s27, 6144 }
  0x2a   : > { %1024 = vmatpush1.bf16.msra.mxu0 %v1004_v24  ;;  %539 = vmatprep.mubr.bf16.mxu0 %v6189_v4  ;;  %v387_v50 = vsel %vm343_vm2, %v382_v46, %v386_v47  ;;  %v398_v58 = vor.u32 %v396_v54, %v394_v53  ;;  %v404_v60 = vshrl.u32 %v4461_v51, 16  ;;  %v408_v61 = vshll.u32 %v4462_v57, 16  ;;  %v4474_v47 = vld [vmem:[%s4798_s16 + $0x20] sm:$0xff]   ;;  %p4580_p5 = scmp.lt.s32.totalorder %s4578_s8, %s4572_s17 }
  0x2b   : > { %4062 = vmatmul.mubr.msk.bf16.gmra.mxu1 %vm453_vm1, %v4455_v12  ;;  %4143 = vmatprep.subr.msk.bf16.mxu0 %vm490_vm0, %v1746_v25  ;;  %v395_v56 = vsel %vm343_vm2, %v390_v52, %v394_v53  ;;  %v402_v59 = vrot.slane %v400_v55, 1  ;;  %v412_v2 = vshrl.u32 %v4462_v57, 16  ;;  %v416_v3 = vshll.u32 %v4463_v63, 16  ;;  %v4477_v52 = vld [vmem:[%s4798_s16 + $0x2c] sm:$0xff]   ;;  %p4575_p2 = pneg %p4574_p1 }
  0x2c   : > { %741 = vmatprep.mubr.bf16.mxu1 %v6189_v4  ;;  %v410_v1 = vrot.slane %v408_v61, 1  ;;  %v420_v12 = vshrl.u32 %v4463_v63, 16  ;;  %v424_v13 = vshll.u32 %v4464_v9, 16  ;;  %v428_v19 = vshrl.u32 %v4464_v9, 16  ;;  %v4478_v55 = vld [vmem:[%s4798_s16 + $0x30] sm:$0xff]   ;;  %p4581_p6 = por %p4580_p5, %p4579_p4 }
  0x2d   : > { %v403_v62 = vsel %vm343_vm2, %v398_v58, %v402_v59  ;;  %v406_v0 = vor.u32 %v404_v60, %v402_v59  ;;  %v418_v8 = vrot.slane %v416_v3, 1  ;;  %v432_v20 = vshll.u32 %v4465_v16, 16  ;;  %v4480_v59 = vld [vmem:[%s4798_s16 + $0x38] sm:$0xff]   ;;  %v4484_v3 = vld [vmem:[%s4798_s16 + $0x48] sm:$0xff]  }
  0x2e   : > { %v414_v7 = vor.u32 %v412_v2, %v410_v1  ;;  %v426_v15 = vrot.slane %v424_v13, 1  ;;  %v436_v25 = vshrl.u32 %v4465_v16, 16  ;;  %v440_v26 = vshll.u32 %v4466_v21, 16  ;;  %v4481_v60 = vld [vmem:[%s4798_s16 + $0x3c] sm:$0xff]   ;;  %v4491_v21 = vld [vmem:[%s4798_s16 + $0x64] sm:$0xff]   ;;  %p4582_p7 = pnand %p4581_p6, %p4575_p2 }
  0x2f   : > { %v411_v5 = vsel %vm343_vm2, %v406_v0, %v410_v1  ;;  %v422_v14 = vor.u32 %v420_v12, %v418_v8  ;;  %v434_v23 = vrot.slane %v432_v20, 1  ;;  %v1784_v39 = vsel %vm490_vm0, %v4809_v18, 0  ;;  %v4483_v0 = vld [vmem:[%s4798_s16 + $0x44] sm:$0xff]   ;;  %v4492_v20 = vld [vmem:[%s4798_s16 + $0xc] sm:$0xff]  }
  0x30   : > { %v419_v11 = vsel %vm343_vm2, %v414_v7, %v418_v8  ;;  %v430_v22 = vor.u32 %v428_v19, %v426_v15  ;;  %v442_v28 = vrot.slane %v440_v26, 1  ;;  %v940_v49 = vrot.slane %v4474_v47, 1  ;;  %v4225_v7 = vld.sshfl [vmem:[%s6184_s1 + $0x1c] sm:$0x33 pattern:$0x76325410] }
  0x31   : > { %4048 = vmatmul.mubr.msk.bf16.gmra.mxu0 %vm453_vm1, %v363_v30  ;;  %v438_v27 = vor.u32 %v436_v25, %v434_v23  ;;  %v4468_v30 = vld [vmem:[%s4798_s16 + $0x8] sm:$0xff]   ;;  %v946_v61 = vrot.slane %v4480_v59, 1  ;;  %v2893_v8 = vcombine.high %v4225_v7, %v4225_v7  ;;  %v952_v12 = vrot.slane %v4486_v10, 1  ;;  %v4490_v19 = vld [vmem:[%s4798_s16 + $0x60] ss:$0 sps:$4 sm:$0x11]  }
  0x32   : > { %549 = vmatprep.mubr.bf16.mxu0 %v6189_v4  ;;  %v435_v24 = vsel %vm343_vm2, %v430_v22, %v434_v23  ;;  %v934_v35 = vrot.slane %v4468_v30, 1  ;;  %v4494_v22 = vld [vmem:[%s4798_s16 + $0xc] sm:$0xfe]   ;;  %v4495_v23 = vld [vmem:[%s4798_s16 + $0x14] sm:$0xff]   ;;  %v1641_v26 = vshll.u32 %v4492_v20, 16  ;;  %v1639_v30 = vshrl.u32 %v4492_v20, 16 }
  0x33   : > { %4063 = vmatmul.mubr.msk.bf16.gmra.mxu1 %vm453_vm1, %v4456_v17  ;;  %v427_v17 = vsel %vm343_vm2, %v422_v14, %v426_v15  ;;  %v443_v31 = vsel %vm343_vm2, %v438_v27, %v442_v28  ;;  %v4488_v14 = vld [vmem:[%s4798_s16 + $0x58] sm:$0xff]   ;;  %v2080_v27 = vrot.slane %v4494_v22, 1  ;;  %v2081_v28 = vrot.slane %v4495_v23, 1 }
  0x34   : > { %751 = vmatprep.mubr.bf16.mxu1 %v6189_v4  ;;  %v4489_v15 = vld [vmem:[%s4798_s16 + $0x5c] sm:$0xff]   ;;  %v4493_v25 = vld [vmem:[%s4798_s16 + $0x14] sm:$0xff]   ;;  %v2489_v47 = vsel %vm490_vm0, %v4896_v36, 0 }
  0x39   : > { %4049 = vmatmul.mubr.msk.bf16.gmra.mxu0 %vm453_vm1, %v371_v38  ;;  %v4470_v38 = vld [vmem:[%s4798_s16 + $0x10] sm:$0xff]  }
  0x3a   : > { %559 = vmatprep.mubr.bf16.mxu0 %v6189_v4 }
  0x3b   : > { %4064 = vmatmul.mubr.msk.bf16.gmra.mxu1 %vm453_vm1, %v4457_v29  ;;  %v4467_v29 = vld [vmem:[%s4798_s16] sm:$0xfe]  }
  0x3c   : > { %761 = vmatprep.mubr.bf16.mxu1 %v6189_v4  ;;  %v933_v34 = vrot.slane %v4467_v29, 1 }
  0x3e   : > { %v935_v37 = vsel %vm932_vm3, %v933_v34, %v934_v35  ;;  %v4497_v34 = vld [vmem:[%s4798_s16 + $0x1c] sm:$0xff]  }
  0x41   : > { %4050 = vmatmul.mubr.msk.bf16.gmra.mxu0 %vm453_vm1, %v379_v42  ;;  %v936_v42 = vrot.slane %v4470_v38, 1 }
  0x42   : > { %569 = vmatprep.mubr.bf16.mxu0 %v6189_v4 }
  0x43   : > { %4065 = vmatmul.mubr.msk.bf16.gmra.mxu1 %vm453_vm1, %v4458_v33  ;;  %v2151_v33 = vsel %vm490_vm0, %v4170_v6, 0  ;;  %v937_v18 = vsel %vm932_vm3, %v934_v35, %v936_v42  ;;  %v950_v6 = vrot.slane %v4484_v3, 1  ;;  %v2931_v35 = vsel %vm490_vm0, %v4225_v7, 0  ;;  %v4501_v7 = vld [vmem:[%s4798_s16 + $0x2c] sm:$0xff]  }
  0x44   : > { %771 = vmatprep.mubr.bf16.mxu1 %v6189_v4 }
  0x45   : > { %v953_v13 = vsel %vm932_vm3, %v950_v6, %v952_v12 }
  0x49   : > { %4051 = vmatmul.mubr.msk.bf16.gmra.mxu0 %vm453_vm1, %v387_v50 }
  0x4a   : > { %579 = vmatprep.mubr.bf16.mxu0 %v6189_v4 }
  0x4b   : > { %4066 = vmatmul.mubr.msk.bf16.gmra.mxu1 %vm453_vm1, %v4459_v41  ;;  %v2451_v41 = vcombine.high %v4896_v36, %v4896_v36 }
  0x4c   : > { %781 = vmatprep.mubr.bf16.mxu1 %v6189_v4 }
  0x51   : > { %4052 = vmatmul.mubr.msk.bf16.gmra.mxu0 %vm453_vm1, %v395_v56  ;;  %v4479_v56 = vld [vmem:[%s4798_s16 + $0x34] sm:$0xff]  }
  0x52   : > { %589 = vmatprep.mubr.bf16.mxu0 %v6189_v4 }
  0x53   : > { %4067 = vmatmul.mubr.msk.bf16.gmra.mxu1 %vm453_vm1, %v4460_v45  ;;  %v938_v45 = vrot.slane %v4472_v43, 1 }
  0x54   : > { %791 = vmatprep.mubr.bf16.mxu1 %v6189_v4 }
  0x55   : > { %v939_v46 = vsel %vm932_vm3, %v936_v42, %v938_v45  ;;  %v941_v50 = vsel %vm932_vm3, %v938_v45, %v940_v49  ;;  %v2083_v42 = vrot.slane %v4497_v34, 1  ;;  %v1650_v45 = vshrl.u32 %v4493_v25, 16 }
  0x59   : > { %4053 = vmatmul.mubr.msk.bf16.gmra.mxu0 %vm453_vm1, %v403_v62 }
  0x5a   : > { %599 = vmatprep.mubr.bf16.mxu0 %v6189_v4 }
  0x5b   : > { %4068 = vmatmul.mubr.msk.bf16.gmra.mxu1 %vm453_vm1, %v4461_v51  ;;  %v4476_v51 = vld [vmem:[%s4798_s16 + $0x28] sm:$0xff]  }
  0x5c   : > { %801 = vmatprep.mubr.bf16.mxu1 %v6189_v4  ;;  %v942_v53 = vrot.slane %v4476_v51, 1  ;;  %v4499_v51 = vld [vmem:[%s4798_s16 + $0x24] sm:$0xff]  }
  0x5d   : > { %v2085_v59 = vrot.slane %v4499_v51, 1  ;;  %v4505_v51 = vld [vmem:[%s4798_s16 + $0x3c] sm:$0xff]  }
  0x5e   : > { %v943_v54 = vsel %vm932_vm3, %v940_v49, %v942_v53 }
  0x61   : > { %4054 = vmatmul.mubr.msk.bf16.gmra.mxu0 %vm453_vm1, %v411_v5  ;;  %v4485_v5 = vld [vmem:[%s4798_s16 + $0x4c] sm:$0xff]  }
  0x62   : > { %609 = vmatprep.mubr.bf16.mxu0 %v6189_v4 }
  0x63   : > { %4069 = vmatmul.mubr.msk.bf16.gmra.mxu1 %vm453_vm1, %v4462_v57  ;;  %v944_v57 = vrot.slane %v4478_v55, 1 }
  0x64   : > { %811 = vmatprep.mubr.bf16.mxu1 %v6189_v4 }
  0x65   : > { %v945_v58 = vsel %vm932_vm3, %v942_v53, %v944_v57  ;;  %v947_v62 = vsel %vm932_vm3, %v944_v57, %v946_v61 }
  0x69   : > { %4055 = vmatmul.mubr.msk.bf16.gmra.mxu0 %vm453_vm1, %v419_v11  ;;  %v4487_v11 = vld [vmem:[%s4798_s16 + $0x54] sm:$0xff]  }
  0x6a   : > { %619 = vmatprep.mubr.bf16.mxu0 %v6189_v4 }
  0x6b   : > { %4070 = vmatmul.mubr.msk.bf16.gmra.mxu1 %vm453_vm1, %v4463_v63  ;;  %v4482_v63 = vld [vmem:[%s4798_s16 + $0x40] sm:$0xff]  }
  0x6c   : > { %821 = vmatprep.mubr.bf16.mxu1 %v6189_v4  ;;  %v948_v1 = vrot.slane %v4482_v63, 1 }
  0x6e   : > { %v949_v2 = vsel %vm932_vm3, %v946_v61, %v948_v1 }
  0x71   : > { %4056 = vmatmul.mubr.msk.bf16.gmra.mxu0 %vm453_vm1, %v427_v17 }
  0x72   : > { %629 = vmatprep.mubr.bf16.mxu0 %v6189_v4 }
  0x73   : > { %4071 = vmatmul.mubr.msk.bf16.gmra.mxu1 %vm453_vm1, %v4464_v9  ;;  %v951_v9 = vsel %vm932_vm3, %v948_v1, %v950_v6  ;;  %v2086_v6 = vsel %vm932_vm3, %v2083_v42, %v2085_v59 }
  0x74   : > { %831 = vmatprep.mubr.bf16.mxu1 %v6189_v4 }
  0x79   : > { %4057 = vmatmul.mubr.msk.bf16.gmra.mxu0 %vm453_vm1, %v435_v24  ;;  %v956_v24 = vrot.slane %v4490_v19, 1 }
  0x7a   : > { %639 = vmatprep.mubr.bf16.mxu0 %v6189_v4 }
  0x7b   : > { %4072 = vmatmul.mubr.msk.bf16.gmra.mxu1 %vm453_vm1, %v4465_v16  ;;  %v954_v16 = vrot.slane %v4488_v14, 1 }
  0x7c   : > { %1379 = vmatprep.mubr.bf16.mxu1 %v6189_v4 }
  0x7d   : > { %v955_v17 = vsel %vm932_vm3, %v952_v12, %v954_v16  ;;  %v957_v29 = vsel %vm932_vm3, %v954_v16, %v956_v24 }
  0x81   : > { %4058 = vmatmul.mubr.msk.bf16.gmra.mxu0 %vm453_vm1, %v443_v31  ;;  %v1643_v31 = vrot.slane %v1641_v26, 1 }
  0x82   : > { %1041 = vmatprep.mubr.bf16.mxu0 %v6189_v4 }
  0x83   : > { %4116 = vmatmul.mubr.msk.bf16.vlgmr.msra.gmra.mxu1 %vm453_vm1, %v4469_v32  ;;  %v1646_v32 = vshll.u32 %v4493_v25, 16  ;;  %v1644_v38 = vor.u32 %v1643_v31, %v1639_v30 }
  0x84   : > { %1389 = vmatprep.mubr.bf16.mxu1 %v6189_v4  ;;  %2171 = vmatpush1.bf16.msra.mxu1 %v2151_v33  ;;  %v2082_v33 = vsel %vm932_vm3, %v2080_v27, %v2081_v28 }
  0x85   : > { %4226 = vmatprep.subr.msk.bf16.mxu1 %vm490_vm0, %v2893_v8 }
  0x89   : > { %4089 = vmatmul.mubr.msk.bf16.vlgmr.msra.gmra.mxu0 %vm453_vm1, %v935_v37 }
  0x8a   : > { %1804 = vmatpush1.bf16.msra.mxu0 %v1784_v39  ;;  %1051 = vmatprep.mubr.bf16.mxu0 %v6189_v4  ;;  %v1648_v39 = vrot.slane %v1646_v32, 1 }
  0x8b   : > { %4117 = vmatmul.mubr.msk.bf16.gmra.mxu1 %vm453_vm1, %v4471_v40  ;;  %4198 = vmatprep.subr.msk.bf16.mxu0 %vm490_vm0, %v2451_v41  ;;  %v4496_v40 = vld [vmem:[%s4798_s16 + $0x1c] sm:$0xff]  }
  0x8c   : > { %1399 = vmatprep.mubr.bf16.mxu1 %v6189_v4  ;;  %v1649_v43 = vsel %vm343_vm2, %v1644_v38, %v1648_v39 }
  0x91   : > { %4090 = vmatmul.mubr.msk.bf16.gmra.mxu0 %vm453_vm1, %v937_v18  ;;  %v5000_v18 = vld.sshfl [vmem:[%s6184_s1 + $0x20] sm:$0x33 pattern:$0x76325410] }
  0x92   : > { %1061 = vmatprep.mubr.bf16.mxu0 %v6189_v4 }
  0x93   : > { %4118 = vmatmul.mubr.msk.bf16.gmra.mxu1 %vm453_vm1, %v4473_v44 }
  0x94   : > { %1409 = vmatprep.mubr.bf16.mxu1 %v6189_v4 }
  0x99   : > { %4091 = vmatmul.mubr.msk.bf16.gmra.mxu0 %vm453_vm1, %v939_v46  ;;  %v1654_v46 = vshll.u32 %v4496_v40, 16 }
  0x9a   : > { %1071 = vmatprep.mubr.bf16.mxu0 %v6189_v4 }
  0x9b   : > { %4119 = vmatmul.mubr.msk.bf16.gmra.mxu1 %vm453_vm1, %v4475_v48  ;;  %v3260_v48 = vcombine.high %v5000_v18, %v5000_v18  ;;  %v1656_v55 = vrot.slane %v1654_v46, 1 }
  0x9c   : > { %1419 = vmatprep.mubr.bf16.mxu1 %v6189_v4 }
  0xa1   : > { %4092 = vmatmul.mubr.msk.bf16.gmra.mxu0 %vm453_vm1, %v941_v50  ;;  %v2084_v50 = vsel %vm932_vm3, %v2081_v28, %v2083_v42 }
  0xa2   : > { %1081 = vmatprep.mubr.bf16.mxu0 %v6189_v4 }
  0xa3   : > { %4120 = vmatmul.mubr.msk.bf16.gmra.mxu1 %vm453_vm1, %v4477_v52 }
  0xa4   : > { %1429 = vmatprep.mubr.bf16.mxu1 %v6189_v4 }
  0xa9   : > { %4093 = vmatmul.mubr.msk.bf16.gmra.mxu0 %vm453_vm1, %v943_v54  ;;  %v1652_v54 = vor.u32 %v1650_v45, %v1648_v39 }
  0xaa   : > { %1091 = vmatprep.mubr.bf16.mxu0 %v6189_v4 }
  0xab   : > { %4121 = vmatmul.mubr.msk.bf16.gmra.mxu1 %vm453_vm1, %v4479_v56  ;;  %v4498_v56 = vld [vmem:[%s4798_s16 + $0x24] sm:$0xff]   ;;  %v1657_v63 = vsel %vm343_vm2, %v1652_v54, %v1656_v55 }
  0xac   : > { %1439 = vmatprep.mubr.bf16.mxu1 %v6189_v4  ;;  %v1662_v1 = vshll.u32 %v4498_v56, 16  ;;  %v1666_v23 = vshrl.u32 %v4498_v56, 16 }
  0xae   : > { %v1664_v12 = vrot.slane %v1662_v1, 1 }
  0xb1   : > { %4094 = vmatmul.mubr.msk.bf16.gmra.mxu0 %vm453_vm1, %v945_v58 }
  0xb2   : > { %1101 = vmatprep.mubr.bf16.mxu0 %v6189_v4 }
  0xb3   : > { %4122 = vmatmul.mubr.msk.bf16.gmra.mxu1 %vm453_vm1, %v4481_v60 }
  0xb4   : > { %1449 = vmatprep.mubr.bf16.mxu1 %v6189_v4 }
  0xb9   : > { %4095 = vmatmul.mubr.msk.bf16.gmra.mxu0 %vm453_vm1, %v947_v62 }
  0xba   : > { %1111 = vmatprep.mubr.bf16.mxu0 %v6189_v4 }
  0xbb   : > { %4123 = vmatmul.mubr.msk.bf16.gmra.mxu1 %vm453_vm1, %v4483_v0  ;;  %v1658_v0 = vshrl.u32 %v4496_v40, 16 }
  0xbc   : > { %1459 = vmatprep.mubr.bf16.mxu1 %v6189_v4 }
  0xc1   : > { %4096 = vmatmul.mubr.msk.bf16.gmra.mxu0 %vm453_vm1, %v949_v2 }
  0xc2   : > { %1121 = vmatprep.mubr.bf16.mxu0 %v6189_v4 }
  0xc3   : > { %4124 = vmatmul.mubr.msk.bf16.gmra.mxu1 %vm453_vm1, %v4485_v5 }
  0xc4   : > { %1469 = vmatprep.mubr.bf16.mxu1 %v6189_v4 }
  0xc9   : > { %4097 = vmatmul.mubr.msk.bf16.gmra.mxu0 %vm453_vm1, %v951_v9 }
  0xca   : > { %1131 = vmatprep.mubr.bf16.mxu0 %v6189_v4 }
  0xcb   : > { %4125 = vmatmul.mubr.msk.bf16.gmra.mxu1 %vm453_vm1, %v4487_v11  ;;  %v1660_v11 = vor.u32 %v1658_v0, %v1656_v55 }
  0xcc   : > { %1479 = vmatprep.mubr.bf16.mxu1 %v6189_v4 }
  0xcd   : > { %v1665_v22 = vsel %vm343_vm2, %v1660_v11, %v1664_v12 }
  0xd1   : > { %4098 = vmatmul.mubr.msk.bf16.gmra.mxu0 %vm453_vm1, %v953_v13  ;;  %v4500_v13 = vld [vmem:[%s4798_s16 + $0x2c] sm:$0xff]  }
  0xd2   : > { %1141 = vmatprep.mubr.bf16.mxu0 %v6189_v4  ;;  %v1670_v24 = vshll.u32 %v4500_v13, 16  ;;  %v1674_v45 = vshrl.u32 %v4500_v13, 16  ;;  %v4507_v13 = vld [vmem:[%s4798_s16 + $0x44] sm:$0xff]  }
  0xd3   : > { %4126 = vmatmul.mubr.msk.bf16.gmra.mxu1 %vm453_vm1, %v4489_v15 }
  0xd4   : > { %1489 = vmatprep.mubr.bf16.mxu1 %v6189_v4  ;;  %v1672_v34 = vrot.slane %v1670_v24, 1 }
  0xd6   : > { %v1676_v56 = vor.u32 %v1674_v45, %v1672_v34 }
  0xd9   : > { %4099 = vmatmul.mubr.msk.bf16.gmra.mxu0 %vm453_vm1, %v955_v17  ;;  %v2087_v17 = vrot.slane %v4501_v7, 1 }
  0xda   : > { %1151 = vmatprep.mubr.bf16.mxu0 %v6189_v4 }
  0xdb   : > { %4127 = vmatmul.mubr.msk.bf16.gmra.mxu1 %vm453_vm1, %v4491_v21  ;;  %v2088_v28 = vsel %vm932_vm3, %v2085_v59, %v2087_v17 }
  0xdc   : > { %2188 = vmatprep.mubr.bf16.mxu1 %v6189_v4 }
  0xe1   : > { %4100 = vmatmul.mubr.msk.bf16.gmra.mxu0 %vm453_vm1, %v957_v29  ;;  %v4503_v29 = vld [vmem:[%s4798_s16 + $0x34] sm:$0xff]  }
  0xe2   : > { %1821 = vmatprep.mubr.bf16.mxu0 %v6189_v4  ;;  %v723_v37 = vpop.f32.mrf.mxu1  ;;  %v2089_v40 = vrot.slane %v4503_v29, 1 }
  0xe3   : > { %4172 = vmatmul.mubr.msk.bf16.vlgmr.msra.gmra.mxu1 %vm453_vm1, %v2082_v33  ;;  %v1668_v33 = vor.u32 %v1666_v23, %v1664_v12 }
  0xe4   : > { %v725_v41 = vpop.f32.mrf.mxu1  ;;  %2198 = vmatprep.mubr.bf16.mxu1 %v6189_v4  ;;  %2951 = vmatpush1.bf16.msra.mxu1 %v2931_v35  ;;  %v4502_v35 = vld [vmem:[%s4798_s16 + $0x34] sm:$0xff]  }
  0xe5   : > { %v1678_v46 = vshll.u32 %v4502_v35, 16 }
  0xe6   : > { %v727_v44 = vpop.f32.mrf.mxu1 }
  0xe8   : > { %v729_v49 = vpop.f32.mrf.mxu1 }
  0xe9   : > { %v531_v52 = vpop.f32.mrf.mxu0  ;;  %4144 = vmatmul.mubr.msk.bf16.vlgmr.msra.gmra.mxu0 %vm453_vm1, %v1649_v43 }
  0xea   : > { %v5010_v53 = vadd.f32 %v723_v37, %v531_v52  ;;  %2509 = vmatpush1.bf16.msra.mxu0 %v2489_v47  ;;  %1831 = vmatprep.mubr.bf16.mxu0 %v6189_v4 }
  0xeb   : > { %v533_v57 = vpop.f32.mrf.mxu0  ;;  %v733_v36 = vpop.f32.mrf.mxu1  ;;  %4173 = vmatmul.mubr.msk.bf16.gmra.mxu1 %vm453_vm1, %v2084_v50  ;;  %4254 = vmatprep.subr.msk.bf16.mxu0 %vm490_vm0, %v3260_v48  ;;  %v2090_v50 = vsel %vm932_vm3, %v2087_v17, %v2089_v40 }
  0xec   : > { %v5016_v58 = vadd.f32 %v725_v41, %v533_v57  ;;  %2208 = vmatprep.mubr.bf16.mxu1 %v6189_v4  ;;  %v1680_v57 = vrot.slane %v1678_v46, 1 }
  0xed   : > { %v535_v60 = vpop.f32.mrf.mxu0  ;;  %v735_v61 = vpop.f32.mrf.mxu1 }
  0xee   : > { %v5019_v62 = vadd.f32 %v727_v44, %v535_v60  ;;  %v1673_v44 = vsel %vm343_vm2, %v1668_v33, %v1672_v34 }
  0xef   : > { %v537_v2 = vpop.f32.mrf.mxu0  ;;  %v737_v3 = vpop.f32.mrf.mxu1 }
  0xf0   : > { %v5022_v5 = vadd.f32 %v729_v49, %v537_v2 }
  0xf1   : > { %v541_v8 = vpop.f32.mrf.mxu0  ;;  %4145 = vmatmul.mubr.msk.bf16.gmra.mxu0 %vm453_vm1, %v1657_v63  ;;  %v739_v9 = vpop.f32.mrf.mxu1  ;;  %v2091_v63 = vrot.slane %v4505_v51, 1 }
  0xf2   : > { %v5027_v10 = vadd.f32 %v733_v36, %v541_v8  ;;  %1841 = vmatprep.mubr.bf16.mxu0 %v6189_v4  ;;  %v4504_v36 = vld [vmem:[%s4798_s16 + $0x3c] sm:$0xff]  }
  0xf3   : > { %v543_v14 = vpop.f32.mrf.mxu0  ;;  %v743_v15 = vpop.f32.mrf.mxu1  ;;  %4174 = vmatmul.mubr.msk.bf16.gmra.mxu1 %vm453_vm1, %v2086_v6  ;;  %v1682_v6 = vshrl.u32 %v4502_v35, 16  ;;  %v1686_v7 = vshll.u32 %v4504_v36, 16  ;;  %v2092_v12 = vsel %vm932_vm3, %v2089_v40, %v2091_v63  ;;  %v1690_v33 = vshrl.u32 %v4504_v36, 16 }
  0xf4   : > { %v5032_v16 = vadd.f32 %v735_v61, %v543_v14  ;;  %2218 = vmatprep.mubr.bf16.mxu1 %v6189_v4 }
  0xf5   : > { %v545_v19 = vpop.f32.mrf.mxu0  ;;  %v745_v20 = vpop.f32.mrf.mxu1 }
  0xf6   : > { %v5035_v21 = vadd.f32 %v737_v3, %v545_v19  ;;  %v1681_v3 = vsel %vm343_vm2, %v1676_v56, %v1680_v57  ;;  %v1684_v19 = vor.u32 %v1682_v6, %v1680_v57 }
  0xf7   : > { %v547_v25 = vpop.f32.mrf.mxu0  ;;  %v747_v26 = vpop.f32.mrf.mxu1 }
  0xf8   : > { %v5038_v27 = vadd.f32 %v739_v9, %v547_v25 }
  0xf9   : > { %v551_v30 = vpop.f32.mrf.mxu0  ;;  %4146 = vmatmul.mubr.msk.bf16.gmra.mxu0 %vm453_vm1, %v1665_v22  ;;  %v749_v31 = vpop.f32.mrf.mxu1  ;;  %v4506_v22 = vld [vmem:[%s4798_s16 + $0x44] sm:$0xff]  }
  0xfa   : > { %v5043_v32 = vadd.f32 %v743_v15, %v551_v30  ;;  %1851 = vmatprep.mubr.bf16.mxu0 %v6189_v4  ;;  %v1694_v34 = vshll.u32 %v4506_v22, 16 }
  0xfb   : > { %v553_v37 = vpop.f32.mrf.mxu0  ;;  %v753_v38 = vpop.f32.mrf.mxu1  ;;  %4175 = vmatmul.mubr.msk.bf16.gmra.mxu1 %vm453_vm1, %v2088_v28 }
  0xfc   : > { %v5048_v39 = vadd.f32 %v745_v20, %v553_v37  ;;  %2228 = vmatprep.mubr.bf16.mxu1 %v6189_v4  ;;  %v1688_v20 = vrot.slane %v1686_v7, 1  ;;  %v4511_v7 = vld [vmem:[%s4798_s16 + $0x54] sm:$0xff]  }
  0xfd   : > { %v555_v41 = vpop.f32.mrf.mxu0  ;;  %v755_v42 = vpop.f32.mrf.mxu1 }
  0xfe   : > { %v5051_v43 = vadd.f32 %v747_v26, %v555_v41  ;;  %v2093_v26 = vrot.slane %v4507_v13, 1  ;;  %v4509_v41 = vld [vmem:[%s4798_s16 + $0x4c] sm:$0xff]   ;;  %v1692_v46 = vor.u32 %v1690_v33, %v1688_v20 }
  0xff   : > { %v557_v47 = vpop.f32.mrf.mxu0  ;;  %v757_v48 = vpop.f32.mrf.mxu1 }
 0x100   : > { %v5054_v49 = vadd.f32 %v749_v31, %v557_v47  ;;  %v1689_v31 = vsel %vm343_vm2, %v1684_v19, %v1688_v20  ;;  %v2094_v40 = vsel %vm932_vm3, %v2091_v63, %v2093_v26  ;;  %v1696_v47 = vrot.slane %v1694_v34, 1 }
 0x101   : > { %v561_v52 = vpop.f32.mrf.mxu0  ;;  %4147 = vmatmul.mubr.msk.bf16.gmra.mxu0 %vm453_vm1, %v1673_v44  ;;  %v759_v54 = vpop.f32.mrf.mxu1 }
 0x102   : > { %v5059_v55 = vadd.f32 %v753_v38, %v561_v52  ;;  %1861 = vmatprep.mubr.bf16.mxu0 %v6189_v4 }
 0x103   : > { %v563_v59 = vpop.f32.mrf.mxu0  ;;  %v763_v60 = vpop.f32.mrf.mxu1  ;;  %4176 = vmatmul.mubr.msk.bf16.gmra.mxu1 %vm453_vm1, %v2090_v50 }
 0x104   : > { %v5064_v61 = vadd.f32 %v755_v42, %v563_v59  ;;  %2238 = vmatprep.mubr.bf16.mxu1 %v6189_v4  ;;  %v1697_v59 = vsel %vm343_vm2, %v1692_v46, %v1696_v47 }
 0x105   : > { %v565_v0 = vpop.f32.mrf.mxu0  ;;  %v765_v1 = vpop.f32.mrf.mxu1 }
 0x106   : > { %v5067_v2 = vadd.f32 %v757_v48, %v565_v0  ;;  %v4508_v48 = vld [vmem:[%s4798_s16 + $0x4c] sm:$0xff]  }
 0x107   : > { %v567_v8 = vpop.f32.mrf.mxu0  ;;  %v767_v9 = vpop.f32.mrf.mxu1  ;;  %v1702_v63 = vshll.u32 %v4508_v48, 16 }
 0x108   : > { %v5070_v11 = vadd.f32 %v759_v54, %v567_v8  ;;  %v2095_v54 = vrot.slane %v4509_v41, 1  ;;  %v4513_v41 = vld [vmem:[%s4798_s16 + $0x5c] sm:$0xff]  }
 0x109   : > { %v571_v14 = vpop.f32.mrf.mxu0  ;;  %4148 = vmatmul.mubr.msk.bf16.gmra.mxu0 %vm453_vm1, %v1681_v3  ;;  %v769_v15 = vpop.f32.mrf.mxu1 }
 0x10a   : > { %v5075_v17 = vadd.f32 %v763_v60, %v571_v14  ;;  %1871 = vmatprep.mubr.bf16.mxu0 %v6189_v4  ;;  %v1698_v60 = vshrl.u32 %v4506_v22, 16  ;;  %v2096_v6 = vsel %vm932_vm3, %v2093_v26, %v2095_v54  ;;  %v1704_v14 = vrot.slane %v1702_v63, 1 }
 0x10b   : > { %v573_v23 = vpop.f32.mrf.mxu0  ;;  %v773_v24 = vpop.f32.mrf.mxu1  ;;  %4177 = vmatmul.mubr.msk.bf16.gmra.mxu1 %vm453_vm1, %v2092_v12 }
 0x10c   : > { %v5080_v25 = vadd.f32 %v765_v1, %v573_v23  ;;  %2248 = vmatprep.mubr.bf16.mxu1 %v6189_v4  ;;  %v1700_v13 = vor.u32 %v1698_v60, %v1696_v47  ;;  %v2097_v23 = vrot.slane %v4511_v7, 1 }
 0x10d   : > { %v575_v28 = vpop.f32.mrf.mxu0  ;;  %v775_v29 = vpop.f32.mrf.mxu1 }
 0x10e   : > { %v5083_v30 = vadd.f32 %v767_v9, %v575_v28 }
 0x10f   : > { %v577_v35 = vpop.f32.mrf.mxu0  ;;  %v777_v37 = vpop.f32.mrf.mxu1 }
 0x110   : > { %v5086_v38 = vadd.f32 %v769_v15, %v577_v35  ;;  %v4510_v15 = vld [vmem:[%s4798_s16 + $0x54] sm:$0xff]  }
 0x111   : > { %v581_v42 = vpop.f32.mrf.mxu0  ;;  %4149 = vmatmul.mubr.msk.bf16.gmra.mxu0 %vm453_vm1, %v1689_v31  ;;  %v779_v44 = vpop.f32.mrf.mxu1  ;;  %v1706_v31 = vshrl.u32 %v4508_v48, 16  ;;  %v1710_v33 = vshll.u32 %v4510_v15, 16 }
 0x112   : > { %v5091_v45 = vadd.f32 %v773_v24, %v581_v42  ;;  %1881 = vmatprep.mubr.bf16.mxu0 %v6189_v4 }
 0x113   : > { %v583_v50 = vpop.f32.mrf.mxu0  ;;  %v783_v51 = vpop.f32.mrf.mxu1  ;;  %4178 = vmatmul.mubr.msk.bf16.gmra.mxu1 %vm453_vm1, %v2094_v40  ;;  %v2098_v40 = vsel %vm932_vm3, %v2095_v54, %v2097_v23  ;;  %v1708_v47 = vor.u32 %v1706_v31, %v1704_v14  ;;  %v2099_v54 = vrot.slane %v4513_v41, 1 }
 0x114   : > { %v5096_v52 = vadd.f32 %v775_v29, %v583_v50  ;;  %2258 = vmatprep.mubr.bf16.mxu1 %v6189_v4  ;;  %v1705_v29 = vsel %vm343_vm2, %v1700_v13, %v1704_v14  ;;  %v1712_v50 = vrot.slane %v1710_v33, 1  ;;  %v4515_v14 = vld [vmem:[%s4798_s16 + $0x64] sm:$0xff]  }
 0x115   : > { %v585_v56 = vpop.f32.mrf.mxu0  ;;  %v785_v57 = vpop.f32.mrf.mxu1  ;;  %v2100_v13 = vsel %vm932_vm3, %v2097_v23, %v2099_v54  ;;  %v2101_v23 = vrot.slane %v4515_v14, 1 }
 0x116   : > { %v5099_v36 = vadd.f32 %v777_v37, %v585_v56 }
 0x117   : > { %v587_v0 = vpop.f32.mrf.mxu0  ;;  %v787_v1 = vpop.f32.mrf.mxu1 }
 0x118   : > { %v5102_v3 = vadd.f32 %v779_v44, %v587_v0  ;;  %v1713_v0 = vsel %vm343_vm2, %v1708_v47, %v1712_v50 }
 0x119   : > { %v591_v8 = vpop.f32.mrf.mxu0  ;;  %4150 = vmatmul.mubr.msk.bf16.gmra.mxu0 %vm453_vm1, %v1697_v59  ;;  %v789_v9 = vpop.f32.mrf.mxu1 }
 0x11a   : > { %v5107_v12 = vadd.f32 %v783_v51, %v591_v8  ;;  %1891 = vmatprep.mubr.bf16.mxu0 %v6189_v4  ;;  %v4512_v51 = vld [vmem:[%s4798_s16 + $0x5c] sm:$0xff]  }
 0x11b   : > { %v593_v19 = vpop.f32.mrf.mxu0  ;;  %v793_v20 = vpop.f32.mrf.mxu1  ;;  %4179 = vmatmul.mubr.msk.bf16.gmra.mxu1 %vm453_vm1, %v2096_v6  ;;  %v1718_v6 = vshll.u32 %v4512_v51, 16 }
 0x11c   : > { %v5112_v22 = vadd.f32 %v785_v57, %v593_v19  ;;  %2268 = vmatprep.mubr.bf16.mxu1 %v6189_v4 }
 0x11d   : > { %v595_v24 = vpop.f32.mrf.mxu0  ;;  %v795_v26 = vpop.f32.mrf.mxu1 }
 0x11e   : > { %v5115_v28 = vadd.f32 %v787_v1, %v595_v24  ;;  %v1714_v1 = vshrl.u32 %v4510_v15, 16  ;;  %v4514_v15 = vld [vmem:[%s4798_s16 + $0x64] sm:$0xff]  }
 0x11f   : > { %v597_v34 = vpop.f32.mrf.mxu0  ;;  %v797_v35 = vpop.f32.mrf.mxu1  ;;  %v1726_v47 = vshll.u32 %v4514_v15, 16 }
 0x120   : > { %v5118_v37 = vadd.f32 %v789_v9, %v597_v34 }
 0x121   : > { %v601_v42 = vpop.f32.mrf.mxu0  ;;  %4151 = vmatmul.mubr.msk.bf16.gmra.mxu0 %vm453_vm1, %v1705_v29  ;;  %v799_v44 = vpop.f32.mrf.mxu1  ;;  %v1720_v29 = vrot.slane %v1718_v6, 1 }
 0x122   : > { %v5123_v46 = vadd.f32 %v793_v20, %v601_v42  ;;  %1901 = vmatprep.mubr.bf16.mxu0 %v6189_v4 }
 0x123   : > { %v603_v48 = vpop.f32.mrf.mxu0  ;;  %v803_v56 = vpop.f32.mrf.mxu1  ;;  %4180 = vmatmul.mubr.msk.bf16.gmra.mxu1 %vm453_vm1, %v2098_v40 }
 0x124   : > { %v5128_v57 = vadd.f32 %v795_v26, %v603_v48  ;;  %2278 = vmatprep.mubr.bf16.mxu1 %v6189_v4  ;;  %v1716_v26 = vor.u32 %v1714_v1, %v1712_v50 }
 0x125   : > { %v605_v59 = vpop.f32.mrf.mxu0  ;;  %v805_v60 = vpop.f32.mrf.mxu1 }
 0x126   : > { %v5131_v63 = vadd.f32 %v797_v35, %v605_v59  ;;  %v1721_v42 = vsel %vm343_vm2, %v1716_v26, %v1720_v29 }
 0x127   : > { %v607_v7 = vpop.f32.mrf.mxu0  ;;  %v807_v8 = vpop.f32.mrf.mxu1 }
 0x128   : > { %v5134_v9 = vadd.f32 %v799_v44, %v607_v7  ;;  %v1722_v44 = vshrl.u32 %v4512_v51, 16  ;;  %v1728_v51 = vrot.slane %v1726_v47, 1 }
 0x129   : > { %v611_v19 = vpop.f32.mrf.mxu0  ;;  %4152 = vmatmul.mubr.msk.bf16.gmra.mxu0 %vm453_vm1, %v1713_v0  ;;  %v809_v20 = vpop.f32.mrf.mxu1  ;;  %v4519_v0 = vld [vmem:[%s4798_s16 + $0x18] sm:$0xff]  }
 0x12a   : > { %v5139_v24 = vadd.f32 %v803_v56, %v611_v19  ;;  %1911 = vmatprep.mubr.bf16.mxu0 %v6189_v4  ;;  %v4517_v56 = vld [vmem:[%s4798_s16 + $0x6c] ss:$0 sps:$4 sm:$0x11]  }
 0x12b   : > { %v613_v31 = vpop.f32.mrf.mxu0  ;;  %v813_v33 = vpop.f32.mrf.mxu1  ;;  %4181 = vmatmul.mubr.msk.bf16.gmra.mxu1 %vm453_vm1, %v2100_v13  ;;  %v4516_v13 = vld [vmem:[%s4798_s16 + $0x6c] ss:$0 sps:$4 sm:$0x11]  }
 0x12c   : > { %v5144_v34 = vadd.f32 %v805_v60, %v613_v31  ;;  %2288 = vmatprep.mubr.bf16.mxu1 %v6189_v4  ;;  %v2102_v60 = vsel %vm932_vm3, %v2099_v54, %v2101_v23  ;;  %v4520_v54 = vld [vmem:[%s4798_s16 + $0x20] sm:$0xff]   ;;  %v2788_v31 = vshll.u32 %v4519_v0, 16 }
 0x12d   : > { %v615_v35 = vpop.f32.mrf.mxu0  ;;  %v815_v40 = vpop.f32.mrf.mxu1 }
 0x12e   : > { %v5147_v41 = vadd.f32 %v807_v8, %v615_v35  ;;  %v1724_v8 = vor.u32 %v1722_v44, %v1720_v29  ;;  %v1730_v29 = vshrl.u32 %v4514_v15, 16  ;;  %v1734_v44 = vshll.u32 %v4516_v13, 16 }
 0x12f   : > { %v617_v50 = vpop.f32.mrf.mxu0  ;;  %v817_v48 = vpop.f32.mrf.mxu1 }
 0x130   : > { %v5151_v59 = vadd.f32 %v809_v20, %v617_v50  ;;  %v2103_v20 = vrot.slane %v4517_v56, 1  ;;  %v1729_v50 = vsel %vm343_vm2, %v1724_v8, %v1728_v51  ;;  %v2790_v56 = vrot.slane %v2788_v31, 1 }
 0x131   : > { %v621_v1 = vpop.f32.mrf.mxu0  ;;  %4153 = vmatmul.mubr.msk.bf16.gmra.mxu0 %vm453_vm1, %v1721_v42  ;;  %v819_v6 = vpop.f32.mrf.mxu1  ;;  %v1732_v15 = vor.u32 %v1730_v29, %v1728_v51  ;;  %v1736_v8 = vrot.slane %v1734_v44, 1 }
 0x132   : > { %v5156_v7 = vadd.f32 %v813_v33, %v621_v1  ;;  %1921 = vmatprep.mubr.bf16.mxu0 %v6189_v4 }
 0x133   : > { %v623_v14 = vpop.f32.mrf.mxu0  ;;  %v823_v19 = vpop.f32.mrf.mxu1  ;;  %4182 = vmatmul.mubr.msk.bf16.gmra.mxu1 %vm453_vm1, %v2102_v60 }
 0x134   : > { %6193 = vst [vmem:[#allocation5_spill] sm:$0xff] %v5156_v7  ;;  %v5161_v26 = vadd.f32 %v815_v40, %v623_v14  ;;  %2298 = vmatprep.mubr.bf16.mxu1 %v6189_v4  ;;  %v2104_v7 = vsel %vm932_vm3, %v2101_v23, %v2103_v20  ;;  %v2786_v40 = vshrl.u32 %v4519_v0, 16  ;;  %v2793_v14 = vshll.u32 %v4520_v54, 16  ;;  %v4522_v20 = vld [vmem:[%s4798_s16 + $0x28] sm:$0xff]  }
 0x135   : > { %v625_v35 = vpop.f32.mrf.mxu0  ;;  %v825_v42 = vpop.f32.mrf.mxu1  ;;  %v2801_v44 = vshll.u32 %v4522_v20, 16 }
 0x136   : > { %6194 = vst [vmem:[#allocation6_spill] sm:$0xff] %v5161_v26  ;;  %v5165_v33 = vadd.f32 %v817_v48, %v625_v35  ;;  %v6196_v35 = vmov 0   ;;  %v2791_v0 = vor.u32 %v2790_v56, %v2786_v40 }
 0x137   : > { %v627_v47 = vpop.f32.mrf.mxu0  ;;  %v827_v1 = vpop.f32.mrf.mxu1 }
 0x138   : > { %6195 = vst [vmem:[#allocation7_spill] sm:$0xff] %v5165_v33  ;;  %v5169_v60 = vadd.f32 %v819_v6, %v627_v47  ;;  %v2795_v6 = vrot.slane %v2793_v14, 1 }
 0x139   : > { %v631_v4 = vpop.f32.mrf.mxu0  ;;  %4154 = vmatmul.mubr.msk.bf16.gmra.mxu0 %vm453_vm1, %v1729_v50  ;;  %v829_v26 = vpop.f32.mrf.mxu1 }
 0x13a   : > { %v5172_v48 = vadd.f32 %v823_v19, %v631_v4  ;;  %1931 = vmatprep.mubr.bf16.mxu0 %v6196_v35  ;;  %v1737_v4 = vsel %vm343_vm2, %v1732_v15, %v1736_v8  ;;  %v4524_v15 = vld [vmem:[%s4798_s16 + $0x30] sm:$0xff]   ;;  %v2803_v8 = vrot.slane %v2801_v44, 1 }
 0x13b   : > { %v633_v13 = vpop.f32.mrf.mxu0  ;;  %v833_v33 = vpop.f32.mrf.mxu1  ;;  %4183 = vmatmul.mubr.msk.bf16.gmra.mxu1 %vm453_vm1, %v2104_v7  ;;  %v2796_v7 = vsel %vm343_vm2, %v2791_v0, %v2795_v6 }
 0x13c   : > { %v5176_v23 = vadd.f32 %v825_v42, %v633_v13  ;;  %2968 = vmatprep.mubr.bf16.mxu1 %v6196_v35  ;;  %v2797_v42 = vshrl.u32 %v4520_v54, 16 }
 0x13d   : > { %v635_v31 = vpop.f32.mrf.mxu0  ;;  %v835_v50 = vpop.f32.mrf.mxu1 }
 0x13e   : > { %v5180_v47 = vadd.f32 %v827_v1, %v635_v31  ;;  %v2799_v54 = vor.u32 %v2797_v42, %v2795_v6  ;;  %v4518_v31 = vld [vmem:[%s4798_s16 + $0x18] sm:$0xff]  }
 0x13f   : > { %v637_v51 = vpop.f32.mrf.mxu0  ;;  %v837_v19 = vpop.f32.mrf.mxu1 }
 0x140   : > { %6197 = vst [vmem:[#allocation8_spill] sm:$0xff] %v5180_v47  ;;  %v5183_v29 = vadd.f32 %v829_v26, %v637_v51  ;;  %v2809_v47 = vshll.u32 %v4524_v15, 16 }
 0x141   : > { %v641_v13 = vpop.f32.mrf.mxu0  ;;  %4155 = vmatmul.mubr.msk.bf16.gmra.mxu0 %vm453_vm1, %v1737_v4  ;;  %v839_v40 = vpop.f32.mrf.mxu1 }
 0x142   : > { %6198 = vst [vmem:[#allocation9_spill] sm:$0xff] %v5183_v29  ;;  %v5187_v56 = vadd.f32 %v833_v33, %v641_v13  ;;  %2526 = vmatprep.mubr.bf16.mxu0 %v6196_v35  ;;  %v3298_v13 = vsel %vm490_vm0, %v5000_v18, 0  ;;  %v2805_v29 = vshrl.u32 %v4522_v20, 16  ;;  %v2811_v44 = vrot.slane %v2809_v47, 1 }
 0x143   : > { %v643_v1 = vpop.f32.mrf.mxu0  ;;  %v1381_v14 = vpop.f32.mrf.mxu1  ;;  %4227 = vmatmul.mubr.msk.bf16.vlgmr.msra.gmra.mxu1 %vm453_vm1, %v2796_v7 }
 0x144   : > { %6199 = vst [vmem:[#allocation10_spill] sm:$0xff] %v5187_v56  ;;  %v5192_v26 = vadd.f32 %v835_v50, %v643_v1  ;;  %2978 = vmatprep.mubr.bf16.mxu1 %v6196_v35  ;;  %v2804_v50 = vsel %vm343_vm2, %v2799_v54, %v2803_v8  ;;  %v2807_v20 = vor.u32 %v2805_v29, %v2803_v8  ;;  %v4526_v54 = vld [vmem:[%s4798_s16 + $0x38] sm:$0xff]  }
 0x145   : > { %v645_v0 = vpop.f32.mrf.mxu0  ;;  %v1383_v51 = vpop.f32.mrf.mxu1  ;;  %v2817_v8 = vshll.u32 %v4526_v54, 16 }
 0x146   : > { %v5196_v4 = vadd.f32 %v837_v19, %v645_v0  ;;  %v2812_v29 = vsel %vm343_vm2, %v2807_v20, %v2811_v44 }
 0x147   : > { %v647_v33 = vpop.f32.mrf.mxu0  ;;  %v1385_v56 = vpop.f32.mrf.mxu1 }
 0x148   : > { %6200 = vst [vmem:[#allocation11_spill] sm:$0xff] %v5196_v4  ;;  %v5200_v7 = vadd.f32 %v839_v40, %v647_v33  ;;  %v4521_v33 = vld [vmem:[%s4798_s16 + $0x20] sm:$0xff]  }
 0x149   : > { %v1043_v1 = vpop.f32.mrf.mxu0  ;;  %4199 = vmatmul.mubr.msk.bf16.vlgmr.msra.gmra.mxu0 %vm453_vm1, %v4518_v31  ;;  %v1387_v6 = vpop.f32.mrf.mxu1 }
 0x14a   : > { %6201 = vst [vmem:[#allocation12_spill] sm:$0xff] %v5200_v7  ;;  %v1162_v19 = vadd.f32 %v1043_v1, %v5010_v53  ;;  %3318 = vmatpush1.bf16.msra.mxu0 %v3298_v13  ;;  %2536 = vmatprep.mubr.bf16.mxu0 %v6196_v35 }
 0x14b   : > { %v1045_v42 = vpop.f32.mrf.mxu0  ;;  %v1391_v18 = vpop.f32.mrf.mxu1  ;;  %4228 = vmatmul.mubr.msk.bf16.gmra.mxu1 %vm453_vm1, %v2804_v50 }
 0x14c   : > { %v1163_v40 = vadd.f32 %v1045_v42, %v5016_v58  ;;  %v5208_v0 = vadd.f32 %v1381_v14, %v1162_v19  ;;  %2988 = vmatprep.mubr.bf16.mxu1 %v6196_v35  ;;  %v2813_v14 = vshrl.u32 %v4524_v15, 16 }
 0x14d   : > { %v1047_v31 = vpop.f32.mrf.mxu0  ;;  %v1393_v7 = vpop.f32.mrf.mxu1 }
 0x14e   : > { %v1164_v53 = vadd.f32 %v1047_v31, %v5019_v62  ;;  %v5214_v13 = vadd.f32 %v1383_v51, %v1163_v40  ;;  %v2815_v20 = vor.u32 %v2813_v14, %v2811_v44  ;;  %v2819_v31 = vrot.slane %v2817_v8, 1 }
 0x14f   : > { %v1049_v1 = vpop.f32.mrf.mxu0  ;;  %v1395_v4 = vpop.f32.mrf.mxu1 }
 0x150   : > { %v1165_v47 = vadd.f32 %v1049_v1, %v5022_v5  ;;  %v5218_v58 = vadd.f32 %v1385_v56, %v1164_v53  ;;  %v4528_v5 = vld [vmem:[%s4798_s16 + $0x40] sm:$0xff]   ;;  %v4523_v53 = vld [vmem:[%s4798_s16 + $0x28] sm:$0xff]  }
 0x151   : > { %v1053_v50 = vpop.f32.mrf.mxu0  ;;  %4200 = vmatmul.mubr.msk.bf16.gmra.mxu0 %vm453_vm1, %v4521_v33  ;;  %v1397_v19 = vpop.f32.mrf.mxu1 }
 0x152   : > { %6202 = vst [vmem:[#allocation13_spill] sm:$0xff] %v5218_v58  ;;  %v1166_v62 = vadd.f32 %v1053_v50, %v5027_v10  ;;  %v5222_v51 = vadd.f32 %v1387_v6, %v1165_v47  ;;  %2546 = vmatprep.mubr.bf16.mxu0 %v6196_v35 }
 0x153   : > { %v1055_v42 = vpop.f32.mrf.mxu0  ;;  %v1401_v40 = vpop.f32.mrf.mxu1  ;;  %4229 = vmatmul.mubr.msk.bf16.gmra.mxu1 %vm453_vm1, %v2812_v29  ;;  %v2825_v29 = vshll.u32 %v4528_v5, 16 }
 0x154   : > { %6203 = vst [vmem:[#allocation14_spill] sm:$0xff] %v5222_v51  ;;  %v1167_v56 = vadd.f32 %v1055_v42, %v5032_v16  ;;  %v5228_v15 = vadd.f32 %v1391_v18, %v1166_v62  ;;  %2998 = vmatprep.mubr.bf16.mxu1 %v6196_v35  ;;  %v2821_v51 = vshrl.u32 %v4526_v54, 16  ;;  %v2820_v18 = vsel %vm343_vm2, %v2815_v20, %v2819_v31 }
 0x155   : > { %v1057_v33 = vpop.f32.mrf.mxu0  ;;  %v1403_v10 = vpop.f32.mrf.mxu1 }
 0x156   : > { %v1168_v6 = vadd.f32 %v1057_v33, %v5035_v21  ;;  %v5233_v1 = vadd.f32 %v1393_v7, %v1167_v56  ;;  %v4530_v56 = vld [vmem:[%s4798_s16 + $0x48] sm:$0xff]   ;;  %v4525_v33 = vld [vmem:[%s4798_s16 + $0x30] sm:$0xff]  }
 0x157   : > { %v1059_v47 = vpop.f32.mrf.mxu0  ;;  %v1405_v50 = vpop.f32.mrf.mxu1 }
 0x158   : > { %v1169_v58 = vadd.f32 %v1059_v47, %v5038_v27  ;;  %v5236_v16 = vadd.f32 %v1395_v4, %v1168_v6  ;;  %v2823_v27 = vor.u32 %v2821_v51, %v2819_v31  ;;  %v2827_v4 = vrot.slane %v2825_v29, 1 }
 0x159   : > { %v1063_v44 = vpop.f32.mrf.mxu0  ;;  %4201 = vmatmul.mubr.msk.bf16.gmra.mxu0 %vm453_vm1, %v4523_v53  ;;  %v1407_v14 = vpop.f32.mrf.mxu1  ;;  %v2833_v47 = vshll.u32 %v4530_v56, 16 }
 0x15a   : > { %v1170_v21 = vadd.f32 %v1063_v44, %v5043_v32  ;;  %v5241_v7 = vadd.f32 %v1397_v19, %v1169_v58  ;;  %2556 = vmatprep.mubr.bf16.mxu0 %v6196_v35  ;;  %v2828_v51 = vsel %vm343_vm2, %v2823_v27, %v2827_v4 }
 0x15b   : > { %v1065_v54 = vpop.f32.mrf.mxu0  ;;  %v1411_v8 = vpop.f32.mrf.mxu1  ;;  %4230 = vmatmul.mubr.msk.bf16.gmra.mxu1 %vm453_vm1, %v2820_v18  ;;  %v2835_v27 = vrot.slane %v2833_v47, 1 }
 0x15c   : > { %v1171_v62 = vadd.f32 %v1065_v54, %v5048_v39  ;;  %v5246_v42 = vadd.f32 %v1401_v40, %v1170_v21  ;;  %3008 = vmatprep.mubr.bf16.mxu1 %v6196_v35  ;;  %v2829_v40 = vshrl.u32 %v4528_v5, 16 }
 0x15d   : > { %v1067_v20 = vpop.f32.mrf.mxu0  ;;  %v1413_v32 = vpop.f32.mrf.mxu1 }
 0x15e   : > { %v1172_v58 = vadd.f32 %v1067_v20, %v5051_v43  ;;  %v5252_v19 = vadd.f32 %v1403_v10, %v1171_v62  ;;  %v2831_v54 = vor.u32 %v2829_v40, %v2827_v4  ;;  %v4527_v20 = vld [vmem:[%s4798_s16 + $0x38] sm:$0xff]  }
 0x15f   : > { %v1069_v53 = vpop.f32.mrf.mxu0  ;;  %v1415_v6 = vpop.f32.mrf.mxu1 }
 0x160   : > { %v1173_v31 = vadd.f32 %v1069_v53, %v5054_v49  ;;  %v5256_v39 = vadd.f32 %v1405_v50, %v1172_v58  ;;  %v4532_v49 = vld [vmem:[%s4798_s16 + $0x50] sm:$0xff]  }
 0x161   : > { %v1073_v29 = vpop.f32.mrf.mxu0  ;;  %4202 = vmatmul.mubr.msk.bf16.gmra.mxu0 %vm453_vm1, %v4525_v33  ;;  %v1417_v18 = vpop.f32.mrf.mxu1 }
 0x162   : > { %v1174_v43 = vadd.f32 %v1073_v29, %v5059_v55  ;;  %v5260_v10 = vadd.f32 %v1407_v14, %v1173_v31  ;;  %2566 = vmatprep.mubr.bf16.mxu0 %v6196_v35  ;;  %v2837_v31 = vshrl.u32 %v4530_v56, 16 }
 0x163   : > { %v1075_v44 = vpop.f32.mrf.mxu0  ;;  %v1421_v21 = vpop.f32.mrf.mxu1  ;;  %4231 = vmatmul.mubr.msk.bf16.gmra.mxu1 %vm453_vm1, %v2828_v51  ;;  %v2841_v51 = vshll.u32 %v4532_v49, 16 }
 0x164   : > { %v1175_v50 = vadd.f32 %v1075_v44, %v5064_v61  ;;  %v5266_v5 = vadd.f32 %v1411_v8, %v1174_v43  ;;  %3018 = vmatprep.mubr.bf16.mxu1 %v6196_v35  ;;  %v2836_v8 = vsel %vm343_vm2, %v2831_v54, %v2835_v27 }
 0x165   : > { %v1077_v62 = vpop.f32.mrf.mxu0  ;;  %v1423_v55 = vpop.f32.mrf.mxu1 }
 0x166   : > { %v1176_v14 = vadd.f32 %v1077_v62, %v5067_v2  ;;  %v5271_v33 = vadd.f32 %v1413_v32, %v1175_v50  ;;  %v4534_v50 = vld [vmem:[%s4798_s16 + $0x58] sm:$0xff]   ;;  %v4529_v62 = vld [vmem:[%s4798_s16 + $0x40] sm:$0xff]  }
 0x167   : > { %v1079_v58 = vpop.f32.mrf.mxu0  ;;  %v1425_v53 = vpop.f32.mrf.mxu1 }
 0x168   : > { %v1177_v29 = vadd.f32 %v1079_v58, %v5070_v11  ;;  %v5274_v61 = vadd.f32 %v1415_v6, %v1176_v14  ;;  %v2839_v11 = vor.u32 %v2837_v31, %v2835_v27  ;;  %v2843_v6 = vrot.slane %v2841_v51, 1 }
 0x169   : > { %v1083_v4 = vpop.f32.mrf.mxu0  ;;  %4203 = vmatmul.mubr.msk.bf16.gmra.mxu0 %vm453_vm1, %v4527_v20  ;;  %v1427_v40 = vpop.f32.mrf.mxu1  ;;  %v2849_v51 = vshll.u32 %v4534_v50, 16 }
 0x16a   : > { %v1178_v2 = vadd.f32 %v1083_v4, %v5075_v17  ;;  %v5279_v32 = vadd.f32 %v1417_v18, %v1177_v29  ;;  %2576 = vmatprep.mubr.bf16.mxu0 %v6196_v35  ;;  %v2844_v27 = vsel %vm343_vm2, %v2839_v11, %v2843_v6 }
 0x16b   : > { %v1085_v56 = vpop.f32.mrf.mxu0  ;;  %v1431_v47 = vpop.f32.mrf.mxu1  ;;  %4232 = vmatmul.mubr.msk.bf16.gmra.mxu1 %vm453_vm1, %v2836_v8  ;;  %v2851_v11 = vrot.slane %v2849_v51, 1 }
 0x16c   : > { %v1179_v43 = vadd.f32 %v1085_v56, %v5080_v25  ;;  %v5284_v44 = vadd.f32 %v1421_v21, %v1178_v2  ;;  %3028 = vmatprep.mubr.bf16.mxu1 %v6196_v35  ;;  %v2845_v21 = vshrl.u32 %v4532_v49, 16 }
 0x16d   : > { %v1087_v54 = vpop.f32.mrf.mxu0  ;;  %v1433_v17 = vpop.f32.mrf.mxu1 }
 0x16e   : > { %v1180_v18 = vadd.f32 %v1087_v54, %v5083_v30  ;;  %v5290_v20 = vadd.f32 %v1423_v55, %v1179_v43  ;;  %v2847_v56 = vor.u32 %v2845_v21, %v2843_v6  ;;  %v4531_v54 = vld [vmem:[%s4798_s16 + $0x48] sm:$0xff]  }
 0x16f   : > { %v1089_v14 = vpop.f32.mrf.mxu0  ;;  %v1435_v58 = vpop.f32.mrf.mxu1 }
 0x170   : > { %v1181_v31 = vadd.f32 %v1089_v14, %v5086_v38  ;;  %v5294_v25 = vadd.f32 %v1425_v53, %v1180_v18  ;;  %v4536_v38 = vld [vmem:[%s4798_s16 + $0x60] sm:$0xff]  }
 0x171   : > { %v1093_v29 = vpop.f32.mrf.mxu0  ;;  %4204 = vmatmul.mubr.msk.bf16.gmra.mxu0 %vm453_vm1, %v4529_v62  ;;  %v1437_v8 = vpop.f32.mrf.mxu1 }
 0x172   : > { %v1182_v30 = vadd.f32 %v1093_v29, %v5091_v45  ;;  %v5298_v55 = vadd.f32 %v1427_v40, %v1181_v31  ;;  %2586 = vmatprep.mubr.bf16.mxu0 %v6196_v35  ;;  %v2853_v31 = vshrl.u32 %v4534_v50, 16 }
 0x173   : > { %v1095_v4 = vpop.f32.mrf.mxu0  ;;  %v1441_v2 = vpop.f32.mrf.mxu1  ;;  %4233 = vmatmul.mubr.msk.bf16.gmra.mxu1 %vm453_vm1, %v2844_v27  ;;  %v2857_v27 = vshll.u32 %v4536_v38, 16 }
 0x174   : > { %v1183_v53 = vadd.f32 %v1095_v4, %v5096_v52  ;;  %v5304_v49 = vadd.f32 %v1431_v47, %v1182_v30  ;;  %3038 = vmatprep.mubr.bf16.mxu1 %v6196_v35  ;;  %v2852_v47 = vsel %vm343_vm2, %v2847_v56, %v2851_v11 }
 0x175   : > { %v1097_v43 = vpop.f32.mrf.mxu0  ;;  %v1443_v45 = vpop.f32.mrf.mxu1 }
 0x176   : > { %v1184_v40 = vadd.f32 %v1097_v43, %v5099_v36  ;;  %v5309_v62 = vadd.f32 %v1433_v17, %v1183_v53  ;;  %v4538_v53 = vld [vmem:[%s4798_s16 + $0x68] sm:$0xff]   ;;  %v4533_v43 = vld [vmem:[%s4798_s16 + $0x50] sm:$0xff]  }
 0x177   : > { %v1099_v18 = vpop.f32.mrf.mxu0  ;;  %v1445_v14 = vpop.f32.mrf.mxu1 }
 0x178   : > { %v1185_v29 = vadd.f32 %v1099_v18, %v5102_v3  ;;  %v5312_v52 = vadd.f32 %v1435_v58, %v1184_v40  ;;  %v2855_v3 = vor.u32 %v2853_v31, %v2851_v11  ;;  %v2859_v58 = vrot.slane %v2857_v27, 1 }
 0x179   : > { %v1103_v6 = vpop.f32.mrf.mxu0  ;;  %4205 = vmatmul.mubr.msk.bf16.gmra.mxu0 %vm453_vm1, %v4531_v54  ;;  %v1447_v21 = vpop.f32.mrf.mxu1  ;;  %v2865_v27 = vshll.u32 %v4538_v53, 16 }
 0x17a   : > { %v1186_v36 = vadd.f32 %v1103_v6, %v5107_v12  ;;  %v5317_v17 = vadd.f32 %v1437_v8, %v1185_v29  ;;  %2596 = vmatprep.mubr.bf16.mxu0 %v6196_v35  ;;  %v2860_v11 = vsel %vm343_vm2, %v2855_v3, %v2859_v58 }
 0x17b   : > { %v1105_v50 = vpop.f32.mrf.mxu0  ;;  %v1451_v51 = vpop.f32.mrf.mxu1  ;;  %4234 = vmatmul.mubr.msk.bf16.gmra.mxu1 %vm453_vm1, %v2852_v47  ;;  %v2867_v3 = vrot.slane %v2865_v27, 1 }
 0x17c   : > { %v1187_v30 = vadd.f32 %v1105_v50, %v5112_v22  ;;  %v5322_v4 = vadd.f32 %v1441_v2, %v1186_v36  ;;  %3048 = vmatprep.mubr.bf16.mxu1 %v6196_v35  ;;  %v2861_v2 = vshrl.u32 %v4536_v38, 16 }
 0x17d   : > { %v1107_v56 = vpop.f32.mrf.mxu0  ;;  %v1453_v12 = vpop.f32.mrf.mxu1 }
 0x17e   : > { %v1188_v8 = vadd.f32 %v1107_v56, %v5115_v28  ;;  %v5328_v54 = vadd.f32 %v1443_v45, %v1187_v30  ;;  %v2863_v50 = vor.u32 %v2861_v2, %v2859_v58  ;;  %v4535_v56 = vld [vmem:[%s4798_s16 + $0x58] sm:$0xff]  }
 0x17f   : > { %v1109_v40 = vpop.f32.mrf.mxu0  ;;  %v1455_v18 = vpop.f32.mrf.mxu1 }
 0x180   : > { %v1189_v31 = vadd.f32 %v1109_v40, %v5118_v37  ;;  %v5332_v22 = vadd.f32 %v1445_v14, %v1188_v8  ;;  %v4540_v37 = vld [vmem:[%s4798_s16 + $0x70] sm:$0xff]  }
 0x181   : > { %v1113_v29 = vpop.f32.mrf.mxu0  ;;  %4206 = vmatmul.mubr.msk.bf16.gmra.mxu0 %vm453_vm1, %v4533_v43  ;;  %v1457_v47 = vpop.f32.mrf.mxu1 }
 0x182   : > { %v1190_v28 = vadd.f32 %v1113_v29, %v5123_v46  ;;  %v5336_v45 = vadd.f32 %v1447_v21, %v1189_v31  ;;  %2606 = vmatprep.mubr.bf16.mxu0 %v6196_v35  ;;  %v2869_v31 = vshrl.u32 %v4538_v53, 16 }
 0x183   : > { %v1115_v6 = vpop.f32.mrf.mxu0  ;;  %v1461_v36 = vpop.f32.mrf.mxu1  ;;  %4235 = vmatmul.mubr.msk.bf16.gmra.mxu1 %vm453_vm1, %v2860_v11  ;;  %v2873_v11 = vshll.u32 %v4540_v37, 16 }
 0x184   : > { %v1191_v14 = vadd.f32 %v1115_v6, %v5128_v57  ;;  %v5342_v38 = vadd.f32 %v1451_v51, %v1190_v28  ;;  %3058 = vmatprep.mubr.bf16.mxu1 %v6196_v35  ;;  %v2868_v51 = vsel %vm343_vm2, %v2863_v50, %v2867_v3 }
 0x185   : > { %v1117_v30 = vpop.f32.mrf.mxu0  ;;  %v1463_v46 = vpop.f32.mrf.mxu1 }
 0x186   : > { %v1192_v21 = vadd.f32 %v1117_v30, %v5131_v63  ;;  %v5347_v43 = vadd.f32 %v1453_v12, %v1191_v14  ;;  %v4542_v14 = vld [vmem:[%s4798_s16 + $0x78] ss:$0 sps:$4 sm:$0x11]   ;;  %v4537_v30 = vld [vmem:[%s4798_s16 + $0x60] sm:$0xff]  }
 0x187   : > { %v1119_v8 = vpop.f32.mrf.mxu0  ;;  %v1465_v40 = vpop.f32.mrf.mxu1 }
 0x188   : > { %v1193_v29 = vadd.f32 %v1119_v8, %v5134_v9  ;;  %v5350_v57 = vadd.f32 %v1455_v18, %v1192_v21  ;;  %v2871_v9 = vor.u32 %v2869_v31, %v2867_v3  ;;  %v2875_v18 = vrot.slane %v2873_v11, 1 }
 0x189   : > { %v1123_v58 = vpop.f32.mrf.mxu0  ;;  %4207 = vmatmul.mubr.msk.bf16.gmra.mxu0 %vm453_vm1, %v4535_v56  ;;  %v5354_v2 = vpop.f32.mrf.mxu1  ;;  %v2881_v31 = vshll.u32 %v4542_v14, 16  ;;  %v4539_v14 = vld [vmem:[%s4798_s16 + $0x68] sm:$0xff]  }
 0x18a   : > { %v1194_v63 = vadd.f32 %v1123_v58, %v5139_v24  ;;  %v5357_v12 = vadd.f32 %v1457_v47, %v1193_v29  ;;  %2616 = vmatprep.mubr.bf16.mxu0 %v6196_v35  ;;  %v2876_v29 = vsel %vm343_vm2, %v2871_v9, %v2875_v18 }
 0x18b   : > { %v1125_v53 = vpop.f32.mrf.mxu0  ;;  %v1471_v27 = vpop.f32.mrf.mxu1  ;;  %4236 = vmatmul.mubr.msk.bf16.gmra.mxu1 %vm453_vm1, %v2868_v51  ;;  %v2883_v9 = vrot.slane %v2881_v31, 1 }
 0x18c   : > { %v1195_v28 = vadd.f32 %v1125_v53, %v5144_v34  ;;  %v5362_v6 = vadd.f32 %v1461_v36, %v1194_v63  ;;  %3068 = vmatprep.mubr.bf16.mxu1 %v6196_v35  ;;  %v2877_v36 = vshrl.u32 %v4540_v37, 16 }
 0x18d   : > { %v1127_v50 = vpop.f32.mrf.mxu0  ;;  %v1473_v24 = vpop.f32.mrf.mxu1 }
 0x18e   : > { %v1196_v47 = vadd.f32 %v1127_v50, %v5147_v41  ;;  %v5368_v56 = vadd.f32 %v1463_v46, %v1195_v28  ;;  %v6205_v41 = vld [vmem:[#allocation5_spill] sm:$0xff]  ;;  %v2879_v37 = vor.u32 %v2877_v36, %v2875_v18  ;;  %v4556_v18 = vld [vmem:[%s6186_s3 + $0x78] sm:$0xff]  }
 0x18f   : > { %v1129_v21 = vpop.f32.mrf.mxu0  ;;  %v1475_v8 = vpop.f32.mrf.mxu1  ;;  %4287 = vmatprep.subr.bf16.mxu1 %v4556_v18 }
 0x190   : > { %v5372_v3 = vadd.f32 %v1129_v21, %v5151_v59  ;;  %v5374_v34 = vadd.f32 %v1465_v40, %v1196_v47  ;;  %v6206_v59 = vld [vmem:[#allocation6_spill] sm:$0xff] }
 0x191   : > { %v1133_v11 = vpop.f32.mrf.mxu0  ;;  %4208 = vmatmul.mubr.msk.bf16.gmra.mxu0 %vm453_vm1, %v4537_v30  ;;  %v5377_v51 = vpop.f32.mrf.mxu1  ;;  %v6207_v30 = vld [vmem:[#allocation7_spill] sm:$0xff] }
 0x192   : > { %6204 = vst [vmem:[#allocation15_spill] sm:$0xff] %v5377_v51  ;;  %v1198_v46 = vadd.f32 %v1133_v11, %v6205_v41  ;;  %2626 = vmatprep.mubr.bf16.mxu0 %v6196_v35 }
 0x193   : > { %v1135_v58 = vpop.f32.mrf.mxu0  ;;  %v1481_v63 = vpop.f32.mrf.mxu1  ;;  %4237 = vmatmul.mubr.msk.bf16.gmra.mxu1 %vm453_vm1, %v2876_v29 }
 0x194   : > { %v1199_v53 = vadd.f32 %v1135_v58, %v6206_v59  ;;  %v5383_v40 = vadd.f32 %v1471_v27, %v1198_v46  ;;  %3078 = vmatprep.mubr.bf16.mxu1 %v6196_v35  ;;  %v2884_v27 = vsel %vm343_vm2, %v2879_v37, %v2883_v9  ;;  %v4541_v37 = vld [vmem:[%s4798_s16 + $0x70] sm:$0xff]   ;;  %v6209_v9 = vld [vmem:[#allocation8_spill] sm:$0xff] }
 0x195   : > { %v1137_v28 = vpop.f32.mrf.mxu0  ;;  %v1483_v50 = vpop.f32.mrf.mxu1 }
 0x196   : > { %v1200_v47 = vadd.f32 %v1137_v28, %v6207_v30  ;;  %v5388_v21 = vadd.f32 %v1473_v24, %v1199_v53  ;;  %v4543_v30 = vld [vmem:[%s4798_s16 + $0x18] sm:$0xfe]  }
 0x197   : > { %v1139_v11 = vpop.f32.mrf.mxu0  ;;  %v1485_v41 = vpop.f32.mrf.mxu1 }
 0x198   : > { %v5391_v51 = vadd.f32 %v1139_v11, %v5169_v60  ;;  %v5393_v29 = vadd.f32 %v1475_v8, %v1200_v47  ;;  %v4557_v60 = vld [vmem:[%s6186_s3 + $0x38] sm:$0xff]   ;;  %v4544_v47 = vld [vmem:[%s4798_s16 + $0x20] sm:$0xff]  }
 0x199   : > { %v1143_v36 = vpop.f32.mrf.mxu0  ;;  %4209 = vmatmul.mubr.msk.bf16.gmra.mxu0 %vm453_vm1, %v4539_v14  ;;  %v5400_v31 = vpop.f32.mrf.mxu1  ;;  %4288 = vmatpush3.bf16.msra.mxu1 %v4557_v60 }
 0x19a   : > { %6208 = vst [vmem:[#allocation5_spill] sm:$0xff] %v5400_v31  ;;  %v1202_v24 = vadd.f32 %v1143_v36, %v5172_v48  ;;  %2636 = vmatprep.mubr.bf16.mxu0 %v6196_v35  ;;  %v6210_v36 = vld [vmem:[#allocation9_spill] sm:$0xff] }
 0x19b   : > { %v1145_v8 = vpop.f32.mrf.mxu0  ;;  %v1491_v46 = vpop.f32.mrf.mxu1  ;;  %4238 = vmatmul.mubr.msk.bf16.gmra.mxu1 %vm453_vm1, %v2884_v27 }
 0x19c   : > { %v1203_v58 = vadd.f32 %v1145_v8, %v5176_v23  ;;  %v5409_v59 = vadd.f32 %v1481_v63, %v1202_v24  ;;  %v6213_v24 = vld [vmem:[#allocation10_spill] sm:$0xff]  ;;  %v3228_v8 = vrot.slane %v4544_v47, 1 }
 0x19d   : > { %v1147_v53 = vpop.f32.mrf.mxu0  ;;  %v1493_v48 = vpop.f32.mrf.mxu1 }
 0x19e   : > { %v1204_v28 = vadd.f32 %v1147_v53, %v6209_v9  ;;  %v5413_v14 = vadd.f32 %v1483_v50, %v1203_v58  ;;  %v3227_v50 = vrot.slane %v4543_v30, 1  ;;  %v4545_v30 = vld [vmem:[%s4798_s16 + $0x28] sm:$0xff]  }
 0x19f   : > { %v1149_v11 = vpop.f32.mrf.mxu0  ;;  %v1495_v18 = vpop.f32.mrf.mxu1 }
 0x1a0   : > { %v5418_v31 = vadd.f32 %v1149_v11, %v6210_v36  ;;  %v5420_v27 = vadd.f32 %v1485_v41, %v1204_v28  ;;  %v4558_v41 = vld [vmem:[%s6186_s3 + $0x70] sm:$0xff]  }
 0x1a1   : > { %v1153_v23 = vpop.f32.mrf.mxu0  ;;  %4210 = vmatmul.mubr.msk.bf16.gmra.mxu0 %vm453_vm1, %v4541_v37  ;;  %v5423_v63 = vpop.f32.mrf.mxu1  ;;  %v6215_v36 = vld [vmem:[#allocation11_spill] sm:$0xff]  ;;  %4289 = vmatprep.subr.bf16.mxu1 %v4558_v41 }
 0x1a2   : > { %6211 = vst [vmem:[#allocation6_spill] sm:$0xff] %v5420_v27  ;;  %6212 = vst [vmem:[#allocation7_spill] sm:$0xff] %v5423_v63  ;;  %v1206_v60 = vadd.f32 %v1153_v23, %v6213_v24  ;;  %3335 = vmatprep.mubr.bf16.mxu0 %v6196_v35  ;;  %v3229_v23 = vsel %vm932_vm3, %v3227_v50, %v3228_v8  ;;  %v6217_v24 = vld [vmem:[#allocation12_spill] sm:$0xff] }
 0x1a3   : > { %v1155_v58 = vpop.f32.mrf.mxu0  ;;  %v2190_v53 = vpop.f32.mrf.mxu1 }
 0x1a4   : > { %v1207_v9 = vadd.f32 %v1155_v58, %v5192_v26  ;;  %v5428_v11 = vadd.f32 %v1491_v46, %v1206_v60  ;;  %v4559_v26 = vld [vmem:[%s6186_s3 + $0x30] sm:$0xff]  }
 0x1a5   : > { %v1157_v37 = vpop.f32.mrf.mxu0  ;;  %v2192_v28 = vpop.f32.mrf.mxu1  ;;  %4290 = vmatpush3.bf16.msra.mxu1 %v4559_v26  ;;  %v6221_v26 = vld [vmem:[#allocation13_spill] sm:$0xff] }
 0x1a6   : > { %6214 = vst [vmem:[#allocation8_spill] sm:$0xff] %v5428_v11  ;;  %v1208_v63 = vadd.f32 %v1157_v37, %v6215_v36  ;;  %v5434_v27 = vadd.f32 %v1493_v48, %v1207_v9  ;;  %v3230_v9 = vrot.slane %v4545_v30, 1 }
 0x1a7   : > { %v1159_v46 = vpop.f32.mrf.mxu0  ;;  %v2194_v47 = vpop.f32.mrf.mxu1 }
 0x1a8   : > { %6216 = vst [vmem:[#allocation9_spill] sm:$0xff] %v5434_v27  ;;  %v5442_v60 = vadd.f32 %v1159_v46, %v6217_v24  ;;  %v5444_v58 = vadd.f32 %v1495_v18, %v1208_v63 }
 0x1a9   : > { %v1823_v37 = vpop.f32.mrf.mxu0  ;;  %4255 = vmatmul.mubr.msk.bf16.vlgmr.msra.gmra.mxu0 %vm453_vm1, %v3229_v23  ;;  %v5447_v48 = vpop.f32.mrf.mxu1  ;;  %v3231_v23 = vsel %vm932_vm3, %v3228_v8, %v3230_v9 }
 0x1aa   : > { %6218 = vst [vmem:[#allocation10_spill] sm:$0xff] %v5442_v60  ;;  %6219 = vst [vmem:[#allocation11_spill] sm:$0xff] %v5444_v58  ;;  %v1942_v50 = vadd.f32 %v1823_v37, %v5208_v0  ;;  %3345 = vmatprep.mubr.bf16.mxu0 %v6196_v35  ;;  %v6222_v37 = vld [vmem:[#allocation14_spill] sm:$0xff] }
 0x1ab   : > { %6220 = vst [vmem:[#allocation12_spill] sm:$0xff] %v5447_v48  ;;  %v1825_v41 = vpop.f32.mrf.mxu0  ;;  %v2200_v36 = vpop.f32.mrf.mxu1  ;;  %v4546_v48 = vld [vmem:[%s4798_s16 + $0x30] sm:$0xff]  }
 0x1ac   : > { %v1943_v27 = vadd.f32 %v1825_v41, %v5214_v13  ;;  %v5452_v46 = vadd.f32 %v2190_v53, %v1942_v50  ;;  %v4560_v13 = vld [vmem:[%s6186_s3 + $0x68] sm:$0xff]   ;;  %v3232_v8 = vrot.slane %v4546_v48, 1 }
 0x1ad   : > { %v1827_v18 = vpop.f32.mrf.mxu0  ;;  %v2202_v63 = vpop.f32.mrf.mxu1  ;;  %4291 = vmatprep.subr.bf16.mxu1 %v4560_v13 }
 0x1ae   : > { %v1944_v24 = vadd.f32 %v1827_v18, %v6221_v26  ;;  %v5455_v58 = vadd.f32 %v2192_v28, %v1943_v27  ;;  %v4561_v28 = vld [vmem:[%s6186_s3 + $0x28] sm:$0xff]   ;;  %v3233_v48 = vsel %vm932_vm3, %v3230_v9, %v3232_v8 }
 0x1af   : > { %v1829_v60 = vpop.f32.mrf.mxu0  ;;  %v2204_v0 = vpop.f32.mrf.mxu1  ;;  %4292 = vmatpush3.bf16.msra.mxu1 %v4561_v28 }
 0x1b0   : > { %v5460_v11 = vadd.f32 %v1829_v60, %v6222_v37  ;;  %v5462_v30 = vadd.f32 %v2194_v47, %v1944_v24  ;;  %v4547_v37 = vld [vmem:[%s4798_s16 + $0x38] sm:$0xff]  }
 0x1b1   : > { %v1833_v53 = vpop.f32.mrf.mxu0  ;;  %4256 = vmatmul.mubr.msk.bf16.gmra.mxu0 %vm453_vm1, %v3231_v23  ;;  %v5468_v50 = vpop.f32.mrf.mxu1 }
 0x1b2   : > { %6223 = vst [vmem:[#allocation13_spill] sm:$0xff] %v5462_v30  ;;  %6224 = vst [vmem:[#allocation14_spill] sm:$0xff] %v5468_v50  ;;  %v1946_v27 = vadd.f32 %v1833_v53, %v5228_v15  ;;  %3355 = vmatprep.mubr.bf16.mxu0 %v6196_v35 }
 0x1b3   : > { %v1835_v47 = vpop.f32.mrf.mxu0  ;;  %v2210_v60 = vpop.f32.mrf.mxu1 }
 0x1b4   : > { %v1947_v41 = vadd.f32 %v1835_v47, %v5233_v1  ;;  %v5476_v18 = vadd.f32 %v2200_v36, %v1946_v27 }
 0x1b5   : > { %v1837_v26 = vpop.f32.mrf.mxu0  ;;  %v2212_v24 = vpop.f32.mrf.mxu1 }
 0x1b6   : > { %v1948_v23 = vadd.f32 %v1837_v26, %v5236_v16  ;;  %v5479_v15 = vadd.f32 %v2202_v63, %v1947_v41  ;;  %v3234_v63 = vrot.slane %v4547_v37, 1 }
 0x1b7   : > { %v1839_v13 = vpop.f32.mrf.mxu0  ;;  %v2214_v53 = vpop.f32.mrf.mxu1 }
 0x1b8   : > { %v5484_v50 = vadd.f32 %v1839_v13, %v5241_v7  ;;  %v5486_v30 = vadd.f32 %v2204_v0, %v1948_v23  ;;  %v4562_v7 = vld [vmem:[%s6186_s3 + $0x60] sm:$0xff]  }
 0x1b9   : > { %v1843_v1 = vpop.f32.mrf.mxu0  ;;  %4257 = vmatmul.mubr.msk.bf16.gmra.mxu0 %vm453_vm1, %v3233_v48  ;;  %v5489_v36 = vpop.f32.mrf.mxu1  ;;  %v4548_v48 = vld [vmem:[%s4798_s16 + $0x40] sm:$0xff]   ;;  %4293 = vmatprep.subr.bf16.mxu1 %v4562_v7 }
 0x1ba   : > { %v1950_v16 = vadd.f32 %v1843_v1, %v5246_v42  ;;  %3365 = vmatprep.mubr.bf16.mxu0 %v6196_v35  ;;  %v3235_v42 = vsel %vm932_vm3, %v3232_v8, %v3234_v63 }
 0x1bb   : > { %v1845_v9 = vpop.f32.mrf.mxu0  ;;  %v2220_v27 = vpop.f32.mrf.mxu1 }
 0x1bc   : > { %v1951_v28 = vadd.f32 %v1845_v9, %v5252_v19  ;;  %v5494_v47 = vadd.f32 %v2210_v60, %v1950_v16  ;;  %v4563_v19 = vld [vmem:[%s6186_s3 + $0x20] sm:$0xff]   ;;  %v3236_v16 = vrot.slane %v4548_v48, 1 }
 0x1bd   : > { %v1847_v0 = vpop.f32.mrf.mxu0  ;;  %v2222_v41 = vpop.f32.mrf.mxu1  ;;  %4294 = vmatpush3.bf16.msra.mxu1 %v4563_v19 }
 0x1be   : > { %v1952_v26 = vadd.f32 %v1847_v0, %v5256_v39  ;;  %v5500_v23 = vadd.f32 %v2212_v24, %v1951_v28 }
 0x1bf   : > { %v1849_v60 = vpop.f32.mrf.mxu0  ;;  %v2224_v37 = vpop.f32.mrf.mxu1 }
 0x1c0   : > { %v5508_v13 = vadd.f32 %v1849_v60, %v5260_v10  ;;  %v5510_v1 = vadd.f32 %v2214_v53, %v1952_v26  ;;  %v4549_v60 = vld [vmem:[%s4798_s16 + $0x48] sm:$0xff]  }
 0x1c1   : > { %v1853_v39 = vpop.f32.mrf.mxu0  ;;  %4258 = vmatmul.mubr.msk.bf16.gmra.mxu0 %vm453_vm1, %v3235_v42  ;;  %v5513_v24 = vpop.f32.mrf.mxu1  ;;  %v3237_v42 = vsel %vm932_vm3, %v3234_v63, %v3236_v16 }
 0x1c2   : > { %6225 = vst [vmem:[#allocation16_spill] sm:$0xff] %v5513_v24  ;;  %v1954_v8 = vadd.f32 %v1853_v39, %v5266_v5  ;;  %3375 = vmatprep.mubr.bf16.mxu0 %v6196_v35 }
 0x1c3   : > { %v1855_v9 = vpop.f32.mrf.mxu0  ;;  %v2230_v28 = vpop.f32.mrf.mxu1 }
 0x1c4   : > { %v1955_v7 = vadd.f32 %v1855_v9, %v5271_v33  ;;  %v5518_v10 = vadd.f32 %v2220_v27, %v1954_v8  ;;  %v4564_v33 = vld [vmem:[%s6186_s3 + $0x58] sm:$0xff]  }
 0x1c5   : > { %v1857_v53 = vpop.f32.mrf.mxu0  ;;  %v2232_v0 = vpop.f32.mrf.mxu1  ;;  %4295 = vmatprep.subr.bf16.mxu1 %v4564_v33 }
 0x1c6   : > { %v1956_v26 = vadd.f32 %v1857_v53, %v5274_v61  ;;  %v5521_v19 = vadd.f32 %v2222_v41, %v1955_v7  ;;  %v3238_v41 = vrot.slane %v4549_v60, 1  ;;  %v4550_v60 = vld [vmem:[%s4798_s16 + $0x50] sm:$0xff]  }
 0x1c7   : > { %v1859_v24 = vpop.f32.mrf.mxu0  ;;  %v2234_v5 = vpop.f32.mrf.mxu1 }
 0x1c8   : > { %v5526_v39 = vadd.f32 %v1859_v24, %v5279_v32  ;;  %v5528_v48 = vadd.f32 %v2224_v37, %v1956_v26  ;;  %v4565_v32 = vld [vmem:[%s6186_s3 + $0x18] sm:$0xff]  }
 0x1c9   : > { %v1863_v27 = vpop.f32.mrf.mxu0  ;;  %4259 = vmatmul.mubr.msk.bf16.gmra.mxu0 %vm453_vm1, %v3237_v42  ;;  %v5534_v61 = vpop.f32.mrf.mxu1  ;;  %4296 = vmatpush3.bf16.msra.mxu1 %v4565_v32  ;;  %v3239_v42 = vsel %vm932_vm3, %v3236_v16, %v3238_v41 }
 0x1ca   : > { %6226 = vst [vmem:[#allocation17_spill] sm:$0xff] %v5528_v48  ;;  %6227 = vst [vmem:[#allocation18_spill] sm:$0xff] %v5534_v61  ;;  %v1958_v63 = vadd.f32 %v1863_v27, %v5284_v44  ;;  %3385 = vmatprep.mubr.bf16.mxu0 %v6196_v35 }
 0x1cb   : > { %v1865_v37 = vpop.f32.mrf.mxu0  ;;  %v2240_v24 = vpop.f32.mrf.mxu1 }
 0x1cc   : > { %v1959_v8 = vadd.f32 %v1865_v37, %v5290_v20  ;;  %v5542_v9 = vadd.f32 %v2230_v28, %v1958_v63 }
 0x1cd   : > { %v1867_v7 = vpop.f32.mrf.mxu0  ;;  %v2242_v53 = vpop.f32.mrf.mxu1 }
 0x1ce   : > { %v1960_v26 = vadd.f32 %v1867_v7, %v5294_v25  ;;  %v5545_v44 = vadd.f32 %v2232_v0, %v1959_v8  ;;  %v3240_v0 = vrot.slane %v4550_v60, 1 }
 0x1cf   : > { %v1869_v33 = vpop.f32.mrf.mxu0  ;;  %v2244_v27 = vpop.f32.mrf.mxu1 }
 0x1d0   : > { %v5550_v61 = vadd.f32 %v1869_v33, %v5298_v55  ;;  %v5552_v48 = vadd.f32 %v2234_v5, %v1960_v26  ;;  %v4566_v55 = vld [vmem:[%s6186_s3 + $0x50] sm:$0xff]  }
 0x1d1   : > { %v1873_v20 = vpop.f32.mrf.mxu0  ;;  %4260 = vmatmul.mubr.msk.bf16.gmra.mxu0 %vm453_vm1, %v3239_v42  ;;  %v5555_v28 = vpop.f32.mrf.mxu1  ;;  %v4551_v42 = vld [vmem:[%s4798_s16 + $0x58] sm:$0xff]   ;;  %4297 = vmatprep.subr.bf16.mxu1 %v4566_v55 }
 0x1d2   : > { %v1962_v25 = vadd.f32 %v1873_v20, %v5304_v49  ;;  %3395 = vmatprep.mubr.bf16.mxu0 %v6196_v35  ;;  %v3241_v49 = vsel %vm932_vm3, %v3238_v41, %v3240_v0 }
 0x1d3   : > { %v1875_v16 = vpop.f32.mrf.mxu0  ;;  %v2250_v63 = vpop.f32.mrf.mxu1 }
 0x1d4   : > { %v1963_v32 = vadd.f32 %v1875_v16, %v5309_v62  ;;  %v5560_v37 = vadd.f32 %v2240_v24, %v1962_v25  ;;  %v4567_v62 = vld [vmem:[%s6186_s3 + $0x10] sm:$0xff]   ;;  %v3242_v25 = vrot.slane %v4551_v42, 1 }
 0x1d5   : > { %v1877_v5 = vpop.f32.mrf.mxu0  ;;  %v2252_v8 = vpop.f32.mrf.mxu1  ;;  %4298 = vmatpush3.bf16.msra.mxu1 %v4567_v62 }
 0x1d6   : > { %v1964_v7 = vadd.f32 %v1877_v5, %v5312_v52  ;;  %v5566_v26 = vadd.f32 %v2242_v53, %v1963_v32 }
 0x1d7   : > { %v1879_v24 = vpop.f32.mrf.mxu0  ;;  %v2254_v60 = vpop.f32.mrf.mxu1 }
 0x1d8   : > { %v5574_v33 = vadd.f32 %v1879_v24, %v5317_v17  ;;  %v5576_v20 = vadd.f32 %v2244_v27, %v1964_v7  ;;  %v4552_v24 = vld [vmem:[%s4798_s16 + $0x60] sm:$0xff]  }
 0x1d9   : > { %v1883_v52 = vpop.f32.mrf.mxu0  ;;  %4261 = vmatmul.mubr.msk.bf16.gmra.mxu0 %vm453_vm1, %v3241_v49  ;;  %v5579_v53 = vpop.f32.mrf.mxu1  ;;  %v3243_v49 = vsel %vm932_vm3, %v3240_v0, %v3242_v25 }
 0x1da   : > { %6228 = vst [vmem:[#allocation19_spill] sm:$0xff] %v5579_v53  ;;  %v1966_v41 = vadd.f32 %v1883_v52, %v5322_v4  ;;  %3405 = vmatprep.mubr.bf16.mxu0 %v6196_v35 }
 0x1db   : > { %v1885_v16 = vpop.f32.mrf.mxu0  ;;  %v2260_v32 = vpop.f32.mrf.mxu1 }
 0x1dc   : > { %v1967_v55 = vadd.f32 %v1885_v16, %v5328_v54  ;;  %v5584_v17 = vadd.f32 %v2250_v63, %v1966_v41  ;;  %v4568_v54 = vld [vmem:[%s6186_s3 + $0x48] sm:$0xff]  }
 0x1dd   : > { %v1887_v27 = vpop.f32.mrf.mxu0  ;;  %v2262_v5 = vpop.f32.mrf.mxu1  ;;  %4299 = vmatprep.subr.bf16.mxu1 %v4568_v54 }
 0x1de   : > { %v1968_v7 = vadd.f32 %v1887_v27, %v5332_v22  ;;  %v5587_v62 = vadd.f32 %v2252_v8, %v1967_v55  ;;  %v3244_v8 = vrot.slane %v4552_v24, 1  ;;  %v4553_v24 = vld [vmem:[%s4798_s16 + $0x68] sm:$0xff]  }
 0x1df   : > { %v1889_v53 = vpop.f32.mrf.mxu0  ;;  %v2264_v4 = vpop.f32.mrf.mxu1 }
 0x1e0   : > { %v5592_v52 = vadd.f32 %v1889_v53, %v5336_v45  ;;  %v5594_v42 = vadd.f32 %v2254_v60, %v1968_v7  ;;  %v4569_v45 = vld [vmem:[%s6186_s3 + $0x8] sm:$0xff]  }
 0x1e1   : > { %v1893_v63 = vpop.f32.mrf.mxu0  ;;  %4262 = vmatmul.mubr.msk.bf16.gmra.mxu0 %vm453_vm1, %v3243_v49  ;;  %v5600_v22 = vpop.f32.mrf.mxu1  ;;  %4300 = vmatpush3.bf16.msra.mxu1 %v4569_v45  ;;  %v3245_v49 = vsel %vm932_vm3, %v3242_v25, %v3244_v8 }
 0x1e2   : > { %6229 = vst [vmem:[#allocation20_spill] sm:$0xff] %v5594_v42  ;;  %6230 = vst [vmem:[#allocation21_spill] sm:$0xff] %v5600_v22  ;;  %v1970_v0 = vadd.f32 %v1893_v63, %v5342_v38  ;;  %3415 = vmatprep.mubr.bf16.mxu0 %v6196_v35 }
 0x1e3   : > { %v1895_v60 = vpop.f32.mrf.mxu0  ;;  %v2270_v53 = vpop.f32.mrf.mxu1 }
 0x1e4   : > { %v1971_v41 = vadd.f32 %v1895_v60, %v5347_v43  ;;  %v5608_v16 = vadd.f32 %v2260_v32, %v1970_v0 }
 0x1e5   : > { %v1897_v55 = vpop.f32.mrf.mxu0  ;;  %v2272_v27 = vpop.f32.mrf.mxu1 }
 0x1e6   : > { %v1972_v7 = vadd.f32 %v1897_v55, %v5350_v57  ;;  %v5611_v38 = vadd.f32 %v2262_v5, %v1971_v41  ;;  %v3246_v57 = vrot.slane %v4553_v24, 1 }
 0x1e7   : > { %v1899_v54 = vpop.f32.mrf.mxu0  ;;  %v2274_v63 = vpop.f32.mrf.mxu1 }
 0x1e8   : > { %v5616_v22 = vadd.f32 %v1899_v54, %v5357_v12  ;;  %v5618_v42 = vadd.f32 %v2264_v4, %v1972_v7  ;;  %v1535_v4 = vadd.f32 %v5354_v2, %v5372_v3 }
 0x1e9   : > { %v1903_v43 = vpop.f32.mrf.mxu0  ;;  %4263 = vmatmul.mubr.msk.bf16.gmra.mxu0 %vm453_vm1, %v3245_v49  ;;  %v2276_v32 = vpop.f32.mrf.mxu1  ;;  %v4554_v49 = vld [vmem:[%s4798_s16 + $0x70] sm:$0xff]  }
 0x1ea   : > { %6231 = vst [vmem:[#allocation22_spill] sm:$0xff] %v5618_v42  ;;  %v1974_v0 = vadd.f32 %v1903_v43, %v5362_v6  ;;  %3425 = vmatprep.mubr.bf16.mxu0 %v6196_v35  ;;  %v3247_v6 = vsel %vm932_vm3, %v3244_v8, %v3246_v57  ;;  %v3248_v8 = vrot.slane %v4554_v49, 1 }
 0x1eb   : > { %v1905_v5 = vpop.f32.mrf.mxu0  ;;  %v2280_v25 = vpop.f32.mrf.mxu1 }
 0x1ec   : > { %v1975_v45 = vadd.f32 %v1905_v5, %v5368_v56  ;;  %v5624_v60 = vadd.f32 %v2270_v53, %v1974_v0  ;;  %v4570_v56 = vld [vmem:[%s6186_s3 + $0x40] sm:$0xff]   ;;  %v3249_v49 = vsel %vm932_vm3, %v3246_v57, %v3248_v8 }
 0x1ed   : > { %v1907_v12 = vpop.f32.mrf.mxu0  ;;  %v2282_v41 = vpop.f32.mrf.mxu1  ;;  %4301 = vmatprep.subr.bf16.mxu1 %v4570_v56 }
 0x1ee   : > { %v1976_v55 = vadd.f32 %v1907_v12, %v5374_v34  ;;  %v5629_v7 = vadd.f32 %v2272_v27, %v1975_v45  ;;  %v4571_v45 = vld [vmem:[%s6186_s3] sm:$0xff]  }
 0x1ef   : > { %v1909_v54 = vpop.f32.mrf.mxu0  ;;  %v2284_v24 = vpop.f32.mrf.mxu1  ;;  %4302 = vmatpush3.bf16.msra.mxu1 %v4571_v45 }
 0x1f0   : > { %v1977_v43 = vadd.f32 %v1909_v54, %v1535_v4  ;;  %v5633_v42 = vadd.f32 %v2274_v63, %v1976_v55  ;;  %v4555_v54 = vld [vmem:[%s4798_s16 + $0x78] ss:$0 sps:$4 sm:$0x11]   ;;  %s6124_s16 = scalar_lea.hbm %s6188_s5, %s4284_s12 }
 0x1f1   : > { %v1913_v53 = vpop.f32.mrf.mxu0  ;;  %4264 = vmatmul.mubr.msk.bf16.gmra.mxu0 %vm453_vm1, %v3247_v6  ;;  %v2286_v2 = vpop.f32.mrf.mxu1 }
 0x1f2   : > { %v1978_v3 = vadd.f32 %v1913_v53, %v5383_v40  ;;  %v5640_v34 = vadd.f32 %v2276_v32, %v1977_v43  ;;  %3435 = vmatprep.mubr.bf16.mxu0 %v6196_v35  ;;  %v6232_v40 = vld [vmem:[#allocation15_spill] sm:$0xff] }
 0x1f3   : > { %v1915_v27 = vpop.f32.mrf.mxu0  ;;  %v2290_v63 = vpop.f32.mrf.mxu1  ;;  %v1539_v32 = vadd.f32 %v6232_v40, %v5391_v51  ;;  %v6233_v40 = vld [vmem:[#allocation5_spill] sm:$0xff] }
 0x1f4   : > { %v1979_v0 = vadd.f32 %v1915_v27, %v5388_v21  ;;  %v5644_v5 = vadd.f32 %v2280_v25, %v1978_v3 }
 0x1f5   : > { %v1917_v12 = vpop.f32.mrf.mxu0  ;;  %v2292_v4 = vpop.f32.mrf.mxu1 }
 0x1f6   : > { %v1980_v55 = vadd.f32 %v1917_v12, %v5393_v29  ;;  %v5652_v6 = vadd.f32 %v2282_v41, %v1979_v0  ;;  %v3250_v29 = vrot.slane %v4555_v54, 1 }
 0x1f7   : > { %v1919_v21 = vpop.f32.mrf.mxu0  ;;  %v2294_v25 = vpop.f32.mrf.mxu1 }
 0x1f8   : > { %v1981_v43 = vadd.f32 %v1919_v21, %v1539_v32  ;;  %v5656_v56 = vadd.f32 %v2284_v24, %v1980_v55  ;;  %v1543_v32 = vadd.f32 %v6233_v40, %v5418_v31  ;;  %v6234_v55 = vld [vmem:[#allocation6_spill] sm:$0xff]  ;;  %v6236_v40 = vld [vmem:[#allocation9_spill] sm:$0xff] }
 0x1f9   : > { %v1923_v53 = vpop.f32.mrf.mxu0  ;;  %4265 = vmatmul.mubr.msk.bf16.gmra.mxu0 %vm453_vm1, %v3249_v49  ;;  %v2296_v3 = vpop.f32.mrf.mxu1 }
 0x1fa   : > { %v1982_v27 = vadd.f32 %v1923_v53, %v5409_v59  ;;  %v5660_v51 = vadd.f32 %v2286_v2, %v1981_v43  ;;  %3445 = vmatprep.mubr.bf16.mxu0 %v6196_v35  ;;  %v3251_v59 = vsel %vm932_vm3, %v3248_v8, %v3250_v29  ;;  %v6237_v8 = vld [vmem:[#allocation10_spill] sm:$0xff]  ;;  %v6238_v29 = vld [vmem:[#allocation7_spill] sm:$0xff] }
 0x1fb   : > { %v1925_v41 = vpop.f32.mrf.mxu0  ;;  %v2300_v57 = vpop.f32.mrf.mxu1 }
 0x1fc   : > { %v1983_v0 = vadd.f32 %v1925_v41, %v5413_v14  ;;  %v5664_v45 = vadd.f32 %v2290_v63, %v1982_v27  ;;  %v6235_v14 = vld [vmem:[#allocation8_spill] sm:$0xff] }
 0x1fd   : > { %v1927_v12 = vpop.f32.mrf.mxu0  ;;  %v2302_v24 = vpop.f32.mrf.mxu1 }
 0x1fe   : > { %v1984_v49 = vadd.f32 %v1927_v12, %v6234_v55  ;;  %v5669_v21 = vadd.f32 %v2292_v4, %v1983_v0  ;;  %v1547_v55 = vadd.f32 %v6238_v29, %v6237_v8  ;;  %v6241_v8 = vld [vmem:[#allocation13_spill] sm:$0xff] }
 0x1ff   : > { %v1929_v2 = vpop.f32.mrf.mxu0  ;;  %v2304_v35 = vpop.f32.mrf.mxu1 }
 0x200   : > { %v1985_v54 = vadd.f32 %v1929_v2, %v1543_v32  ;;  %v5672_v43 = vadd.f32 %v2294_v25, %v1984_v49  ;;  %v6239_v32 = vld [vmem:[#allocation11_spill] sm:$0xff] }
 0x201   : > { %v1933_v53 = vpop.f32.mrf.mxu0  ;;  %4266 = vmatmul.mubr.msk.bf16.gmra.mxu0 %vm453_vm1, %v3251_v59  ;;  %v2306_v31 = vpop.f32.mrf.mxu1 }
 0x202   : > { %v1986_v63 = vadd.f32 %v1933_v53, %v6235_v14  ;;  %v5676_v27 = vadd.f32 %v2296_v3, %v1985_v54 }
 0x203   : > { %v1935_v41 = vpop.f32.mrf.mxu0  ;;  %v5686_v59 = vpop.f32.mrf.mxu1 }
 0x204   : > { %v1987_v12 = vadd.f32 %v1935_v41, %v6236_v40  ;;  %v5679_v4 = vadd.f32 %v2300_v57, %v1986_v63 }
 0x205   : > { %v1937_v0 = vpop.f32.mrf.mxu0  ;;  %v5695_v41 = vpop.f32.mrf.mxu1 }
 0x206   : > { %v1988_v25 = vadd.f32 %v1937_v0, %v6239_v32  ;;  %v5684_v49 = vadd.f32 %v2302_v24, %v1987_v12  ;;  %v6240_v12 = vld [vmem:[#allocation12_spill] sm:$0xff] }
 0x207   : > { %v1939_v2 = vpop.f32.mrf.mxu0  ;;  %v2312_v0 = vadd.f32 %v6240_v12, %v5460_v11  ;;  %v6242_v11 = vld [vmem:[#allocation14_spill] sm:$0xff] }
 0x208   : > { %v1989_v53 = vadd.f32 %v1939_v2, %v1547_v55  ;;  %v5688_v3 = vadd.f32 %v2304_v35, %v1988_v25  ;;  %v5705_v55 = vpop.f32.mrf.mxu1 }
 0x209   : > { %v2528_v54 = vpop.f32.mrf.mxu0 }
 0x20a   : > { %v5690_v14 = vadd.f32 %v2306_v31, %v1989_v53  ;;  %v5693_v57 = vadd.f32 %v2528_v54, %v5452_v46  ;;  %v5712_v25 = vpop.f32.mrf.mxu1  ;;  %v2316_v54 = vadd.f32 %v6242_v11, %v5484_v50 }
 0x20b   : > { %v2530_v63 = vpop.f32.mrf.mxu0 }
 0x20c   : > { %v5698_v40 = vadd.f32 %v2530_v63, %v5455_v58 }
 0x20d   : > { %v2532_v24 = vpop.f32.mrf.mxu0 }
 0x20e   : > { %v5703_v29 = vadd.f32 %v2532_v24, %v6241_v8  ;;  %v5722_v24 = vpop.f32.mrf.mxu1 }
 0x20f   : > { %v2534_v35 = vpop.f32.mrf.mxu0 }
 0x210   : > { %v5707_v31 = vadd.f32 %v2534_v35, %v2312_v0  ;;  %v5729_v35 = vpop.f32.mrf.mxu1 }
 0x211   : > { %v2538_v46 = vpop.f32.mrf.mxu0 }
 0x212   : > { %v5710_v32 = vadd.f32 %v2538_v46, %v5476_v18 }
 0x213   : > { %v2540_v58 = vpop.f32.mrf.mxu0 }
 0x214   : > { %v5715_v2 = vadd.f32 %v2540_v58, %v5479_v15 }
 0x215   : > { %v2542_v53 = vpop.f32.mrf.mxu0 }
 0x216   : > { %v5720_v63 = vadd.f32 %v2542_v53, %v5486_v30  ;;  %v2320_v30 = vadd.f32 %v5489_v36, %v5508_v13  ;;  %v5739_v53 = vpop.f32.mrf.mxu1  ;;  %v6247_v36 = vld [vmem:[#allocation16_spill] sm:$0xff] }
 0x217   : > { %v2544_v12 = vpop.f32.mrf.mxu0  ;;  %v2324_v13 = vadd.f32 %v6247_v36, %v5526_v39  ;;  %v6251_v39 = vld [vmem:[#allocation18_spill] sm:$0xff] }
 0x218   : > { %v5724_v0 = vadd.f32 %v2544_v12, %v2316_v54 }
 0x219   : > { %v2548_v18 = vpop.f32.mrf.mxu0 }
 0x21a   : > { %v5727_v8 = vadd.f32 %v2548_v18, %v5494_v47  ;;  %v5746_v18 = vpop.f32.mrf.mxu1 }
 0x21b   : > { %v2550_v15 = vpop.f32.mrf.mxu0 }
 0x21c   : > { %v5732_v46 = vadd.f32 %v2550_v15, %v5500_v23 }
 0x21d   : > { %v2552_v58 = vpop.f32.mrf.mxu0 }
 0x21e   : > { %6243 = vst [vmem:[#allocation15_spill] sm:$0xff] %v5732_v46  ;;  %v5737_v50 = vadd.f32 %v2552_v58, %v5510_v1  ;;  %v6248_v1 = vld [vmem:[#allocation17_spill] sm:$0xff] }
 0x21f   : > { %v2554_v11 = vpop.f32.mrf.mxu0 }
 0x220   : > { %6244 = vst [vmem:[#allocation5_spill] sm:$0xff] %v5737_v50  ;;  %v5741_v54 = vadd.f32 %v2554_v11, %v2320_v30  ;;  %v5756_v50 = vpop.f32.mrf.mxu1 }
 0x221   : > { %v2558_v47 = vpop.f32.mrf.mxu0 }
 0x222   : > { %v5744_v12 = vadd.f32 %v2558_v47, %v5518_v10 }
 0x223   : > { %v2560_v23 = vpop.f32.mrf.mxu0 }
 0x224   : > { %6245 = vst [vmem:[#allocation6_spill] sm:$0xff] %v5744_v12  ;;  %v5749_v15 = vadd.f32 %v2560_v23, %v5521_v19  ;;  %v5763_v12 = vpop.f32.mrf.mxu1 }
 0x225   : > { %v2562_v46 = vpop.f32.mrf.mxu0 }
 0x226   : > { %6246 = vst [vmem:[#allocation8_spill] sm:$0xff] %v5749_v15  ;;  %v5754_v58 = vadd.f32 %v2562_v46, %v6248_v1  ;;  %v2328_v46 = vadd.f32 %v6251_v39, %v5550_v61  ;;  %v5773_v1 = vpop.f32.mrf.mxu1 }
 0x227   : > { %v2564_v30 = vpop.f32.mrf.mxu0 }
 0x228   : > { %v5758_v11 = vadd.f32 %v2564_v30, %v2324_v13 }
 0x229   : > { %v2568_v10 = vpop.f32.mrf.mxu0 }
 0x22a   : > { %v5761_v47 = vadd.f32 %v2568_v10, %v5542_v9 }
 0x22b   : > { %v2570_v19 = vpop.f32.mrf.mxu0 }
 0x22c   : > { %6249 = vst [vmem:[#allocation9_spill] sm:$0xff] %v5761_v47  ;;  %v5766_v23 = vadd.f32 %v2570_v19, %v5545_v44  ;;  %v5780_v47 = vpop.f32.mrf.mxu1 }
 0x22d   : > { %v2572_v15 = vpop.f32.mrf.mxu0 }
 0x22e   : > { %6250 = vst [vmem:[#allocation10_spill] sm:$0xff] %v5766_v23  ;;  %v5771_v36 = vadd.f32 %v2572_v15, %v5552_v48  ;;  %v2332_v48 = vadd.f32 %v5555_v28, %v5574_v33  ;;  %v5790_v15 = vpop.f32.mrf.mxu1  ;;  %v6256_v28 = vld [vmem:[#allocation19_spill] sm:$0xff] }
 0x22f   : > { %v2574_v13 = vpop.f32.mrf.mxu0  ;;  %v2336_v33 = vadd.f32 %v6256_v28, %v5592_v52  ;;  %v6261_v52 = vld [vmem:[#allocation21_spill] sm:$0xff]  ;;  %v6262_v28 = vld [vmem:[#allocation22_spill] sm:$0xff] }
 0x230   : > { %v5775_v30 = vadd.f32 %v2574_v13, %v2328_v46 }
 0x231   : > { %v2578_v9 = vpop.f32.mrf.mxu0 }
 0x232   : > { %v5778_v10 = vadd.f32 %v2578_v9, %v5560_v37  ;;  %v5797_v9 = vpop.f32.mrf.mxu1 }
 0x233   : > { %v2580_v44 = vpop.f32.mrf.mxu0 }
 0x234   : > { %v5783_v19 = vadd.f32 %v2580_v44, %v5566_v26 }
 0x235   : > { %v2582_v23 = vpop.f32.mrf.mxu0 }
 0x236   : > { %6252 = vst [vmem:[#allocation7_spill] sm:$0xff] %v5783_v19  ;;  %v5788_v61 = vadd.f32 %v2582_v23, %v5576_v20  ;;  %v6257_v20 = vld [vmem:[#allocation20_spill] sm:$0xff] }
 0x237   : > { %v2584_v39 = vpop.f32.mrf.mxu0 }
 0x238   : > { %6253 = vst [vmem:[#allocation11_spill] sm:$0xff] %v5788_v61  ;;  %v5792_v46 = vadd.f32 %v2584_v39, %v2332_v48  ;;  %v5807_v61 = vpop.f32.mrf.mxu1 }
 0x239   : > { %v2588_v37 = vpop.f32.mrf.mxu0 }
 0x23a   : > { %v5795_v13 = vadd.f32 %v2588_v37, %v5584_v17 }
 0x23b   : > { %v2590_v26 = vpop.f32.mrf.mxu0 }
 0x23c   : > { %6254 = vst [vmem:[#allocation12_spill] sm:$0xff] %v5795_v13  ;;  %v5800_v44 = vadd.f32 %v2590_v26, %v5587_v62  ;;  %v5814_v13 = vpop.f32.mrf.mxu1 }
 0x23d   : > { %v2592_v19 = vpop.f32.mrf.mxu0 }
 0x23e   : > { %6255 = vst [vmem:[#allocation13_spill] sm:$0xff] %v5800_v44  ;;  %v5805_v23 = vadd.f32 %v2592_v19, %v6257_v20  ;;  %v2340_v19 = vadd.f32 %v6261_v52, %v5616_v22 }
 0x23f   : > { %v2594_v48 = vpop.f32.mrf.mxu0 }
 0x240   : > { %6258 = vst [vmem:[#allocation14_spill] sm:$0xff] %v5805_v23  ;;  %v5809_v39 = vadd.f32 %v2594_v48, %v2336_v33  ;;  %v5824_v23 = vpop.f32.mrf.mxu1 }
 0x241   : > { %v2598_v17 = vpop.f32.mrf.mxu0 }
 0x242   : > { %v5812_v37 = vadd.f32 %v2598_v17, %v5608_v16 }
 0x243   : > { %v2600_v62 = vpop.f32.mrf.mxu0 }
 0x244   : > { %6259 = vst [vmem:[#allocation16_spill] sm:$0xff] %v5812_v37  ;;  %v5817_v26 = vadd.f32 %v2600_v62, %v5611_v38  ;;  %v5831_v37 = vpop.f32.mrf.mxu1 }
 0x245   : > { %v2602_v44 = vpop.f32.mrf.mxu0 }
 0x246   : > { %6260 = vst [vmem:[#allocation17_spill] sm:$0xff] %v5817_v26  ;;  %v5822_v20 = vadd.f32 %v2602_v44, %v6262_v28  ;;  %v5839_v44 = vpop.f32.mrf.mxu1 }
 0x247   : > { %v2604_v33 = vpop.f32.mrf.mxu0 }
 0x248   : > { %v5826_v48 = vadd.f32 %v2604_v33, %v2340_v19  ;;  %v5847_v33 = vpop.f32.mrf.mxu1 }
 0x249   : > { %v2608_v16 = vpop.f32.mrf.mxu0 }
 0x24a   : > { %v5829_v17 = vadd.f32 %v2608_v16, %v5624_v60 }
 0x24b   : > { %v2610_v38 = vpop.f32.mrf.mxu0 }
 0x24c   : > { %v5834_v62 = vadd.f32 %v2610_v38, %v5629_v7 }
 0x24d   : > { %v2612_v26 = vpop.f32.mrf.mxu0 }
 0x24e   : > { %v5837_v22 = vadd.f32 %v2612_v26, %v5633_v42  ;;  %v5855_v26 = vpop.f32.mrf.mxu1 }
 0x24f   : > { %v2614_v52 = vpop.f32.mrf.mxu0 }
 0x250   : > { %6263 = vst [vmem:[#allocation18_spill] sm:$0xff] %v5837_v22  ;;  %v5842_v19 = vadd.f32 %v2614_v52, %v5640_v34 }
 0x251   : > { %v2618_v28 = vpop.f32.mrf.mxu0 }
 0x252   : > { %v5845_v60 = vadd.f32 %v2618_v28, %v5644_v5  ;;  %v5863_v28 = vpop.f32.mrf.mxu1 }
 0x253   : > { %v2620_v16 = vpop.f32.mrf.mxu0 }
 0x254   : > { %6264 = vst [vmem:[#allocation19_spill] sm:$0xff] %v5845_v60  ;;  %v5850_v7 = vadd.f32 %v2620_v16, %v5652_v6 }
 0x255   : > { %v2622_v38 = vpop.f32.mrf.mxu0 }
 0x256   : > { %6265 = vst [vmem:[#allocation20_spill] sm:$0xff] %v5850_v7  ;;  %v5853_v42 = vadd.f32 %v2622_v38, %v5656_v56  ;;  %v3506_v38 = vlaneseq }
 0x257   : > { %v2624_v22 = vpop.f32.mrf.mxu0 }
 0x258   : > { %6266 = vst [vmem:[#allocation21_spill] sm:$0xff] %v5853_v42  ;;  %v5858_v34 = vadd.f32 %v2624_v22, %v5660_v51  ;;  %v5871_v42 = vpop.f32.mrf.mxu1 }
 0x259   : > { %v2628_v52 = vpop.f32.mrf.mxu0 }
 0x25a   : > { %6267 = vst [vmem:[#allocation22_spill] sm:$0xff] %v5858_v34  ;;  %v5861_v5 = vadd.f32 %v2628_v52, %v5664_v45  ;;  %v3507_v52 = vshrl.u32 %v3506_v38, 7 }
 0x25b   : > { %v2630_v60 = vpop.f32.mrf.mxu0 }
 0x25c   : > { %6268 = vst [vmem:[#allocation23_spill] sm:$0xff] %v5861_v5  ;;  %v5866_v6 = vadd.f32 %v2630_v60, %v5669_v21  ;;  %v5879_v5 = vpop.f32.mrf.mxu1 }
 0x25d   : > { %v2632_v16 = vpop.f32.mrf.mxu0 }
 0x25e   : > { %6269 = vst [vmem:[#allocation24_spill] sm:$0xff] %v5866_v6  ;;  %v5869_v56 = vadd.f32 %v2632_v16, %v5672_v43  ;;  %v5887_v6 = vpop.f32.mrf.mxu1 }
 0x25f   : > { %v2634_v7 = vpop.f32.mrf.mxu0 }
 0x260   : > { %6270 = vst [vmem:[#allocation25_spill] sm:$0xff] %v5869_v56  ;;  %v5874_v51 = vadd.f32 %v2634_v7, %v5676_v27  ;;  %v3508_v56 = vsub.s32 0, %v3507_v52  ;;  %v3089_v7 = vadd.f32 %v5686_v59, %v5693_v57 }
 0x261   : > { %v2638_v22 = vpop.f32.mrf.mxu0 }
 0x262   : > { %6271 = vst [vmem:[#allocation26_spill] sm:$0xff] %v5874_v51  ;;  %v5877_v45 = vadd.f32 %v2638_v22, %v5679_v4  ;;  %v3504_v4 = vld [vmem:[%s6185_s2] sm:$0x3] }
 0x263   : > { %v2640_v21 = vpop.f32.mrf.mxu0 }
 0x264   : > { %6272 = vst [vmem:[#allocation27_spill] sm:$0xff] %v5877_v45  ;;  %v5882_v60 = vadd.f32 %v2640_v21, %v5684_v49  ;;  %v3512_v49 = vsub.s32 1, %v3507_v52  ;;  %v3091_v45 = vadd.f32 %v5705_v55, %v5703_v29 }
 0x265   : > { %v2642_v43 = vpop.f32.mrf.mxu0 }
 0x266   : > { %6273 = vst [vmem:[#allocation28_spill] sm:$0xff] %v5882_v60  ;;  %v5885_v16 = vadd.f32 %v2642_v43, %v5688_v3  ;;  %v3090_v3 = vadd.f32 %v5695_v41, %v5698_v40  ;;  %v5899_v43 = vrot.slane %v3504_v4, %v3508_v56  ;;  %v5905_v34 = vrot.slane %v3504_v4, %v3512_v49 }
 0x267   : > { %v2644_v27 = vpop.f32.mrf.mxu0  ;;  %v3093_v56 = vadd.f32 %v5722_v24, %v5710_v32  ;;  %v3095_v49 = vadd.f32 %v5739_v53, %v5720_v63  ;;  %v3097_v63 = vadd.f32 %v5756_v50, %v5727_v8 }
 0x268   : > { %6274 = vst [vmem:[#allocation29_spill] sm:$0xff] %v5885_v16  ;;  %v5895_v38 = vadd.f32 %v2644_v27, %v5690_v14  ;;  %v5901_v16 = vpop.f32.mrf.mxu1  ;;  %v3092_v14 = vadd.f32 %v5712_v25, %v5707_v31 }
 0x269   : > { %v3337_v22 = vpop.f32.mrf.mxu0 }
 0x26a   : > { %v3456_v21 = vadd.f32 %v3337_v22, %v3089_v7  ;;  %v5910_v41 = vpop.f32.mrf.mxu1 }
 0x26b   : > { %v3339_v60 = vpop.f32.mrf.mxu0 }
 0x26c   : > { %v3457_v51 = vadd.f32 %v3339_v60, %v3090_v3  ;;  %v3516_v57 = vadd.f32 %v5899_v43, %v3456_v21  ;;  %v3094_v60 = vadd.f32 %v5729_v35, %v5715_v2  ;;  %v5921_v22 = vpop.f32.mrf.mxu1  ;;  %v3096_v2 = vadd.f32 %v5746_v18, %v5724_v0 }
 0x26d   : > { %v3341_v59 = vpop.f32.mrf.mxu0 }
 0x26e   : > { %v3458_v52 = vadd.f32 %v3341_v59, %v3091_v45  ;;  %v3517_v27 = vadd.f32 %v5905_v34, %v3457_v51  ;;  %v3564_v7 = vmax.f32 %v3516_v57, 0.0 }
 0x26f   : > { %v3343_v40 = vpop.f32.mrf.mxu0 }
 0x270   : > { %v3518_v29 = vadd.f32 %v5899_v43, %v3458_v52  ;;  %v3459_v55 = vadd.f32 %v3343_v40, %v3092_v14  ;;  %v3565_v24 = vmax.f32 %v3517_v27, 0.0  ;;  %v5926_v52 = vpop.f32.mrf.mxu1 }
 0x271   : > { %v3347_v4 = vpop.f32.mrf.mxu0 }
 0x272   : > { %v3566_v31 = vmax.f32 %v3518_v29, 0.0  ;;  %v3519_v25 = vadd.f32 %v5905_v34, %v3459_v55  ;;  %v3460_v45 = vadd.f32 %v3347_v4, %v3093_v56  ;;  %v6275_v29 = vld [vmem:[#allocation15_spill] sm:$0xff]  ;;  %v5937_v8 = vpop.f32.mrf.mxu1 }
 0x273   : > { %v3349_v32 = vpop.f32.mrf.mxu0  ;;  %v3098_v55 = vadd.f32 %v5763_v12, %v6275_v29  ;;  %v3100_v12 = vadd.f32 %v5780_v47, %v5741_v54 }
 0x274   : > { %v3612_v51 = vpack.c.bf16 %v3566_v31, %v3564_v7  ;;  %v3567_v3 = vmax.f32 %v3519_v25, 0.0  ;;  %v3461_v21 = vadd.f32 %v3349_v32, %v3094_v60  ;;  %v3520_v35 = vadd.f32 %v5899_v43, %v3460_v45  ;;  %v6276_v31 = vld [vmem:[#allocation5_spill] sm:$0xff] }
 0x275   : > { %v3351_v59 = vpop.f32.mrf.mxu0  ;;  %v3099_v25 = vadd.f32 %v5773_v1, %v6276_v31 }
 0x276   : > { %v3462_v14 = vadd.f32 %v3351_v59, %v3095_v49  ;;  %v3613_v57 = vpack.c.bf16 %v3567_v3, %v3565_v24  ;;  %v3521_v53 = vadd.f32 %v5905_v34, %v3461_v21  ;;  %v3568_v18 = vmax.f32 %v3520_v35, 0.0 }
 0x277   : > { %v3353_v40 = vpop.f32.mrf.mxu0 }
 0x278   : > { %v3522_v56 = vadd.f32 %v5899_v43, %v3462_v14  ;;  %v3463_v27 = vadd.f32 %v3353_v40, %v3096_v2  ;;  %3803 = vmatprep.mubr.bf16.mxu1 %v3613_v57  ;;  %v3569_v45 = vmax.f32 %v3521_v53, 0.0  ;;  %v5942_v2 = vpop.f32.mrf.mxu1  ;;  %v6277_v14 = vld [vmem:[#allocation6_spill] sm:$0xff]  ;;  %v6278_v53 = vld [vmem:[#allocation8_spill] sm:$0xff] }
 0x279   : > { %v3357_v0 = vpop.f32.mrf.mxu0  ;;  %3804 = vmatmul.mubr.bf16.vlgmr.msra.gmra.mxu1 %v3612_v51  ;;  %v3101_v1 = vadd.f32 %v5790_v15, %v6277_v14 }
 0x27a   : > { %v3570_v60 = vmax.f32 %v3522_v56, 0.0  ;;  %v3523_v4 = vadd.f32 %v5905_v34, %v3463_v27  ;;  %v3464_v7 = vadd.f32 %v3357_v0, %v3097_v63  ;;  %v3102_v56 = vadd.f32 %v5797_v9, %v6278_v53  ;;  %v5953_v15 = vpop.f32.mrf.mxu1 }
 0x27b   : > { %v3359_v50 = vpop.f32.mrf.mxu0  ;;  %v3103_v0 = vadd.f32 %v5807_v61, %v5754_v58  ;;  %v3104_v9 = vadd.f32 %v5814_v13, %v5758_v11 }
 0x27c   : > { %v3614_v49 = vpack.c.bf16 %v3570_v60, %v3568_v18  ;;  %v3571_v32 = vmax.f32 %v3523_v4, 0.0  ;;  %v3465_v24 = vadd.f32 %v3359_v50, %v3098_v55  ;;  %v3524_v51 = vadd.f32 %v5899_v43, %v3464_v7 }
 0x27d   : > { %v3361_v3 = vpop.f32.mrf.mxu0 }
 0x27e   : > { %v3466_v21 = vadd.f32 %v3361_v3, %v3099_v25  ;;  %v3615_v59 = vpack.c.bf16 %v3571_v32, %v3569_v45  ;;  %v3525_v57 = vadd.f32 %v5905_v34, %v3465_v24  ;;  %v3572_v47 = vmax.f32 %v3524_v51, 0.0  ;;  %v5958_v32 = vpop.f32.mrf.mxu1  ;;  %v6279_v3 = vld [vmem:[#allocation9_spill] sm:$0xff] }
 0x27f   : > { %v3363_v35 = vpop.f32.mrf.mxu0  ;;  %v3105_v58 = vadd.f32 %v5824_v23, %v6279_v3 }
 0x280   : > { %v3526_v40 = vadd.f32 %v5899_v43, %v3466_v21  ;;  %v3467_v63 = vadd.f32 %v3363_v35, %v3100_v12  ;;  %3811 = vmatprep.mubr.bf16.mxu1 %v3615_v59  ;;  %v3573_v60 = vmax.f32 %v3525_v57, 0.0  ;;  %v6280_v21 = vld [vmem:[#allocation10_spill] sm:$0xff]  ;;  %v3107_v57 = vadd.f32 %v5839_v44, %v5771_v36  ;;  %v5969_v23 = vpop.f32.mrf.mxu1 }
 0x281   : > { %v3367_v54 = vpop.f32.mrf.mxu0  ;;  %3812 = vmatmul.mubr.bf16.gmra.mxu1 %v3614_v49  ;;  %v3106_v59 = vadd.f32 %v5831_v37, %v6280_v21  ;;  %v3108_v37 = vadd.f32 %v5847_v33, %v5775_v30  ;;  %v3109_v36 = vadd.f32 %v5855_v26, %v5778_v10 }
 0x282   : > { %v3574_v27 = vmax.f32 %v3526_v40, 0.0  ;;  %v3527_v29 = vadd.f32 %v5905_v34, %v3467_v63  ;;  %v3468_v55 = vadd.f32 %v3367_v54, %v3101_v1 }
 0x283   : > { %v3369_v18 = vpop.f32.mrf.mxu0 }
 0x284   : > { %v3616_v4 = vpack.c.bf16 %v3574_v27, %v3572_v47  ;;  %v3575_v7 = vmax.f32 %v3527_v29, 0.0  ;;  %v3469_v31 = vadd.f32 %v3369_v18, %v3102_v56  ;;  %v3528_v50 = vadd.f32 %v5899_v43, %v3468_v55 }
 0x285   : > { %v3371_v25 = vpop.f32.mrf.mxu0 }
 0x286   : > { %v3470_v45 = vadd.f32 %v3371_v25, %v3103_v0  ;;  %v3617_v49 = vpack.c.bf16 %v3575_v7, %v3573_v60  ;;  %v3529_v61 = vadd.f32 %v5905_v34, %v3469_v31  ;;  %v3576_v13 = vmax.f32 %v3528_v50, 0.0  ;;  %v5974_v0 = vpop.f32.mrf.mxu1  ;;  %v6281_v7 = vld [vmem:[#allocation7_spill] sm:$0xff] }
 0x287   : > { %v3373_v24 = vpop.f32.mrf.mxu0  ;;  %v3110_v31 = vadd.f32 %v5863_v28, %v6281_v7  ;;  %v3112_v28 = vadd.f32 %v5879_v5, %v5792_v46 }
 0x288   : > { %v3530_v12 = vadd.f32 %v5899_v43, %v3470_v45  ;;  %v3471_v51 = vadd.f32 %v3373_v24, %v3104_v9  ;;  %3819 = vmatprep.mubr.bf16.mxu1 %v3617_v49  ;;  %v3577_v63 = vmax.f32 %v3529_v61, 0.0  ;;  %v6282_v45 = vld [vmem:[#allocation11_spill] sm:$0xff]  ;;  %v5985_v10 = vpop.f32.mrf.mxu1 }
 0x289   : > { %v3377_v11 = vpop.f32.mrf.mxu0  ;;  %3820 = vmatmul.mubr.bf16.gmra.mxu1 %v3616_v4  ;;  %v3111_v49 = vadd.f32 %v5871_v42, %v6282_v45  ;;  %v6287_v45 = vld [vmem:[#allocation17_spill] sm:$0xff] }
 0x28a   : > { %v3578_v35 = vmax.f32 %v3530_v12, 0.0  ;;  %v3531_v14 = vadd.f32 %v5905_v34, %v3471_v51  ;;  %v3472_v1 = vadd.f32 %v3377_v11, %v3105_v58  ;;  %v5990_v11 = vpop.f32.mrf.mxu1 }
 0x28b   : > { %v3379_v40 = vpop.f32.mrf.mxu0 }
 0x28c   : > { %v3618_v53 = vpack.c.bf16 %v3578_v35, %v3576_v13  ;;  %v3579_v56 = vmax.f32 %v3531_v14, 0.0  ;;  %v3473_v54 = vadd.f32 %v3379_v40, %v3106_v59  ;;  %v3532_v27 = vadd.f32 %v5899_v43, %v3472_v1  ;;  %v6283_v35 = vld [vmem:[#allocation12_spill] sm:$0xff]  ;;  %v6284_v40 = vld [vmem:[#allocation13_spill] sm:$0xff] }
 0x28d   : > { %v3381_v47 = vpop.f32.mrf.mxu0  ;;  %v3113_v42 = vadd.f32 %v5887_v6, %v6283_v35  ;;  %v6001_v6 = vpop.f32.mrf.mxu1 }
 0x28e   : > { %v3474_v29 = vadd.f32 %v3381_v47, %v3107_v57  ;;  %v3619_v55 = vpack.c.bf16 %v3579_v56, %v3577_v63  ;;  %v3533_v44 = vadd.f32 %v5905_v34, %v3473_v54  ;;  %v3580_v33 = vmax.f32 %v3532_v27, 0.0  ;;  %v6285_v47 = vld [vmem:[#allocation14_spill] sm:$0xff] }
 0x28f   : > { %v3383_v18 = vpop.f32.mrf.mxu0  ;;  %v3114_v63 = vadd.f32 %v5901_v16, %v6284_v40  ;;  %v3116_v16 = vadd.f32 %v5921_v22, %v5809_v39 }
 0x290   : > { %v3534_v60 = vadd.f32 %v5899_v43, %v3474_v29  ;;  %v3475_v4 = vadd.f32 %v3383_v18, %v3108_v37  ;;  %3827 = vmatprep.mubr.bf16.mxu1 %v3619_v55  ;;  %v3581_v24 = vmax.f32 %v3533_v44, 0.0  ;;  %v3115_v37 = vadd.f32 %v5910_v41, %v6285_v47 }
 0x291   : > { %v3387_v30 = vpop.f32.mrf.mxu0  ;;  %3828 = vmatmul.mubr.bf16.gmra.mxu1 %v3618_v53 }
 0x292   : > { %v3582_v25 = vmax.f32 %v3534_v60, 0.0  ;;  %v3535_v9 = vadd.f32 %v5905_v34, %v3475_v4  ;;  %v3476_v50 = vadd.f32 %v3387_v30, %v3109_v36 }
 0x293   : > { %v3389_v26 = vpop.f32.mrf.mxu0 }
 0x294   : > { %v3620_v3 = vpack.c.bf16 %v3582_v25, %v3580_v33  ;;  %v3583_v58 = vmax.f32 %v3535_v9, 0.0  ;;  %v3477_v61 = vadd.f32 %v3389_v26, %v3110_v31  ;;  %v3536_v51 = vadd.f32 %v5899_v43, %v3476_v50  ;;  %v6006_v31 = vpop.f32.mrf.mxu1  ;;  %v6286_v33 = vld [vmem:[#allocation16_spill] sm:$0xff] }
 0x295   : > { %v3391_v12 = vpop.f32.mrf.mxu0  ;;  %v3117_v41 = vadd.f32 %v5926_v52, %v6286_v33  ;;  %v6290_v33 = vld [vmem:[#allocation20_spill] sm:$0xff] }
 0x296   : > { %v3478_v21 = vadd.f32 %v3391_v12, %v3111_v49  ;;  %v3621_v59 = vpack.c.bf16 %v3583_v58, %v3581_v24  ;;  %v3537_v14 = vadd.f32 %v5905_v34, %v3477_v61  ;;  %v3584_v5 = vmax.f32 %v3536_v51, 0.0  ;;  %v3066_v52 = vpop.f32.mrf.mxu1 }
 0x297   : > { %v3393_v13 = vpop.f32.mrf.mxu0  ;;  %v3118_v49 = vadd.f32 %v5937_v8, %v6287_v45  ;;  %v3119_v58 = vadd.f32 %v5942_v2, %v5822_v20  ;;  %v3120_v8 = vadd.f32 %v5953_v15, %v5826_v48  ;;  %v6291_v45 = vld [vmem:[#allocation21_spill] sm:$0xff] }
 0x298   : > { %v3538_v1 = vadd.f32 %v5899_v43, %v3478_v21  ;;  %v3479_v57 = vadd.f32 %v3393_v13, %v3112_v28  ;;  %3835 = vmatprep.mubr.bf16.mxu1 %v3621_v59  ;;  %v3585_v29 = vmax.f32 %v3537_v14, 0.0  ;;  %v3070_v14 = vpop.f32.mrf.mxu1 }
 0x299   : > { %v3397_v46 = vpop.f32.mrf.mxu0  ;;  %3836 = vmatmul.mubr.bf16.gmra.mxu1 %v3620_v3 }
 0x29a   : > { %v3586_v53 = vmax.f32 %v3538_v1, 0.0  ;;  %v3539_v56 = vadd.f32 %v5905_v34, %v3479_v57  ;;  %v3480_v54 = vadd.f32 %v3397_v46, %v3113_v42  ;;  %v3121_v57 = vadd.f32 %v5958_v32, %v5829_v17  ;;  %v3072_v17 = vpop.f32.mrf.mxu1 }
 0x29b   : > { %v3399_v27 = vpop.f32.mrf.mxu0 }
 0x29c   : > { %v3622_v55 = vpack.c.bf16 %v3586_v53, %v3584_v5  ;;  %v3587_v18 = vmax.f32 %v3539_v56, 0.0  ;;  %v3481_v36 = vadd.f32 %v3399_v27, %v3114_v63  ;;  %v3540_v60 = vadd.f32 %v5899_v43, %v3480_v54  ;;  %v6288_v56 = vld [vmem:[#allocation18_spill] sm:$0xff] }
 0x29d   : > { %v3401_v44 = vpop.f32.mrf.mxu0  ;;  %v3122_v63 = vadd.f32 %v5969_v23, %v5834_v62  ;;  %v3123_v54 = vadd.f32 %v5974_v0, %v6288_v56  ;;  %v3124_v62 = vadd.f32 %v5985_v10, %v5842_v19 }
 0x29e   : > { %v3482_v4 = vadd.f32 %v3401_v44, %v3115_v37  ;;  %v3623_v7 = vpack.c.bf16 %v3587_v18, %v3585_v29  ;;  %v3541_v25 = vadd.f32 %v5905_v34, %v3481_v36  ;;  %v3588_v22 = vmax.f32 %v3540_v60, 0.0  ;;  %v3074_v44 = vpop.f32.mrf.mxu1  ;;  %v6289_v60 = vld [vmem:[#allocation19_spill] sm:$0xff] }
 0x29f   : > { %v3403_v30 = vpop.f32.mrf.mxu0 }
 0x2a0   : > { %v3542_v9 = vadd.f32 %v5899_v43, %v3482_v4  ;;  %v3483_v50 = vadd.f32 %v3403_v30, %v3116_v16  ;;  %3843 = vmatprep.mubr.bf16.mxu1 %v3623_v7  ;;  %v3589_v12 = vmax.f32 %v3541_v25, 0.0  ;;  %v3125_v4 = vadd.f32 %v5990_v11, %v6289_v60  ;;  %v3076_v11 = vpop.f32.mrf.mxu1  ;;  %v6298_v60 = vld [vmem:[#allocation28_spill] sm:$0xff] }
 0x2a1   : > { %v3407_v39 = vpop.f32.mrf.mxu0  ;;  %3844 = vmatmul.mubr.bf16.gmra.mxu1 %v3622_v55 }
 0x2a2   : > { %v3590_v26 = vmax.f32 %v3542_v9, 0.0  ;;  %v3543_v24 = vadd.f32 %v5905_v34, %v3483_v50  ;;  %v3484_v3 = vadd.f32 %v3407_v39, %v3117_v41  ;;  %v3126_v41 = vadd.f32 %v6001_v6, %v6290_v33 }
 0x2a3   : > { %v3409_v61 = vpop.f32.mrf.mxu0 }
 0x2a4   : > { %v3624_v28 = vpack.c.bf16 %v3590_v26, %v3588_v22  ;;  %v3591_v51 = vmax.f32 %v3543_v24, 0.0  ;;  %v3485_v21 = vadd.f32 %v3409_v61, %v3118_v49  ;;  %v3544_v13 = vadd.f32 %v5899_v43, %v3484_v3  ;;  %v6292_v61 = vld [vmem:[#allocation22_spill] sm:$0xff] }
 0x2a5   : > { %v3411_v59 = vpop.f32.mrf.mxu0  ;;  %v3127_v49 = vadd.f32 %v6006_v31, %v6291_v45 }
 0x2a6   : > { %v3486_v35 = vadd.f32 %v3411_v59, %v3119_v58  ;;  %v3625_v42 = vpack.c.bf16 %v3591_v51, %v3589_v12  ;;  %v3545_v20 = vadd.f32 %v5905_v34, %v3485_v21  ;;  %v3592_v48 = vmax.f32 %v3544_v13, 0.0  ;;  %v3080_v21 = vpop.f32.mrf.mxu1 }
 0x2a7   : > { %v3413_v1 = vpop.f32.mrf.mxu0  ;;  %v3128_v12 = vadd.f32 %v3066_v52, %v6292_v61 }
 0x2a8   : > { %v3546_v2 = vadd.f32 %v5899_v43, %v3486_v35  ;;  %v3487_v40 = vadd.f32 %v3413_v1, %v3120_v8  ;;  %3851 = vmatprep.mubr.bf16.mxu1 %v3625_v42  ;;  %v3593_v47 = vmax.f32 %v3545_v20, 0.0  ;;  %v6293_v8 = vld [vmem:[#allocation23_spill] sm:$0xff]  ;;  %v6294_v1 = vld [vmem:[#allocation24_spill] sm:$0xff] }
 0x2a9   : > { %v3417_v46 = vpop.f32.mrf.mxu0  ;;  %3852 = vmatmul.mubr.bf16.gmra.mxu1 %v3624_v28  ;;  %v3129_v13 = vadd.f32 %v3070_v14, %v6293_v8 }
 0x2aa   : > { %v3594_v15 = vmax.f32 %v3546_v2, 0.0  ;;  %v3547_v5 = vadd.f32 %v5905_v34, %v3487_v40  ;;  %v3488_v53 = vadd.f32 %v3417_v46, %v3121_v57  ;;  %v3130_v57 = vadd.f32 %v3072_v17, %v6294_v1  ;;  %v6295_v46 = vld [vmem:[#allocation25_spill] sm:$0xff] }
 0x2ab   : > { %v3419_v32 = vpop.f32.mrf.mxu0 }
 0x2ac   : > { %v3626_v37 = vpack.c.bf16 %v3594_v15, %v3592_v48  ;;  %v3595_v27 = vmax.f32 %v3547_v5, 0.0  ;;  %v3489_v29 = vadd.f32 %v3419_v32, %v3122_v63  ;;  %v3548_v23 = vadd.f32 %v5899_v43, %v3488_v53  ;;  %v3082_v15 = vpop.f32.mrf.mxu1 }
 0x2ad   : > { %v3421_v55 = vpop.f32.mrf.mxu0  ;;  %v3131_v48 = vadd.f32 %v3074_v44, %v6295_v46 }
 0x2ae   : > { %v3490_v18 = vadd.f32 %v3421_v55, %v3123_v54  ;;  %v3627_v36 = vpack.c.bf16 %v3595_v27, %v3593_v47  ;;  %v3549_v0 = vadd.f32 %v5905_v34, %v3489_v29  ;;  %v3596_v19 = vmax.f32 %v3548_v23, 0.0  ;;  %v6296_v47 = vld [vmem:[#allocation26_spill] sm:$0xff]  ;;  %v3084_v55 = vpop.f32.mrf.mxu1  ;;  %v6297_v23 = vld [vmem:[#allocation27_spill] sm:$0xff] }
 0x2af   : > { %v3423_v16 = vpop.f32.mrf.mxu0 }
 0x2b0   : > { %v3550_v7 = vadd.f32 %v5899_v43, %v3490_v18  ;;  %v3491_v30 = vadd.f32 %v3423_v16, %v3124_v62  ;;  %3859 = vmatprep.mubr.bf16.mxu1 %v3627_v36  ;;  %v3597_v22 = vmax.f32 %v3549_v0, 0.0  ;;  %v3133_v18 = vadd.f32 %v3080_v21, %v6297_v23 }
 0x2b1   : > { %v3427_v25 = vpop.f32.mrf.mxu0  ;;  %3860 = vmatmul.mubr.bf16.gmra.mxu1 %v3626_v37  ;;  %v3132_v37 = vadd.f32 %v3076_v11, %v6296_v47 }
 0x2b2   : > { %v3598_v10 = vmax.f32 %v3550_v7, 0.0  ;;  %v3551_v9 = vadd.f32 %v5905_v34, %v3491_v30  ;;  %v3492_v50 = vadd.f32 %v3427_v25, %v3125_v4  ;;  %v3134_v4 = vadd.f32 %v3082_v15, %v6298_v60  ;;  %v6299_v25 = vld [vmem:[#allocation29_spill] sm:$0xff] }
 0x2b3   : > { %v3429_v39 = vpop.f32.mrf.mxu0 }
 0x2b4   : > { %v3628_v26 = vpack.c.bf16 %v3598_v10, %v3596_v19  ;;  %v3599_v24 = vmax.f32 %v3551_v9, 0.0  ;;  %v3493_v3 = vadd.f32 %v3429_v39, %v3126_v41  ;;  %v3552_v6 = vadd.f32 %v5899_v43, %v3492_v50  ;;  %v3086_v10 = vpop.f32.mrf.mxu1 }
 0x2b5   : > { %v3431_v58 = vpop.f32.mrf.mxu0  ;;  %v3135_v19 = vadd.f32 %v3084_v55, %v6299_v25 }
 0x2b6   : > { %v3494_v28 = vadd.f32 %v3431_v58, %v3127_v49  ;;  %v3629_v51 = vpack.c.bf16 %v3599_v24, %v3597_v22  ;;  %v3553_v35 = vadd.f32 %v5905_v34, %v3493_v3  ;;  %v3600_v2 = vmax.f32 %v3552_v6, 0.0 }
 0x2b7   : > { %v3433_v59 = vpop.f32.mrf.mxu0  ;;  %v3136_v22 = vadd.f32 %v3086_v10, %v5895_v38 }
 0x2b8   : > { %v3554_v31 = vadd.f32 %v5899_v43, %v3494_v28  ;;  %v3495_v42 = vadd.f32 %v3433_v59, %v3128_v12  ;;  %3867 = vmatprep.mubr.bf16.mxu1 %v3629_v51  ;;  %v3601_v14 = vmax.f32 %v3553_v35, 0.0 }
 0x2b9   : > { %v3437_v20 = vpop.f32.mrf.mxu0  ;;  %3868 = vmatmul.mubr.bf16.gmra.mxu1 %v3628_v26 }
 0x2ba   : > { %v3602_v52 = vmax.f32 %v3554_v31, 0.0  ;;  %v3555_v40 = vadd.f32 %v5905_v34, %v3495_v42  ;;  %v3496_v63 = vadd.f32 %v3437_v20, %v3129_v13 }
 0x2bb   : > { %v3439_v5 = vpop.f32.mrf.mxu0 }
 0x2bc   : > { %v3630_v53 = vpack.c.bf16 %v3602_v52, %v3600_v2  ;;  %v3603_v56 = vmax.f32 %v3555_v40, 0.0  ;;  %v3497_v54 = vadd.f32 %v3439_v5, %v3130_v57  ;;  %v3556_v17 = vadd.f32 %v5899_v43, %v3496_v63 }
 0x2bd   : > { %v3441_v32 = vpop.f32.mrf.mxu0 }
 0x2be   : > { %v3498_v27 = vadd.f32 %v3441_v32, %v3131_v48  ;;  %v3631_v29 = vpack.c.bf16 %v3603_v56, %v3601_v14  ;;  %v3557_v36 = vadd.f32 %v5905_v34, %v3497_v54  ;;  %v3604_v7 = vmax.f32 %v3556_v17, 0.0 }
 0x2bf   : > { %v3443_v62 = vpop.f32.mrf.mxu0 }
 0x2c0   : > { %v3558_v44 = vadd.f32 %v5899_v43, %v3498_v27  ;;  %v3499_v16 = vadd.f32 %v3443_v62, %v3132_v37  ;;  %3875 = vmatprep.mubr.bf16.mxu1 %v3631_v29  ;;  %v3605_v50 = vmax.f32 %v3557_v36, 0.0 }
 0x2c1   : > { %v3447_v0 = vpop.f32.mrf.mxu0  ;;  %3876 = vmatmul.mubr.bf16.gmra.mxu1 %v3630_v53 }
 0x2c2   : > { %v3606_v30 = vmax.f32 %v3558_v44, 0.0  ;;  %v3559_v33 = vadd.f32 %v5905_v34, %v3499_v16  ;;  %v3500_v41 = vadd.f32 %v3447_v0, %v3133_v18 }
 0x2c3   : > { %v3449_v9 = vpop.f32.mrf.mxu0 }
 0x2c4   : > { %v3632_v45 = vpack.c.bf16 %v3606_v30, %v3604_v7  ;;  %v3607_v49 = vmax.f32 %v3559_v33, 0.0  ;;  %v3501_v11 = vadd.f32 %v3449_v9, %v3134_v4  ;;  %v3560_v26 = vadd.f32 %v5899_v43, %v3500_v41 }
 0x2c5   : > { %v3451_v39 = vpop.f32.mrf.mxu0 }
 0x2c6   : > { %v3502_v24 = vadd.f32 %v3451_v39, %v3135_v19  ;;  %v3633_v3 = vpack.c.bf16 %v3607_v49, %v3605_v50  ;;  %v3561_v61 = vadd.f32 %v5905_v34, %v3501_v11  ;;  %v3608_v28 = vmax.f32 %v3560_v26, 0.0 }
 0x2c7   : > { %v3453_v58 = vpop.f32.mrf.mxu0 }
 0x2c8   : > { %v3562_v12 = vadd.f32 %v5899_v43, %v3502_v24  ;;  %v3503_v6 = vadd.f32 %v3453_v58, %v3136_v22  ;;  %3883 = vmatprep.mubr.bf16.mxu1 %v3633_v3  ;;  %v3609_v59 = vmax.f32 %v3561_v61, 0.0  ;;  %v6068_v43 = vld [vmem:[%s6187_s4] ss:$0 sm:$0xff] }
 0x2c9   : > { %3884 = vmatmul.mubr.bf16.gmra.mxu1 %v3632_v45 }
 0x2ca   : > { %v3610_v51 = vmax.f32 %v3562_v12, 0.0  ;;  %v3563_v21 = vadd.f32 %v5905_v34, %v3503_v6 }
 0x2cc   : > { %v3634_v38 = vpack.c.bf16 %v3610_v51, %v3608_v28  ;;  %v3611_v8 = vmax.f32 %v3563_v21, 0.0 }
 0x2ce   : > { %v3635_v13 = vpack.c.bf16 %v3611_v8, %v3609_v59 }
 0x2d0   : > { %3891 = vmatprep.mubr.bf16.mxu1 %v3635_v13 }
 0x2d1   : > { %3892 = vmatmul.mubr.bf16.gmra.mxu1 %v3634_v38 }
 0x339   : > { %v4303_v35 = vpop.f32.mrf.mxu1 }
 0x33b   : > { %v4304_v31 = vpop.f32.mrf.mxu1 }
 0x33c   : > { %v4305_v42 = vadd.f32 %v4304_v31, %v4303_v35 }
 0x33d   : > { %v4306_v1 = vpop.f32.mrf.mxu1 }
 0x33e   : > { %v3806_v34 = vadd.f32 %v4305_v42, %v6068_v43 }
 0x33f   : > { %v4307_v57 = vpop.f32.mrf.mxu1 }
 0x340   : > { %3900 = vst [vmem:[%s6071_s30] sm:$0xff] %v3806_v34  ;;  %v4308_v20 = vadd.f32 %v4307_v57, %v4306_v1 }
 0x341   : > { %v4309_v2 = vpop.f32.mrf.mxu1 }
 0x342   : > { %v3809_v52 = vadd.f32 %v4308_v20, %v6068_v43 }
 0x343   : > { %v4310_v40 = vpop.f32.mrf.mxu1 }
 0x344   : > { %3901 = vst [vmem:[%s6071_s30 + $0x8] sm:$0xff] %v3809_v52  ;;  %v4311_v63 = vadd.f32 %v4310_v40, %v4309_v2 }
 0x345   : > { %v4312_v46 = vpop.f32.mrf.mxu1 }
 0x346   : > { %v3814_v48 = vadd.f32 %v4311_v63, %v6068_v43 }
 0x347   : > { %v4313_v15 = vpop.f32.mrf.mxu1 }
 0x348   : > { %3902 = vst [vmem:[%s6071_s30 + $0x10] sm:$0xff] %v3814_v48  ;;  %v4314_v5 = vadd.f32 %v4313_v15, %v4312_v46 }
 0x349   : > { %v4315_v14 = vpop.f32.mrf.mxu1 }
 0x34a   : > { %v3817_v53 = vadd.f32 %v4314_v5, %v6068_v43 }
 0x34b   : > { %v4316_v56 = vpop.f32.mrf.mxu1 }
 0x34c   : > { %3903 = vst [vmem:[%s6071_s30 + $0x18] sm:$0xff] %v3817_v53  ;;  %v4317_v54 = vadd.f32 %v4316_v56, %v4315_v14 }
 0x34d   : > { %v4318_v32 = vpop.f32.mrf.mxu1 }
 0x34e   : > { %v3822_v47 = vadd.f32 %v4317_v54, %v6068_v43 }
 0x34f   : > { %v4319_v37 = vpop.f32.mrf.mxu1 }
 0x350   : > { %3904 = vst [vmem:[%s6071_s30 + $0x20] sm:$0xff] %v3822_v47  ;;  %v4320_v17 = vadd.f32 %v4319_v37, %v4318_v32 }
 0x351   : > { %v4321_v27 = vpop.f32.mrf.mxu1 }
 0x352   : > { %v3825_v29 = vadd.f32 %v4320_v17, %v6068_v43 }
 0x353   : > { %v4322_v55 = vpop.f32.mrf.mxu1 }
 0x354   : > { %3905 = vst [vmem:[%s6071_s30 + $0x28] sm:$0xff] %v3825_v29  ;;  %v4323_v62 = vadd.f32 %v4322_v55, %v4321_v27 }
 0x355   : > { %v4324_v23 = vpop.f32.mrf.mxu1 }
 0x356   : > { %v3830_v18 = vadd.f32 %v4323_v62, %v6068_v43 }
 0x357   : > { %v4325_v36 = vpop.f32.mrf.mxu1 }
 0x358   : > { %3906 = vst [vmem:[%s6071_s30 + $0x30] sm:$0xff] %v3830_v18  ;;  %v4326_v44 = vadd.f32 %v4325_v36, %v4324_v23 }
 0x359   : > { %v4327_v16 = vpop.f32.mrf.mxu1 }
 0x35a   : > { %v3833_v60 = vadd.f32 %v4326_v44, %v6068_v43 }
 0x35b   : > { %v4328_v4 = vpop.f32.mrf.mxu1 }
 0x35c   : > { %3907 = vst [vmem:[%s6071_s30 + $0x38] sm:$0xff] %v3833_v60  ;;  %v4329_v0 = vadd.f32 %v4328_v4, %v4327_v16 }
 0x35d   : > { %v4330_v7 = vpop.f32.mrf.mxu1 }
 0x35e   : > { %v3838_v30 = vadd.f32 %v4329_v0, %v6068_v43 }
 0x35f   : > { %v4331_v33 = vpop.f32.mrf.mxu1 }
 0x360   : > { %3908 = vst [vmem:[%s6071_s30 + $0x40] sm:$0xff] %v3838_v30  ;;  %v4332_v41 = vadd.f32 %v4331_v33, %v4330_v7 }
 0x361   : > { %v4333_v25 = vpop.f32.mrf.mxu1 }
 0x362   : > { %v3841_v19 = vadd.f32 %v4332_v41, %v6068_v43 }
 0x363   : > { %v4334_v10 = vpop.f32.mrf.mxu1 }
 0x364   : > { %3909 = vst [vmem:[%s6071_s30 + $0x48] sm:$0xff] %v3841_v19  ;;  %v4335_v9 = vadd.f32 %v4334_v10, %v4333_v25 }
 0x365   : > { %v4336_v50 = vpop.f32.mrf.mxu1 }
 0x366   : > { %v3846_v45 = vadd.f32 %v4335_v9, %v6068_v43 }
 0x367   : > { %v4337_v49 = vpop.f32.mrf.mxu1 }
 0x368   : > { %3910 = vst [vmem:[%s6071_s30 + $0x50] sm:$0xff] %v3846_v45  ;;  %v4338_v11 = vadd.f32 %v4337_v49, %v4336_v50 }
 0x369   : > { %v4339_v39 = vpop.f32.mrf.mxu1 }
 0x36a   : > { %v3849_v22 = vadd.f32 %v4338_v11, %v6068_v43 }
 0x36b   : > { %v4340_v26 = vpop.f32.mrf.mxu1 }
 0x36c   : > { %3911 = vst [vmem:[%s6071_s30 + $0x58] sm:$0xff] %v3849_v22  ;;  %v4341_v24 = vadd.f32 %v4340_v26, %v4339_v39 }
 0x36d   : > { %v4342_v3 = vpop.f32.mrf.mxu1 }
 0x36e   : > { %v3854_v58 = vadd.f32 %v4341_v24, %v6068_v43 }
 0x36f   : > { %v4343_v61 = vpop.f32.mrf.mxu1 }
 0x370   : > { %3912 = vst [vmem:[%s6071_s30 + $0x60] sm:$0xff] %v3854_v58  ;;  %v4344_v12 = vadd.f32 %v4343_v61, %v4342_v3 }
 0x371   : > { %v4345_v6 = vpop.f32.mrf.mxu1 }
 0x372   : > { %v3857_v28 = vadd.f32 %v4344_v12, %v6068_v43 }
 0x373   : > { %v4346_v51 = vpop.f32.mrf.mxu1 }
 0x374   : > { %3913 = vst [vmem:[%s6071_s30 + $0x68] sm:$0xff] %v3857_v28  ;;  %v4347_v21 = vadd.f32 %v4346_v51, %v4345_v6 }
 0x375   : > { %v4348_v59 = vpop.f32.mrf.mxu1 }
 0x376   : > { %v3862_v38 = vadd.f32 %v4347_v21, %v6068_v43 }
 0x377   : > { %v4349_v8 = vpop.f32.mrf.mxu1 }
 0x378   : > { %3914 = vst [vmem:[%s6071_s30 + $0x70] sm:$0xff] %v3862_v38  ;;  %v4350_v13 = vadd.f32 %v4349_v8, %v4348_v59 }
 0x379   : > { %v4351_v35 = vpop.f32.mrf.mxu1 }
 0x37a   : > { %v3865_v31 = vadd.f32 %v4350_v13, %v6068_v43 }
 0x37b   : > { %v4352_v42 = vpop.f32.mrf.mxu1 }
 0x37c   : > { %3915 = vst [vmem:[%s6071_s30 + $0x78] sm:$0xff] %v3865_v31  ;;  %v4353_v1 = vadd.f32 %v4352_v42, %v4351_v35 }
 0x37d   : > { %v4354_v34 = vpop.f32.mrf.mxu1 }
 0x37e   : > { %v3870_v57 = vadd.f32 %v4353_v1, %v6068_v43 }
 0x37f   : > { %v4355_v20 = vpop.f32.mrf.mxu1 }
 0x380   : > { %3916 = vst [vmem:[%s6071_s30 + $0x80] sm:$0xff] %v3870_v57  ;;  %v4356_v2 = vadd.f32 %v4355_v20, %v4354_v34 }
 0x381   : > { %v4357_v52 = vpop.f32.mrf.mxu1 }
 0x382   : > { %v3873_v40 = vadd.f32 %v4356_v2, %v6068_v43 }
 0x383   : > { %v4358_v63 = vpop.f32.mrf.mxu1 }
 0x384   : > { %3917 = vst [vmem:[%s6071_s30 + $0x88] sm:$0xff] %v3873_v40  ;;  %v4359_v46 = vadd.f32 %v4358_v63, %v4357_v52 }
 0x385   : > { %v4360_v48 = vpop.f32.mrf.mxu1 }
 0x386   : > { %v3878_v15 = vadd.f32 %v4359_v46, %v6068_v43 }
 0x387   : > { %v4361_v5 = vpop.f32.mrf.mxu1 }
 0x388   : > { %3918 = vst [vmem:[%s6071_s30 + $0x90] sm:$0xff] %v3878_v15  ;;  %v4362_v14 = vadd.f32 %v4361_v5, %v4360_v48 }
 0x389   : > { %v4363_v53 = vpop.f32.mrf.mxu1 }
 0x38a   : > { %v3881_v56 = vadd.f32 %v4362_v14, %v6068_v43 }
 0x38b   : > { %v4364_v54 = vpop.f32.mrf.mxu1 }
 0x38c   : > { %3919 = vst [vmem:[%s6071_s30 + $0x98] sm:$0xff] %v3881_v56  ;;  %v4365_v32 = vadd.f32 %v4364_v54, %v4363_v53 }
 0x38d   : > { %v4366_v47 = vpop.f32.mrf.mxu1 }
 0x38e   : > { %v3886_v37 = vadd.f32 %v4365_v32, %v6068_v43 }
 0x38f   : > { %v4367_v17 = vpop.f32.mrf.mxu1 }
 0x390   : > { %3920 = vst [vmem:[%s6071_s30 + $0xa0] sm:$0xff] %v3886_v37  ;;  %v4368_v27 = vadd.f32 %v4367_v17, %v4366_v47 }
 0x391   : > { %v4369_v29 = vpop.f32.mrf.mxu1 }
 0x392   : > { %v3889_v55 = vadd.f32 %v4368_v27, %v6068_v43 }
 0x393   : > { %v4370_v62 = vpop.f32.mrf.mxu1 }
 0x394   : > { %3921 = vst [vmem:[%s6071_s30 + $0xa8] sm:$0xff] %v3889_v55  ;;  %v4371_v23 = vadd.f32 %v4370_v62, %v4369_v29 }
 0x395   : > { %v4372_v18 = vpop.f32.mrf.mxu1 }
 0x396   : > { %v3894_v36 = vadd.f32 %v4371_v23, %v6068_v43 }
 0x397   : > { %v4373_v44 = vpop.f32.mrf.mxu1 }
 0x398   : > { %3922 = vst [vmem:[%s6071_s30 + $0xb0] sm:$0xff] %v3894_v36  ;;  %v4374_v16 = vadd.f32 %v4373_v44, %v4372_v18 }
 0x39a   : > { %v3897_v60 = vadd.f32 %v4374_v16, %v6068_v43 }
 0x39c   : > { %3923 = vst [vmem:[%s6071_s30 + $0xb8] sm:$0xff] %v3897_v60 }
 0x39d   : > { %4585 = shalt.err (!%p4582_p7)
}
 0x39e   : > { %s4586_s15 = scalar_lea.hbm %s6124_s16, 3072  ;;  %s4590_s10 = scalar_lea.hbm %s6188_s5, 12288 }
 0x39f   : > { %p4587_p9 = scmp.ne.s32.totalorder %s6124_s16, %s4586_s15  ;;  %p4591_p12 = scmp.lt.s32.totalorder %s6124_s16, %s6188_s5 }
 0x3a0   : > { %p4592_p13 = scmp.lt.s32.totalorder %s4590_s10, %s4586_s15 }
 0x3a1   : > { %p4588_p10 = pnand %p4587_p9, %p4751_p3 }
 0x3a2   : > { %p4593_p0 = por %p4592_p13, %p4591_p12 }
 0x3a3   : > { %p4589_p11 = pneg %p4588_p10 }
 0x3a5   : > { %p4594_p1 = pnand %p4593_p0, %p4589_p11 }
 0x3a7   : > { %4597 = shalt.err (!%p4594_p1)
}
 0x3a8   : > { %s4668_s13 = smov 128   ;;  %s4669_s17 = smov 8  }
 0x3a9   : > { %4380 = dma.vmem_to_hbm [thread:$0]  (%p4751_p3), %s6126_s21, 3072, %s6124_s16, %s6132_s14, %s4668_s13, %s4668_s13, %s4669_s17  }
 0x3aa PF: > { %p4386_p2 = scmp.ge.s32.totalorder %s4664_s25, 2  ;;  %s3955_s26 = sand.u32 1, %s4636_s18  }
 0x3ab   : > { %s3956_s27 = scalar_lea.sflag [#allocation3], %s3955_s26 }
 0x3ac   : > { %p4383_p4 = pnand %p4386_p2, %p4760_p8 }
 0x3ae   : > { %p4384_p5 = pneg %p4383_p4 }
 0x3b0   : > { %4631 = dma.done.wait (%p4384_p5), %s3956_s27, 3072  }
 0x3b1   : > { %4633 = vsyncadd (%p4384_p5), %s3956_s27, 4294964224  ;;  %s18_s25 = sadd.s32 1, %s4664_s25   ;;  %s6300_s18 = smov %s4640_s19 }
 0x3b2   : > { %p15_p6 = scmp.ge.s32.totalorder %s18_s25, 6   ;;  %s6301_s19 = smov %s4644_s20 }
 0x3b3   : > { %s6302_s20 = smov %s4769_s11  ;;  %s6303_s21 = smov %s4656_s23 }
 0x3b4   : > { %s6304_s22 = smov %s4660_s24  ;;  %s6305_s23 = smov %s6308_s28 }
 0x3b5   : > { %s6306_s24 = smov %s6312_s29  ;;  %17 = sbr.rel (!%p15_p6) target bundleno = 5 (0x5), region = 83 }
 0x3ba   :  { %3961 = vsyncpa [#allocation3], 1 }
 0x3bb   :  { %3963 = vsyncpa [#allocation3 + $0x1], 1 }

</bundles_post_ra>
